<compile_context>
chip_gen: v6e
topology: v6e:2x2x1
jax: 0.10.0
libtpu: 0.0.40
codegen_flags: <defaults>
</compile_context>

<pallas_src>
import functools

import jax
import jax.numpy as jnp
from jax.experimental import pallas as pl
from jax.experimental.pallas import tpu as pltpu


# ------------------------- fused DenseBlock kernel ---------------------------

def _make_dense_block(layer_channels, H, W, k):
    """Fused pallas_call computing a whole dense block, one image per grid step.

    layer_channels: list of input channel counts for each layer in the block.
    """
    L = len(layer_channels)
    c4 = 4 * k
    c_in = layer_channels[0]
    c_out = layer_channels[-1] + k
    HW = H * W

    def kernel(x_ref, *args):
        wrefs = args[:6 * L]
        o_ref = args[6 * L]
        slab = args[6 * L + 1]        # (HW, c_out) growing activation slab (VMEM)
        pad = args[6 * L + 2]         # (H+2, W+2, 4k) zero-padded bottleneck (VMEM)

        # Copy the block input channels into the slab; later layers append in place.
        slab[:, :c_in] = x_ref[...].reshape(HW, c_in)
        # Zero the halo buffer once; only the interior is rewritten per layer,
        # so the borders stay zero (conv padding=1).
        pad[...] = jnp.zeros(pad.shape, jnp.float32)

        c = c_in
        for l in range(L):
            s1, b1, w1, s2, b2, w2 = wrefs[6 * l: 6 * l + 6]
            xl = slab[:, :c]                                           # (HW, c)
            h = jnp.maximum(xl * s1[...] + b1[...], 0.0)               # BN1 + ReLU
            h = jnp.dot(h, w1[...],
                        preferred_element_type=jnp.float32)            # 1x1 conv
            h = jnp.maximum(h * s2[...] + b2[...], 0.0)                # BN2 + ReLU
            pad[pl.ds(1, H), pl.ds(1, W), :] = h.reshape(H, W, c4)

            # 3x3 'same' conv as 9 shifted matmuls accumulating in VMEM/f32.
            acc = jnp.zeros((HW, k), jnp.float32)
            for j in range(9):
                dh, dw = j // 3, j % 3
                win = pad[pl.ds(dh, H), pl.ds(dw, W), :]               # (H, W, 4k)
                acc = acc + jnp.dot(win.reshape(HW, c4), w2[j],
                                    preferred_element_type=jnp.float32)
            # Write the k new channels into the slab (no HBM concat).
            slab[:, c:c + k] = acc
            c += k

        o_ref[...] = slab[...].reshape(H, W, c_out)

    in_specs = [pl.BlockSpec((None, H, W, c_in), lambda n: (n, 0, 0, 0))]
    for cl in layer_channels:
        in_specs += [
            pl.BlockSpec((1, cl), lambda n: (0, 0)),          # bn1 scale
            pl.BlockSpec((1, cl), lambda n: (0, 0)),          # bn1 bias
            pl.BlockSpec((cl, c4), lambda n: (0, 0)),         # 1x1 conv weight
            pl.BlockSpec((1, c4), lambda n: (0, 0)),          # bn2 scale
            pl.BlockSpec((1, c4), lambda n: (0, 0)),          # bn2 bias
            pl.BlockSpec((9, c4, k), lambda n: (0, 0, 0)),    # 3x3 conv weight
        ]

    def call(x, layer_params):
        N = x.shape[0]
        flat = []
        for lp in layer_params:
            flat += [lp['bn1_scale'], lp['bn1_bias'], lp['w1'],
                     lp['bn2_scale'], lp['bn2_bias'], lp['w2']]
        return pl.pallas_call(
            kernel,
            out_shape=jax.ShapeDtypeStruct((N, H, W, c_out), jnp.float32),
            grid=(N,),
            in_specs=in_specs,
            out_specs=pl.BlockSpec((None, H, W, c_out), lambda n: (n, 0, 0, 0)),
            scratch_shapes=[pltpu.VMEM((HW, c_out), jnp.float32),
                            pltpu.VMEM((H + 2, W + 2, c4), jnp.float32)],
            compiler_params=pltpu.CompilerParams(
                dimension_semantics=("parallel",)),
        )(x, *flat)

    return call


# ----------------------- fused TransitionLayer kernel ------------------------

def _make_transition(H, W, C, Cout):
    """BN -> ReLU -> 2x2 avg pool -> 1x1 conv (pool/1x1 commute), one image/step."""
    Ho, Wo = H // 2, W // 2
    HW = H * W

    def kernel(x_ref, s_ref, b_ref, w_ref, o_ref):
        r = jnp.maximum(x_ref[...].reshape(HW, C) * s_ref[...] + b_ref[...], 0.0)
        # 2x2 average pool; channels stay in the lane dimension throughout.
        r4 = r.reshape(Ho, 2, W, C)
        rv = r4[:, 0] + r4[:, 1]                       # vertical pair sum  (Ho,W,C)
        rh = rv.reshape(Ho, Wo, 2, C)
        pooled = jnp.sum(rh, axis=2) * 0.25            # horizontal pair sum (Ho,Wo,C)
        h = jnp.dot(pooled.reshape(Ho * Wo, C), w_ref[...],
                    preferred_element_type=jnp.float32)
        o_ref[...] = h.reshape(Ho, Wo, Cout)

    def call(x, p):
        N = x.shape[0]
        return pl.pallas_call(
            kernel,
            out_shape=jax.ShapeDtypeStruct((N, Ho, Wo, Cout), jnp.float32),
            grid=(N,),
            in_specs=[pl.BlockSpec((None, H, W, C), lambda n: (n, 0, 0, 0)),
                      pl.BlockSpec((1, C), lambda n: (0, 0)),
                      pl.BlockSpec((1, C), lambda n: (0, 0)),
                      pl.BlockSpec((C, Cout), lambda n: (0, 0))],
            out_specs=pl.BlockSpec((None, Ho, Wo, Cout), lambda n: (n, 0, 0, 0)),
            compiler_params=pltpu.CompilerParams(
                dimension_semantics=("parallel",)),
        )(x, p['bn_scale'], p['bn_bias'], p['w'])

    return call


# ------------------------------ fused head kernel ----------------------------

def _make_head(N, H, W, C, num_classes):
    """ReLU -> AdaptiveAvgPool2d(1) -> Flatten -> Linear, whole batch in one call."""
    HW = H * W

    def kernel(x_ref, w_ref, b_ref, o_ref):
        rows = []
        for i in range(N):
            xi = jnp.maximum(x_ref[i].reshape(HW, C), 0.0)
            rows.append(jnp.sum(xi, axis=0, keepdims=True) * (1.0 / HW))
        pooled = jnp.concatenate(rows, axis=0)                       # (N, C)
        o_ref[...] = (jnp.dot(pooled, w_ref[...],
                              preferred_element_type=jnp.float32) + b_ref[...])

    def call(x, p):
        return pl.pallas_call(
            kernel,
            out_shape=jax.ShapeDtypeStruct((N, num_classes), jnp.float32),
            grid=(1,),
            in_specs=[pl.BlockSpec((N, H, W, C), lambda i: (0, 0, 0, 0)),
                      pl.BlockSpec((C, num_classes), lambda i: (0, 0)),
                      pl.BlockSpec((1, num_classes), lambda i: (0, 0))],
            out_specs=pl.BlockSpec((N, num_classes), lambda i: (0, 0)),
            compiler_params=pltpu.CompilerParams(
                dimension_semantics=("arbitrary",)),
        )(x, p['w'], p['b'])

    return call


# --------------------------- Parameter construction --------------------------

def make_densenet_params(key, config):
    C = config['C']
    k = config['k']
    cf = config['compression_factor']
    variant = config['densenet_variant']
    num_classes = config['num_classes']
    eps = 1e-5

    keys = iter(jax.random.split(key, 4096))

    def bn_params(c):
        gamma = 1.0 + 0.1 * jax.random.normal(next(keys), (c,))
        beta = 0.1 * jax.random.normal(next(keys), (c,))
        mean = jnp.zeros((c,))
        var = jnp.ones((c,))
        scale = gamma / jnp.sqrt(var + eps)
        bias = beta - mean * scale
        return (scale.reshape(1, c).astype(jnp.float32),
                bias.reshape(1, c).astype(jnp.float32))

    def conv_w(cin, cout, kk):
        fan_in = cin * kk * kk
        w = jax.random.normal(next(keys), (kk * kk * cin, cout))
        return (w * (2.0 / fan_in) ** 0.5).astype(jnp.float32)

    stages = []
    ch = C
    num_stages = len(variant)
    for si, n_layers in enumerate(variant):
        layers = []
        for _ in range(n_layers):
            lp = {}
            lp['bn1_scale'], lp['bn1_bias'] = bn_params(ch)
            lp['w1'] = conv_w(ch, 4 * k, 1)                           # 1x1 bottleneck
            lp['bn2_scale'], lp['bn2_bias'] = bn_params(4 * k)
            lp['w2'] = conv_w(4 * k, k, 3).reshape(9, 4 * k, k)       # 3x3, (dh,dw)-major
            layers.append(lp)
            ch += k
        trans = None
        if si < num_stages - 1:
            trans = {}
            trans['bn_scale'], trans['bn_bias'] = bn_params(ch)
            cout = int(ch * cf)
            trans['w'] = conv_w(ch, cout, 1)
            ch = cout
        stages.append({'layers': layers, 'transition': trans})

    head = {
        'w': (jax.random.normal(next(keys), (ch, num_classes))
              * (1.0 / ch) ** 0.5).astype(jnp.float32),
        'b': (0.01 * jax.random.normal(next(keys), (1, num_classes))
              ).astype(jnp.float32),
    }
    return {'stages': stages, 'head': head}, ch


# -------------------------------- Forward -----------------------------------

def densenet_forward(params, x_nchw, k):
    # PyTorch input is NCHW; convert once to NHWC for the kernels.
    x = jnp.transpose(x_nchw, (0, 2, 3, 1)).astype(jnp.float32)
    for stage in params['stages']:
        N, H, W, _ = x.shape
        layer_channels = [lp['w1'].shape[0] for lp in stage['layers']]
        x = _make_dense_block(layer_channels, H, W, k)(x, stage['layers'])
        t = stage['transition']
        if t is not None:
            N, H, W, C = x.shape
            x = _make_transition(H, W, C, t['w'].shape[1])(x, t)
    N, H, W, C = x.shape
    head = params['head']
    return _make_head(N, H, W, C, head['w'].shape[1])(x, head)


# --------------------------------- main --------------------------------------

if __name__ == "__main__":
    config = {
        'densenet_variant': [2, 2],     # two dense blocks, 2 layers each
        'C': 4,
        'num_classes': 10,
        'compression_factor': 0.5,
        'k': 8,
        'activation_func': 'relu',
        'model_name': 'densenet_pallas',
    }

    key = jax.random.PRNGKey(0)
    pkey, xkey = jax.random.split(key)
    params, final_ch = make_densenet_params(pkey, config)

    # input (B, C, H, W) like the PyTorch module, small shapes.
    x = jax.random.normal(xkey, (2, config['C'], 16, 16), dtype=jnp.float32)

    fwd = jax.jit(functools.partial(densenet_forward, params, k=config['k']))
    out = fwd(x)
    out = jax.block_until_ready(out)

    assert out.shape == (2, config['num_classes']), out.shape
    assert bool(jnp.all(jnp.isfinite(out)))
    print("KERNEL_OK")
</pallas_src>

<mosaic_0001>
module attributes {stable_mosaic.version = 11 : i64} {
  func.func @kernel(%arg0: i32, %arg1: memref<1x8x8x10xf32, #tpu.memory_space<vmem>>, %arg2: memref<1x10xf32, #tpu.memory_space<vmem>>, %arg3: memref<1x10xf32, #tpu.memory_space<vmem>>, %arg4: memref<10x32xf32, #tpu.memory_space<vmem>>, %arg5: memref<1x32xf32, #tpu.memory_space<vmem>>, %arg6: memref<1x32xf32, #tpu.memory_space<vmem>>, %arg7: memref<9x32x8xf32, #tpu.memory_space<vmem>>, %arg8: memref<1x18xf32, #tpu.memory_space<vmem>>, %arg9: memref<1x18xf32, #tpu.memory_space<vmem>>, %arg10: memref<18x32xf32, #tpu.memory_space<vmem>>, %arg11: memref<1x32xf32, #tpu.memory_space<vmem>>, %arg12: memref<1x32xf32, #tpu.memory_space<vmem>>, %arg13: memref<9x32x8xf32, #tpu.memory_space<vmem>>, %arg14: memref<1x8x8x26xf32, #tpu.memory_space<vmem>>, %arg15: memref<64x26xf32, #tpu.memory_space<vmem>>, %arg16: memref<10x10x32xf32, #tpu.memory_space<vmem>>) attributes {dimension_semantics = [#tpu.dimension_semantics<parallel>], iteration_bounds = array<i64: 2>, scalar_prefetch = 0 : i64, scratch_operands = 2 : i64, tpu.core_type = #tpu.core_type<tc>, window_params = [{transform_indices = @transform_0, window_bounds = array<i64: 1, 8, 8, 10>}, {pipeline_mode = #tpu.pipeline_mode<synchronous>, transform_indices = @transform_1, window_bounds = array<i64: 1, 10>}, {pipeline_mode = #tpu.pipeline_mode<synchronous>, transform_indices = @transform_2, window_bounds = array<i64: 1, 10>}, {pipeline_mode = #tpu.pipeline_mode<synchronous>, transform_indices = @transform_3, window_bounds = array<i64: 10, 32>}, {pipeline_mode = #tpu.pipeline_mode<synchronous>, transform_indices = @transform_4, window_bounds = array<i64: 1, 32>}, {pipeline_mode = #tpu.pipeline_mode<synchronous>, transform_indices = @transform_5, window_bounds = array<i64: 1, 32>}, {pipeline_mode = #tpu.pipeline_mode<synchronous>, transform_indices = @transform_6, window_bounds = array<i64: 9, 32, 8>}, {pipeline_mode = #tpu.pipeline_mode<synchronous>, transform_indices = @transform_7, window_bounds = array<i64: 1, 18>}, {pipeline_mode = #tpu.pipeline_mode<synchronous>, transform_indices = @transform_8, window_bounds = array<i64: 1, 18>}, {pipeline_mode = #tpu.pipeline_mode<synchronous>, transform_indices = @transform_9, window_bounds = array<i64: 18, 32>}, {pipeline_mode = #tpu.pipeline_mode<synchronous>, transform_indices = @transform_10, window_bounds = array<i64: 1, 32>}, {pipeline_mode = #tpu.pipeline_mode<synchronous>, transform_indices = @transform_11, window_bounds = array<i64: 1, 32>}, {pipeline_mode = #tpu.pipeline_mode<synchronous>, transform_indices = @transform_12, window_bounds = array<i64: 9, 32, 8>}, {transform_indices = @transform_13, window_bounds = array<i64: 1, 8, 8, 26>}]} {
    %c0 = arith.constant 0 : index
    %c0_0 = arith.constant 0 : index
    %c0_1 = arith.constant 0 : index
    %c0_2 = arith.constant 0 : index
    %0 = vector.load %arg1[%c0, %c0_0, %c0_1, %c0_2] : memref<1x8x8x10xf32, #tpu.memory_space<vmem>>, vector<1x8x8x10xf32>
    %1 = vector.shape_cast %0 : vector<1x8x8x10xf32> to vector<8x8x10xf32>
    %2 = vector.shape_cast %1 : vector<8x8x10xf32> to vector<64x10xf32>
    %c0_3 = arith.constant 0 : index
    %c0_4 = arith.constant 0 : index
    %3 = vector.load %arg15[%c0_3, %c0_4] : memref<64x26xf32, #tpu.memory_space<vmem>>, vector<64x10xf32>
    tpu.vector_store %arg15[%c0_3, %c0_4], %2 {strides = array<i32>} : memref<64x26xf32, #tpu.memory_space<vmem>>, vector<64x10xf32>,
    %cst = arith.constant 0.000000e+00 : f32
    %4 = vector.broadcast %cst : f32 to vector<10x10x32xf32>
    %c0_5 = arith.constant 0 : index
    %c0_6 = arith.constant 0 : index
    %c0_7 = arith.constant 0 : index
    %5 = vector.load %arg16[%c0_5, %c0_6, %c0_7] : memref<10x10x32xf32, #tpu.memory_space<vmem>>, vector<10x10x32xf32>
    tpu.vector_store %arg16[%c0_5, %c0_6, %c0_7], %4 {strides = array<i32>} : memref<10x10x32xf32, #tpu.memory_space<vmem>>, vector<10x10x32xf32>,
    %c0_8 = arith.constant 0 : index
    %c0_9 = arith.constant 0 : index
    %6 = vector.load %arg15[%c0_8, %c0_9] : memref<64x26xf32, #tpu.memory_space<vmem>>, vector<64x10xf32>
    %c0_10 = arith.constant 0 : index
    %c0_11 = arith.constant 0 : index
    %7 = vector.load %arg2[%c0_10, %c0_11] : memref<1x10xf32, #tpu.memory_space<vmem>>, vector<1x10xf32>
    %8 = vector.broadcast %7 : vector<1x10xf32> to vector<64x10xf32>
    %9 = arith.mulf %6, %8 : vector<64x10xf32>
    %c0_12 = arith.constant 0 : index
    %c0_13 = arith.constant 0 : index
    %10 = vector.load %arg3[%c0_12, %c0_13] : memref<1x10xf32, #tpu.memory_space<vmem>>, vector<1x10xf32>
    %11 = vector.broadcast %10 : vector<1x10xf32> to vector<64x10xf32>
    %12 = arith.addf %9, %11 : vector<64x10xf32>
    %cst_14 = arith.constant 0.000000e+00 : f32
    %13 = vector.broadcast %cst_14 : f32 to vector<64x10xf32>
    %14 = arith.maximumf %12, %13 : vector<64x10xf32>
    %c0_15 = arith.constant 0 : index
    %c0_16 = arith.constant 0 : index
    %15 = vector.load %arg4[%c0_15, %c0_16] : memref<10x32xf32, #tpu.memory_space<vmem>>, vector<10x32xf32>
    %cst_17 = arith.constant dense<0.000000e+00> : vector<64x32xf32>
    %16 = tpu.matmul %14, %15, %cst_17 {dimension_numbers = #tpu.dot_dimension_numbers<[1], [0], [0], [1], [0, 0, 1, 1], [], []>} : vector<64x10xf32>, vector<10x32xf32>, vector<64x32xf32> -> vector<64x32xf32>
    %c0_18 = arith.constant 0 : index
    %c0_19 = arith.constant 0 : index
    %17 = vector.load %arg5[%c0_18, %c0_19] : memref<1x32xf32, #tpu.memory_space<vmem>>, vector<1x32xf32>
    %18 = vector.broadcast %17 : vector<1x32xf32> to vector<64x32xf32>
    %19 = arith.mulf %16, %18 : vector<64x32xf32>
    %c0_20 = arith.constant 0 : index
    %c0_21 = arith.constant 0 : index
    %20 = vector.load %arg6[%c0_20, %c0_21] : memref<1x32xf32, #tpu.memory_space<vmem>>, vector<1x32xf32>
    %21 = vector.broadcast %20 : vector<1x32xf32> to vector<64x32xf32>
    %22 = arith.addf %19, %21 : vector<64x32xf32>
    %cst_22 = arith.constant 0.000000e+00 : f32
    %23 = vector.broadcast %cst_22 : f32 to vector<64x32xf32>
    %24 = arith.maximumf %22, %23 : vector<64x32xf32>
    %25 = vector.shape_cast %24 : vector<64x32xf32> to vector<8x8x32xf32>
    %c1 = arith.constant 1 : index
    %c1_23 = arith.constant 1 : index
    %c0_24 = arith.constant 0 : index
    %26 = vector.load %arg16[%c1, %c1_23, %c0_24] : memref<10x10x32xf32, #tpu.memory_space<vmem>>, vector<8x8x32xf32>
    tpu.vector_store %arg16[%c1, %c1_23, %c0_24], %25 {strides = array<i32>} : memref<10x10x32xf32, #tpu.memory_space<vmem>>, vector<8x8x32xf32>,
    %cst_25 = arith.constant 0.000000e+00 : f32
    %27 = vector.broadcast %cst_25 : f32 to vector<64x8xf32>
    %c0_26 = arith.constant 0 : index
    %c0_27 = arith.constant 0 : index
    %c0_28 = arith.constant 0 : index
    %28 = vector.load %arg16[%c0_26, %c0_27, %c0_28] : memref<10x10x32xf32, #tpu.memory_space<vmem>>, vector<8x8x32xf32>
    %29 = vector.shape_cast %28 : vector<8x8x32xf32> to vector<64x32xf32>
    %c0_29 = arith.constant 0 : index
    %c0_30 = arith.constant 0 : index
    %c0_31 = arith.constant 0 : index
    %30 = vector.load %arg7[%c0_29, %c0_30, %c0_31] : memref<9x32x8xf32, #tpu.memory_space<vmem>>, vector<1x32x8xf32>
    %31 = vector.shape_cast %30 : vector<1x32x8xf32> to vector<32x8xf32>
    %cst_32 = arith.constant dense<0.000000e+00> : vector<64x8xf32>
    %32 = tpu.matmul %29, %31, %cst_32 {dimension_numbers = #tpu.dot_dimension_numbers<[1], [0], [0], [1], [0, 0, 1, 1], [], []>} : vector<64x32xf32>, vector<32x8xf32>, vector<64x8xf32> -> vector<64x8xf32>
    %33 = arith.addf %27, %32 : vector<64x8xf32>
    %c0_33 = arith.constant 0 : index
    %c1_34 = arith.constant 1 : index
    %c0_35 = arith.constant 0 : index
    %34 = vector.load %arg16[%c0_33, %c1_34, %c0_35] : memref<10x10x32xf32, #tpu.memory_space<vmem>>, vector<8x8x32xf32>
    %35 = vector.shape_cast %34 : vector<8x8x32xf32> to vector<64x32xf32>
    %c1_36 = arith.constant 1 : index
    %c0_37 = arith.constant 0 : index
    %c0_38 = arith.constant 0 : index
    %36 = vector.load %arg7[%c1_36, %c0_37, %c0_38] : memref<9x32x8xf32, #tpu.memory_space<vmem>>, vector<1x32x8xf32>
    %37 = vector.shape_cast %36 : vector<1x32x8xf32> to vector<32x8xf32>
    %cst_39 = arith.constant dense<0.000000e+00> : vector<64x8xf32>
    %38 = tpu.matmul %35, %37, %cst_39 {dimension_numbers = #tpu.dot_dimension_numbers<[1], [0], [0], [1], [0, 0, 1, 1], [], []>} : vector<64x32xf32>, vector<32x8xf32>, vector<64x8xf32> -> vector<64x8xf32>
    %39 = arith.addf %33, %38 : vector<64x8xf32>
    %c0_40 = arith.constant 0 : index
    %c2 = arith.constant 2 : index
    %c0_41 = arith.constant 0 : index
    %40 = vector.load %arg16[%c0_40, %c2, %c0_41] : memref<10x10x32xf32, #tpu.memory_space<vmem>>, vector<8x8x32xf32>
    %41 = vector.shape_cast %40 : vector<8x8x32xf32> to vector<64x32xf32>
    %c2_42 = arith.constant 2 : index
    %c0_43 = arith.constant 0 : index
    %c0_44 = arith.constant 0 : index
    %42 = vector.load %arg7[%c2_42, %c0_43, %c0_44] : memref<9x32x8xf32, #tpu.memory_space<vmem>>, vector<1x32x8xf32>
    %43 = vector.shape_cast %42 : vector<1x32x8xf32> to vector<32x8xf32>
    %cst_45 = arith.constant dense<0.000000e+00> : vector<64x8xf32>
    %44 = tpu.matmul %41, %43, %cst_45 {dimension_numbers = #tpu.dot_dimension_numbers<[1], [0], [0], [1], [0, 0, 1, 1], [], []>} : vector<64x32xf32>, vector<32x8xf32>, vector<64x8xf32> -> vector<64x8xf32>
    %45 = arith.addf %39, %44 : vector<64x8xf32>
    %c1_46 = arith.constant 1 : index
    %c0_47 = arith.constant 0 : index
    %c0_48 = arith.constant 0 : index
    %46 = vector.load %arg16[%c1_46, %c0_47, %c0_48] : memref<10x10x32xf32, #tpu.memory_space<vmem>>, vector<8x8x32xf32>
    %47 = vector.shape_cast %46 : vector<8x8x32xf32> to vector<64x32xf32>
    %c3 = arith.constant 3 : index
    %c0_49 = arith.constant 0 : index
    %c0_50 = arith.constant 0 : index
    %48 = vector.load %arg7[%c3, %c0_49, %c0_50] : memref<9x32x8xf32, #tpu.memory_space<vmem>>, vector<1x32x8xf32>
    %49 = vector.shape_cast %48 : vector<1x32x8xf32> to vector<32x8xf32>
    %cst_51 = arith.constant dense<0.000000e+00> : vector<64x8xf32>
    %50 = tpu.matmul %47, %49, %cst_51 {dimension_numbers = #tpu.dot_dimension_numbers<[1], [0], [0], [1], [0, 0, 1, 1], [], []>} : vector<64x32xf32>, vector<32x8xf32>, vector<64x8xf32> -> vector<64x8xf32>
    %51 = arith.addf %45, %50 : vector<64x8xf32>
    %c1_52 = arith.constant 1 : index
    %c1_53 = arith.constant 1 : index
    %c0_54 = arith.constant 0 : index
    %52 = vector.load %arg16[%c1_52, %c1_53, %c0_54] : memref<10x10x32xf32, #tpu.memory_space<vmem>>, vector<8x8x32xf32>
    %53 = vector.shape_cast %52 : vector<8x8x32xf32> to vector<64x32xf32>
    %c4 = arith.constant 4 : index
    %c0_55 = arith.constant 0 : index
    %c0_56 = arith.constant 0 : index
    %54 = vector.load %arg7[%c4, %c0_55, %c0_56] : memref<9x32x8xf32, #tpu.memory_space<vmem>>, vector<1x32x8xf32>
    %55 = vector.shape_cast %54 : vector<1x32x8xf32> to vector<32x8xf32>
    %cst_57 = arith.constant dense<0.000000e+00> : vector<64x8xf32>
    %56 = tpu.matmul %53, %55, %cst_57 {dimension_numbers = #tpu.dot_dimension_numbers<[1], [0], [0], [1], [0, 0, 1, 1], [], []>} : vector<64x32xf32>, vector<32x8xf32>, vector<64x8xf32> -> vector<64x8xf32>
    %57 = arith.addf %51, %56 : vector<64x8xf32>
    %c1_58 = arith.constant 1 : index
    %c2_59 = arith.constant 2 : index
    %c0_60 = arith.constant 0 : index
    %58 = vector.load %arg16[%c1_58, %c2_59, %c0_60] : memref<10x10x32xf32, #tpu.memory_space<vmem>>, vector<8x8x32xf32>
    %59 = vector.shape_cast %58 : vector<8x8x32xf32> to vector<64x32xf32>
    %c5 = arith.constant 5 : index
    %c0_61 = arith.constant 0 : index
    %c0_62 = arith.constant 0 : index
    %60 = vector.load %arg7[%c5, %c0_61, %c0_62] : memref<9x32x8xf32, #tpu.memory_space<vmem>>, vector<1x32x8xf32>
    %61 = vector.shape_cast %60 : vector<1x32x8xf32> to vector<32x8xf32>
    %cst_63 = arith.constant dense<0.000000e+00> : vector<64x8xf32>
    %62 = tpu.matmul %59, %61, %cst_63 {dimension_numbers = #tpu.dot_dimension_numbers<[1], [0], [0], [1], [0, 0, 1, 1], [], []>} : vector<64x32xf32>, vector<32x8xf32>, vector<64x8xf32> -> vector<64x8xf32>
    %63 = arith.addf %57, %62 : vector<64x8xf32>
    %c2_64 = arith.constant 2 : index
    %c0_65 = arith.constant 0 : index
    %c0_66 = arith.constant 0 : index
    %64 = vector.load %arg16[%c2_64, %c0_65, %c0_66] : memref<10x10x32xf32, #tpu.memory_space<vmem>>, vector<8x8x32xf32>
    %65 = vector.shape_cast %64 : vector<8x8x32xf32> to vector<64x32xf32>
    %c6 = arith.constant 6 : index
    %c0_67 = arith.constant 0 : index
    %c0_68 = arith.constant 0 : index
    %66 = vector.load %arg7[%c6, %c0_67, %c0_68] : memref<9x32x8xf32, #tpu.memory_space<vmem>>, vector<1x32x8xf32>
    %67 = vector.shape_cast %66 : vector<1x32x8xf32> to vector<32x8xf32>
    %cst_69 = arith.constant dense<0.000000e+00> : vector<64x8xf32>
    %68 = tpu.matmul %65, %67, %cst_69 {dimension_numbers = #tpu.dot_dimension_numbers<[1], [0], [0], [1], [0, 0, 1, 1], [], []>} : vector<64x32xf32>, vector<32x8xf32>, vector<64x8xf32> -> vector<64x8xf32>
    %69 = arith.addf %63, %68 : vector<64x8xf32>
    %c2_70 = arith.constant 2 : index
    %c1_71 = arith.constant 1 : index
    %c0_72 = arith.constant 0 : index
    %70 = vector.load %arg16[%c2_70, %c1_71, %c0_72] : memref<10x10x32xf32, #tpu.memory_space<vmem>>, vector<8x8x32xf32>
    %71 = vector.shape_cast %70 : vector<8x8x32xf32> to vector<64x32xf32>
    %c7 = arith.constant 7 : index
    %c0_73 = arith.constant 0 : index
    %c0_74 = arith.constant 0 : index
    %72 = vector.load %arg7[%c7, %c0_73, %c0_74] : memref<9x32x8xf32, #tpu.memory_space<vmem>>, vector<1x32x8xf32>
    %73 = vector.shape_cast %72 : vector<1x32x8xf32> to vector<32x8xf32>
    %cst_75 = arith.constant dense<0.000000e+00> : vector<64x8xf32>
    %74 = tpu.matmul %71, %73, %cst_75 {dimension_numbers = #tpu.dot_dimension_numbers<[1], [0], [0], [1], [0, 0, 1, 1], [], []>} : vector<64x32xf32>, vector<32x8xf32>, vector<64x8xf32> -> vector<64x8xf32>
    %75 = arith.addf %69, %74 : vector<64x8xf32>
    %c2_76 = arith.constant 2 : index
    %c2_77 = arith.constant 2 : index
    %c0_78 = arith.constant 0 : index
    %76 = vector.load %arg16[%c2_76, %c2_77, %c0_78] : memref<10x10x32xf32, #tpu.memory_space<vmem>>, vector<8x8x32xf32>
    %77 = vector.shape_cast %76 : vector<8x8x32xf32> to vector<64x32xf32>
    %c8 = arith.constant 8 : index
    %c0_79 = arith.constant 0 : index
    %c0_80 = arith.constant 0 : index
    %78 = vector.load %arg7[%c8, %c0_79, %c0_80] : memref<9x32x8xf32, #tpu.memory_space<vmem>>, vector<1x32x8xf32>
    %79 = vector.shape_cast %78 : vector<1x32x8xf32> to vector<32x8xf32>
    %cst_81 = arith.constant dense<0.000000e+00> : vector<64x8xf32>
    %80 = tpu.matmul %77, %79, %cst_81 {dimension_numbers = #tpu.dot_dimension_numbers<[1], [0], [0], [1], [0, 0, 1, 1], [], []>} : vector<64x32xf32>, vector<32x8xf32>, vector<64x8xf32> -> vector<64x8xf32>
    %81 = arith.addf %75, %80 : vector<64x8xf32>
    %c0_82 = arith.constant 0 : index
    %c10 = arith.constant 10 : index
    %82 = vector.load %arg15[%c0_82, %c10] : memref<64x26xf32, #tpu.memory_space<vmem>>, vector<64x8xf32>
    tpu.vector_store %arg15[%c0_82, %c10], %81 {strides = array<i32>} : memref<64x26xf32, #tpu.memory_space<vmem>>, vector<64x8xf32>,
    %c0_83 = arith.constant 0 : index
    %c0_84 = arith.constant 0 : index
    %83 = vector.load %arg15[%c0_83, %c0_84] : memref<64x26xf32, #tpu.memory_space<vmem>>, vector<64x18xf32>
    %c0_85 = arith.constant 0 : index
    %c0_86 = arith.constant 0 : index
    %84 = vector.load %arg8[%c0_85, %c0_86] : memref<1x18xf32, #tpu.memory_space<vmem>>, vector<1x18xf32>
    %85 = vector.broadcast %84 : vector<1x18xf32> to vector<64x18xf32>
    %86 = arith.mulf %83, %85 : vector<64x18xf32>
    %c0_87 = arith.constant 0 : index
    %c0_88 = arith.constant 0 : index
    %87 = vector.load %arg9[%c0_87, %c0_88] : memref<1x18xf32, #tpu.memory_space<vmem>>, vector<1x18xf32>
    %88 = vector.broadcast %87 : vector<1x18xf32> to vector<64x18xf32>
    %89 = arith.addf %86, %88 : vector<64x18xf32>
    %cst_89 = arith.constant 0.000000e+00 : f32
    %90 = vector.broadcast %cst_89 : f32 to vector<64x18xf32>
    %91 = arith.maximumf %89, %90 : vector<64x18xf32>
    %c0_90 = arith.constant 0 : index
    %c0_91 = arith.constant 0 : index
    %92 = vector.load %arg10[%c0_90, %c0_91] : memref<18x32xf32, #tpu.memory_space<vmem>>, vector<18x32xf32>
    %cst_92 = arith.constant dense<0.000000e+00> : vector<64x32xf32>
    %93 = tpu.matmul %91, %92, %cst_92 {dimension_numbers = #tpu.dot_dimension_numbers<[1], [0], [0], [1], [0, 0, 1, 1], [], []>} : vector<64x18xf32>, vector<18x32xf32>, vector<64x32xf32> -> vector<64x32xf32>
    %c0_93 = arith.constant 0 : index
    %c0_94 = arith.constant 0 : index
    %94 = vector.load %arg11[%c0_93, %c0_94] : memref<1x32xf32, #tpu.memory_space<vmem>>, vector<1x32xf32>
    %95 = vector.broadcast %94 : vector<1x32xf32> to vector<64x32xf32>
    %96 = arith.mulf %93, %95 : vector<64x32xf32>
    %c0_95 = arith.constant 0 : index
    %c0_96 = arith.constant 0 : index
    %97 = vector.load %arg12[%c0_95, %c0_96] : memref<1x32xf32, #tpu.memory_space<vmem>>, vector<1x32xf32>
    %98 = vector.broadcast %97 : vector<1x32xf32> to vector<64x32xf32>
    %99 = arith.addf %96, %98 : vector<64x32xf32>
    %cst_97 = arith.constant 0.000000e+00 : f32
    %100 = vector.broadcast %cst_97 : f32 to vector<64x32xf32>
    %101 = arith.maximumf %99, %100 : vector<64x32xf32>
    %102 = vector.shape_cast %101 : vector<64x32xf32> to vector<8x8x32xf32>
    %c1_98 = arith.constant 1 : index
    %c1_99 = arith.constant 1 : index
    %c0_100 = arith.constant 0 : index
    %103 = vector.load %arg16[%c1_98, %c1_99, %c0_100] : memref<10x10x32xf32, #tpu.memory_space<vmem>>, vector<8x8x32xf32>
    tpu.vector_store %arg16[%c1_98, %c1_99, %c0_100], %102 {strides = array<i32>} : memref<10x10x32xf32, #tpu.memory_space<vmem>>, vector<8x8x32xf32>,
    %cst_101 = arith.constant 0.000000e+00 : f32
    %104 = vector.broadcast %cst_101 : f32 to vector<64x8xf32>
    %c0_102 = arith.constant 0 : index
    %c0_103 = arith.constant 0 : index
    %c0_104 = arith.constant 0 : index
    %105 = vector.load %arg16[%c0_102, %c0_103, %c0_104] : memref<10x10x32xf32, #tpu.memory_space<vmem>>, vector<8x8x32xf32>
    %106 = vector.shape_cast %105 : vector<8x8x32xf32> to vector<64x32xf32>
    %c0_105 = arith.constant 0 : index
    %c0_106 = arith.constant 0 : index
    %c0_107 = arith.constant 0 : index
    %107 = vector.load %arg13[%c0_105, %c0_106, %c0_107] : memref<9x32x8xf32, #tpu.memory_space<vmem>>, vector<1x32x8xf32>
    %108 = vector.shape_cast %107 : vector<1x32x8xf32> to vector<32x8xf32>
    %cst_108 = arith.constant dense<0.000000e+00> : vector<64x8xf32>
    %109 = tpu.matmul %106, %108, %cst_108 {dimension_numbers = #tpu.dot_dimension_numbers<[1], [0], [0], [1], [0, 0, 1, 1], [], []>} : vector<64x32xf32>, vector<32x8xf32>, vector<64x8xf32> -> vector<64x8xf32>
    %110 = arith.addf %104, %109 : vector<64x8xf32>
    %c0_109 = arith.constant 0 : index
    %c1_110 = arith.constant 1 : index
    %c0_111 = arith.constant 0 : index
    %111 = vector.load %arg16[%c0_109, %c1_110, %c0_111] : memref<10x10x32xf32, #tpu.memory_space<vmem>>, vector<8x8x32xf32>
    %112 = vector.shape_cast %111 : vector<8x8x32xf32> to vector<64x32xf32>
    %c1_112 = arith.constant 1 : index
    %c0_113 = arith.constant 0 : index
    %c0_114 = arith.constant 0 : index
    %113 = vector.load %arg13[%c1_112, %c0_113, %c0_114] : memref<9x32x8xf32, #tpu.memory_space<vmem>>, vector<1x32x8xf32>
    %114 = vector.shape_cast %113 : vector<1x32x8xf32> to vector<32x8xf32>
    %cst_115 = arith.constant dense<0.000000e+00> : vector<64x8xf32>
    %115 = tpu.matmul %112, %114, %cst_115 {dimension_numbers = #tpu.dot_dimension_numbers<[1], [0], [0], [1], [0, 0, 1, 1], [], []>} : vector<64x32xf32>, vector<32x8xf32>, vector<64x8xf32> -> vector<64x8xf32>
    %116 = arith.addf %110, %115 : vector<64x8xf32>
    %c0_116 = arith.constant 0 : index
    %c2_117 = arith.constant 2 : index
    %c0_118 = arith.constant 0 : index
    %117 = vector.load %arg16[%c0_116, %c2_117, %c0_118] : memref<10x10x32xf32, #tpu.memory_space<vmem>>, vector<8x8x32xf32>
    %118 = vector.shape_cast %117 : vector<8x8x32xf32> to vector<64x32xf32>
    %c2_119 = arith.constant 2 : index
    %c0_120 = arith.constant 0 : index
    %c0_121 = arith.constant 0 : index
    %119 = vector.load %arg13[%c2_119, %c0_120, %c0_121] : memref<9x32x8xf32, #tpu.memory_space<vmem>>, vector<1x32x8xf32>
    %120 = vector.shape_cast %119 : vector<1x32x8xf32> to vector<32x8xf32>
    %cst_122 = arith.constant dense<0.000000e+00> : vector<64x8xf32>
    %121 = tpu.matmul %118, %120, %cst_122 {dimension_numbers = #tpu.dot_dimension_numbers<[1], [0], [0], [1], [0, 0, 1, 1], [], []>} : vector<64x32xf32>, vector<32x8xf32>, vector<64x8xf32> -> vector<64x8xf32>
    %122 = arith.addf %116, %121 : vector<64x8xf32>
    %c1_123 = arith.constant 1 : index
    %c0_124 = arith.constant 0 : index
    %c0_125 = arith.constant 0 : index
    %123 = vector.load %arg16[%c1_123, %c0_124, %c0_125] : memref<10x10x32xf32, #tpu.memory_space<vmem>>, vector<8x8x32xf32>
    %124 = vector.shape_cast %123 : vector<8x8x32xf32> to vector<64x32xf32>
    %c3_126 = arith.constant 3 : index
    %c0_127 = arith.constant 0 : index
    %c0_128 = arith.constant 0 : index
    %125 = vector.load %arg13[%c3_126, %c0_127, %c0_128] : memref<9x32x8xf32, #tpu.memory_space<vmem>>, vector<1x32x8xf32>
    %126 = vector.shape_cast %125 : vector<1x32x8xf32> to vector<32x8xf32>
    %cst_129 = arith.constant dense<0.000000e+00> : vector<64x8xf32>
    %127 = tpu.matmul %124, %126, %cst_129 {dimension_numbers = #tpu.dot_dimension_numbers<[1], [0], [0], [1], [0, 0, 1, 1], [], []>} : vector<64x32xf32>, vector<32x8xf32>, vector<64x8xf32> -> vector<64x8xf32>
    %128 = arith.addf %122, %127 : vector<64x8xf32>
    %c1_130 = arith.constant 1 : index
    %c1_131 = arith.constant 1 : index
    %c0_132 = arith.constant 0 : index
    %129 = vector.load %arg16[%c1_130, %c1_131, %c0_132] : memref<10x10x32xf32, #tpu.memory_space<vmem>>, vector<8x8x32xf32>
    %130 = vector.shape_cast %129 : vector<8x8x32xf32> to vector<64x32xf32>
    %c4_133 = arith.constant 4 : index
    %c0_134 = arith.constant 0 : index
    %c0_135 = arith.constant 0 : index
    %131 = vector.load %arg13[%c4_133, %c0_134, %c0_135] : memref<9x32x8xf32, #tpu.memory_space<vmem>>, vector<1x32x8xf32>
    %132 = vector.shape_cast %131 : vector<1x32x8xf32> to vector<32x8xf32>
    %cst_136 = arith.constant dense<0.000000e+00> : vector<64x8xf32>
    %133 = tpu.matmul %130, %132, %cst_136 {dimension_numbers = #tpu.dot_dimension_numbers<[1], [0], [0], [1], [0, 0, 1, 1], [], []>} : vector<64x32xf32>, vector<32x8xf32>, vector<64x8xf32> -> vector<64x8xf32>
    %134 = arith.addf %128, %133 : vector<64x8xf32>
    %c1_137 = arith.constant 1 : index
    %c2_138 = arith.constant 2 : index
    %c0_139 = arith.constant 0 : index
    %135 = vector.load %arg16[%c1_137, %c2_138, %c0_139] : memref<10x10x32xf32, #tpu.memory_space<vmem>>, vector<8x8x32xf32>
    %136 = vector.shape_cast %135 : vector<8x8x32xf32> to vector<64x32xf32>
    %c5_140 = arith.constant 5 : index
    %c0_141 = arith.constant 0 : index
    %c0_142 = arith.constant 0 : index
    %137 = vector.load %arg13[%c5_140, %c0_141, %c0_142] : memref<9x32x8xf32, #tpu.memory_space<vmem>>, vector<1x32x8xf32>
    %138 = vector.shape_cast %137 : vector<1x32x8xf32> to vector<32x8xf32>
    %cst_143 = arith.constant dense<0.000000e+00> : vector<64x8xf32>
    %139 = tpu.matmul %136, %138, %cst_143 {dimension_numbers = #tpu.dot_dimension_numbers<[1], [0], [0], [1], [0, 0, 1, 1], [], []>} : vector<64x32xf32>, vector<32x8xf32>, vector<64x8xf32> -> vector<64x8xf32>
    %140 = arith.addf %134, %139 : vector<64x8xf32>
    %c2_144 = arith.constant 2 : index
    %c0_145 = arith.constant 0 : index
    %c0_146 = arith.constant 0 : index
    %141 = vector.load %arg16[%c2_144, %c0_145, %c0_146] : memref<10x10x32xf32, #tpu.memory_space<vmem>>, vector<8x8x32xf32>
    %142 = vector.shape_cast %141 : vector<8x8x32xf32> to vector<64x32xf32>
    %c6_147 = arith.constant 6 : index
    %c0_148 = arith.constant 0 : index
    %c0_149 = arith.constant 0 : index
    %143 = vector.load %arg13[%c6_147, %c0_148, %c0_149] : memref<9x32x8xf32, #tpu.memory_space<vmem>>, vector<1x32x8xf32>
    %144 = vector.shape_cast %143 : vector<1x32x8xf32> to vector<32x8xf32>
    %cst_150 = arith.constant dense<0.000000e+00> : vector<64x8xf32>
    %145 = tpu.matmul %142, %144, %cst_150 {dimension_numbers = #tpu.dot_dimension_numbers<[1], [0], [0], [1], [0, 0, 1, 1], [], []>} : vector<64x32xf32>, vector<32x8xf32>, vector<64x8xf32> -> vector<64x8xf32>
    %146 = arith.addf %140, %145 : vector<64x8xf32>
    %c2_151 = arith.constant 2 : index
    %c1_152 = arith.constant 1 : index
    %c0_153 = arith.constant 0 : index
    %147 = vector.load %arg16[%c2_151, %c1_152, %c0_153] : memref<10x10x32xf32, #tpu.memory_space<vmem>>, vector<8x8x32xf32>
    %148 = vector.shape_cast %147 : vector<8x8x32xf32> to vector<64x32xf32>
    %c7_154 = arith.constant 7 : index
    %c0_155 = arith.constant 0 : index
    %c0_156 = arith.constant 0 : index
    %149 = vector.load %arg13[%c7_154, %c0_155, %c0_156] : memref<9x32x8xf32, #tpu.memory_space<vmem>>, vector<1x32x8xf32>
    %150 = vector.shape_cast %149 : vector<1x32x8xf32> to vector<32x8xf32>
    %cst_157 = arith.constant dense<0.000000e+00> : vector<64x8xf32>
    %151 = tpu.matmul %148, %150, %cst_157 {dimension_numbers = #tpu.dot_dimension_numbers<[1], [0], [0], [1], [0, 0, 1, 1], [], []>} : vector<64x32xf32>, vector<32x8xf32>, vector<64x8xf32> -> vector<64x8xf32>
    %152 = arith.addf %146, %151 : vector<64x8xf32>
    %c2_158 = arith.constant 2 : index
    %c2_159 = arith.constant 2 : index
    %c0_160 = arith.constant 0 : index
    %153 = vector.load %arg16[%c2_158, %c2_159, %c0_160] : memref<10x10x32xf32, #tpu.memory_space<vmem>>, vector<8x8x32xf32>
    %154 = vector.shape_cast %153 : vector<8x8x32xf32> to vector<64x32xf32>
    %c8_161 = arith.constant 8 : index
    %c0_162 = arith.constant 0 : index
    %c0_163 = arith.constant 0 : index
    %155 = vector.load %arg13[%c8_161, %c0_162, %c0_163] : memref<9x32x8xf32, #tpu.memory_space<vmem>>, vector<1x32x8xf32>
    %156 = vector.shape_cast %155 : vector<1x32x8xf32> to vector<32x8xf32>
    %cst_164 = arith.constant dense<0.000000e+00> : vector<64x8xf32>
    %157 = tpu.matmul %154, %156, %cst_164 {dimension_numbers = #tpu.dot_dimension_numbers<[1], [0], [0], [1], [0, 0, 1, 1], [], []>} : vector<64x32xf32>, vector<32x8xf32>, vector<64x8xf32> -> vector<64x8xf32>
    %158 = arith.addf %152, %157 : vector<64x8xf32>
    %c0_165 = arith.constant 0 : index
    %c18 = arith.constant 18 : index
    %159 = vector.load %arg15[%c0_165, %c18] : memref<64x26xf32, #tpu.memory_space<vmem>>, vector<64x8xf32>
    tpu.vector_store %arg15[%c0_165, %c18], %158 {strides = array<i32>} : memref<64x26xf32, #tpu.memory_space<vmem>>, vector<64x8xf32>,
    %c0_166 = arith.constant 0 : index
    %c0_167 = arith.constant 0 : index
    %160 = vector.load %arg15[%c0_166, %c0_167] : memref<64x26xf32, #tpu.memory_space<vmem>>, vector<64x26xf32>
    %161 = vector.shape_cast %160 : vector<64x26xf32> to vector<8x8x26xf32>
    %c0_168 = arith.constant 0 : index
    %c0_169 = arith.constant 0 : index
    %c0_170 = arith.constant 0 : index
    %c0_171 = arith.constant 0 : index
    %162 = vector.load %arg14[%c0_168, %c0_169, %c0_170, %c0_171] : memref<1x8x8x26xf32, #tpu.memory_space<vmem>>, vector<1x8x8x26xf32>
    %163 = vector.shape_cast %162 : vector<1x8x8x26xf32> to vector<8x8x26xf32>
    %164 = vector.shape_cast %161 : vector<8x8x26xf32> to vector<1x8x8x26xf32>
    tpu.vector_store %arg14[%c0_168, %c0_169, %c0_170, %c0_171], %164 {strides = array<i32>} : memref<1x8x8x26xf32, #tpu.memory_space<vmem>>, vector<1x8x8x26xf32>,
    return
  }
  func.func @transform_0(%arg0: i32) -> (i32, i32, i32, i32) {
    %c0_i32 = arith.constant 0 : i32
    %c0_i32_0 = arith.constant 0 : i32
    %c0_i32_1 = arith.constant 0 : i32
    %c0_i32_2 = arith.constant 0 : i32
    return %arg0, %c0_i32, %c0_i32_0, %c0_i32_1 : i32, i32, i32, i32
  }
  func.func @transform_1(%arg0: i32) -> (i32, i32) {
    %c0_i32 = arith.constant 0 : i32
    %c0_i32_0 = arith.constant 0 : i32
    %c0_i32_1 = arith.constant 0 : i32
    return %c0_i32, %c0_i32_0 : i32, i32
  }
  func.func @transform_2(%arg0: i32) -> (i32, i32) {
    %c0_i32 = arith.constant 0 : i32
    %c0_i32_0 = arith.constant 0 : i32
    %c0_i32_1 = arith.constant 0 : i32
    return %c0_i32, %c0_i32_0 : i32, i32
  }
  func.func @transform_3(%arg0: i32) -> (i32, i32) {
    %c0_i32 = arith.constant 0 : i32
    %c0_i32_0 = arith.constant 0 : i32
    %c0_i32_1 = arith.constant 0 : i32
    return %c0_i32, %c0_i32_0 : i32, i32
  }
  func.func @transform_4(%arg0: i32) -> (i32, i32) {
    %c0_i32 = arith.constant 0 : i32
    %c0_i32_0 = arith.constant 0 : i32
    %c0_i32_1 = arith.constant 0 : i32
    return %c0_i32, %c0_i32_0 : i32, i32
  }
  func.func @transform_5(%arg0: i32) -> (i32, i32) {
    %c0_i32 = arith.constant 0 : i32
    %c0_i32_0 = arith.constant 0 : i32
    %c0_i32_1 = arith.constant 0 : i32
    return %c0_i32, %c0_i32_0 : i32, i32
  }
  func.func @transform_6(%arg0: i32) -> (i32, i32, i32) {
    %c0_i32 = arith.constant 0 : i32
    %c0_i32_0 = arith.constant 0 : i32
    %c0_i32_1 = arith.constant 0 : i32
    %c0_i32_2 = arith.constant 0 : i32
    return %c0_i32, %c0_i32_0, %c0_i32_1 : i32, i32, i32
  }
  func.func @transform_7(%arg0: i32) -> (i32, i32) {
    %c0_i32 = arith.constant 0 : i32
    %c0_i32_0 = arith.constant 0 : i32
    %c0_i32_1 = arith.constant 0 : i32
    return %c0_i32, %c0_i32_0 : i32, i32
  }
  func.func @transform_8(%arg0: i32) -> (i32, i32) {
    %c0_i32 = arith.constant 0 : i32
    %c0_i32_0 = arith.constant 0 : i32
    %c0_i32_1 = arith.constant 0 : i32
    return %c0_i32, %c0_i32_0 : i32, i32
  }
  func.func @transform_9(%arg0: i32) -> (i32, i32) {
    %c0_i32 = arith.constant 0 : i32
    %c0_i32_0 = arith.constant 0 : i32
    %c0_i32_1 = arith.constant 0 : i32
    return %c0_i32, %c0_i32_0 : i32, i32
  }
  func.func @transform_10(%arg0: i32) -> (i32, i32) {
    %c0_i32 = arith.constant 0 : i32
    %c0_i32_0 = arith.constant 0 : i32
    %c0_i32_1 = arith.constant 0 : i32
    return %c0_i32, %c0_i32_0 : i32, i32
  }
  func.func @transform_11(%arg0: i32) -> (i32, i32) {
    %c0_i32 = arith.constant 0 : i32
    %c0_i32_0 = arith.constant 0 : i32
    %c0_i32_1 = arith.constant 0 : i32
    return %c0_i32, %c0_i32_0 : i32, i32
  }
  func.func @transform_12(%arg0: i32) -> (i32, i32, i32) {
    %c0_i32 = arith.constant 0 : i32
    %c0_i32_0 = arith.constant 0 : i32
    %c0_i32_1 = arith.constant 0 : i32
    %c0_i32_2 = arith.constant 0 : i32
    return %c0_i32, %c0_i32_0, %c0_i32_1 : i32, i32, i32
  }
  func.func @transform_13(%arg0: i32) -> (i32, i32, i32, i32) {
    %c0_i32 = arith.constant 0 : i32
    %c0_i32_0 = arith.constant 0 : i32
    %c0_i32_1 = arith.constant 0 : i32
    %c0_i32_2 = arith.constant 0 : i32
    return %arg0, %c0_i32, %c0_i32_0, %c0_i32_1 : i32, i32, i32, i32
  }
}

module attributes {stable_mosaic.version = 11 : i64} {
  func.func @kernel(%arg0: i32, %arg1: memref<1x16x16x4xf32, #tpu.memory_space<vmem>>, %arg2: memref<1x4xf32, #tpu.memory_space<vmem>>, %arg3: memref<1x4xf32, #tpu.memory_space<vmem>>, %arg4: memref<4x32xf32, #tpu.memory_space<vmem>>, %arg5: memref<1x32xf32, #tpu.memory_space<vmem>>, %arg6: memref<1x32xf32, #tpu.memory_space<vmem>>, %arg7: memref<9x32x8xf32, #tpu.memory_space<vmem>>, %arg8: memref<1x12xf32, #tpu.memory_space<vmem>>, %arg9: memref<1x12xf32, #tpu.memory_space<vmem>>, %arg10: memref<12x32xf32, #tpu.memory_space<vmem>>, %arg11: memref<1x32xf32, #tpu.memory_space<vmem>>, %arg12: memref<1x32xf32, #tpu.memory_space<vmem>>, %arg13: memref<9x32x8xf32, #tpu.memory_space<vmem>>, %arg14: memref<1x16x16x20xf32, #tpu.memory_space<vmem>>, %arg15: memref<256x20xf32, #tpu.memory_space<vmem>>, %arg16: memref<18x18x32xf32, #tpu.memory_space<vmem>>) attributes {dimension_semantics = [#tpu.dimension_semantics<parallel>], iteration_bounds = array<i64: 2>, scalar_prefetch = 0 : i64, scratch_operands = 2 : i64, tpu.core_type = #tpu.core_type<tc>, window_params = [{transform_indices = @transform_0, window_bounds = array<i64: 1, 16, 16, 4>}, {pipeline_mode = #tpu.pipeline_mode<synchronous>, transform_indices = @transform_1, window_bounds = array<i64: 1, 4>}, {pipeline_mode = #tpu.pipeline_mode<synchronous>, transform_indices = @transform_2, window_bounds = array<i64: 1, 4>}, {pipeline_mode = #tpu.pipeline_mode<synchronous>, transform_indices = @transform_3, window_bounds = array<i64: 4, 32>}, {pipeline_mode = #tpu.pipeline_mode<synchronous>, transform_indices = @transform_4, window_bounds = array<i64: 1, 32>}, {pipeline_mode = #tpu.pipeline_mode<synchronous>, transform_indices = @transform_5, window_bounds = array<i64: 1, 32>}, {pipeline_mode = #tpu.pipeline_mode<synchronous>, transform_indices = @transform_6, window_bounds = array<i64: 9, 32, 8>}, {pipeline_mode = #tpu.pipeline_mode<synchronous>, transform_indices = @transform_7, window_bounds = array<i64: 1, 12>}, {pipeline_mode = #tpu.pipeline_mode<synchronous>, transform_indices = @transform_8, window_bounds = array<i64: 1, 12>}, {pipeline_mode = #tpu.pipeline_mode<synchronous>, transform_indices = @transform_9, window_bounds = array<i64: 12, 32>}, {pipeline_mode = #tpu.pipeline_mode<synchronous>, transform_indices = @transform_10, window_bounds = array<i64: 1, 32>}, {pipeline_mode = #tpu.pipeline_mode<synchronous>, transform_indices = @transform_11, window_bounds = array<i64: 1, 32>}, {pipeline_mode = #tpu.pipeline_mode<synchronous>, transform_indices = @transform_12, window_bounds = array<i64: 9, 32, 8>}, {transform_indices = @transform_13, window_bounds = array<i64: 1, 16, 16, 20>}]} {
    %c0 = arith.constant 0 : index
    %c0_0 = arith.constant 0 : index
    %c0_1 = arith.constant 0 : index
    %c0_2 = arith.constant 0 : index
    %0 = vector.load %arg1[%c0, %c0_0, %c0_1, %c0_2] : memref<1x16x16x4xf32, #tpu.memory_space<vmem>>, vector<1x16x16x4xf32>
    %1 = vector.shape_cast %0 : vector<1x16x16x4xf32> to vector<16x16x4xf32>
    %2 = vector.shape_cast %1 : vector<16x16x4xf32> to vector<256x4xf32>
    %c0_3 = arith.constant 0 : index
    %c0_4 = arith.constant 0 : index
    %3 = vector.load %arg15[%c0_3, %c0_4] : memref<256x20xf32, #tpu.memory_space<vmem>>, vector<256x4xf32>
    tpu.vector_store %arg15[%c0_3, %c0_4], %2 {strides = array<i32>} : memref<256x20xf32, #tpu.memory_space<vmem>>, vector<256x4xf32>,
    %cst = arith.constant 0.000000e+00 : f32
    %4 = vector.broadcast %cst : f32 to vector<18x18x32xf32>
    %c0_5 = arith.constant 0 : index
    %c0_6 = arith.constant 0 : index
    %c0_7 = arith.constant 0 : index
    %5 = vector.load %arg16[%c0_5, %c0_6, %c0_7] : memref<18x18x32xf32, #tpu.memory_space<vmem>>, vector<18x18x32xf32>
    tpu.vector_store %arg16[%c0_5, %c0_6, %c0_7], %4 {strides = array<i32>} : memref<18x18x32xf32, #tpu.memory_space<vmem>>, vector<18x18x32xf32>,
    %c0_8 = arith.constant 0 : index
    %c0_9 = arith.constant 0 : index
    %6 = vector.load %arg15[%c0_8, %c0_9] : memref<256x20xf32, #tpu.memory_space<vmem>>, vector<256x4xf32>
    %c0_10 = arith.constant 0 : index
    %c0_11 = arith.constant 0 : index
    %7 = vector.load %arg2[%c0_10, %c0_11] : memref<1x4xf32, #tpu.memory_space<vmem>>, vector<1x4xf32>
    %8 = vector.broadcast %7 : vector<1x4xf32> to vector<256x4xf32>
    %9 = arith.mulf %6, %8 : vector<256x4xf32>
    %c0_12 = arith.constant 0 : index
    %c0_13 = arith.constant 0 : index
    %10 = vector.load %arg3[%c0_12, %c0_13] : memref<1x4xf32, #tpu.memory_space<vmem>>, vector<1x4xf32>
    %11 = vector.broadcast %10 : vector<1x4xf32> to vector<256x4xf32>
    %12 = arith.addf %9, %11 : vector<256x4xf32>
    %cst_14 = arith.constant 0.000000e+00 : f32
    %13 = vector.broadcast %cst_14 : f32 to vector<256x4xf32>
    %14 = arith.maximumf %12, %13 : vector<256x4xf32>
    %c0_15 = arith.constant 0 : index
    %c0_16 = arith.constant 0 : index
    %15 = vector.load %arg4[%c0_15, %c0_16] : memref<4x32xf32, #tpu.memory_space<vmem>>, vector<4x32xf32>
    %cst_17 = arith.constant dense<0.000000e+00> : vector<256x32xf32>
    %16 = tpu.matmul %14, %15, %cst_17 {dimension_numbers = #tpu.dot_dimension_numbers<[1], [0], [0], [1], [0, 0, 1, 1], [], []>} : vector<256x4xf32>, vector<4x32xf32>, vector<256x32xf32> -> vector<256x32xf32>
    %c0_18 = arith.constant 0 : index
    %c0_19 = arith.constant 0 : index
    %17 = vector.load %arg5[%c0_18, %c0_19] : memref<1x32xf32, #tpu.memory_space<vmem>>, vector<1x32xf32>
    %18 = vector.broadcast %17 : vector<1x32xf32> to vector<256x32xf32>
    %19 = arith.mulf %16, %18 : vector<256x32xf32>
    %c0_20 = arith.constant 0 : index
    %c0_21 = arith.constant 0 : index
    %20 = vector.load %arg6[%c0_20, %c0_21] : memref<1x32xf32, #tpu.memory_space<vmem>>, vector<1x32xf32>
    %21 = vector.broadcast %20 : vector<1x32xf32> to vector<256x32xf32>
    %22 = arith.addf %19, %21 : vector<256x32xf32>
    %cst_22 = arith.constant 0.000000e+00 : f32
    %23 = vector.broadcast %cst_22 : f32 to vector<256x32xf32>
    %24 = arith.maximumf %22, %23 : vector<256x32xf32>
    %25 = vector.shape_cast %24 : vector<256x32xf32> to vector<16x16x32xf32>
    %c1 = arith.constant 1 : index
    %c1_23 = arith.constant 1 : index
    %c0_24 = arith.constant 0 : index
    %26 = vector.load %arg16[%c1, %c1_23, %c0_24] : memref<18x18x32xf32, #tpu.memory_space<vmem>>, vector<16x16x32xf32>
    tpu.vector_store %arg16[%c1, %c1_23, %c0_24], %25 {strides = array<i32>} : memref<18x18x32xf32, #tpu.memory_space<vmem>>, vector<16x16x32xf32>,
    %cst_25 = arith.constant 0.000000e+00 : f32
    %27 = vector.broadcast %cst_25 : f32 to vector<256x8xf32>
    %c0_26 = arith.constant 0 : index
    %c0_27 = arith.constant 0 : index
    %c0_28 = arith.constant 0 : index
    %28 = vector.load %arg16[%c0_26, %c0_27, %c0_28] : memref<18x18x32xf32, #tpu.memory_space<vmem>>, vector<16x16x32xf32>
    %29 = vector.shape_cast %28 : vector<16x16x32xf32> to vector<256x32xf32>
    %c0_29 = arith.constant 0 : index
    %c0_30 = arith.constant 0 : index
    %c0_31 = arith.constant 0 : index
    %30 = vector.load %arg7[%c0_29, %c0_30, %c0_31] : memref<9x32x8xf32, #tpu.memory_space<vmem>>, vector<1x32x8xf32>
    %31 = vector.shape_cast %30 : vector<1x32x8xf32> to vector<32x8xf32>
    %cst_32 = arith.constant dense<0.000000e+00> : vector<256x8xf32>
    %32 = tpu.matmul %29, %31, %cst_32 {dimension_numbers = #tpu.dot_dimension_numbers<[1], [0], [0], [1], [0, 0, 1, 1], [], []>} : vector<256x32xf32>, vector<32x8xf32>, vector<256x8xf32> -> vector<256x8xf32>
    %33 = arith.addf %27, %32 : vector<256x8xf32>
    %c0_33 = arith.constant 0 : index
    %c1_34 = arith.constant 1 : index
    %c0_35 = arith.constant 0 : index
    %34 = vector.load %arg16[%c0_33, %c1_34, %c0_35] : memref<18x18x32xf32, #tpu.memory_space<vmem>>, vector<16x16x32xf32>
    %35 = vector.shape_cast %34 : vector<16x16x32xf32> to vector<256x32xf32>
    %c1_36 = arith.constant 1 : index
    %c0_37 = arith.constant 0 : index
    %c0_38 = arith.constant 0 : index
    %36 = vector.load %arg7[%c1_36, %c0_37, %c0_38] : memref<9x32x8xf32, #tpu.memory_space<vmem>>, vector<1x32x8xf32>
    %37 = vector.shape_cast %36 : vector<1x32x8xf32> to vector<32x8xf32>
    %cst_39 = arith.constant dense<0.000000e+00> : vector<256x8xf32>
    %38 = tpu.matmul %35, %37, %cst_39 {dimension_numbers = #tpu.dot_dimension_numbers<[1], [0], [0], [1], [0, 0, 1, 1], [], []>} : vector<256x32xf32>, vector<32x8xf32>, vector<256x8xf32> -> vector<256x8xf32>
    %39 = arith.addf %33, %38 : vector<256x8xf32>
    %c0_40 = arith.constant 0 : index
    %c2 = arith.constant 2 : index
    %c0_41 = arith.constant 0 : index
    %40 = vector.load %arg16[%c0_40, %c2, %c0_41] : memref<18x18x32xf32, #tpu.memory_space<vmem>>, vector<16x16x32xf32>
    %41 = vector.shape_cast %40 : vector<16x16x32xf32> to vector<256x32xf32>
    %c2_42 = arith.constant 2 : index
    %c0_43 = arith.constant 0 : index
    %c0_44 = arith.constant 0 : index
    %42 = vector.load %arg7[%c2_42, %c0_43, %c0_44] : memref<9x32x8xf32, #tpu.memory_space<vmem>>, vector<1x32x8xf32>
    %43 = vector.shape_cast %42 : vector<1x32x8xf32> to vector<32x8xf32>
    %cst_45 = arith.constant dense<0.000000e+00> : vector<256x8xf32>
    %44 = tpu.matmul %41, %43, %cst_45 {dimension_numbers = #tpu.dot_dimension_numbers<[1], [0], [0], [1], [0, 0, 1, 1], [], []>} : vector<256x32xf32>, vector<32x8xf32>, vector<256x8xf32> -> vector<256x8xf32>
    %45 = arith.addf %39, %44 : vector<256x8xf32>
    %c1_46 = arith.constant 1 : index
    %c0_47 = arith.constant 0 : index
    %c0_48 = arith.constant 0 : index
    %46 = vector.load %arg16[%c1_46, %c0_47, %c0_48] : memref<18x18x32xf32, #tpu.memory_space<vmem>>, vector<16x16x32xf32>
    %47 = vector.shape_cast %46 : vector<16x16x32xf32> to vector<256x32xf32>
    %c3 = arith.constant 3 : index
    %c0_49 = arith.constant 0 : index
    %c0_50 = arith.constant 0 : index
    %48 = vector.load %arg7[%c3, %c0_49, %c0_50] : memref<9x32x8xf32, #tpu.memory_space<vmem>>, vector<1x32x8xf32>
    %49 = vector.shape_cast %48 : vector<1x32x8xf32> to vector<32x8xf32>
    %cst_51 = arith.constant dense<0.000000e+00> : vector<256x8xf32>
    %50 = tpu.matmul %47, %49, %cst_51 {dimension_numbers = #tpu.dot_dimension_numbers<[1], [0], [0], [1], [0, 0, 1, 1], [], []>} : vector<256x32xf32>, vector<32x8xf32>, vector<256x8xf32> -> vector<256x8xf32>
    %51 = arith.addf %45, %50 : vector<256x8xf32>
    %c1_52 = arith.constant 1 : index
    %c1_53 = arith.constant 1 : index
    %c0_54 = arith.constant 0 : index
    %52 = vector.load %arg16[%c1_52, %c1_53, %c0_54] : memref<18x18x32xf32, #tpu.memory_space<vmem>>, vector<16x16x32xf32>
    %53 = vector.shape_cast %52 : vector<16x16x32xf32> to vector<256x32xf32>
    %c4 = arith.constant 4 : index
    %c0_55 = arith.constant 0 : index
    %c0_56 = arith.constant 0 : index
    %54 = vector.load %arg7[%c4, %c0_55, %c0_56] : memref<9x32x8xf32, #tpu.memory_space<vmem>>, vector<1x32x8xf32>
    %55 = vector.shape_cast %54 : vector<1x32x8xf32> to vector<32x8xf32>
    %cst_57 = arith.constant dense<0.000000e+00> : vector<256x8xf32>
    %56 = tpu.matmul %53, %55, %cst_57 {dimension_numbers = #tpu.dot_dimension_numbers<[1], [0], [0], [1], [0, 0, 1, 1], [], []>} : vector<256x32xf32>, vector<32x8xf32>, vector<256x8xf32> -> vector<256x8xf32>
    %57 = arith.addf %51, %56 : vector<256x8xf32>
    %c1_58 = arith.constant 1 : index
    %c2_59 = arith.constant 2 : index
    %c0_60 = arith.constant 0 : index
    %58 = vector.load %arg16[%c1_58, %c2_59, %c0_60] : memref<18x18x32xf32, #tpu.memory_space<vmem>>, vector<16x16x32xf32>
    %59 = vector.shape_cast %58 : vector<16x16x32xf32> to vector<256x32xf32>
    %c5 = arith.constant 5 : index
    %c0_61 = arith.constant 0 : index
    %c0_62 = arith.constant 0 : index
    %60 = vector.load %arg7[%c5, %c0_61, %c0_62] : memref<9x32x8xf32, #tpu.memory_space<vmem>>, vector<1x32x8xf32>
    %61 = vector.shape_cast %60 : vector<1x32x8xf32> to vector<32x8xf32>
    %cst_63 = arith.constant dense<0.000000e+00> : vector<256x8xf32>
    %62 = tpu.matmul %59, %61, %cst_63 {dimension_numbers = #tpu.dot_dimension_numbers<[1], [0], [0], [1], [0, 0, 1, 1], [], []>} : vector<256x32xf32>, vector<32x8xf32>, vector<256x8xf32> -> vector<256x8xf32>
    %63 = arith.addf %57, %62 : vector<256x8xf32>
    %c2_64 = arith.constant 2 : index
    %c0_65 = arith.constant 0 : index
    %c0_66 = arith.constant 0 : index
    %64 = vector.load %arg16[%c2_64, %c0_65, %c0_66] : memref<18x18x32xf32, #tpu.memory_space<vmem>>, vector<16x16x32xf32>
    %65 = vector.shape_cast %64 : vector<16x16x32xf32> to vector<256x32xf32>
    %c6 = arith.constant 6 : index
    %c0_67 = arith.constant 0 : index
    %c0_68 = arith.constant 0 : index
    %66 = vector.load %arg7[%c6, %c0_67, %c0_68] : memref<9x32x8xf32, #tpu.memory_space<vmem>>, vector<1x32x8xf32>
    %67 = vector.shape_cast %66 : vector<1x32x8xf32> to vector<32x8xf32>
    %cst_69 = arith.constant dense<0.000000e+00> : vector<256x8xf32>
    %68 = tpu.matmul %65, %67, %cst_69 {dimension_numbers = #tpu.dot_dimension_numbers<[1], [0], [0], [1], [0, 0, 1, 1], [], []>} : vector<256x32xf32>, vector<32x8xf32>, vector<256x8xf32> -> vector<256x8xf32>
    %69 = arith.addf %63, %68 : vector<256x8xf32>
    %c2_70 = arith.constant 2 : index
    %c1_71 = arith.constant 1 : index
    %c0_72 = arith.constant 0 : index
    %70 = vector.load %arg16[%c2_70, %c1_71, %c0_72] : memref<18x18x32xf32, #tpu.memory_space<vmem>>, vector<16x16x32xf32>
    %71 = vector.shape_cast %70 : vector<16x16x32xf32> to vector<256x32xf32>
    %c7 = arith.constant 7 : index
    %c0_73 = arith.constant 0 : index
    %c0_74 = arith.constant 0 : index
    %72 = vector.load %arg7[%c7, %c0_73, %c0_74] : memref<9x32x8xf32, #tpu.memory_space<vmem>>, vector<1x32x8xf32>
    %73 = vector.shape_cast %72 : vector<1x32x8xf32> to vector<32x8xf32>
    %cst_75 = arith.constant dense<0.000000e+00> : vector<256x8xf32>
    %74 = tpu.matmul %71, %73, %cst_75 {dimension_numbers = #tpu.dot_dimension_numbers<[1], [0], [0], [1], [0, 0, 1, 1], [], []>} : vector<256x32xf32>, vector<32x8xf32>, vector<256x8xf32> -> vector<256x8xf32>
    %75 = arith.addf %69, %74 : vector<256x8xf32>
    %c2_76 = arith.constant 2 : index
    %c2_77 = arith.constant 2 : index
    %c0_78 = arith.constant 0 : index
    %76 = vector.load %arg16[%c2_76, %c2_77, %c0_78] : memref<18x18x32xf32, #tpu.memory_space<vmem>>, vector<16x16x32xf32>
    %77 = vector.shape_cast %76 : vector<16x16x32xf32> to vector<256x32xf32>
    %c8 = arith.constant 8 : index
    %c0_79 = arith.constant 0 : index
    %c0_80 = arith.constant 0 : index
    %78 = vector.load %arg7[%c8, %c0_79, %c0_80] : memref<9x32x8xf32, #tpu.memory_space<vmem>>, vector<1x32x8xf32>
    %79 = vector.shape_cast %78 : vector<1x32x8xf32> to vector<32x8xf32>
    %cst_81 = arith.constant dense<0.000000e+00> : vector<256x8xf32>
    %80 = tpu.matmul %77, %79, %cst_81 {dimension_numbers = #tpu.dot_dimension_numbers<[1], [0], [0], [1], [0, 0, 1, 1], [], []>} : vector<256x32xf32>, vector<32x8xf32>, vector<256x8xf32> -> vector<256x8xf32>
    %81 = arith.addf %75, %80 : vector<256x8xf32>
    %c0_82 = arith.constant 0 : index
    %c4_83 = arith.constant 4 : index
    %82 = vector.load %arg15[%c0_82, %c4_83] : memref<256x20xf32, #tpu.memory_space<vmem>>, vector<256x8xf32>
    tpu.vector_store %arg15[%c0_82, %c4_83], %81 {strides = array<i32>} : memref<256x20xf32, #tpu.memory_space<vmem>>, vector<256x8xf32>,
    %c0_84 = arith.constant 0 : index
    %c0_85 = arith.constant 0 : index
    %83 = vector.load %arg15[%c0_84, %c0_85] : memref<256x20xf32, #tpu.memory_space<vmem>>, vector<256x12xf32>
    %c0_86 = arith.constant 0 : index
    %c0_87 = arith.constant 0 : index
    %84 = vector.load %arg8[%c0_86, %c0_87] : memref<1x12xf32, #tpu.memory_space<vmem>>, vector<1x12xf32>
    %85 = vector.broadcast %84 : vector<1x12xf32> to vector<256x12xf32>
    %86 = arith.mulf %83, %85 : vector<256x12xf32>
    %c0_88 = arith.constant 0 : index
    %c0_89 = arith.constant 0 : index
    %87 = vector.load %arg9[%c0_88, %c0_89] : memref<1x12xf32, #tpu.memory_space<vmem>>, vector<1x12xf32>
    %88 = vector.broadcast %87 : vector<1x12xf32> to vector<256x12xf32>
    %89 = arith.addf %86, %88 : vector<256x12xf32>
    %cst_90 = arith.constant 0.000000e+00 : f32
    %90 = vector.broadcast %cst_90 : f32 to vector<256x12xf32>
    %91 = arith.maximumf %89, %90 : vector<256x12xf32>
    %c0_91 = arith.constant 0 : index
    %c0_92 = arith.constant 0 : index
    %92 = vector.load %arg10[%c0_91, %c0_92] : memref<12x32xf32, #tpu.memory_space<vmem>>, vector<12x32xf32>
    %cst_93 = arith.constant dense<0.000000e+00> : vector<256x32xf32>
    %93 = tpu.matmul %91, %92, %cst_93 {dimension_numbers = #tpu.dot_dimension_numbers<[1], [0], [0], [1], [0, 0, 1, 1], [], []>} : vector<256x12xf32>, vector<12x32xf32>, vector<256x32xf32> -> vector<256x32xf32>
    %c0_94 = arith.constant 0 : index
    %c0_95 = arith.constant 0 : index
    %94 = vector.load %arg11[%c0_94, %c0_95] : memref<1x32xf32, #tpu.memory_space<vmem>>, vector<1x32xf32>
    %95 = vector.broadcast %94 : vector<1x32xf32> to vector<256x32xf32>
    %96 = arith.mulf %93, %95 : vector<256x32xf32>
    %c0_96 = arith.constant 0 : index
    %c0_97 = arith.constant 0 : index
    %97 = vector.load %arg12[%c0_96, %c0_97] : memref<1x32xf32, #tpu.memory_space<vmem>>, vector<1x32xf32>
    %98 = vector.broadcast %97 : vector<1x32xf32> to vector<256x32xf32>
    %99 = arith.addf %96, %98 : vector<256x32xf32>
    %cst_98 = arith.constant 0.000000e+00 : f32
    %100 = vector.broadcast %cst_98 : f32 to vector<256x32xf32>
    %101 = arith.maximumf %99, %100 : vector<256x32xf32>
    %102 = vector.shape_cast %101 : vector<256x32xf32> to vector<16x16x32xf32>
    %c1_99 = arith.constant 1 : index
    %c1_100 = arith.constant 1 : index
    %c0_101 = arith.constant 0 : index
    %103 = vector.load %arg16[%c1_99, %c1_100, %c0_101] : memref<18x18x32xf32, #tpu.memory_space<vmem>>, vector<16x16x32xf32>
    tpu.vector_store %arg16[%c1_99, %c1_100, %c0_101], %102 {strides = array<i32>} : memref<18x18x32xf32, #tpu.memory_space<vmem>>, vector<16x16x32xf32>,
    %cst_102 = arith.constant 0.000000e+00 : f32
    %104 = vector.broadcast %cst_102 : f32 to vector<256x8xf32>
    %c0_103 = arith.constant 0 : index
    %c0_104 = arith.constant 0 : index
    %c0_105 = arith.constant 0 : index
    %105 = vector.load %arg16[%c0_103, %c0_104, %c0_105] : memref<18x18x32xf32, #tpu.memory_space<vmem>>, vector<16x16x32xf32>
    %106 = vector.shape_cast %105 : vector<16x16x32xf32> to vector<256x32xf32>
    %c0_106 = arith.constant 0 : index
    %c0_107 = arith.constant 0 : index
    %c0_108 = arith.constant 0 : index
    %107 = vector.load %arg13[%c0_106, %c0_107, %c0_108] : memref<9x32x8xf32, #tpu.memory_space<vmem>>, vector<1x32x8xf32>
    %108 = vector.shape_cast %107 : vector<1x32x8xf32> to vector<32x8xf32>
    %cst_109 = arith.constant dense<0.000000e+00> : vector<256x8xf32>
    %109 = tpu.matmul %106, %108, %cst_109 {dimension_numbers = #tpu.dot_dimension_numbers<[1], [0], [0], [1], [0, 0, 1, 1], [], []>} : vector<256x32xf32>, vector<32x8xf32>, vector<256x8xf32> -> vector<256x8xf32>
    %110 = arith.addf %104, %109 : vector<256x8xf32>
    %c0_110 = arith.constant 0 : index
    %c1_111 = arith.constant 1 : index
    %c0_112 = arith.constant 0 : index
    %111 = vector.load %arg16[%c0_110, %c1_111, %c0_112] : memref<18x18x32xf32, #tpu.memory_space<vmem>>, vector<16x16x32xf32>
    %112 = vector.shape_cast %111 : vector<16x16x32xf32> to vector<256x32xf32>
    %c1_113 = arith.constant 1 : index
    %c0_114 = arith.constant 0 : index
    %c0_115 = arith.constant 0 : index
    %113 = vector.load %arg13[%c1_113, %c0_114, %c0_115] : memref<9x32x8xf32, #tpu.memory_space<vmem>>, vector<1x32x8xf32>
    %114 = vector.shape_cast %113 : vector<1x32x8xf32> to vector<32x8xf32>
    %cst_116 = arith.constant dense<0.000000e+00> : vector<256x8xf32>
    %115 = tpu.matmul %112, %114, %cst_116 {dimension_numbers = #tpu.dot_dimension_numbers<[1], [0], [0], [1], [0, 0, 1, 1], [], []>} : vector<256x32xf32>, vector<32x8xf32>, vector<256x8xf32> -> vector<256x8xf32>
    %116 = arith.addf %110, %115 : vector<256x8xf32>
    %c0_117 = arith.constant 0 : index
    %c2_118 = arith.constant 2 : index
    %c0_119 = arith.constant 0 : index
    %117 = vector.load %arg16[%c0_117, %c2_118, %c0_119] : memref<18x18x32xf32, #tpu.memory_space<vmem>>, vector<16x16x32xf32>
    %118 = vector.shape_cast %117 : vector<16x16x32xf32> to vector<256x32xf32>
    %c2_120 = arith.constant 2 : index
    %c0_121 = arith.constant 0 : index
    %c0_122 = arith.constant 0 : index
    %119 = vector.load %arg13[%c2_120, %c0_121, %c0_122] : memref<9x32x8xf32, #tpu.memory_space<vmem>>, vector<1x32x8xf32>
    %120 = vector.shape_cast %119 : vector<1x32x8xf32> to vector<32x8xf32>
    %cst_123 = arith.constant dense<0.000000e+00> : vector<256x8xf32>
    %121 = tpu.matmul %118, %120, %cst_123 {dimension_numbers = #tpu.dot_dimension_numbers<[1], [0], [0], [1], [0, 0, 1, 1], [], []>} : vector<256x32xf32>, vector<32x8xf32>, vector<256x8xf32> -> vector<256x8xf32>
    %122 = arith.addf %116, %121 : vector<256x8xf32>
    %c1_124 = arith.constant 1 : index
    %c0_125 = arith.constant 0 : index
    %c0_126 = arith.constant 0 : index
    %123 = vector.load %arg16[%c1_124, %c0_125, %c0_126] : memref<18x18x32xf32, #tpu.memory_space<vmem>>, vector<16x16x32xf32>
    %124 = vector.shape_cast %123 : vector<16x16x32xf32> to vector<256x32xf32>
    %c3_127 = arith.constant 3 : index
    %c0_128 = arith.constant 0 : index
    %c0_129 = arith.constant 0 : index
    %125 = vector.load %arg13[%c3_127, %c0_128, %c0_129] : memref<9x32x8xf32, #tpu.memory_space<vmem>>, vector<1x32x8xf32>
    %126 = vector.shape_cast %125 : vector<1x32x8xf32> to vector<32x8xf32>
    %cst_130 = arith.constant dense<0.000000e+00> : vector<256x8xf32>
    %127 = tpu.matmul %124, %126, %cst_130 {dimension_numbers = #tpu.dot_dimension_numbers<[1], [0], [0], [1], [0, 0, 1, 1], [], []>} : vector<256x32xf32>, vector<32x8xf32>, vector<256x8xf32> -> vector<256x8xf32>
    %128 = arith.addf %122, %127 : vector<256x8xf32>
    %c1_131 = arith.constant 1 : index
    %c1_132 = arith.constant 1 : index
    %c0_133 = arith.constant 0 : index
    %129 = vector.load %arg16[%c1_131, %c1_132, %c0_133] : memref<18x18x32xf32, #tpu.memory_space<vmem>>, vector<16x16x32xf32>
    %130 = vector.shape_cast %129 : vector<16x16x32xf32> to vector<256x32xf32>
    %c4_134 = arith.constant 4 : index
    %c0_135 = arith.constant 0 : index
    %c0_136 = arith.constant 0 : index
    %131 = vector.load %arg13[%c4_134, %c0_135, %c0_136] : memref<9x32x8xf32, #tpu.memory_space<vmem>>, vector<1x32x8xf32>
    %132 = vector.shape_cast %131 : vector<1x32x8xf32> to vector<32x8xf32>
    %cst_137 = arith.constant dense<0.000000e+00> : vector<256x8xf32>
    %133 = tpu.matmul %130, %132, %cst_137 {dimension_numbers = #tpu.dot_dimension_numbers<[1], [0], [0], [1], [0, 0, 1, 1], [], []>} : vector<256x32xf32>, vector<32x8xf32>, vector<256x8xf32> -> vector<256x8xf32>
    %134 = arith.addf %128, %133 : vector<256x8xf32>
    %c1_138 = arith.constant 1 : index
    %c2_139 = arith.constant 2 : index
    %c0_140 = arith.constant 0 : index
    %135 = vector.load %arg16[%c1_138, %c2_139, %c0_140] : memref<18x18x32xf32, #tpu.memory_space<vmem>>, vector<16x16x32xf32>
    %136 = vector.shape_cast %135 : vector<16x16x32xf32> to vector<256x32xf32>
    %c5_141 = arith.constant 5 : index
    %c0_142 = arith.constant 0 : index
    %c0_143 = arith.constant 0 : index
    %137 = vector.load %arg13[%c5_141, %c0_142, %c0_143] : memref<9x32x8xf32, #tpu.memory_space<vmem>>, vector<1x32x8xf32>
    %138 = vector.shape_cast %137 : vector<1x32x8xf32> to vector<32x8xf32>
    %cst_144 = arith.constant dense<0.000000e+00> : vector<256x8xf32>
    %139 = tpu.matmul %136, %138, %cst_144 {dimension_numbers = #tpu.dot_dimension_numbers<[1], [0], [0], [1], [0, 0, 1, 1], [], []>} : vector<256x32xf32>, vector<32x8xf32>, vector<256x8xf32> -> vector<256x8xf32>
    %140 = arith.addf %134, %139 : vector<256x8xf32>
    %c2_145 = arith.constant 2 : index
    %c0_146 = arith.constant 0 : index
    %c0_147 = arith.constant 0 : index
    %141 = vector.load %arg16[%c2_145, %c0_146, %c0_147] : memref<18x18x32xf32, #tpu.memory_space<vmem>>, vector<16x16x32xf32>
    %142 = vector.shape_cast %141 : vector<16x16x32xf32> to vector<256x32xf32>
    %c6_148 = arith.constant 6 : index
    %c0_149 = arith.constant 0 : index
    %c0_150 = arith.constant 0 : index
    %143 = vector.load %arg13[%c6_148, %c0_149, %c0_150] : memref<9x32x8xf32, #tpu.memory_space<vmem>>, vector<1x32x8xf32>
    %144 = vector.shape_cast %143 : vector<1x32x8xf32> to vector<32x8xf32>
    %cst_151 = arith.constant dense<0.000000e+00> : vector<256x8xf32>
    %145 = tpu.matmul %142, %144, %cst_151 {dimension_numbers = #tpu.dot_dimension_numbers<[1], [0], [0], [1], [0, 0, 1, 1], [], []>} : vector<256x32xf32>, vector<32x8xf32>, vector<256x8xf32> -> vector<256x8xf32>
    %146 = arith.addf %140, %145 : vector<256x8xf32>
    %c2_152 = arith.constant 2 : index
    %c1_153 = arith.constant 1 : index
    %c0_154 = arith.constant 0 : index
    %147 = vector.load %arg16[%c2_152, %c1_153, %c0_154] : memref<18x18x32xf32, #tpu.memory_space<vmem>>, vector<16x16x32xf32>
    %148 = vector.shape_cast %147 : vector<16x16x32xf32> to vector<256x32xf32>
    %c7_155 = arith.constant 7 : index
    %c0_156 = arith.constant 0 : index
    %c0_157 = arith.constant 0 : index
    %149 = vector.load %arg13[%c7_155, %c0_156, %c0_157] : memref<9x32x8xf32, #tpu.memory_space<vmem>>, vector<1x32x8xf32>
    %150 = vector.shape_cast %149 : vector<1x32x8xf32> to vector<32x8xf32>
    %cst_158 = arith.constant dense<0.000000e+00> : vector<256x8xf32>
    %151 = tpu.matmul %148, %150, %cst_158 {dimension_numbers = #tpu.dot_dimension_numbers<[1], [0], [0], [1], [0, 0, 1, 1], [], []>} : vector<256x32xf32>, vector<32x8xf32>, vector<256x8xf32> -> vector<256x8xf32>
    %152 = arith.addf %146, %151 : vector<256x8xf32>
    %c2_159 = arith.constant 2 : index
    %c2_160 = arith.constant 2 : index
    %c0_161 = arith.constant 0 : index
    %153 = vector.load %arg16[%c2_159, %c2_160, %c0_161] : memref<18x18x32xf32, #tpu.memory_space<vmem>>, vector<16x16x32xf32>
    %154 = vector.shape_cast %153 : vector<16x16x32xf32> to vector<256x32xf32>
    %c8_162 = arith.constant 8 : index
    %c0_163 = arith.constant 0 : index
    %c0_164 = arith.constant 0 : index
    %155 = vector.load %arg13[%c8_162, %c0_163, %c0_164] : memref<9x32x8xf32, #tpu.memory_space<vmem>>, vector<1x32x8xf32>
    %156 = vector.shape_cast %155 : vector<1x32x8xf32> to vector<32x8xf32>
    %cst_165 = arith.constant dense<0.000000e+00> : vector<256x8xf32>
    %157 = tpu.matmul %154, %156, %cst_165 {dimension_numbers = #tpu.dot_dimension_numbers<[1], [0], [0], [1], [0, 0, 1, 1], [], []>} : vector<256x32xf32>, vector<32x8xf32>, vector<256x8xf32> -> vector<256x8xf32>
    %158 = arith.addf %152, %157 : vector<256x8xf32>
    %c0_166 = arith.constant 0 : index
    %c12 = arith.constant 12 : index
    %159 = vector.load %arg15[%c0_166, %c12] : memref<256x20xf32, #tpu.memory_space<vmem>>, vector<256x8xf32>
    tpu.vector_store %arg15[%c0_166, %c12], %158 {strides = array<i32>} : memref<256x20xf32, #tpu.memory_space<vmem>>, vector<256x8xf32>,
    %c0_167 = arith.constant 0 : index
    %c0_168 = arith.constant 0 : index
    %160 = vector.load %arg15[%c0_167, %c0_168] : memref<256x20xf32, #tpu.memory_space<vmem>>, vector<256x20xf32>
    %161 = vector.shape_cast %160 : vector<256x20xf32> to vector<16x16x20xf32>
    %c0_169 = arith.constant 0 : index
    %c0_170 = arith.constant 0 : index
    %c0_171 = arith.constant 0 : index
    %c0_172 = arith.constant 0 : index
    %162 = vector.load %arg14[%c0_169, %c0_170, %c0_171, %c0_172] : memref<1x16x16x20xf32, #tpu.memory_space<vmem>>, vector<1x16x16x20xf32>
    %163 = vector.shape_cast %162 : vector<1x16x16x20xf32> to vector<16x16x20xf32>
    %164 = vector.shape_cast %161 : vector<16x16x20xf32> to vector<1x16x16x20xf32>
    tpu.vector_store %arg14[%c0_169, %c0_170, %c0_171, %c0_172], %164 {strides = array<i32>} : memref<1x16x16x20xf32, #tpu.memory_space<vmem>>, vector<1x16x16x20xf32>,
    return
  }
  func.func @transform_0(%arg0: i32) -> (i32, i32, i32, i32) {
    %c0_i32 = arith.constant 0 : i32
    %c0_i32_0 = arith.constant 0 : i32
    %c0_i32_1 = arith.constant 0 : i32
    %c0_i32_2 = arith.constant 0 : i32
    return %arg0, %c0_i32, %c0_i32_0, %c0_i32_1 : i32, i32, i32, i32
  }
  func.func @transform_1(%arg0: i32) -> (i32, i32) {
    %c0_i32 = arith.constant 0 : i32
    %c0_i32_0 = arith.constant 0 : i32
    %c0_i32_1 = arith.constant 0 : i32
    return %c0_i32, %c0_i32_0 : i32, i32
  }
  func.func @transform_2(%arg0: i32) -> (i32, i32) {
    %c0_i32 = arith.constant 0 : i32
    %c0_i32_0 = arith.constant 0 : i32
    %c0_i32_1 = arith.constant 0 : i32
    return %c0_i32, %c0_i32_0 : i32, i32
  }
  func.func @transform_3(%arg0: i32) -> (i32, i32) {
    %c0_i32 = arith.constant 0 : i32
    %c0_i32_0 = arith.constant 0 : i32
    %c0_i32_1 = arith.constant 0 : i32
    return %c0_i32, %c0_i32_0 : i32, i32
  }
  func.func @transform_4(%arg0: i32) -> (i32, i32) {
    %c0_i32 = arith.constant 0 : i32
    %c0_i32_0 = arith.constant 0 : i32
    %c0_i32_1 = arith.constant 0 : i32
    return %c0_i32, %c0_i32_0 : i32, i32
  }
  func.func @transform_5(%arg0: i32) -> (i32, i32) {
    %c0_i32 = arith.constant 0 : i32
    %c0_i32_0 = arith.constant 0 : i32
    %c0_i32_1 = arith.constant 0 : i32
    return %c0_i32, %c0_i32_0 : i32, i32
  }
  func.func @transform_6(%arg0: i32) -> (i32, i32, i32) {
    %c0_i32 = arith.constant 0 : i32
    %c0_i32_0 = arith.constant 0 : i32
    %c0_i32_1 = arith.constant 0 : i32
    %c0_i32_2 = arith.constant 0 : i32
    return %c0_i32, %c0_i32_0, %c0_i32_1 : i32, i32, i32
  }
  func.func @transform_7(%arg0: i32) -> (i32, i32) {
    %c0_i32 = arith.constant 0 : i32
    %c0_i32_0 = arith.constant 0 : i32
    %c0_i32_1 = arith.constant 0 : i32
    return %c0_i32, %c0_i32_0 : i32, i32
  }
  func.func @transform_8(%arg0: i32) -> (i32, i32) {
    %c0_i32 = arith.constant 0 : i32
    %c0_i32_0 = arith.constant 0 : i32
    %c0_i32_1 = arith.constant 0 : i32
    return %c0_i32, %c0_i32_0 : i32, i32
  }
  func.func @transform_9(%arg0: i32) -> (i32, i32) {
    %c0_i32 = arith.constant 0 : i32
    %c0_i32_0 = arith.constant 0 : i32
    %c0_i32_1 = arith.constant 0 : i32
    return %c0_i32, %c0_i32_0 : i32, i32
  }
  func.func @transform_10(%arg0: i32) -> (i32, i32) {
    %c0_i32 = arith.constant 0 : i32
    %c0_i32_0 = arith.constant 0 : i32
    %c0_i32_1 = arith.constant 0 : i32
    return %c0_i32, %c0_i32_0 : i32, i32
  }
  func.func @transform_11(%arg0: i32) -> (i32, i32) {
    %c0_i32 = arith.constant 0 : i32
    %c0_i32_0 = arith.constant 0 : i32
    %c0_i32_1 = arith.constant 0 : i32
    return %c0_i32, %c0_i32_0 : i32, i32
  }
  func.func @transform_12(%arg0: i32) -> (i32, i32, i32) {
    %c0_i32 = arith.constant 0 : i32
    %c0_i32_0 = arith.constant 0 : i32
    %c0_i32_1 = arith.constant 0 : i32
    %c0_i32_2 = arith.constant 0 : i32
    return %c0_i32, %c0_i32_0, %c0_i32_1 : i32, i32, i32
  }
  func.func @transform_13(%arg0: i32) -> (i32, i32, i32, i32) {
    %c0_i32 = arith.constant 0 : i32
    %c0_i32_0 = arith.constant 0 : i32
    %c0_i32_1 = arith.constant 0 : i32
    %c0_i32_2 = arith.constant 0 : i32
    return %arg0, %c0_i32, %c0_i32_0, %c0_i32_1 : i32, i32, i32, i32
  }
}

module attributes {stable_mosaic.version = 11 : i64} {
  func.func @kernel(%arg0: i32, %arg1: memref<1x16x16x20xf32, #tpu.memory_space<vmem>>, %arg2: memref<1x20xf32, #tpu.memory_space<vmem>>, %arg3: memref<1x20xf32, #tpu.memory_space<vmem>>, %arg4: memref<20x10xf32, #tpu.memory_space<vmem>>, %arg5: memref<1x8x8x10xf32, #tpu.memory_space<vmem>>) attributes {dimension_semantics = [#tpu.dimension_semantics<parallel>], iteration_bounds = array<i64: 2>, scalar_prefetch = 0 : i64, scratch_operands = 0 : i64, tpu.core_type = #tpu.core_type<tc>, window_params = [{transform_indices = @transform_0, window_bounds = array<i64: 1, 16, 16, 20>}, {pipeline_mode = #tpu.pipeline_mode<synchronous>, transform_indices = @transform_1, window_bounds = array<i64: 1, 20>}, {pipeline_mode = #tpu.pipeline_mode<synchronous>, transform_indices = @transform_2, window_bounds = array<i64: 1, 20>}, {pipeline_mode = #tpu.pipeline_mode<synchronous>, transform_indices = @transform_3, window_bounds = array<i64: 20, 10>}, {transform_indices = @transform_4, window_bounds = array<i64: 1, 8, 8, 10>}]} {
    %c0 = arith.constant 0 : index
    %c0_0 = arith.constant 0 : index
    %c0_1 = arith.constant 0 : index
    %c0_2 = arith.constant 0 : index
    %0 = vector.load %arg1[%c0, %c0_0, %c0_1, %c0_2] : memref<1x16x16x20xf32, #tpu.memory_space<vmem>>, vector<1x16x16x20xf32>
    %1 = vector.shape_cast %0 : vector<1x16x16x20xf32> to vector<16x16x20xf32>
    %2 = vector.shape_cast %1 : vector<16x16x20xf32> to vector<256x20xf32>
    %c0_3 = arith.constant 0 : index
    %c0_4 = arith.constant 0 : index
    %3 = vector.load %arg2[%c0_3, %c0_4] : memref<1x20xf32, #tpu.memory_space<vmem>>, vector<1x20xf32>
    %4 = vector.broadcast %3 : vector<1x20xf32> to vector<256x20xf32>
    %5 = arith.mulf %2, %4 : vector<256x20xf32>
    %c0_5 = arith.constant 0 : index
    %c0_6 = arith.constant 0 : index
    %6 = vector.load %arg3[%c0_5, %c0_6] : memref<1x20xf32, #tpu.memory_space<vmem>>, vector<1x20xf32>
    %7 = vector.broadcast %6 : vector<1x20xf32> to vector<256x20xf32>
    %8 = arith.addf %5, %7 : vector<256x20xf32>
    %cst = arith.constant 0.000000e+00 : f32
    %9 = vector.broadcast %cst : f32 to vector<256x20xf32>
    %10 = arith.maximumf %8, %9 : vector<256x20xf32>
    %11 = vector.shape_cast %10 : vector<256x20xf32> to vector<8x2x16x20xf32>
    %12 = vector.extract_strided_slice %11 {offsets = [0, 0, 0, 0], sizes = [8, 1, 16, 20], strides = [1, 1, 1, 1]} : vector<8x2x16x20xf32> to vector<8x1x16x20xf32>
    %13 = vector.shape_cast %12 : vector<8x1x16x20xf32> to vector<8x16x20xf32>
    %14 = vector.extract_strided_slice %11 {offsets = [0, 1, 0, 0], sizes = [8, 1, 16, 20], strides = [1, 1, 1, 1]} : vector<8x2x16x20xf32> to vector<8x1x16x20xf32>
    %15 = vector.shape_cast %14 : vector<8x1x16x20xf32> to vector<8x16x20xf32>
    %16 = arith.addf %13, %15 : vector<8x16x20xf32>
    %17 = vector.shape_cast %16 : vector<8x16x20xf32> to vector<8x8x2x20xf32>
    %cst_7 = arith.constant dense<0.000000e+00> : vector<8x8x20xf32>
    %18 = vector.multi_reduction <add>, %17, %cst_7 [2] : vector<8x8x2x20xf32> to vector<8x8x20xf32>
    %cst_8 = arith.constant 2.500000e-01 : f32
    %19 = vector.broadcast %cst_8 : f32 to vector<8x8x20xf32>
    %20 = arith.mulf %18, %19 : vector<8x8x20xf32>
    %21 = vector.shape_cast %20 : vector<8x8x20xf32> to vector<64x20xf32>
    %c0_9 = arith.constant 0 : index
    %c0_10 = arith.constant 0 : index
    %22 = vector.load %arg4[%c0_9, %c0_10] : memref<20x10xf32, #tpu.memory_space<vmem>>, vector<20x10xf32>
    %cst_11 = arith.constant dense<0.000000e+00> : vector<64x10xf32>
    %23 = tpu.matmul %21, %22, %cst_11 {dimension_numbers = #tpu.dot_dimension_numbers<[1], [0], [0], [1], [0, 0, 1, 1], [], []>} : vector<64x20xf32>, vector<20x10xf32>, vector<64x10xf32> -> vector<64x10xf32>
    %24 = vector.shape_cast %23 : vector<64x10xf32> to vector<8x8x10xf32>
    %c0_12 = arith.constant 0 : index
    %c0_13 = arith.constant 0 : index
    %c0_14 = arith.constant 0 : index
    %c0_15 = arith.constant 0 : index
    %25 = vector.load %arg5[%c0_12, %c0_13, %c0_14, %c0_15] : memref<1x8x8x10xf32, #tpu.memory_space<vmem>>, vector<1x8x8x10xf32>
    %26 = vector.shape_cast %25 : vector<1x8x8x10xf32> to vector<8x8x10xf32>
    %27 = vector.shape_cast %24 : vector<8x8x10xf32> to vector<1x8x8x10xf32>
    tpu.vector_store %arg5[%c0_12, %c0_13, %c0_14, %c0_15], %27 {strides = array<i32>} : memref<1x8x8x10xf32, #tpu.memory_space<vmem>>, vector<1x8x8x10xf32>,
    return
  }
  func.func @transform_0(%arg0: i32) -> (i32, i32, i32, i32) {
    %c0_i32 = arith.constant 0 : i32
    %c0_i32_0 = arith.constant 0 : i32
    %c0_i32_1 = arith.constant 0 : i32
    %c0_i32_2 = arith.constant 0 : i32
    return %arg0, %c0_i32, %c0_i32_0, %c0_i32_1 : i32, i32, i32, i32
  }
  func.func @transform_1(%arg0: i32) -> (i32, i32) {
    %c0_i32 = arith.constant 0 : i32
    %c0_i32_0 = arith.constant 0 : i32
    %c0_i32_1 = arith.constant 0 : i32
    return %c0_i32, %c0_i32_0 : i32, i32
  }
  func.func @transform_2(%arg0: i32) -> (i32, i32) {
    %c0_i32 = arith.constant 0 : i32
    %c0_i32_0 = arith.constant 0 : i32
    %c0_i32_1 = arith.constant 0 : i32
    return %c0_i32, %c0_i32_0 : i32, i32
  }
  func.func @transform_3(%arg0: i32) -> (i32, i32) {
    %c0_i32 = arith.constant 0 : i32
    %c0_i32_0 = arith.constant 0 : i32
    %c0_i32_1 = arith.constant 0 : i32
    return %c0_i32, %c0_i32_0 : i32, i32
  }
  func.func @transform_4(%arg0: i32) -> (i32, i32, i32, i32) {
    %c0_i32 = arith.constant 0 : i32
    %c0_i32_0 = arith.constant 0 : i32
    %c0_i32_1 = arith.constant 0 : i32
    %c0_i32_2 = arith.constant 0 : i32
    return %arg0, %c0_i32, %c0_i32_0, %c0_i32_1 : i32, i32, i32, i32
  }
}

module attributes {stable_mosaic.version = 11 : i64} {
  func.func @kernel(%arg0: i32, %arg1: memref<2x8x8x26xf32, #tpu.memory_space<vmem>>, %arg2: memref<26x10xf32, #tpu.memory_space<vmem>>, %arg3: memref<1x10xf32, #tpu.memory_space<vmem>>, %arg4: memref<2x10xf32, #tpu.memory_space<vmem>>) attributes {dimension_semantics = [#tpu.dimension_semantics<arbitrary>], iteration_bounds = array<i64: 1>, scalar_prefetch = 0 : i64, scratch_operands = 0 : i64, tpu.core_type = #tpu.core_type<tc>, window_params = [{pipeline_mode = #tpu.pipeline_mode<synchronous>, transform_indices = @transform_0, window_bounds = array<i64: 2, 8, 8, 26>}, {pipeline_mode = #tpu.pipeline_mode<synchronous>, transform_indices = @transform_1, window_bounds = array<i64: 26, 10>}, {pipeline_mode = #tpu.pipeline_mode<synchronous>, transform_indices = @transform_2, window_bounds = array<i64: 1, 10>}, {pipeline_mode = #tpu.pipeline_mode<synchronous>, transform_indices = @transform_3, window_bounds = array<i64: 2, 10>}]} {
    %c0 = arith.constant 0 : index
    %c0_0 = arith.constant 0 : index
    %c0_1 = arith.constant 0 : index
    %c0_2 = arith.constant 0 : index
    %0 = vector.load %arg1[%c0, %c0_0, %c0_1, %c0_2] : memref<2x8x8x26xf32, #tpu.memory_space<vmem>>, vector<1x8x8x26xf32>
    %1 = vector.shape_cast %0 : vector<1x8x8x26xf32> to vector<8x8x26xf32>
    %2 = vector.shape_cast %1 : vector<8x8x26xf32> to vector<64x26xf32>
    %cst = arith.constant 0.000000e+00 : f32
    %3 = vector.broadcast %cst : f32 to vector<64x26xf32>
    %4 = arith.maximumf %2, %3 : vector<64x26xf32>
    %cst_3 = arith.constant dense<0.000000e+00> : vector<26xf32>
    %5 = vector.multi_reduction <add>, %4, %cst_3 [0] : vector<64x26xf32> to vector<26xf32>
    %6 = vector.shape_cast %5 : vector<26xf32> to vector<1x26xf32>
    %cst_4 = arith.constant 1.562500e-02 : f32
    %7 = vector.broadcast %cst_4 : f32 to vector<1x26xf32>
    %8 = arith.mulf %6, %7 : vector<1x26xf32>
    %c1 = arith.constant 1 : index
    %c0_5 = arith.constant 0 : index
    %c0_6 = arith.constant 0 : index
    %c0_7 = arith.constant 0 : index
    %9 = vector.load %arg1[%c1, %c0_5, %c0_6, %c0_7] : memref<2x8x8x26xf32, #tpu.memory_space<vmem>>, vector<1x8x8x26xf32>
    %10 = vector.shape_cast %9 : vector<1x8x8x26xf32> to vector<8x8x26xf32>
    %11 = vector.shape_cast %10 : vector<8x8x26xf32> to vector<64x26xf32>
    %cst_8 = arith.constant 0.000000e+00 : f32
    %12 = vector.broadcast %cst_8 : f32 to vector<64x26xf32>
    %13 = arith.maximumf %11, %12 : vector<64x26xf32>
    %cst_9 = arith.constant dense<0.000000e+00> : vector<26xf32>
    %14 = vector.multi_reduction <add>, %13, %cst_9 [0] : vector<64x26xf32> to vector<26xf32>
    %15 = vector.shape_cast %14 : vector<26xf32> to vector<1x26xf32>
    %cst_10 = arith.constant 1.562500e-02 : f32
    %16 = vector.broadcast %cst_10 : f32 to vector<1x26xf32>
    %17 = arith.mulf %15, %16 : vector<1x26xf32>
    %18 = tpu.concatenate %8, %17 in 0 : vector<1x26xf32>, vector<1x26xf32> -> vector<2x26xf32>
    %c0_11 = arith.constant 0 : index
    %c0_12 = arith.constant 0 : index
    %19 = vector.load %arg2[%c0_11, %c0_12] : memref<26x10xf32, #tpu.memory_space<vmem>>, vector<26x10xf32>
    %cst_13 = arith.constant dense<0.000000e+00> : vector<2x10xf32>
    %20 = tpu.matmul %18, %19, %cst_13 {dimension_numbers = #tpu.dot_dimension_numbers<[1], [0], [0], [1], [0, 0, 1, 1], [], []>} : vector<2x26xf32>, vector<26x10xf32>, vector<2x10xf32> -> vector<2x10xf32>
    %c0_14 = arith.constant 0 : index
    %c0_15 = arith.constant 0 : index
    %21 = vector.load %arg3[%c0_14, %c0_15] : memref<1x10xf32, #tpu.memory_space<vmem>>, vector<1x10xf32>
    %22 = vector.broadcast %21 : vector<1x10xf32> to vector<2x10xf32>
    %23 = arith.addf %20, %22 : vector<2x10xf32>
    %c0_16 = arith.constant 0 : index
    %c0_17 = arith.constant 0 : index
    %24 = vector.load %arg4[%c0_16, %c0_17] : memref<2x10xf32, #tpu.memory_space<vmem>>, vector<2x10xf32>
    tpu.vector_store %arg4[%c0_16, %c0_17], %23 {strides = array<i32>} : memref<2x10xf32, #tpu.memory_space<vmem>>, vector<2x10xf32>,
    return
  }
  func.func @transform_0(%arg0: i32) -> (i32, i32, i32, i32) {
    %c0_i32 = arith.constant 0 : i32
    %c0_i32_0 = arith.constant 0 : i32
    %c0_i32_1 = arith.constant 0 : i32
    %c0_i32_2 = arith.constant 0 : i32
    %c0_i32_3 = arith.constant 0 : i32
    return %c0_i32, %c0_i32_0, %c0_i32_1, %c0_i32_2 : i32, i32, i32, i32
  }
  func.func @transform_1(%arg0: i32) -> (i32, i32) {
    %c0_i32 = arith.constant 0 : i32
    %c0_i32_0 = arith.constant 0 : i32
    %c0_i32_1 = arith.constant 0 : i32
    return %c0_i32, %c0_i32_0 : i32, i32
  }
  func.func @transform_2(%arg0: i32) -> (i32, i32) {
    %c0_i32 = arith.constant 0 : i32
    %c0_i32_0 = arith.constant 0 : i32
    %c0_i32_1 = arith.constant 0 : i32
    return %c0_i32, %c0_i32_0 : i32, i32
  }
  func.func @transform_3(%arg0: i32) -> (i32, i32) {
    %c0_i32 = arith.constant 0 : i32
    %c0_i32_0 = arith.constant 0 : i32
    %c0_i32_1 = arith.constant 0 : i32
    return %c0_i32, %c0_i32_0 : i32, i32
  }
}

</mosaic_0001>

<bundles_post_ra>
// kernel: densenet_forward.7
= control target key start
LH: loop header
LB: loop body
LE: loop exit
PB: predicated region body
PF: predicated region fallthrough
CT: control target
= control target key end

     0   :  { %vm109_vm0 = vcmask 1041408   ;;  %v251_v1 = vmov 0.0   ;;  %vm31_vm1 = vcmask 211968   ;;  %vm252_vm2 = vmmov 0   ;;  %s357_s0 = inlined_call_operand.vmem [shape: f32[2,8,8,26], index: 0, kind: input, shape index: {}]   ;;  %s358_s1 = inlined_call_operand.vmem [shape: f32[26,10], index: 1, kind: input, shape index: {}]   ;;  %s359_s2 = inlined_call_operand.vmem [shape: f32[1,10], index: 2, kind: input, shape index: {}]   ;;  %s360_s3 = inlined_call_operand.hbm [shape: f32[2,10], index: 3, kind: output, shape index: {}]  }
   0x1   :  { %v98_v0 = vld [vmem:[%s358_s1 + $0x18] sm:$0x3]  ;;  %215 = vmatprep.subr.mxu0 %v251_v1  ;;  %v97_v2 = vld [vmem:[%s358_s1 + $0x10] sm:$0xff]  ;;  %v15_v3 = vld [vmem:[%s357_s0] sm:$0xff]  ;;  %223 = vmatprep.mubr.msk.f32.mxu0 %vm252_vm2, %v251_v1 }
   0x2   :  { %v16_v4 = vld [vmem:[%s357_s0 + $0x8] sm:$0xff]  ;;  %216 = vmatpush3.msk.msra.mxu0 %vm109_vm0, %v98_v0  ;;  %v17_v5 = vld [vmem:[%s357_s0 + $0x10] sm:$0xff]  ;;  %v18_v6 = vld [vmem:[%s357_s0 + $0x18] sm:$0xff]  ;;  %v23_v8 = vmax.f32 %v15_v3, 0.0 }
   0x3   :  { %v19_v7 = vld [vmem:[%s357_s0 + $0x20] sm:$0xff]  ;;  %v24_v9 = vmax.f32 %v16_v4, 0.0  ;;  %217 = vmatprep.subr.mxu0 %v251_v1  ;;  %v96_v10 = vld [vmem:[%s358_s1 + $0x8] sm:$0xff]  ;;  %v25_v12 = vmax.f32 %v17_v5, 0.0  ;;  %v26_v13 = vmax.f32 %v18_v6, 0.0  ;;  %v21_v19 = vld [vmem:[%s357_s0 + $0x30] sm:$0xff] }
   0x4   :  { %v20_v11 = vld [vmem:[%s357_s0 + $0x28] sm:$0xff]  ;;  %218 = vmatpush3.msra.mxu0 %v97_v2  ;;  %v95_v14 = vld [vmem:[%s358_s1] sm:$0xff]  ;;  %v27_v15 = vmax.f32 %v19_v7, 0.0  ;;  %v32_v16 = vsel %vm31_vm1, %v23_v8, 0.0  ;;  %v201_v22 = vld [vmem:[%s357_s0 + $0x50] sm:$0xff]  ;;  %v29_v33 = vmax.f32 %v21_v19, 0.0 }
   0x5   :  { %v199_v17 = vld [vmem:[%s357_s0 + $0x40] sm:$0xff]  ;;  %v200_v18 = vld [vmem:[%s357_s0 + $0x48] sm:$0xff]  ;;  %219 = vmatprep.subr.mxu0 %v251_v1  ;;  %v33_v20 = vsel %vm31_vm1, %v24_v9, 0.0  ;;  %v35_v21 = vsel %vm31_vm1, %v25_v12, 0.0  ;;  %v202_v23 = vld [vmem:[%s357_s0 + $0x58] sm:$0xff]  ;;  %v28_v24 = vmax.f32 %v20_v11, 0.0 }
   0x6   :  { %220 = vmatpush3.msra.mxu0 %v96_v10  ;;  %v34_v25 = vadd.f32 %v33_v20, %v32_v16  ;;  %v37_v26 = vsel %vm31_vm1, %v26_v13, 0.0  ;;  %v203_v27 = vld [vmem:[%s357_s0 + $0x60] sm:$0xff]  ;;  %v63_v28 = vmax.f32 %v199_v17, 0.0  ;;  %v64_v29 = vmax.f32 %v200_v18, 0.0  ;;  %v22_v32 = vld [vmem:[%s357_s0 + $0x38] sm:$0xff]  ;;  %v204_v36 = vld [vmem:[%s357_s0 + $0x68] sm:$0xff] }
   0x7   :  { %221 = vmatprep.subr.mxu0 %v251_v1  ;;  %v65_v30 = vmax.f32 %v201_v22, 0.0  ;;  %v66_v31 = vmax.f32 %v202_v23, 0.0  ;;  %v39_v35 = vsel %vm31_vm1, %v27_v15, 0.0  ;;  %v67_v37 = vmax.f32 %v203_v27, 0.0 }
   0x8   :  { %222 = vmatpush3.msra.mxu0 %v95_v14  ;;  %v36_v34 = vadd.f32 %v35_v21, %v34_v25  ;;  %v71_v38 = vsel %vm31_vm1, %v63_v28, 0.0  ;;  %v72_v39 = vsel %vm31_vm1, %v64_v29, 0.0 }
   0x9   :  { %v74_v40 = vsel %vm31_vm1, %v65_v30, 0.0 }
   0xa   :  { %8 = vsyncpa [#allocation3], 0  ;;  %v38_v41 = vadd.f32 %v37_v26, %v36_v34  ;;  %v205_v42 = vld [vmem:[%s357_s0 + $0x70] sm:$0xff]  ;;  %v73_v43 = vadd.f32 %v72_v39, %v71_v38  ;;  %v30_v44 = vmax.f32 %v22_v32, 0.0  ;;  %v41_v45 = vsel %vm31_vm1, %v28_v24, 0.0  ;;  %v206_v49 = vld [vmem:[%s357_s0 + $0x78] sm:$0xff] }
   0xb   :  { %v68_v46 = vmax.f32 %v204_v36, 0.0  ;;  %v76_v47 = vsel %vm31_vm1, %v66_v31, 0.0  ;;  %v43_v51 = vsel %vm31_vm1, %v29_v33, 0.0  ;;  %v69_v52 = vmax.f32 %v205_v42, 0.0  ;;  %v207_v18 = vld [vmem:[%s359_s2] ss:$0 sm:$0xff] }
   0xc   :  { %v40_v48 = vadd.f32 %v39_v35, %v38_v41  ;;  %v75_v50 = vadd.f32 %v74_v40, %v73_v43  ;;  %v78_v53 = vsel %vm31_vm1, %v67_v37, 0.0  ;;  %v45_v56 = vsel %vm31_vm1, %v30_v44, 0.0  ;;  %s253_s25 = smov [#allocation2]  }
   0xd   :  { %v70_v57 = vmax.f32 %v206_v49, 0.0  ;;  %v80_v58 = vsel %vm31_vm1, %v68_v46, 0.0  ;;  %v82_v61 = vsel %vm31_vm1, %v69_v52, 0.0  ;;  %vm93_vm3 = vcmask 1040384   ;;  %s191_s26 = sshll.u32 %s253_s25, 4  ;;  %s192_s26 = int_to_ptr.vmem [resolvable:$true] %s191_s26 }
   0xe   :  { %v42_v54 = vadd.f32 %v41_v45, %v40_v48  ;;  %v77_v55 = vadd.f32 %v76_v47, %v75_v50  ;;  %vm183_vm4 = vcmask 74752   ;;  %s229_s27 = scalar_lea.vmem %s192_s26, 32  ;;  %p234_p1 = scmp.lt.s32.totalorder %s192_s26, %s192_s26 }
   0xf   :  { %v84_v0 = vsel %vm31_vm1, %v70_v57, 0.0  ;;  %p230_p0 = scmp.ne.s32.totalorder %s192_s26, %s229_s27  ;;  %p235_p2 = scmp.lt.s32.totalorder %s229_s27, %s229_s27 }
  0x10   :  { %v44_v59 = vadd.f32 %v43_v51, %v42_v54  ;;  %v79_v60 = vadd.f32 %v78_v53, %v77_v55 }
  0x11   :  { %p236_p3 = por %p235_p2, %p234_p1 }
  0x12   :  { %v46_v62 = vadd.f32 %v45_v56, %v44_v59  ;;  %v81_v63 = vadd.f32 %v80_v58, %v79_v60 }
  0x13   :  { %p237_p4 = pnand %p236_p3, %p230_p0 }
  0x14   :  { %v47_v1 = vrot.slane %v46_v62, 4  ;;  %v83_v2 = vadd.f32 %v82_v61, %v81_v63 }
  0x16   :  { %v48_v3 = vadd.f32 %v47_v1, %v46_v62  ;;  %v85_v4 = vadd.f32 %v84_v0, %v83_v2 }
  0x18   :  { %v49_v5 = vrot.slane %v48_v3, 2  ;;  %v86_v6 = vrot.slane %v85_v4, 4 }
  0x1a   :  { %v50_v7 = vadd.f32 %v49_v5, %v48_v3  ;;  %v87_v8 = vadd.f32 %v86_v6, %v85_v4 }
  0x1c   :  { %v51_v9 = vrot.slane %v50_v7, 1  ;;  %v88_v10 = vrot.slane %v87_v8, 2 }
  0x1e   :  { %v52_v11 = vadd.f32 %v51_v9, %v50_v7  ;;  %v89_v12 = vadd.f32 %v88_v10, %v87_v8 }
  0x20   :  { %v90_v13 = vrot.slane %v89_v12, 1  ;;  %v53_v14 = vmul.f32 0.015625, %v52_v11 }
  0x22   :  { %v91_v15 = vadd.f32 %v90_v13, %v89_v12 }
  0x24   :  { %v92_v16 = vmul.f32 0.015625, %v91_v15 }
  0x26   :  { %v94_v17 = vsel %vm93_vm3, %v53_v14, %v92_v16 }
  0x27   :  { %224 = vmatmul.mubr.msk.f32.vlgmr.msra.gmra.mxu0 %vm31_vm1, %v94_v17 }
  0xe7   :  { %v179_v19 = vpop.f32.mrf.mxu0 }
  0xe8   :  { %v180_v20 = vadd.f32 %v207_v18, %v179_v19 }
  0xe9   :  { %v225_v21 = vpop.f32.mrf.mxu0 }
  0xea   :  { %184 = vst.msk [vmem:[#allocation2] sm:$0x3] %vm183_vm4, %v180_v20 }
  0xeb   :  { %240 = shalt.err (!%p237_p4)
}
  0xec   :  { %194 = dma.vmem_to_hbm [thread:$0]  %s192_s26, 32, %s360_s3, [#allocation3]  }
  0xed   :  { %249 = dma.done.wait [#allocation3], 32  }
  0xee   :  { %250 = vsyncadd [#allocation3], 4294967264 }
  0xef   :  { %198 = vsyncpa [#allocation3], 1 }

// kernel: densenet_forward.5
= control target key start
LH: loop header
LB: loop body
LE: loop exit
PB: predicated region body
PF: predicated region fallthrough
CT: control target
= control target key end

     0   :  { %s1645_s15 = smov 0   ;;  %s2030_s0 = inlined_call_operand.vmem [shape: f32[2,16,16,20], index: 0, kind: input, shape index: {}]   ;;  %s2031_s1 = inlined_call_operand.vmem [shape: f32[1,20], index: 1, kind: input, shape index: {}]   ;;  %s2032_s2 = inlined_call_operand.vmem [shape: f32[1,20], index: 2, kind: input, shape index: {}]   ;;  %s2033_s3 = inlined_call_operand.vmem [shape: f32[20,10], index: 3, kind: input, shape index: {}]   ;;  %s2034_s4 = inlined_call_operand.vmem [shape: f32[2,8,8,10], index: 4, kind: output, shape index: {}]  }
   0x1 LB: > { %s1541_s16 = sadd.s32 4294967295, %s1617_s15   ;;  %p1545_p0 = scmp.ge.s32.totalorder %s1617_s15, 1  ;;  %s1617_s15 = sphi %s1645_s15, %s14_s15  }
   0x2   : > { %p162_p1 = scmp.lt.s32.totalorder %s1617_s15, 3 }
   0x4   : > { %p163_p2 = pnand %p1545_p0, %p162_p1 }
   0x5   : > { %p188_p3 = scmp.lt.s32.totalorder (!%p163_p2), %s1541_s16, 1 }
   0x6   : > { %166 = sbr.rel (%p163_p2) target bundleno = 408 (0x198), region = 36 }
   0xb   : > { %v1223_v0 = vld [vmem:[%s2033_s3 + $0x10] sm:$0xf]  ;;  %vm1368_vm0 = vcmask 1043456   ;;  %v1222_v1 = vld [vmem:[%s2033_s3 + $0x8] sm:$0xff]  ;;  %v376_v2 = vlaneseq  ;;  %v1221_v3 = vld [vmem:[%s2033_s3] sm:$0xff]  ;;  %s2036_s16 = smov (!%p188_p3, %s1541_s16), 1 }
   0xc   : > { %1576 = vmatprep.subr.msk.mxu0 %vm1368_vm0, %v1223_v0  ;;  %1594 = vmatprep.subr.msk.mxu1 %vm1368_vm0, %v1223_v0  ;;  %v1619_v4 = vmov 1983009808   ;;  %s1563_s23 = sshll.u32 %s2036_s16, 8  ;;  %v1668_v6 = vld [vmem:[%s2031_s1] ss:$0 sm:$0xff]  ;;  %vm708_vm1 = vcmask 156672  }
   0xd   : > { %1577 = vmatpush3.msk.msra.mxu0 %vm1368_vm0, %v1223_v0  ;;  %1597 = vmatpush3.msk.msra.mxu1 %vm1368_vm0, %v1223_v0  ;;  %v374_v5 = vunpack.c.l.s4 %v1619_v4  ;;  %v377_v8 = vshrl.u32 %v376_v2, 7  ;;  %s1673_s28 = scalar_lea.vmem %s2030_s0, %s1563_s23  ;;  %v1678_v9 = vld [vmem:[%s2032_s2] ss:$0 sm:$0xff]  ;;  %vm1288_vm2 = vcmask 1041409   ;;  %vm1290_vm3 = vcmask 1042434   ;;  %s1564_s9 = sshll.u32 %s2036_s16, 6 }
   0xe   : > { %1578 = vmatprep.subr.mxu0 %v1222_v1  ;;  %1595 = vmatprep.subr.mxu1 %v1222_v1  ;;  %v198_v10 = vld [vmem:[%s1673_s28] sm:$0xff]  ;;  %v199_v11 = vld [vmem:[%s1673_s28 + $0x8] sm:$0xff]  ;;  %v200_v12 = vld [vmem:[%s1673_s28 + $0x10] sm:$0xff]  ;;  %vm1292_vm4 = vcmask 1043459   ;;  %vm1294_vm5 = vcmask 1044484   ;;  %vm1296_vm6 = vcmask 1045509   ;;  %s197_s12 = scalar_lea.vmem %s2034_s4, %s1564_s9 }
   0xf   : > { %1579 = vmatpush3.msra.mxu0 %v1222_v1  ;;  %1598 = vmatpush3.msra.mxu1 %v1222_v1  ;;  %v375_v7 = vunpack.c.0.s8 %v374_v5  ;;  %v201_v13 = vld [vmem:[%s1673_s28 + $0x18] sm:$0xff]  ;;  %v237_v14 = vmul.f32 %v1668_v6, %v198_v10  ;;  %v238_v15 = vmul.f32 %v1668_v6, %v199_v11  ;;  %v239_v16 = vmul.f32 %v1668_v6, %v200_v12  ;;  %v214_v17 = vld [vmem:[%s1673_s28 + $0x80] sm:$0xff]  ;;  %v215_v18 = vld [vmem:[%s1673_s28 + $0x88] sm:$0xff] }
  0x10   : > { %1580 = vmatprep.subr.mxu0 %v1221_v3  ;;  %1596 = vmatprep.subr.mxu1 %v1221_v3  ;;  %v240_v19 = vmul.f32 %v1668_v6, %v201_v13  ;;  %v216_v21 = vld [vmem:[%s1673_s28 + $0x90] sm:$0xff]  ;;  %v217_v22 = vld [vmem:[%s1673_s28 + $0x98] sm:$0xff]  ;;  %v253_v23 = vmul.f32 %v1668_v6, %v214_v17  ;;  %v254_v24 = vmul.f32 %v1668_v6, %v215_v18  ;;  %v202_v33 = vld [vmem:[%s1673_s28 + $0x20] sm:$0xff]  ;;  %vm1298_vm7 = vcmask 1046534  }
  0x11   : > { %1581 = vmatpush3.msra.mxu0 %v1221_v3  ;;  %1599 = vmatpush3.msra.mxu1 %v1221_v3  ;;  %v1690_v20 = vsub.s32 %v375_v7, %v377_v8  ;;  %v276_v25 = vadd.f32 %v1678_v9, %v237_v14  ;;  %v277_v26 = vadd.f32 %v1678_v9, %v238_v15  ;;  %v203_v34 = vld [vmem:[%s1673_s28 + $0x28] sm:$0xff]  ;;  %v204_v39 = vld [vmem:[%s1673_s28 + $0x30] sm:$0xff]  ;;  %v205_v40 = vld [vmem:[%s1673_s28 + $0x38] sm:$0xff]  ;;  %vm1300_vm8 = vcmask 1047559  }
  0x12   : > { %v278_v27 = vadd.f32 %v1678_v9, %v239_v16  ;;  %v255_v28 = vmul.f32 %v1668_v6, %v216_v21  ;;  %v279_v29 = vadd.f32 %v1678_v9, %v240_v19  ;;  %v256_v30 = vmul.f32 %v1668_v6, %v217_v22 }
  0x13   : > { %v292_v31 = vadd.f32 %v1678_v9, %v253_v23  ;;  %v293_v32 = vadd.f32 %v1678_v9, %v254_v24  ;;  %v308_v35 = vmax.f32 %v276_v25, 0.0  ;;  %v309_v36 = vmax.f32 %v277_v26, 0.0 }
  0x14   : > { %v310_v37 = vmax.f32 %v278_v27, 0.0  ;;  %v294_v38 = vadd.f32 %v1678_v9, %v255_v28  ;;  %v311_v41 = vmax.f32 %v279_v29, 0.0  ;;  %v295_v42 = vadd.f32 %v1678_v9, %v256_v30 }
  0x15   : > { %v324_v43 = vmax.f32 %v292_v31, 0.0  ;;  %v325_v44 = vmax.f32 %v293_v32, 0.0  ;;  %v241_v47 = vmul.f32 %v1668_v6, %v202_v33  ;;  %v242_v48 = vmul.f32 %v1668_v6, %v203_v34 }
  0x16   : > { %v340_v45 = vadd.f32 %v310_v37, %v308_v35  ;;  %v326_v46 = vmax.f32 %v294_v38, 0.0  ;;  %v341_v49 = vadd.f32 %v311_v41, %v309_v36  ;;  %v327_v50 = vmax.f32 %v295_v42, 0.0 }
  0x17   : > { %v1713_v51 = vmul.f32 %v1668_v6, %v204_v39  ;;  %v1716_v52 = vmul.f32 %v1668_v6, %v205_v40  ;;  %v1722_v56 = vadd.f32 %v1678_v9, %v241_v47  ;;  %v1728_v60 = vadd.f32 %v1678_v9, %v242_v48 }
  0x18   : > { %v372_v53 = vcombine.high %v340_v45, %v340_v45  ;;  %v379_v54 = vrot.slane %v340_v45, %v1690_v20  ;;  %v1719_v55 = vadd.f32 %v326_v46, %v324_v43  ;;  %v389_v57 = vcombine.high %v341_v49, %v341_v49 }
  0x19   : > { %v396_v58 = vrot.slane %v341_v49, %v1690_v20  ;;  %v1725_v59 = vadd.f32 %v327_v50, %v325_v44  ;;  %vm1351_vm9 = vcmask 162816   ;;  %vm1477_vm10 = vcmask 80896  }
  0x1a   : > { %v386_v61 = vrot.slane %v372_v53, %v1690_v20  ;;  %v387_v62 = vcombine.high %v379_v54, %v379_v54  ;;  %v709_v63 = vsel %vm708_vm1, %v379_v54, 0.0  ;;  %v508_v0 = vcombine.high %v1719_v55, %v1719_v55 }
  0x1b   : > { %v403_v1 = vrot.slane %v389_v57, %v1690_v20  ;;  %v404_v2 = vcombine.high %v396_v58, %v396_v58  ;;  %v710_v3 = vrot.slane %v709_v63, 4  ;;  %v737_v4 = vsel %vm708_vm1, %v396_v58, 0.0 }
  0x1c   : > { %v388_v5 = vcombine.high %v386_v61, %v386_v61  ;;  %v716_v7 = vsel %vm708_vm1, %v387_v62, 0.0  ;;  %v723_v8 = vsel %vm708_vm1, %v386_v61, 0.0  ;;  %v738_v10 = vrot.slane %v737_v4, 4 }
  0x1d   : > { %v405_v11 = vcombine.high %v403_v1, %v403_v1  ;;  %v711_v12 = vadd.f32 %v710_v3, %v709_v63  ;;  %v717_v13 = vrot.slane %v716_v7, 4  ;;  %v724_v14 = vrot.slane %v723_v8, 4 }
  0x1e   : > { %v730_v15 = vsel %vm708_vm1, %v388_v5, 0.0  ;;  %v739_v16 = vadd.f32 %v738_v10, %v737_v4  ;;  %v744_v17 = vsel %vm708_vm1, %v404_v2, 0.0  ;;  %v751_v18 = vsel %vm708_vm1, %v403_v1, 0.0 }
  0x1f   : > { %v712_v19 = vrot.slane %v711_v12, 2  ;;  %v718_v21 = vadd.f32 %v717_v13, %v716_v7  ;;  %v725_v22 = vadd.f32 %v724_v14, %v723_v8  ;;  %v731_v23 = vrot.slane %v730_v15, 4 }
  0x20   : > { %v740_v24 = vrot.slane %v739_v16, 2  ;;  %v745_v25 = vrot.slane %v744_v17, 4  ;;  %v752_v26 = vrot.slane %v751_v18, 4  ;;  %v758_v27 = vsel %vm708_vm1, %v405_v11, 0.0 }
  0x21   : > { %v713_v28 = vadd.f32 %v712_v19, %v711_v12  ;;  %v719_v29 = vrot.slane %v718_v21, 2  ;;  %v726_v30 = vrot.slane %v725_v22, 2  ;;  %v732_v31 = vadd.f32 %v731_v23, %v730_v15 }
  0x22   : > { %v741_v32 = vadd.f32 %v740_v24, %v739_v16  ;;  %v746_v33 = vadd.f32 %v745_v25, %v744_v17  ;;  %v753_v34 = vadd.f32 %v752_v26, %v751_v18  ;;  %v759_v35 = vrot.slane %v758_v27, 4 }
  0x23   : > { %v714_v36 = vrot.slane %v713_v28, 1  ;;  %v720_v37 = vadd.f32 %v719_v29, %v718_v21  ;;  %v727_v38 = vadd.f32 %v726_v30, %v725_v22  ;;  %v733_v39 = vrot.slane %v732_v31, 2 }
  0x24   : > { %v742_v40 = vrot.slane %v741_v32, 1  ;;  %v747_v41 = vrot.slane %v746_v33, 2  ;;  %v754_v42 = vrot.slane %v753_v34, 2  ;;  %v760_v43 = vadd.f32 %v759_v35, %v758_v27 }
  0x25   : > { %v715_v44 = vadd.f32 %v714_v36, %v713_v28  ;;  %v721_v45 = vrot.slane %v720_v37, 1  ;;  %v728_v46 = vrot.slane %v727_v38, 1  ;;  %v734_v47 = vadd.f32 %v733_v39, %v732_v31 }
  0x26   : > { %v743_v48 = vadd.f32 %v742_v40, %v741_v32  ;;  %v748_v49 = vadd.f32 %v747_v41, %v746_v33  ;;  %v755_v50 = vadd.f32 %v754_v42, %v753_v34  ;;  %v761_v53 = vrot.slane %v760_v43, 2 }
  0x27   : > { %v722_v54 = vadd.f32 %v721_v45, %v720_v37  ;;  %v729_v57 = vadd.f32 %v728_v46, %v727_v38  ;;  %v735_v58 = vrot.slane %v734_v47, 1  ;;  %v1157_v61 = vmul.f32 0.25, %v715_v44 }
  0x28   : > { %v749_v62 = vrot.slane %v748_v49, 1  ;;  %v756_v63 = vrot.slane %v755_v50, 1  ;;  %v762_v1 = vadd.f32 %v761_v53, %v760_v43  ;;  %v1161_v2 = vmul.f32 0.25, %v743_v48 }
  0x29   : > { %v736_v3 = vadd.f32 %v735_v58, %v734_v47  ;;  %v1158_v4 = vmul.f32 0.25, %v722_v54  ;;  %v1159_v5 = vmul.f32 0.25, %v729_v57  ;;  %v515_v7 = vrot.slane %v1719_v55, %v1690_v20 }
  0x2a   : > { %v750_v8 = vadd.f32 %v749_v62, %v748_v49  ;;  %v757_v10 = vadd.f32 %v756_v63, %v755_v50  ;;  %v763_v11 = vrot.slane %v762_v1, 1  ;;  %v522_v12 = vrot.slane %v508_v0, %v1690_v20 }
  0x2b   : > { %v1160_v13 = vmul.f32 0.25, %v736_v3  ;;  %v1289_v14 = vsel %vm1288_vm2, %v1158_v4, %v1157_v61  ;;  %v523_v15 = vcombine.high %v515_v7, %v515_v7  ;;  %v525_v16 = vcombine.high %v1725_v59, %v1725_v59 }
  0x2c   : > { %v764_v17 = vadd.f32 %v763_v11, %v762_v1  ;;  %v1162_v18 = vmul.f32 0.25, %v750_v8  ;;  %v1163_v19 = vmul.f32 0.25, %v757_v10  ;;  %v1291_v21 = vsel %vm1290_vm3, %v1159_v5, %v1289_v14 }
  0x2d   : > { %v1293_v22 = vsel %vm1292_vm4, %v1160_v13, %v1291_v21  ;;  %v524_v23 = vcombine.high %v522_v12, %v522_v12  ;;  %v532_v24 = vrot.slane %v1725_v59, %v1690_v20  ;;  %v539_v55 = vrot.slane %v525_v16, %v1690_v20 }
  0x2e   : > { %v1164_v0 = vmul.f32 0.25, %v764_v17  ;;  %v1295_v25 = vsel %vm1294_vm5, %v1161_v2, %v1293_v22  ;;  %v933_v26 = vsel %vm708_vm1, %v515_v7, 0.0  ;;  %v940_v27 = vsel %vm708_vm1, %v523_v15, 0.0 }
  0x2f   : > { %v1297_v28 = vsel %vm1296_vm6, %v1162_v18, %v1295_v25  ;;  %v540_v29 = vcombine.high %v532_v24, %v532_v24  ;;  %v541_v30 = vcombine.high %v539_v55, %v539_v55  ;;  %v934_v31 = vrot.slane %v933_v26, 4 }
  0x30   : > { %v1299_v32 = vsel %vm1298_vm7, %v1163_v19, %v1297_v28  ;;  %v941_v33 = vrot.slane %v940_v27, 4  ;;  %v947_v34 = vsel %vm708_vm1, %v522_v12, 0.0  ;;  %v954_v59 = vsel %vm708_vm1, %v524_v23, 0.0 }
  0x31   : > { %v1301_v35 = vsel %vm1300_vm8, %v1164_v0, %v1299_v32  ;;  %v935_v36 = vadd.f32 %v934_v31, %v933_v26  ;;  %v948_v37 = vrot.slane %v947_v34, 4  ;;  %v955_v38 = vrot.slane %v954_v59, 4 }
  0x32   : > { %1582 = vmatprep.mubr.msk.f32.mxu0 %vm1351_vm9, %v1301_v35  ;;  %v942_v39 = vadd.f32 %v941_v33, %v940_v27  ;;  %v961_v40 = vsel %vm708_vm1, %v532_v24, 0.0  ;;  %v968_v41 = vsel %vm708_vm1, %v540_v29, 0.0  ;;  %v975_v42 = vsel %vm708_vm1, %v539_v55, 0.0 }
  0x33   : > { %v936_v43 = vrot.slane %v935_v36, 2  ;;  %v949_v44 = vadd.f32 %v948_v37, %v947_v34  ;;  %v956_v45 = vadd.f32 %v955_v38, %v954_v59  ;;  %v962_v46 = vrot.slane %v961_v40, 4  ;;  %v218_v38 = vld [vmem:[%s1673_s28 + $0xa0] sm:$0xff] }
  0x34   : > { %v943_v47 = vrot.slane %v942_v39, 2  ;;  %v969_v48 = vrot.slane %v968_v41, 4  ;;  %v976_v49 = vrot.slane %v975_v42, 4  ;;  %v982_v50 = vsel %vm708_vm1, %v541_v30, 0.0 }
  0x35   : > { %v937_v53 = vadd.f32 %v936_v43, %v935_v36  ;;  %v950_v54 = vrot.slane %v949_v44, 2  ;;  %v957_v57 = vrot.slane %v956_v45, 2  ;;  %v963_v58 = vadd.f32 %v962_v46, %v961_v40  ;;  %v220_v43 = vld [vmem:[%s1673_s28 + $0xb0] sm:$0xff] }
  0x36   : > { %v944_v61 = vadd.f32 %v943_v47, %v942_v39  ;;  %v970_v62 = vadd.f32 %v969_v48, %v968_v41  ;;  %v977_v63 = vadd.f32 %v976_v49, %v975_v42  ;;  %v983_v1 = vrot.slane %v982_v50, 4  ;;  %v219_v39 = vld [vmem:[%s1673_s28 + $0xa8] sm:$0xff]  ;;  %v221_v48 = vld [vmem:[%s1673_s28 + $0xb8] sm:$0xff] }
  0x37   : > { %v938_v2 = vrot.slane %v937_v53, 1  ;;  %v951_v3 = vadd.f32 %v950_v54, %v949_v44  ;;  %v958_v4 = vadd.f32 %v957_v57, %v956_v45  ;;  %v964_v5 = vrot.slane %v963_v58, 2 }
  0x38   : > { %v945_v7 = vrot.slane %v944_v61, 1  ;;  %v971_v8 = vrot.slane %v970_v62, 2  ;;  %v978_v10 = vrot.slane %v977_v63, 2  ;;  %v984_v11 = vadd.f32 %v983_v1, %v982_v50 }
  0x39   : > { %v939_v12 = vadd.f32 %v938_v2, %v937_v53  ;;  %v952_v13 = vrot.slane %v951_v3, 1  ;;  %v959_v14 = vrot.slane %v958_v4, 1  ;;  %v965_v15 = vadd.f32 %v964_v5, %v963_v58 }
  0x3a   : > { %v946_v16 = vadd.f32 %v945_v7, %v944_v61  ;;  %v972_v17 = vadd.f32 %v971_v8, %v970_v62  ;;  %v979_v18 = vadd.f32 %v978_v10, %v977_v63  ;;  %v985_v19 = vrot.slane %v984_v11, 2 }
  0x3b   : > { %v953_v21 = vadd.f32 %v952_v13, %v951_v3  ;;  %v960_v22 = vadd.f32 %v959_v14, %v958_v4  ;;  %v966_v23 = vrot.slane %v965_v15, 1  ;;  %v1189_v24 = vmul.f32 0.25, %v939_v12 }
  0x3c   : > { %v973_v55 = vrot.slane %v972_v17, 1  ;;  %v980_v0 = vrot.slane %v979_v18, 1  ;;  %v986_v25 = vadd.f32 %v985_v19, %v984_v11  ;;  %v1190_v26 = vmul.f32 0.25, %v946_v16 }
  0x3d   : > { %v967_v27 = vadd.f32 %v966_v23, %v965_v15  ;;  %v1191_v28 = vmul.f32 0.25, %v953_v21  ;;  %v1192_v29 = vmul.f32 0.25, %v960_v22  ;;  %v282_v30 = vadd.f32 %v1678_v9, %v1713_v51 }
  0x3e   : > { %v974_v31 = vadd.f32 %v973_v55, %v972_v17  ;;  %v981_v32 = vadd.f32 %v980_v0, %v979_v18  ;;  %v987_v33 = vrot.slane %v986_v25, 1  ;;  %v1323_v34 = vsel %vm1288_vm2, %v1190_v26, %v1189_v24 }
  0x3f   : > { %v1193_v59 = vmul.f32 0.25, %v967_v27  ;;  %v1324_v35 = vsel %vm1290_vm3, %v1191_v28, %v1323_v34  ;;  %v283_v36 = vadd.f32 %v1678_v9, %v1716_v52  ;;  %v312_v37 = vmax.f32 %v1722_v56, 0.0 }
  0x40   : > { %v988_v40 = vadd.f32 %v987_v33, %v986_v25  ;;  %v1194_v41 = vmul.f32 0.25, %v974_v31  ;;  %v1195_v42 = vmul.f32 0.25, %v981_v32  ;;  %v1325_v51 = vsel %vm1292_vm4, %v1192_v29, %v1324_v35 }
  0x41   : > { %v1326_v44 = vsel %vm1294_vm5, %v1193_v59, %v1325_v51  ;;  %v313_v45 = vmax.f32 %v1728_v60, 0.0  ;;  %v314_v46 = vmax.f32 %v282_v30, 0.0  ;;  %v315_v47 = vmax.f32 %v283_v36, 0.0 }
  0x42   : > { %v1196_v49 = vmul.f32 0.25, %v988_v40  ;;  %v1327_v52 = vsel %vm1296_vm6, %v1194_v41, %v1326_v44  ;;  %v257_v56 = vmul.f32 %v1668_v6, %v218_v38  ;;  %v258_v50 = vmul.f32 %v1668_v6, %v219_v39 }
  0x43   : > { %v1328_v53 = vsel %vm1298_vm7, %v1195_v42, %v1327_v52  ;;  %v342_v54 = vadd.f32 %v314_v46, %v312_v37  ;;  %v343_v57 = vadd.f32 %v315_v47, %v313_v45  ;;  %v259_v58 = vmul.f32 %v1668_v6, %v220_v43 }
  0x44   : > { %v1329_v61 = vsel %vm1300_vm8, %v1196_v49, %v1328_v53  ;;  %v260_v60 = vmul.f32 %v1668_v6, %v221_v48  ;;  %v1791_v62 = vadd.f32 %v1678_v9, %v257_v56  ;;  %v1794_v63 = vadd.f32 %v1678_v9, %v258_v50 }
  0x45   : > { %1588 = vmatprep.mubr.msk.f32.mxu1 %vm1351_vm9, %v1329_v61  ;;  %v406_v1 = vcombine.high %v342_v54, %v342_v54  ;;  %v413_v2 = vrot.slane %v342_v54, %v1690_v20  ;;  %v423_v3 = vcombine.high %v343_v57, %v343_v57  ;;  %v430_v4 = vrot.slane %v343_v57, %v1690_v20 }
  0x46   : > { %v1800_v5 = vadd.f32 %v1678_v9, %v259_v58  ;;  %v1803_v7 = vadd.f32 %v1678_v9, %v260_v60  ;;  %v328_v8 = vmax.f32 %v1791_v62, 0.0  ;;  %v329_v10 = vmax.f32 %v1794_v63, 0.0 }
  0x47   : > { %v420_v11 = vrot.slane %v406_v1, %v1690_v20  ;;  %v421_v12 = vcombine.high %v413_v2, %v413_v2  ;;  %v437_v13 = vrot.slane %v423_v3, %v1690_v20  ;;  %v438_v14 = vcombine.high %v430_v4, %v430_v4 }
  0x48   : > { %v765_v15 = vsel %vm708_vm1, %v413_v2, 0.0  ;;  %v793_v16 = vsel %vm708_vm1, %v430_v4, 0.0  ;;  %v330_v17 = vmax.f32 %v1800_v5, 0.0  ;;  %v331_v18 = vmax.f32 %v1803_v7, 0.0 }
  0x49   : > { %v422_v19 = vcombine.high %v420_v11, %v420_v11  ;;  %v439_v21 = vcombine.high %v437_v13, %v437_v13  ;;  %v766_v22 = vrot.slane %v765_v15, 4  ;;  %v772_v23 = vsel %vm708_vm1, %v421_v12, 0.0 }
  0x4a   : > { %v773_v24 = vrot.slane %v772_v23, 4  ;;  %v779_v55 = vsel %vm708_vm1, %v420_v11, 0.0  ;;  %v794_v0 = vrot.slane %v793_v16, 4  ;;  %v800_v25 = vsel %vm708_vm1, %v438_v14, 0.0 }
  0x4b   : > { %v767_v26 = vadd.f32 %v766_v22, %v765_v15  ;;  %v780_v27 = vrot.slane %v779_v55, 4  ;;  %v786_v28 = vsel %vm708_vm1, %v422_v19, 0.0  ;;  %v801_v29 = vrot.slane %v800_v25, 4 }
  0x4c   : > { %v774_v30 = vadd.f32 %v773_v24, %v772_v23  ;;  %v787_v31 = vrot.slane %v786_v28, 4  ;;  %v795_v32 = vadd.f32 %v794_v0, %v793_v16  ;;  %v807_v33 = vsel %vm708_vm1, %v437_v13, 0.0 }
  0x4d   : > { %v768_v34 = vrot.slane %v767_v26, 2  ;;  %v781_v59 = vadd.f32 %v780_v27, %v779_v55  ;;  %v802_v35 = vadd.f32 %v801_v29, %v800_v25  ;;  %v808_v36 = vrot.slane %v807_v33, 4 }
  0x4e   : > { %v775_v37 = vrot.slane %v774_v30, 2  ;;  %v788_v38 = vadd.f32 %v787_v31, %v786_v28  ;;  %v796_v39 = vrot.slane %v795_v32, 2  ;;  %v814_v40 = vsel %vm708_vm1, %v439_v21, 0.0 }
  0x4f   : > { %v769_v41 = vadd.f32 %v768_v34, %v767_v26  ;;  %v782_v42 = vrot.slane %v781_v59, 2  ;;  %v803_v51 = vrot.slane %v802_v35, 2  ;;  %v809_v43 = vadd.f32 %v808_v36, %v807_v33 }
  0x50   : > { %v776_v44 = vadd.f32 %v775_v37, %v774_v30  ;;  %v789_v45 = vrot.slane %v788_v38, 2  ;;  %v797_v46 = vadd.f32 %v796_v39, %v795_v32  ;;  %v815_v47 = vrot.slane %v814_v40, 4 }
  0x51   : > { %v770_v48 = vrot.slane %v769_v41, 1  ;;  %v783_v49 = vadd.f32 %v782_v42, %v781_v59  ;;  %v804_v52 = vadd.f32 %v803_v51, %v802_v35  ;;  %v810_v56 = vrot.slane %v809_v43, 2 }
  0x52   : > { %v777_v50 = vrot.slane %v776_v44, 1  ;;  %v790_v53 = vadd.f32 %v789_v45, %v788_v38  ;;  %v798_v54 = vrot.slane %v797_v46, 1  ;;  %v816_v57 = vadd.f32 %v815_v47, %v814_v40 }
  0x53   : > { %v771_v58 = vadd.f32 %v770_v48, %v769_v41  ;;  %v784_v61 = vrot.slane %v783_v49, 1  ;;  %v805_v60 = vrot.slane %v804_v52, 1  ;;  %v811_v1 = vadd.f32 %v810_v56, %v809_v43 }
  0x54   : > { %v778_v2 = vadd.f32 %v777_v50, %v776_v44  ;;  %v791_v3 = vrot.slane %v790_v53, 1  ;;  %v799_v4 = vadd.f32 %v798_v54, %v797_v46  ;;  %v817_v5 = vrot.slane %v816_v57, 2 }
  0x55   : > { %v785_v11 = vadd.f32 %v784_v61, %v783_v49  ;;  %v806_v12 = vadd.f32 %v805_v60, %v804_v52  ;;  %v812_v13 = vrot.slane %v811_v1, 1  ;;  %v1165_v14 = vmul.f32 0.25, %v771_v58 }
  0x56   : > { %v792_v15 = vadd.f32 %v791_v3, %v790_v53  ;;  %v818_v16 = vadd.f32 %v817_v5, %v816_v57  ;;  %v1166_v19 = vmul.f32 0.25, %v778_v2  ;;  %v1169_v21 = vmul.f32 0.25, %v799_v4 }
  0x57   : > { %v813_v22 = vadd.f32 %v812_v13, %v811_v1  ;;  %v1167_v23 = vmul.f32 0.25, %v785_v11  ;;  %v1170_v24 = vmul.f32 0.25, %v806_v12  ;;  %v350_v55 = vadd.f32 %v330_v17, %v328_v8 }
  0x58   : > { %v819_v0 = vrot.slane %v818_v16, 1  ;;  %v1168_v25 = vmul.f32 0.25, %v792_v15  ;;  %v1302_v26 = vsel %vm1288_vm2, %v1166_v19, %v1165_v14  ;;  %v351_v27 = vadd.f32 %v331_v18, %v329_v10 }
  0x59   : > { %v1171_v28 = vmul.f32 0.25, %v813_v22  ;;  %v1303_v29 = vsel %vm1290_vm3, %v1167_v23, %v1302_v26  ;;  %v542_v30 = vcombine.high %v350_v55, %v350_v55  ;;  %v549_v31 = vrot.slane %v350_v55, %v1690_v20 }
  0x5a   : > { %v820_v32 = vadd.f32 %v819_v0, %v818_v16  ;;  %v1304_v33 = vsel %vm1292_vm4, %v1168_v25, %v1303_v29  ;;  %v559_v62 = vcombine.high %v351_v27, %v351_v27  ;;  %v566_v8 = vrot.slane %v351_v27, %v1690_v20 }
  0x5b   : > { %v1305_v17 = vsel %vm1294_vm5, %v1169_v21, %v1304_v33  ;;  %v556_v34 = vrot.slane %v542_v30, %v1690_v20  ;;  %v557_v63 = vcombine.high %v549_v31, %v549_v31  ;;  %v989_v7 = vsel %vm708_vm1, %v549_v31, 0.0  ;;  %v206_v31 = vld [vmem:[%s1673_s28 + $0x40] sm:$0xff] }
  0x5c   : > { %v1172_v10 = vmul.f32 0.25, %v820_v32  ;;  %v1306_v18 = vsel %vm1296_vm6, %v1170_v24, %v1305_v17  ;;  %v573_v59 = vrot.slane %v559_v62, %v1690_v20  ;;  %v574_v35 = vcombine.high %v566_v8, %v566_v8 }
  0x5d   : > { %v1307_v36 = vsel %vm1298_vm7, %v1171_v28, %v1306_v18  ;;  %v558_v37 = vcombine.high %v556_v34, %v556_v34  ;;  %v990_v38 = vrot.slane %v989_v7, 4  ;;  %v996_v39 = vsel %vm708_vm1, %v557_v63, 0.0 }
  0x5e   : > { %v1308_v40 = vsel %vm1300_vm8, %v1172_v10, %v1307_v36  ;;  %v575_v41 = vcombine.high %v573_v59, %v573_v59  ;;  %v997_v42 = vrot.slane %v996_v39, 4  ;;  %v1003_v51 = vsel %vm708_vm1, %v556_v34, 0.0  ;;  %v207_v10 = vld [vmem:[%s1673_s28 + $0x48] sm:$0xff]  ;;  %v208_v36 = vld [vmem:[%s1673_s28 + $0x50] sm:$0xff] }
  0x5f   : > { %1583 = vmatmul.mubr.msk.f32.vlgmr.msra.gmra.mxu0 %vm1351_vm9, %v1308_v40  ;;  %v991_v43 = vadd.f32 %v990_v38, %v989_v7  ;;  %v1004_v44 = vrot.slane %v1003_v51, 4  ;;  %v1010_v45 = vsel %vm708_vm1, %v558_v37, 0.0  ;;  %v1017_v46 = vsel %vm708_vm1, %v566_v8, 0.0  ;;  %v209_v37 = vld [vmem:[%s1673_s28 + $0x58] sm:$0xff] }
  0x60   : > { %v998_v47 = vadd.f32 %v997_v42, %v996_v39  ;;  %v1011_v48 = vrot.slane %v1010_v45, 4  ;;  %v1018_v49 = vrot.slane %v1017_v46, 4  ;;  %v1024_v52 = vsel %vm708_vm1, %v574_v35, 0.0 }
  0x61   : > { %v992_v56 = vrot.slane %v991_v43, 2  ;;  %v1005_v50 = vadd.f32 %v1004_v44, %v1003_v51  ;;  %v1025_v53 = vrot.slane %v1024_v52, 4  ;;  %v1031_v54 = vsel %vm708_vm1, %v573_v59, 0.0 }
  0x62   : > { %v999_v57 = vrot.slane %v998_v47, 2  ;;  %v1012_v58 = vadd.f32 %v1011_v48, %v1010_v45  ;;  %v1019_v61 = vadd.f32 %v1018_v49, %v1017_v46  ;;  %v1032_v60 = vrot.slane %v1031_v54, 4  ;;  %v222_v46 = vld [vmem:[%s1673_s28 + $0xc0] sm:$0xff] }
  0x63   : > { %v993_v1 = vadd.f32 %v992_v56, %v991_v43  ;;  %v1006_v2 = vrot.slane %v1005_v50, 2  ;;  %v1026_v3 = vadd.f32 %v1025_v53, %v1024_v52  ;;  %v1038_v4 = vsel %vm708_vm1, %v575_v41, 0.0 }
  0x64   : > { %v1000_v5 = vadd.f32 %v999_v57, %v998_v47  ;;  %v1013_v11 = vrot.slane %v1012_v58, 2  ;;  %v1020_v12 = vrot.slane %v1019_v61, 2  ;;  %v1033_v13 = vadd.f32 %v1032_v60, %v1031_v54  ;;  %v223_v57 = vld [vmem:[%s1673_s28 + $0xc8] sm:$0xff] }
  0x65   : > { %v994_v14 = vrot.slane %v993_v1, 1  ;;  %v1007_v15 = vadd.f32 %v1006_v2, %v1005_v50  ;;  %v1027_v16 = vrot.slane %v1026_v3, 2  ;;  %v1039_v19 = vrot.slane %v1038_v4, 4  ;;  %v225_v2 = vld [vmem:[%s1673_s28 + $0xd8] sm:$0xff] }
  0x66   : > { %v1001_v21 = vrot.slane %v1000_v5, 1  ;;  %v1014_v22 = vadd.f32 %v1013_v11, %v1012_v58  ;;  %v1021_v23 = vadd.f32 %v1020_v12, %v1019_v61  ;;  %v1034_v24 = vrot.slane %v1033_v13, 2  ;;  %v224_v58 = vld [vmem:[%s1673_s28 + $0xd0] sm:$0xff] }
  0x67   : > { %v995_v55 = vadd.f32 %v994_v14, %v993_v1  ;;  %v1008_v0 = vrot.slane %v1007_v15, 1  ;;  %v1028_v25 = vadd.f32 %v1027_v16, %v1026_v3  ;;  %v1040_v26 = vadd.f32 %v1039_v19, %v1038_v4  ;;  %v210_v4 = vld [vmem:[%s1673_s28 + $0x60] sm:$0xff] }
  0x68   : > { %v1002_v27 = vadd.f32 %v1001_v21, %v1000_v5  ;;  %v1015_v28 = vrot.slane %v1014_v22, 1  ;;  %v1022_v29 = vrot.slane %v1021_v23, 1  ;;  %v1035_v30 = vadd.f32 %v1034_v24, %v1033_v13  ;;  %v211_v21 = vld [vmem:[%s1673_s28 + $0x68] sm:$0xff] }
  0x69   : > { %v1009_v32 = vadd.f32 %v1008_v0, %v1007_v15  ;;  %v1029_v33 = vrot.slane %v1028_v25, 1  ;;  %v1041_v62 = vrot.slane %v1040_v26, 2  ;;  %v1197_v8 = vmul.f32 0.25, %v995_v55 }
  0x6a   : > { %v1016_v17 = vadd.f32 %v1015_v28, %v1014_v22  ;;  %v1023_v34 = vadd.f32 %v1022_v29, %v1021_v23  ;;  %v1036_v63 = vrot.slane %v1035_v30, 1  ;;  %v1198_v7 = vmul.f32 0.25, %v1002_v27  ;;  %v212_v22 = vld [vmem:[%s1673_s28 + $0x70] sm:$0xff]  ;;  %v213_v29 = vld [vmem:[%s1673_s28 + $0x78] sm:$0xff] }
  0x6b   : > { %v1030_v18 = vadd.f32 %v1029_v33, %v1028_v25  ;;  %v1042_v59 = vadd.f32 %v1041_v62, %v1040_v26  ;;  %v1199_v35 = vmul.f32 0.25, %v1009_v32  ;;  %v245_v38 = vmul.f32 %v1668_v6, %v206_v31 }
  0x6c   : > { %v1037_v39 = vadd.f32 %v1036_v63, %v1035_v30  ;;  %v1200_v40 = vmul.f32 0.25, %v1016_v17  ;;  %v1201_v41 = vmul.f32 0.25, %v1023_v34  ;;  %v1330_v42 = vsel %vm1288_vm2, %v1198_v7, %v1197_v8 }
  0x6d   : > { %v1043_v51 = vrot.slane %v1042_v59, 1  ;;  %v1202_v43 = vmul.f32 0.25, %v1030_v18  ;;  %v1331_v44 = vsel %vm1290_vm3, %v1199_v35, %v1330_v42  ;;  %v246_v45 = vmul.f32 %v1668_v6, %v207_v10 }
  0x6e   : > { %v1203_v47 = vmul.f32 0.25, %v1037_v39  ;;  %v1332_v48 = vsel %vm1292_vm4, %v1200_v40, %v1331_v44  ;;  %v247_v49 = vmul.f32 %v1668_v6, %v208_v36  ;;  %v248_v52 = vmul.f32 %v1668_v6, %v209_v37 }
  0x6f   : > { %v1044_v56 = vadd.f32 %v1043_v51, %v1042_v59  ;;  %v1333_v50 = vsel %vm1294_vm5, %v1201_v41, %v1332_v48  ;;  %v284_v53 = vadd.f32 %v1678_v9, %v245_v38  ;;  %v285_v54 = vadd.f32 %v1678_v9, %v246_v45 }
  0x70   : > { %v1334_v61 = vsel %vm1296_vm6, %v1202_v43, %v1333_v50  ;;  %v286_v60 = vadd.f32 %v1678_v9, %v247_v49  ;;  %v287_v1 = vadd.f32 %v1678_v9, %v248_v52  ;;  %v261_v3 = vmul.f32 %v1668_v6, %v222_v46 }
  0x71   : > { %v1204_v5 = vmul.f32 0.25, %v1044_v56  ;;  %v1335_v11 = vsel %vm1298_vm7, %v1203_v47, %v1334_v61  ;;  %v316_v12 = vmax.f32 %v284_v53, 0.0  ;;  %v317_v13 = vmax.f32 %v285_v54, 0.0 }
  0x72   : > { %v318_v14 = vmax.f32 %v286_v60, 0.0  ;;  %v319_v15 = vmax.f32 %v287_v1, 0.0  ;;  %v262_v16 = vmul.f32 %v1668_v6, %v223_v57  ;;  %v263_v19 = vmul.f32 %v1668_v6, %v224_v58 }
  0x73   : > { %v1336_v23 = vsel %vm1300_vm8, %v1204_v5, %v1335_v11  ;;  %v264_v24 = vmul.f32 %v1668_v6, %v225_v2  ;;  %v300_v55 = vadd.f32 %v1678_v9, %v261_v3  ;;  %v1877_v0 = vmul.f32 %v1668_v6, %v210_v4 }
  0x74   : > { %1589 = vmatmul.mubr.msk.f32.vlgmr.msra.gmra.mxu1 %vm1351_vm9, %v1336_v23  ;;  %v344_v25 = vadd.f32 %v318_v14, %v316_v12  ;;  %v345_v26 = vadd.f32 %v319_v15, %v317_v13  ;;  %v301_v27 = vadd.f32 %v1678_v9, %v262_v16  ;;  %v302_v28 = vadd.f32 %v1678_v9, %v263_v19 }
  0x75   : > { %v303_v30 = vadd.f32 %v1678_v9, %v264_v24  ;;  %v332_v31 = vmax.f32 %v300_v55, 0.0  ;;  %v1885_v32 = vmul.f32 %v1668_v6, %v211_v21  ;;  %v1888_v33 = vmul.f32 %v1668_v6, %v212_v22 }
  0x76   : > { %v440_v62 = vcombine.high %v344_v25, %v344_v25  ;;  %v447_v8 = vrot.slane %v344_v25, %v1690_v20  ;;  %v457_v17 = vcombine.high %v345_v26, %v345_v26  ;;  %v464_v34 = vrot.slane %v345_v26, %v1690_v20 }
  0x77   : > { %v333_v63 = vmax.f32 %v301_v27, 0.0  ;;  %v334_v7 = vmax.f32 %v302_v28, 0.0  ;;  %v335_v10 = vmax.f32 %v303_v30, 0.0  ;;  %v1893_v18 = vmul.f32 %v1668_v6, %v213_v29 }
  0x78   : > { %v454_v9 = vrot.slane %v440_v62, %v1690_v20  ;;  %v455_v59 = vcombine.high %v447_v8, %v447_v8  ;;  %v471_v35 = vrot.slane %v457_v17, %v1690_v20  ;;  %v472_v36 = vcombine.high %v464_v34, %v464_v34 }
  0x79   : > { %v821_v37 = vsel %vm708_vm1, %v447_v8, 0.0  ;;  %v849_v38 = vsel %vm708_vm1, %v464_v34, 0.0  ;;  %v1899_v39 = vadd.f32 %v334_v7, %v332_v31  ;;  %v1901_v40 = vadd.f32 %v335_v10, %v333_v63 }
  0x7a   : > { %v456_v41 = vcombine.high %v454_v9, %v454_v9  ;;  %v473_v42 = vcombine.high %v471_v35, %v471_v35  ;;  %v822_v51 = vrot.slane %v821_v37, 4  ;;  %v828_v6 = vsel %vm708_vm1, %v455_v59, 0.0 }
  0x7b   : > { %v829_v43 = vrot.slane %v828_v6, 4  ;;  %v835_v44 = vsel %vm708_vm1, %v454_v9, 0.0  ;;  %v850_v45 = vrot.slane %v849_v38, 4  ;;  %v856_v46 = vsel %vm708_vm1, %v472_v36, 0.0 }
  0x7c   : > { %v823_v47 = vadd.f32 %v822_v51, %v821_v37  ;;  %v836_v48 = vrot.slane %v835_v44, 4  ;;  %v842_v49 = vsel %vm708_vm1, %v456_v41, 0.0  ;;  %v857_v52 = vrot.slane %v856_v46, 4 }
  0x7d   : > { %v830_v56 = vadd.f32 %v829_v43, %v828_v6  ;;  %v843_v50 = vrot.slane %v842_v49, 4  ;;  %v851_v53 = vadd.f32 %v850_v45, %v849_v38  ;;  %v863_v54 = vsel %vm708_vm1, %v471_v35, 0.0 }
  0x7e   : > { %v824_v57 = vrot.slane %v823_v47, 2  ;;  %v837_v58 = vadd.f32 %v836_v48, %v835_v44  ;;  %v858_v61 = vadd.f32 %v857_v52, %v856_v46  ;;  %v864_v60 = vrot.slane %v863_v54, 4 }
  0x7f   : > { %v831_v1 = vrot.slane %v830_v56, 2  ;;  %v844_v2 = vadd.f32 %v843_v50, %v842_v49  ;;  %v852_v3 = vrot.slane %v851_v53, 2  ;;  %v870_v4 = vsel %vm708_vm1, %v473_v42, 0.0 }
  0x80   : > { %v825_v5 = vadd.f32 %v824_v57, %v823_v47  ;;  %v838_v11 = vrot.slane %v837_v58, 2  ;;  %v859_v12 = vrot.slane %v858_v61, 2  ;;  %v865_v13 = vadd.f32 %v864_v60, %v863_v54 }
  0x81   : > { %v832_v14 = vadd.f32 %v831_v1, %v830_v56  ;;  %v845_v15 = vrot.slane %v844_v2, 2  ;;  %v853_v16 = vadd.f32 %v852_v3, %v851_v53  ;;  %v871_v19 = vrot.slane %v870_v4, 4 }
  0x82   : > { %v826_v21 = vrot.slane %v825_v5, 1  ;;  %v839_v22 = vadd.f32 %v838_v11, %v837_v58  ;;  %v860_v23 = vadd.f32 %v859_v12, %v858_v61  ;;  %v866_v24 = vrot.slane %v865_v13, 2 }
  0x83   : > { %v833_v55 = vrot.slane %v832_v14, 1  ;;  %v846_v25 = vadd.f32 %v845_v15, %v844_v2  ;;  %v854_v26 = vrot.slane %v853_v16, 1  ;;  %v872_v27 = vadd.f32 %v871_v19, %v870_v4 }
  0x84   : > { %v827_v28 = vadd.f32 %v826_v21, %v825_v5  ;;  %v840_v29 = vrot.slane %v839_v22, 1  ;;  %v861_v30 = vrot.slane %v860_v23, 1  ;;  %v867_v31 = vadd.f32 %v866_v24, %v865_v13 }
  0x85   : > { %v834_v62 = vadd.f32 %v833_v55, %v832_v14  ;;  %v847_v8 = vrot.slane %v846_v25, 1  ;;  %v855_v17 = vadd.f32 %v854_v26, %v853_v16  ;;  %v873_v34 = vrot.slane %v872_v27, 2 }
  0x86   : > { %v841_v63 = vadd.f32 %v840_v29, %v839_v22  ;;  %v862_v7 = vadd.f32 %v861_v30, %v860_v23  ;;  %v868_v10 = vrot.slane %v867_v31, 1  ;;  %v1173_v9 = vmul.f32 0.25, %v827_v28 }
  0x87   : > { %v848_v59 = vadd.f32 %v847_v8, %v846_v25  ;;  %v874_v35 = vadd.f32 %v873_v34, %v872_v27  ;;  %v1174_v36 = vmul.f32 0.25, %v834_v62  ;;  %v1177_v37 = vmul.f32 0.25, %v855_v17 }
  0x88   : > { %v869_v38 = vadd.f32 %v868_v10, %v867_v31  ;;  %v1175_v41 = vmul.f32 0.25, %v841_v63  ;;  %v1178_v42 = vmul.f32 0.25, %v862_v7  ;;  %v576_v51 = vcombine.high %v1899_v39, %v1899_v39 }
  0x89   : > { %v875_v6 = vrot.slane %v874_v35, 1  ;;  %v1176_v43 = vmul.f32 0.25, %v848_v59  ;;  %v1309_v44 = vsel %vm1288_vm2, %v1174_v36, %v1173_v9  ;;  %v583_v45 = vrot.slane %v1899_v39, %v1690_v20 }
  0x8a   : > { %v1179_v46 = vmul.f32 0.25, %v869_v38  ;;  %v1310_v47 = vsel %vm1290_vm3, %v1175_v41, %v1309_v44  ;;  %v590_v48 = vrot.slane %v576_v51, %v1690_v20  ;;  %v593_v49 = vcombine.high %v1901_v40, %v1901_v40 }
  0x8b   : > { %v876_v52 = vadd.f32 %v875_v6, %v874_v35  ;;  %v1311_v56 = vsel %vm1292_vm4, %v1176_v43, %v1310_v47  ;;  %v591_v50 = vcombine.high %v583_v45, %v583_v45  ;;  %v600_v53 = vrot.slane %v1901_v40, %v1690_v20 }
  0x8c   : > { %v1312_v54 = vsel %vm1294_vm5, %v1177_v37, %v1311_v56  ;;  %v592_v57 = vcombine.high %v590_v48, %v590_v48  ;;  %v607_v39 = vrot.slane %v593_v49, %v1690_v20  ;;  %v1045_v58 = vsel %vm708_vm1, %v583_v45, 0.0 }
  0x8d   : > { %v1180_v61 = vmul.f32 0.25, %v876_v52  ;;  %v1313_v60 = vsel %vm1296_vm6, %v1178_v42, %v1312_v54  ;;  %v608_v1 = vcombine.high %v600_v53, %v600_v53  ;;  %v1046_v2 = vrot.slane %v1045_v58, 4 }
  0x8e   : > { %v1314_v3 = vsel %vm1298_vm7, %v1179_v46, %v1313_v60  ;;  %v609_v4 = vcombine.high %v607_v39, %v607_v39  ;;  %v1052_v5 = vsel %vm708_vm1, %v591_v50, 0.0  ;;  %v1059_v11 = vsel %vm708_vm1, %v590_v48, 0.0 }
  0x8f   : > { %v1315_v40 = vsel %vm1300_vm8, %v1180_v61, %v1314_v3  ;;  %v1047_v12 = vadd.f32 %v1046_v2, %v1045_v58  ;;  %v1053_v13 = vrot.slane %v1052_v5, 4  ;;  %v1060_v14 = vrot.slane %v1059_v11, 4  ;;  %v1609_v61 = vld [vmem:[%s2032_s2] ss:$0 sm:$0xff] }
  0x90   : > { %1585 = vmatprep.mubr.msk.f32.mxu0 %vm1351_vm9, %v1315_v40  ;;  %v1066_v15 = vsel %vm708_vm1, %v592_v57, 0.0  ;;  %v1073_v16 = vsel %vm708_vm1, %v600_v53, 0.0  ;;  %v1080_v19 = vsel %vm708_vm1, %v608_v1, 0.0  ;;  %v1087_v21 = vsel %vm708_vm1, %v607_v39, 0.0 }
  0x91   : > { %v1048_v22 = vrot.slane %v1047_v12, 2  ;;  %v1054_v23 = vadd.f32 %v1053_v13, %v1052_v5  ;;  %v1061_v24 = vadd.f32 %v1060_v14, %v1059_v11  ;;  %v1067_v55 = vrot.slane %v1066_v15, 4  ;;  %v226_v13 = vld [vmem:[%s1673_s28 + $0xe0] sm:$0xff] }
  0x92   : > { %v1074_v25 = vrot.slane %v1073_v16, 4  ;;  %v1081_v26 = vrot.slane %v1080_v19, 4  ;;  %v1088_v27 = vrot.slane %v1087_v21, 4  ;;  %v1094_v28 = vsel %vm708_vm1, %v609_v4, 0.0 }
  0x93   : > { %v1049_v29 = vadd.f32 %v1048_v22, %v1047_v12  ;;  %v1055_v30 = vrot.slane %v1054_v23, 2  ;;  %v1062_v31 = vrot.slane %v1061_v24, 2  ;;  %v1068_v62 = vadd.f32 %v1067_v55, %v1066_v15  ;;  %v228_v22 = vld [vmem:[%s1673_s28 + $0xf0] sm:$0xff] }
  0x94   : > { %v1075_v8 = vadd.f32 %v1074_v25, %v1073_v16  ;;  %v1082_v17 = vadd.f32 %v1081_v26, %v1080_v19  ;;  %v1089_v34 = vadd.f32 %v1088_v27, %v1087_v21  ;;  %v1095_v63 = vrot.slane %v1094_v28, 4  ;;  %v227_v21 = vld [vmem:[%s1673_s28 + $0xe8] sm:$0xff]  ;;  %v229_v25 = vld [vmem:[%s1673_s28 + $0xf8] sm:$0xff] }
  0x95   : > { %v1050_v7 = vrot.slane %v1049_v29, 1  ;;  %v1056_v10 = vadd.f32 %v1055_v30, %v1054_v23  ;;  %v1063_v9 = vadd.f32 %v1062_v31, %v1061_v24  ;;  %v1069_v59 = vrot.slane %v1068_v62, 2 }
  0x96   : > { %v1076_v35 = vrot.slane %v1075_v8, 2  ;;  %v1083_v36 = vrot.slane %v1082_v17, 2  ;;  %v1090_v37 = vrot.slane %v1089_v34, 2  ;;  %v1096_v38 = vadd.f32 %v1095_v63, %v1094_v28 }
  0x97   : > { %v1051_v41 = vadd.f32 %v1050_v7, %v1049_v29  ;;  %v1057_v42 = vrot.slane %v1056_v10, 1  ;;  %v1064_v51 = vrot.slane %v1063_v9, 1  ;;  %v1070_v6 = vadd.f32 %v1069_v59, %v1068_v62 }
  0x98   : > { %v1077_v43 = vadd.f32 %v1076_v35, %v1075_v8  ;;  %v1084_v44 = vadd.f32 %v1083_v36, %v1082_v17  ;;  %v1091_v45 = vadd.f32 %v1090_v37, %v1089_v34  ;;  %v1097_v46 = vrot.slane %v1096_v38, 2 }
  0x99   : > { %v1058_v47 = vadd.f32 %v1057_v42, %v1056_v10  ;;  %v1065_v48 = vadd.f32 %v1064_v51, %v1063_v9  ;;  %v1071_v49 = vrot.slane %v1070_v6, 1  ;;  %v1205_v52 = vmul.f32 0.25, %v1051_v41 }
  0x9a   : > { %v1078_v56 = vrot.slane %v1077_v43, 1  ;;  %v1085_v50 = vrot.slane %v1084_v44, 1  ;;  %v1092_v53 = vrot.slane %v1091_v45, 1  ;;  %v1098_v54 = vadd.f32 %v1097_v46, %v1096_v38 }
  0x9b   : > { %v1072_v57 = vadd.f32 %v1071_v49, %v1070_v6  ;;  %v1206_v39 = vmul.f32 0.25, %v1058_v47  ;;  %v1207_v58 = vmul.f32 0.25, %v1065_v48  ;;  %v288_v60 = vadd.f32 %v1609_v61, %v1877_v0 }
  0x9c   : > { %v1079_v1 = vadd.f32 %v1078_v56, %v1077_v43  ;;  %v1086_v2 = vadd.f32 %v1085_v50, %v1084_v44  ;;  %v1093_v3 = vadd.f32 %v1092_v53, %v1091_v45  ;;  %v1099_v4 = vrot.slane %v1098_v54, 1 }
  0x9d   : > { %v1208_v5 = vmul.f32 0.25, %v1072_v57  ;;  %v1337_v11 = vsel %vm1288_vm2, %v1206_v39, %v1205_v52  ;;  %v289_v40 = vadd.f32 %v1609_v61, %v1885_v32  ;;  %v290_v12 = vadd.f32 %v1609_v61, %v1888_v33  ;;  %v1610_v33 = vld [vmem:[%s2031_s1] ss:$0 sm:$0xff] }
  0x9e   : > { %v1100_v14 = vadd.f32 %v1099_v4, %v1098_v54  ;;  %v1209_v15 = vmul.f32 0.25, %v1079_v1  ;;  %v1210_v16 = vmul.f32 0.25, %v1086_v2  ;;  %v1211_v19 = vmul.f32 0.25, %v1093_v3 }
  0x9f   : > { %v1338_v0 = vsel %vm1290_vm3, %v1207_v58, %v1337_v11  ;;  %v291_v23 = vadd.f32 %v1609_v61, %v1893_v18  ;;  %v320_v24 = vmax.f32 %v288_v60, 0.0  ;;  %v321_v55 = vmax.f32 %v289_v40, 0.0 }
  0xa0   : > { %v1212_v26 = vmul.f32 0.25, %v1100_v14  ;;  %v1339_v27 = vsel %vm1292_vm4, %v1208_v5, %v1338_v0  ;;  %v322_v32 = vmax.f32 %v290_v12, 0.0  ;;  %v265_v28 = vmul.f32 %v1610_v33, %v226_v13 }
  0xa1   : > { %v1340_v29 = vsel %vm1294_vm5, %v1209_v15, %v1339_v27  ;;  %v323_v30 = vmax.f32 %v291_v23, 0.0  ;;  %v266_v31 = vmul.f32 %v1610_v33, %v227_v21  ;;  %v267_v62 = vmul.f32 %v1610_v33, %v228_v22 }
  0xa2   : > { %v1341_v8 = vsel %vm1296_vm6, %v1210_v16, %v1340_v29  ;;  %v346_v18 = vadd.f32 %v322_v32, %v320_v24  ;;  %v268_v17 = vmul.f32 %v1610_v33, %v229_v25  ;;  %v1954_v34 = vadd.f32 %v1609_v61, %v265_v28 }
  0xa3   : > { %v1342_v63 = vsel %vm1298_vm7, %v1211_v19, %v1341_v8  ;;  %v347_v7 = vadd.f32 %v323_v30, %v321_v55  ;;  %v1957_v10 = vadd.f32 %v1609_v61, %v266_v31  ;;  %v1959_v9 = vadd.f32 %v1609_v61, %v267_v62 }
  0xa4   : > { %v1343_v59 = vsel %vm1300_vm8, %v1212_v26, %v1342_v63  ;;  %v474_v35 = vcombine.high %v346_v18, %v346_v18  ;;  %v481_v36 = vrot.slane %v346_v18, %v1690_v20  ;;  %v1963_v37 = vadd.f32 %v1609_v61, %v268_v17 }
  0xa5   : > { %1591 = vmatprep.mubr.msk.f32.mxu1 %vm1351_vm9, %v1343_v59  ;;  %v491_v38 = vcombine.high %v347_v7, %v347_v7  ;;  %v498_v41 = vrot.slane %v347_v7, %v1690_v20  ;;  %v336_v42 = vmax.f32 %v1954_v34, 0.0  ;;  %v337_v51 = vmax.f32 %v1957_v10, 0.0 }
  0xa6   : > { %v488_v6 = vrot.slane %v474_v35, %v1690_v20  ;;  %v489_v43 = vcombine.high %v481_v36, %v481_v36  ;;  %v877_v44 = vsel %vm708_vm1, %v481_v36, 0.0  ;;  %v338_v45 = vmax.f32 %v1959_v9, 0.0 }
  0xa7   : > { %v505_v46 = vrot.slane %v491_v38, %v1690_v20  ;;  %v506_v47 = vcombine.high %v498_v41, %v498_v41  ;;  %v878_v48 = vrot.slane %v877_v44, 4  ;;  %v905_v49 = vsel %vm708_vm1, %v498_v41, 0.0 }
  0xa8   : > { %v490_v52 = vcombine.high %v488_v6, %v488_v6  ;;  %v884_v56 = vsel %vm708_vm1, %v489_v43, 0.0  ;;  %v891_v50 = vsel %vm708_vm1, %v488_v6, 0.0  ;;  %v906_v53 = vrot.slane %v905_v49, 4 }
  0xa9   : > { %v507_v54 = vcombine.high %v505_v46, %v505_v46  ;;  %v879_v57 = vadd.f32 %v878_v48, %v877_v44  ;;  %v885_v39 = vrot.slane %v884_v56, 4  ;;  %v892_v58 = vrot.slane %v891_v50, 4 }
  0xaa   : > { %v898_v61 = vsel %vm708_vm1, %v490_v52, 0.0  ;;  %v907_v60 = vadd.f32 %v906_v53, %v905_v49  ;;  %v912_v1 = vsel %vm708_vm1, %v506_v47, 0.0  ;;  %v919_v2 = vsel %vm708_vm1, %v505_v46, 0.0 }
  0xab   : > { %v880_v3 = vrot.slane %v879_v57, 2  ;;  %v886_v4 = vadd.f32 %v885_v39, %v884_v56  ;;  %v893_v5 = vadd.f32 %v892_v58, %v891_v50  ;;  %v899_v11 = vrot.slane %v898_v61, 4 }
  0xac   : > { %v908_v40 = vrot.slane %v907_v60, 2  ;;  %v913_v12 = vrot.slane %v912_v1, 4  ;;  %v920_v13 = vrot.slane %v919_v2, 4  ;;  %v926_v14 = vsel %vm708_vm1, %v507_v54, 0.0 }
  0xad   : > { %v881_v15 = vadd.f32 %v880_v3, %v879_v57  ;;  %v887_v16 = vrot.slane %v886_v4, 2  ;;  %v894_v19 = vrot.slane %v893_v5, 2  ;;  %v900_v21 = vadd.f32 %v899_v11, %v898_v61 }
  0xae   : > { %v909_v22 = vadd.f32 %v908_v40, %v907_v60  ;;  %v914_v0 = vadd.f32 %v913_v12, %v912_v1  ;;  %v921_v23 = vadd.f32 %v920_v13, %v919_v2  ;;  %v927_v24 = vrot.slane %v926_v14, 4 }
  0xaf   : > { %v882_v55 = vrot.slane %v881_v15, 1  ;;  %v888_v25 = vadd.f32 %v887_v16, %v886_v4  ;;  %v895_v26 = vadd.f32 %v894_v19, %v893_v5  ;;  %v901_v27 = vrot.slane %v900_v21, 2 }
  0xb0   : > { %v910_v32 = vrot.slane %v909_v22, 1  ;;  %v915_v33 = vrot.slane %v914_v0, 2  ;;  %v922_v28 = vrot.slane %v921_v23, 2  ;;  %v928_v29 = vadd.f32 %v927_v24, %v926_v14 }
  0xb1   : > { %v883_v30 = vadd.f32 %v882_v55, %v881_v15  ;;  %v889_v31 = vrot.slane %v888_v25, 1  ;;  %v896_v62 = vrot.slane %v895_v26, 1  ;;  %v902_v8 = vadd.f32 %v901_v27, %v900_v21 }
  0xb2   : > { %v911_v18 = vadd.f32 %v910_v32, %v909_v22  ;;  %v916_v17 = vadd.f32 %v915_v33, %v914_v0  ;;  %v923_v63 = vadd.f32 %v922_v28, %v921_v23  ;;  %v929_v7 = vrot.slane %v928_v29, 2 }
  0xb3   : > { %v890_v59 = vadd.f32 %v889_v31, %v888_v25  ;;  %v897_v35 = vadd.f32 %v896_v62, %v895_v26  ;;  %v903_v36 = vrot.slane %v902_v8, 1  ;;  %v1181_v38 = vmul.f32 0.25, %v883_v30 }
  0xb4   : > { %v917_v41 = vrot.slane %v916_v17, 1  ;;  %v924_v6 = vrot.slane %v923_v63, 1  ;;  %v930_v43 = vadd.f32 %v929_v7, %v928_v29  ;;  %v1185_v44 = vmul.f32 0.25, %v911_v18 }
  0xb5   : > { %v904_v46 = vadd.f32 %v903_v36, %v902_v8  ;;  %v1182_v47 = vmul.f32 0.25, %v890_v59  ;;  %v1183_v48 = vmul.f32 0.25, %v897_v35  ;;  %v339_v49 = vmax.f32 %v1963_v37, 0.0 }
  0xb6   : > { %v918_v52 = vadd.f32 %v917_v41, %v916_v17  ;;  %v925_v56 = vadd.f32 %v924_v6, %v923_v63  ;;  %v931_v50 = vrot.slane %v930_v43, 1  ;;  %v354_v53 = vadd.f32 %v338_v45, %v336_v42 }
  0xb7   : > { %v1184_v54 = vmul.f32 0.25, %v904_v46  ;;  %v1316_v57 = vsel %vm1288_vm2, %v1182_v47, %v1181_v38  ;;  %v355_v39 = vadd.f32 %v339_v49, %v337_v51 }
  0xb8   : > { %v932_v58 = vadd.f32 %v931_v50, %v930_v43  ;;  %v1186_v61 = vmul.f32 0.25, %v918_v52  ;;  %v1187_v60 = vmul.f32 0.25, %v925_v56  ;;  %v1317_v1 = vsel %vm1290_vm3, %v1183_v48, %v1316_v57 }
  0xb9   : > { %v1318_v37 = vsel %vm1292_vm4, %v1184_v54, %v1317_v1  ;;  %v610_v2 = vcombine.high %v354_v53, %v354_v53  ;;  %v617_v3 = vrot.slane %v354_v53, %v1690_v20  ;;  %v627_v34 = vcombine.high %v355_v39, %v355_v39 }
  0xba   : > { %v1188_v4 = vmul.f32 0.25, %v932_v58  ;;  %v1319_v9 = vsel %vm1294_vm5, %v1185_v44, %v1318_v37  ;;  %v634_v42 = vrot.slane %v355_v39, %v1690_v20 }
  0xbb   : > { %v1320_v45 = vsel %vm1296_vm6, %v1186_v61, %v1319_v9  ;;  %v624_v10 = vrot.slane %v610_v2, %v1690_v20  ;;  %v625_v51 = vcombine.high %v617_v3, %v617_v3  ;;  %v641_v5 = vrot.slane %v627_v34, %v1690_v20 }
  0xbc   : > { %v1321_v11 = vsel %vm1298_vm7, %v1187_v60, %v1320_v45  ;;  %v642_v40 = vcombine.high %v634_v42, %v634_v42  ;;  %v1101_v12 = vsel %vm708_vm1, %v617_v3, 0.0  ;;  %v1129_v13 = vsel %vm708_vm1, %v634_v42, 0.0 }
  0xbd   : > { %v1322_v14 = vsel %vm1300_vm8, %v1188_v4, %v1321_v11  ;;  %v626_v15 = vcombine.high %v624_v10, %v624_v10  ;;  %v643_v16 = vcombine.high %v641_v5, %v641_v5  ;;  %v1102_v19 = vrot.slane %v1101_v12, 4 }
  0xbe   : > { %1586 = vmatmul.mubr.msk.f32.gmra.mxu0 %vm1351_vm9, %v1322_v14  ;;  %v1108_v21 = vsel %vm708_vm1, %v625_v51, 0.0  ;;  %v1115_v22 = vsel %vm708_vm1, %v624_v10, 0.0  ;;  %v1130_v0 = vrot.slane %v1129_v13, 4  ;;  %v1136_v20 = vsel %vm708_vm1, %v642_v40, 0.0 }
  0xbf   : > { %v1103_v23 = vadd.f32 %v1102_v19, %v1101_v12  ;;  %v1109_v24 = vrot.slane %v1108_v21, 4  ;;  %v1116_v55 = vrot.slane %v1115_v22, 4  ;;  %v1122_v25 = vsel %vm708_vm1, %v626_v15, 0.0 }
  0xc0   : > { %v1123_v26 = vrot.slane %v1122_v25, 4  ;;  %v1131_v27 = vadd.f32 %v1130_v0, %v1129_v13  ;;  %v1137_v32 = vrot.slane %v1136_v20, 4  ;;  %v1143_v33 = vsel %vm708_vm1, %v641_v5, 0.0 }
  0xc1   : > { %v1104_v28 = vrot.slane %v1103_v23, 2  ;;  %v1110_v29 = vadd.f32 %v1109_v24, %v1108_v21  ;;  %v1117_v30 = vadd.f32 %v1116_v55, %v1115_v22  ;;  %v1144_v31 = vrot.slane %v1143_v33, 4 }
  0xc2   : > { %v1124_v62 = vadd.f32 %v1123_v26, %v1122_v25  ;;  %v1132_v8 = vrot.slane %v1131_v27, 2  ;;  %v1138_v18 = vadd.f32 %v1137_v32, %v1136_v20  ;;  %v1150_v17 = vsel %vm708_vm1, %v643_v16, 0.0 }
  0xc3   : > { %v1105_v63 = vadd.f32 %v1104_v28, %v1103_v23  ;;  %v1111_v7 = vrot.slane %v1110_v29, 2  ;;  %v1118_v59 = vrot.slane %v1117_v30, 2  ;;  %v1145_v35 = vadd.f32 %v1144_v31, %v1143_v33 }
  0xc4   : > { %v1125_v36 = vrot.slane %v1124_v62, 2  ;;  %v1133_v38 = vadd.f32 %v1132_v8, %v1131_v27  ;;  %v1139_v41 = vrot.slane %v1138_v18, 2  ;;  %v1151_v6 = vrot.slane %v1150_v17, 4 }
  0xc5   : > { %v1106_v43 = vrot.slane %v1105_v63, 1  ;;  %v1112_v44 = vadd.f32 %v1111_v7, %v1110_v29  ;;  %v1119_v46 = vadd.f32 %v1118_v59, %v1117_v30  ;;  %v1146_v47 = vrot.slane %v1145_v35, 2 }
  0xc6   : > { %v1126_v48 = vadd.f32 %v1125_v36, %v1124_v62  ;;  %v1134_v49 = vrot.slane %v1133_v38, 1  ;;  %v1140_v52 = vadd.f32 %v1139_v41, %v1138_v18  ;;  %v1152_v56 = vadd.f32 %v1151_v6, %v1150_v17 }
  0xc7   : > { %v1107_v50 = vadd.f32 %v1106_v43, %v1105_v63  ;;  %v1113_v53 = vrot.slane %v1112_v44, 1  ;;  %v1120_v54 = vrot.slane %v1119_v46, 1  ;;  %v1147_v57 = vadd.f32 %v1146_v47, %v1145_v35 }
  0xc8   : > { %v1127_v39 = vrot.slane %v1126_v48, 1  ;;  %v1135_v58 = vadd.f32 %v1134_v49, %v1133_v38  ;;  %v1141_v61 = vrot.slane %v1140_v52, 1  ;;  %v1153_v60 = vrot.slane %v1152_v56, 2 }
  0xc9   : > { %v1114_v1 = vadd.f32 %v1113_v53, %v1112_v44  ;;  %v1121_v37 = vadd.f32 %v1120_v54, %v1119_v46  ;;  %v1148_v2 = vrot.slane %v1147_v57, 1  ;;  %v1213_v3 = vmul.f32 0.25, %v1107_v50 }
  0xca   : > { %v1128_v34 = vadd.f32 %v1127_v39, %v1126_v48  ;;  %v1142_v4 = vadd.f32 %v1141_v61, %v1140_v52  ;;  %v1154_v9 = vadd.f32 %v1153_v60, %v1152_v56  ;;  %v1217_v11 = vmul.f32 0.25, %v1135_v58 }
  0xcb   : > { %v1149_v42 = vadd.f32 %v1148_v2, %v1147_v57  ;;  %v1214_v45 = vmul.f32 0.25, %v1114_v1  ;;  %v1215_v10 = vmul.f32 0.25, %v1121_v37 }
  0xcc   : > { %v1155_v51 = vrot.slane %v1154_v9, 1  ;;  %v1216_v5 = vmul.f32 0.25, %v1128_v34  ;;  %v1218_v40 = vmul.f32 0.25, %v1142_v4 }
  0xcd   : > { %v1344_v12 = vsel %vm1288_vm2, %v1214_v45, %v1213_v3  ;;  %v1219_v14 = vmul.f32 0.25, %v1149_v42 }
  0xce   : > { %v1156_v13 = vadd.f32 %v1155_v51, %v1154_v9  ;;  %v1345_v15 = vsel %vm1290_vm3, %v1215_v10, %v1344_v12 }
  0xcf   : > { %v1346_v16 = vsel %vm1292_vm4, %v1216_v5, %v1345_v15 }
  0xd0   : > { %v1220_v19 = vmul.f32 0.25, %v1156_v13  ;;  %v1347_v21 = vsel %vm1294_vm5, %v1217_v11, %v1346_v16 }
  0xd1   : > { %v1348_v22 = vsel %vm1296_vm6, %v1218_v40, %v1347_v21 }
  0xd2   : > { %v1349_v0 = vsel %vm1298_vm7, %v1219_v14, %v1348_v22 }
  0xd3   : > { %v1350_v20 = vsel %vm1300_vm8, %v1220_v19, %v1349_v0 }
  0xd4   : > { %1592 = vmatmul.mubr.msk.f32.gmra.mxu1 %vm1351_vm9, %v1350_v20 }
 0x11f   : > { %v1584_v23 = vpop.f32.mrf.mxu0 }
 0x120   : > { %1479 = vst.msk [vmem:[%s197_s12 + $0x8] sm:$0xff] %vm1477_vm10, %v1584_v23 }
 0x121   : > { %v1438_v24 = vpop.f32.mrf.mxu0 }
 0x122   : > { %1478 = vst.msk [vmem:[%s197_s12] sm:$0xff] %vm1477_vm10, %v1438_v24 }
 0x134   : > { %v1590_v55 = vpop.f32.mrf.mxu1 }
 0x135   : > { %1483 = vst.msk [vmem:[%s197_s12 + $0x28] sm:$0xff] %vm1477_vm10, %v1590_v55 }
 0x136   : > { %v1458_v25 = vpop.f32.mrf.mxu1 }
 0x137   : > { %1482 = vst.msk [vmem:[%s197_s12 + $0x20] sm:$0xff] %vm1477_vm10, %v1458_v25 }
 0x17e   : > { %v1587_v26 = vpop.f32.mrf.mxu0 }
 0x17f   : > { %1481 = vst.msk [vmem:[%s197_s12 + $0x18] sm:$0xff] %vm1477_vm10, %v1587_v26 }
 0x180   : > { %v1448_v27 = vpop.f32.mrf.mxu0 }
 0x181   : > { %1480 = vst.msk [vmem:[%s197_s12 + $0x10] sm:$0xff] %vm1477_vm10, %v1448_v27 }
 0x194   : > { %v1593_v32 = vpop.f32.mrf.mxu1 }
 0x195   : > { %1485 = vst.msk [vmem:[%s197_s12 + $0x38] sm:$0xff] %vm1477_vm10, %v1593_v32 }
 0x196   : > { %v1468_v33 = vpop.f32.mrf.mxu1 }
 0x197   : > { %1484 = vst.msk [vmem:[%s197_s12 + $0x30] sm:$0xff] %vm1477_vm10, %v1468_v33 }
 0x198 PF: > { %s14_s15 = sadd.s32 1, %s1617_s15  }
 0x199   : > { %p11_p4 = scmp.ge.s32.totalorder %s14_s15, 4  }
 0x19b   :  { %13 = sbr.rel (!%p11_p4) target bundleno = 1 (0x1), region = 66 }

// kernel: densenet_forward.6
= control target key start
LH: loop header
LB: loop body
LE: loop exit
PB: predicated region body
PF: predicated region fallthrough
CT: control target
= control target key end

     0   :  { %s4727_s25 = smov 0   ;;  %s5543_s0 = inlined_call_operand.vmem [shape: f32[2,8,8,10], index: 0, kind: input, shape index: {}]   ;;  %s5544_s1 = inlined_call_operand.vmem [shape: f32[1,10], index: 1, kind: input, shape index: {}]   ;;  %s5545_s2 = inlined_call_operand.vmem [shape: f32[1,10], index: 2, kind: input, shape index: {}]   ;;  %s5546_s3 = inlined_call_operand.vmem [shape: f32[10,32], index: 3, kind: input, shape index: {}]   ;;  %s5547_s4 = inlined_call_operand.vmem [shape: f32[1,32], index: 4, kind: input, shape index: {}]   ;;  %s5548_s5 = inlined_call_operand.vmem [shape: f32[1,32], index: 5, kind: input, shape index: {}]   ;;  %s5549_s6 = inlined_call_operand.vmem [shape: f32[9,32,8], index: 6, kind: input, shape index: {}]   ;;  %s5550_s7 = inlined_call_operand.vmem [shape: f32[1,18], index: 7, kind: input, shape index: {}]   ;;  %s5551_s8 = inlined_call_operand.vmem [shape: f32[1,18], index: 8, kind: input, shape index: {}]   ;;  %s5552_s9 = inlined_call_operand.vmem [shape: f32[18,32], index: 9, kind: input, shape index: {}]   ;;  %s5553_s10 = inlined_call_operand.vmem [shape: f32[1,32], index: 10, kind: input, shape index: {}]   ;;  %s5554_s11 = inlined_call_operand.vmem [shape: f32[1,32], index: 11, kind: input, shape index: {}]   ;;  %s5555_s12 = inlined_call_operand.vmem [shape: f32[9,32,8], index: 12, kind: input, shape index: {}]   ;;  %s5556_s13 = inlined_call_operand.vmem [shape: f32[2,8,8,26], index: 13, kind: output, shape index: {}]  }
   0x1 LB: > { %s3757_s26 = sadd.s32 4294967295, %s4652_s25   ;;  %p3761_p0 = scmp.ge.s32.totalorder %s4652_s25, 1  ;;  %s4652_s25 = sphi %s4727_s25, %s23_s25  }
   0x2   : > { %p387_p1 = scmp.lt.s32.totalorder %s4652_s25, 3 }
   0x4   : > { %p388_p2 = pnand %p3761_p0, %p387_p1 }
   0x6   : > { %391 = sbr.rel (%p388_p2) target bundleno = 1250 (0x4e2), region = 72 }
   0xb   : > { %v527_v0 = vld [vmem:[%s5546_s3 + $0x8] sm:$0x3]  ;;  %vm552_vm0 = vcmask 1041408   ;;  %v526_v1 = vld [vmem:[%s5546_s3] sm:$0xff]  ;;  %p431_p3 = scmp.lt.s32.totalorder %s3757_s26, 1  ;;  %vm458_vm1 = vcmask 261120  }
   0xc   : > { %4241 = vmatprep.subr.msk.mxu0 %vm552_vm0, %v527_v0  ;;  %vm460_vm2 = vcmask 254976   ;;  %v4654_v2 = vmov 0.0   ;;  %vm449_vm3 = vcmask 80896   ;;  %v3766_v11 = vld [vmem:[%s5544_s1] ss:$0 sm:$0xff]  ;;  %v3782_v45 = vld [vmem:[%s5549_s6 + $0x38] sm:$0xff] }
   0xd   : > { %4242 = vmatpush3.msk.msra.mxu0 %vm552_vm0, %v527_v0  ;;  %s5583_s26 = smov (!%p431_p3, %s3757_s26), 1  ;;  %464 = vst.msk [vmem:[#allocation3 + $0x20] sm:$0xff] %vm458_vm1, %v4654_v2  ;;  %459 = vst.msk [vmem:[#allocation3] sm:$0xff] %vm458_vm1, %v4654_v2  ;;  %v3767_v12 = vld [vmem:[%s5545_s2] ss:$0 sm:$0xff]  ;;  %v719_v46 = vld [vmem:[%s5549_s6 + $0x18] sm:$0xff]  ;;  %4257 = vmatprep.subr.mxu1 %v3782_v45 }
   0xe   : > { %462 = vst.msk [vmem:[#allocation3 + $0x10] sm:$0xff] %vm458_vm1, %v4654_v2  ;;  %466 = vst.msk [vmem:[#allocation3 + $0x30] sm:$0xff] %vm458_vm1, %v4654_v2  ;;  %4243 = vmatprep.subr.mxu0 %v526_v1  ;;  %s4002_s14 = sshll.u32 %s5583_s26, 6  ;;  %4258 = vmatpush3.msra.mxu1 %v3782_v45  ;;  %v3781_v47 = vld [vmem:[%s5549_s6 + $0x30] sm:$0xff]  ;;  %v3780_v49 = vld [vmem:[%s5549_s6 + $0x28] sm:$0xff]  ;;  %s4655_s20 = smov 10  }
   0xf   : > { %468 = vst.msk [vmem:[#allocation3 + $0x40] sm:$0xff] %vm458_vm1, %v4654_v2  ;;  %470 = vst.msk [vmem:[#allocation3 + $0x50] sm:$0xff] %vm458_vm1, %v4654_v2  ;;  %4244 = vmatpush3.msra.mxu0 %v526_v1  ;;  %s435_s17 = scalar_lea.vmem %s5543_s0, %s4002_s14  ;;  %v718_v48 = vld [vmem:[%s5549_s6 + $0x10] sm:$0xff]  ;;  %4259 = vmatprep.subr.mxu1 %v3781_v47  ;;  %v717_v50 = vld [vmem:[%s5549_s6 + $0x8] sm:$0xff]  ;;  %vm2074_vm4 = vcmask 146512   ;;  %vm2132_vm5 = vcmask 146432  }
  0x10   : > { %472 = vst.msk [vmem:[#allocation3 + $0x60] sm:$0xff] %vm458_vm1, %v4654_v2  ;;  %474 = vst.msk [vmem:[#allocation3 + $0x70] sm:$0xff] %vm458_vm1, %v4654_v2  ;;  %v441_v3 = vld [vmem:[%s435_s17] sm:$0xff]  ;;  %v442_v4 = vld [vmem:[%s435_s17 + $0x8] sm:$0xff]  ;;  %4277 = vmatprep.subr.mxu0 %v719_v46  ;;  %4260 = vmatpush3.msra.mxu1 %v3781_v47  ;;  %vm3676_vm6 = vcmask 212112   ;;  %vm3693_vm7 = vcmask 211968  }
  0x11   : > { %476 = vst.msk [vmem:[#allocation3 + $0x80] sm:$0xff] %vm458_vm1, %v4654_v2  ;;  %478 = vst.msk [vmem:[#allocation3 + $0x90] sm:$0xff] %vm458_vm1, %v4654_v2  ;;  %v443_v5 = vld [vmem:[%s435_s17 + $0x10] sm:$0xff]  ;;  %v444_v6 = vld [vmem:[%s435_s17 + $0x18] sm:$0xff]  ;;  %4261 = vmatprep.subr.mxu1 %v3780_v49 }
  0x12   : > { %465 = vst.msk [vmem:[#allocation3 + $0x28] sm:$0x3] %vm460_vm2, %v4654_v2  ;;  %461 = vst.msk [vmem:[#allocation3 + $0x8] sm:$0x3] %vm460_vm2, %v4654_v2  ;;  %v445_v7 = vld [vmem:[%s435_s17 + $0x20] sm:$0xff]  ;;  %v446_v8 = vld [vmem:[%s435_s17 + $0x28] sm:$0xff]  ;;  %4262 = vmatpush3.msra.mxu1 %v3780_v49 }
  0x13   : > { %463 = vst.msk [vmem:[#allocation3 + $0x18] sm:$0x3] %vm460_vm2, %v4654_v2  ;;  %467 = vst.msk [vmem:[#allocation3 + $0x38] sm:$0x3] %vm460_vm2, %v4654_v2  ;;  %v447_v9 = vld [vmem:[%s435_s17 + $0x30] sm:$0xff]  ;;  %v448_v10 = vld [vmem:[%s435_s17 + $0x38] sm:$0xff] }
  0x14   : > { %469 = vst.msk [vmem:[#allocation3 + $0x48] sm:$0x3] %vm460_vm2, %v4654_v2  ;;  %471 = vst.msk [vmem:[#allocation3 + $0x58] sm:$0x3] %vm460_vm2, %v4654_v2  ;;  %v3779_v51 = vld [vmem:[%s5549_s6 + $0x20] sm:$0xff]  ;;  %v3802_v55 = vld [vmem:[%s5549_s6 + $0x58] sm:$0xff] }
  0x15   : > { %473 = vst.msk [vmem:[#allocation3 + $0x68] sm:$0x3] %vm460_vm2, %v4654_v2  ;;  %475 = vst.msk [vmem:[#allocation3 + $0x78] sm:$0x3] %vm460_vm2, %v4654_v2  ;;  %v716_v52 = vld [vmem:[%s5549_s6] sm:$0xff]  ;;  %4263 = vmatprep.subr.mxu1 %v3779_v51  ;;  %v3814_v56 = vld [vmem:[%s5549_s6 + $0x78] sm:$0xff] }
  0x16   : > { %477 = vst.msk [vmem:[#allocation3 + $0x88] sm:$0x3] %vm460_vm2, %v4654_v2  ;;  %479 = vst.msk [vmem:[#allocation3 + $0x98] sm:$0x3] %vm460_vm2, %v4654_v2  ;;  %v4819_v54 = vld [vmem:[#allocation3] sm:$0xff]  ;;  %4264 = vmatpush3.msra.mxu1 %v3779_v51  ;;  %v3838_v49 = vld [vmem:[%s5549_s6 + $0xb8] sm:$0xff] }
  0x17   : > { %450 = vst.msk [vmem:[#allocation2] sm:$0xff] %vm449_vm3, %v441_v3  ;;  %451 = vst.msk [vmem:[#allocation2 + $0x8] sm:$0xff] %vm449_vm3, %v442_v4  ;;  %4297 = vmatprep.subr.mxu1 %v3802_v55  ;;  %v3777_v57 = vld [vmem:[%s5547_s4] ss:$0 sm:$0xff]  ;;  %v3825_v51 = vld [vmem:[%s5549_s6 + $0x90] sm:$0xff]  ;;  %s4656_s17 = smov 18  }
  0x18   : > { %452 = vst.msk [vmem:[#allocation2 + $0x10] sm:$0xff] %vm449_vm3, %v443_v5  ;;  %453 = vst.msk [vmem:[#allocation2 + $0x18] sm:$0xff] %vm449_vm3, %v444_v6  ;;  %v3778_v59 = vld [vmem:[%s5548_s5] ss:$0 sm:$0xff] }
  0x19   : > { %454 = vst.msk [vmem:[#allocation2 + $0x20] sm:$0xff] %vm449_vm3, %v445_v7  ;;  %455 = vst.msk [vmem:[#allocation2 + $0x28] sm:$0xff] %vm449_vm3, %v446_v8  ;;  %v4817_v53 = vld [vmem:[#allocation3 + $0x1] sm:$0xff] }
  0x1a   : > { %456 = vst.msk [vmem:[#allocation2 + $0x30] sm:$0xff] %vm449_vm3, %v447_v9  ;;  %457 = vst.msk [vmem:[#allocation2 + $0x38] sm:$0xff] %vm449_vm3, %v448_v10  ;;  %4265 = vmatprep.mubr.msk.f32.mxu1 %vm458_vm1, %v4817_v53  ;;  %v4912_v47 = vld [vmem:[#allocation3 + $0x2] sm:$0xff] }
  0x1b   : > { %5562 = vst [vmem:[#allocation4_spill] sm:$0xff] %v4819_v54  ;;  %5563 = vst [vmem:[#allocation5_spill] sm:$0xff] %v4912_v47 }
  0x1e   : > { %v480_v13 = vld [vmem:[#allocation2] sm:$0xff]  ;;  %v481_v14 = vld [vmem:[#allocation2 + $0x8] sm:$0xff] }
  0x1f   : > { %v482_v15 = vld [vmem:[#allocation2 + $0x10] sm:$0xff]  ;;  %v495_v16 = vmul.f32 %v3766_v11, %v480_v13  ;;  %v496_v17 = vmul.f32 %v3766_v11, %v481_v14  ;;  %v483_v19 = vld [vmem:[#allocation2 + $0x18] sm:$0xff] }
  0x20   : > { %v497_v18 = vmul.f32 %v3766_v11, %v482_v15  ;;  %v484_v20 = vld [vmem:[#allocation2 + $0x20] sm:$0xff]  ;;  %v485_v21 = vld [vmem:[#allocation2 + $0x28] sm:$0xff]  ;;  %v498_v22 = vmul.f32 %v3766_v11, %v483_v19 }
  0x21   : > { %v499_v23 = vmul.f32 %v3766_v11, %v484_v20  ;;  %v486_v24 = vld [vmem:[#allocation2 + $0x30] sm:$0xff]  ;;  %v510_v25 = vadd.f32 %v3767_v12, %v495_v16  ;;  %v511_v26 = vadd.f32 %v3767_v12, %v496_v17  ;;  %v500_v29 = vmul.f32 %v3766_v11, %v485_v21  ;;  %v487_v35 = vld [vmem:[#allocation2 + $0x38] sm:$0xff] }
  0x22   : > { %v512_v27 = vadd.f32 %v3767_v12, %v497_v18  ;;  %v513_v28 = vadd.f32 %v3767_v12, %v498_v22  ;;  %v501_v30 = vmul.f32 %v3766_v11, %v486_v24  ;;  %v502_v38 = vmul.f32 %v3766_v11, %v487_v35  ;;  %v3813_v35 = vld [vmem:[%s5549_s6 + $0x70] sm:$0xff] }
  0x23   : > { %v518_v31 = vmax.f32 %v510_v25, 0.0  ;;  %v519_v32 = vmax.f32 %v511_v26, 0.0  ;;  %v514_v34 = vadd.f32 %v3767_v12, %v499_v23  ;;  %v515_v37 = vadd.f32 %v3767_v12, %v500_v29  ;;  %v3801_v26 = vld [vmem:[%s5549_s6 + $0x50] sm:$0xff] }
  0x24   : > { %v520_v33 = vmax.f32 %v512_v27, 0.0  ;;  %v521_v36 = vmax.f32 %v513_v28, 0.0  ;;  %v516_v40 = vadd.f32 %v3767_v12, %v501_v30  ;;  %v517_v42 = vadd.f32 %v3767_v12, %v502_v38  ;;  %v3799_v38 = vld [vmem:[%s5549_s6 + $0x40] sm:$0xff] }
  0x25   : > { %4245 = vmatprep.mubr.msk.f32.mxu0 %vm449_vm3, %v518_v31  ;;  %v522_v39 = vmax.f32 %v514_v34, 0.0  ;;  %v523_v41 = vmax.f32 %v515_v37, 0.0 }
  0x26   : > { %4246 = vmatmul.mubr.msk.f32.vlgmr.msra.gmra.mxu0 %vm449_vm3, %v519_v32  ;;  %v524_v43 = vmax.f32 %v516_v40, 0.0  ;;  %v525_v44 = vmax.f32 %v517_v42, 0.0  ;;  %v3800_v32 = vld [vmem:[%s5549_s6 + $0x48] sm:$0xff] }
  0x27   : > { %4248 = vmatprep.mubr.msk.f32.mxu0 %vm449_vm3, %v520_v33  ;;  %4278 = vmatpush3.msra.mxu0 %v719_v46 }
  0x28   : > { %4279 = vmatprep.subr.mxu0 %v718_v48 }
  0x29   : > { %4280 = vmatpush3.msra.mxu0 %v718_v48  ;;  %v3826_v48 = vld [vmem:[%s5549_s6 + $0x98] sm:$0xff] }
  0x2a   : > { %4249 = vmatmul.mubr.msk.f32.gmra.mxu0 %vm449_vm3, %v521_v36  ;;  %4281 = vmatprep.subr.mxu0 %v717_v50 }
  0x2b   : > { %4251 = vmatprep.mubr.msk.f32.mxu0 %vm449_vm3, %v522_v39  ;;  %4282 = vmatpush3.msra.mxu0 %v717_v50 }
  0x2c   : > { %4283 = vmatprep.subr.mxu0 %v716_v52 }
  0x2d   : > { %4284 = vmatpush3.msra.mxu0 %v716_v52 }
  0x2e   : > { %4252 = vmatmul.mubr.msk.f32.gmra.mxu0 %vm449_vm3, %v523_v41  ;;  %4317 = vmatprep.subr.mxu0 %v3814_v56  ;;  %v3812_v41 = vld [vmem:[%s5549_s6 + $0x68] sm:$0xff] }
  0x2f   : > { %4254 = vmatprep.mubr.msk.f32.mxu0 %vm449_vm3, %v524_v43 }
  0x32   : > { %4255 = vmatmul.mubr.msk.f32.gmra.mxu0 %vm449_vm3, %v525_v44  ;;  %v3811_v44 = vld [vmem:[%s5549_s6 + $0x60] sm:$0xff] }
  0x33   : > { %4285 = vmatprep.mubr.msk.f32.mxu0 %vm458_vm1, %v4819_v54 }
  0xe6   : > { %v4247_v58 = vpop.f32.mrf.mxu0 }
  0xe7   : > { %v669_v60 = vmul.f32 %v4247_v58, %v3777_v57 }
  0xe8   : > { %v622_v61 = vpop.f32.mrf.mxu0 }
  0xe9   : > { %v684_v62 = vadd.f32 %v3778_v59, %v669_v60  ;;  %v668_v63 = vmul.f32 %v3777_v57, %v622_v61  ;;  %v3823_v60 = vld [vmem:[%s5549_s6 + $0x80] sm:$0xff]  ;;  %v3836_v61 = vld [vmem:[%s5549_s6 + $0xa8] sm:$0xff] }
  0xea   : > { %v4250_v0 = vpop.f32.mrf.mxu0 }
  0xeb   : > { %v692_v1 = vmax.f32 %v684_v62, 0.0  ;;  %v683_v2 = vadd.f32 %v3778_v59, %v668_v63  ;;  %v671_v3 = vmul.f32 %v4250_v0, %v3777_v57  ;;  %v3835_v63 = vld [vmem:[%s5549_s6 + $0xa0] sm:$0xff] }
  0xec   : > { %v632_v4 = vpop.f32.mrf.mxu0 }
  0xed   : > { %701 = vst.msk [vmem:[#allocation3 + $0x21] sm:$0xff] %vm458_vm1, %v692_v1  ;;  %v691_v5 = vmax.f32 %v683_v2, 0.0  ;;  %v686_v6 = vadd.f32 %v3778_v59, %v671_v3  ;;  %v670_v7 = vmul.f32 %v3777_v57, %v632_v4  ;;  %v3850_v2 = vld [vmem:[%s5549_s6 + $0xd8] sm:$0xff]  ;;  %v3849_v3 = vld [vmem:[%s5549_s6 + $0xd0] sm:$0xff] }
  0xee   : > { %v4253_v8 = vpop.f32.mrf.mxu0  ;;  %v3862_v4 = vld [vmem:[%s5549_s6 + $0xf8] sm:$0xff] }
  0xef   : > { %700 = vst.msk [vmem:[#allocation3 + $0x11] sm:$0xff] %vm458_vm1, %v691_v5  ;;  %v694_v9 = vmax.f32 %v686_v6, 0.0  ;;  %v685_v10 = vadd.f32 %v3778_v59, %v670_v7  ;;  %v673_v11 = vmul.f32 %v4253_v8, %v3777_v57  ;;  %v3848_v5 = vld [vmem:[%s5549_s6 + $0xc8] sm:$0xff]  ;;  %v3861_v6 = vld [vmem:[%s5549_s6 + $0xf0] sm:$0xff]  ;;  %v3847_v7 = vld [vmem:[%s5549_s6 + $0xc0] sm:$0xff] }
  0xf0   : > { %v642_v12 = vpop.f32.mrf.mxu0  ;;  %v3860_v8 = vld [vmem:[%s5549_s6 + $0xe8] sm:$0xff] }
  0xf1   : > { %703 = vst.msk [vmem:[#allocation3 + $0x41] sm:$0xff] %vm458_vm1, %v694_v9  ;;  %v693_v13 = vmax.f32 %v685_v10, 0.0  ;;  %v688_v14 = vadd.f32 %v3778_v59, %v673_v11  ;;  %v672_v15 = vmul.f32 %v3777_v57, %v642_v12  ;;  %v3859_v11 = vld [vmem:[%s5549_s6 + $0xe0] sm:$0xff]  ;;  %v3874_v12 = vld [vmem:[%s5549_s6 + $0x118] sm:$0xff] }
  0xf2   : > { %v4256_v16 = vpop.f32.mrf.mxu0 }
  0xf3   : > { %702 = vst.msk [vmem:[#allocation3 + $0x31] sm:$0xff] %vm458_vm1, %v693_v13  ;;  %v696_v17 = vmax.f32 %v688_v14, 0.0  ;;  %v687_v18 = vadd.f32 %v3778_v59, %v672_v15  ;;  %v675_v19 = vmul.f32 %v4256_v16, %v3777_v57  ;;  %v3873_v13 = vld [vmem:[%s5549_s6 + $0x110] sm:$0xff]  ;;  %v3872_v14 = vld [vmem:[%s5549_s6 + $0x108] sm:$0xff]  ;;  %v3871_v15 = vld [vmem:[%s5549_s6 + $0x100] sm:$0xff] }
  0xf4   : > { %v652_v20 = vpop.f32.mrf.mxu0  ;;  %v4851_v29 = vld [vmem:[#allocation3 + $0x21] sm:$0xff]  ;;  %v5078_v16 = vld [vmem:[#allocation3 + $0x90] sm:$0xff] }
  0xf5   : > { %705 = vst.msk [vmem:[#allocation3 + $0x61] sm:$0xff] %vm458_vm1, %v696_v17  ;;  %v695_v21 = vmax.f32 %v687_v18, 0.0  ;;  %v690_v22 = vadd.f32 %v3778_v59, %v675_v19  ;;  %v674_v23 = vmul.f32 %v3777_v57, %v652_v20  ;;  %v4855_v30 = vld [vmem:[#allocation3 + $0x20] sm:$0xff]  ;;  %v3837_v57 = vld [vmem:[%s5549_s6 + $0xb0] sm:$0xff]  ;;  %5564 = vst [vmem:[#allocation6_spill] sm:$0xff] %v5078_v16 }
  0xf6   : > { %v4842_v24 = vld [vmem:[#allocation3 + $0x11] sm:$0xff]  ;;  %v4933_v52 = vld [vmem:[#allocation3 + $0x22] sm:$0xff] }
  0xf7   : > { %v709_v25 = vld [vmem:[#allocation3 + $0x10] sm:$0xff]  ;;  %704 = vst.msk [vmem:[#allocation3 + $0x51] sm:$0xff] %vm458_vm1, %v695_v21  ;;  %v698_v27 = vmax.f32 %v690_v22, 0.0  ;;  %v689_v28 = vadd.f32 %v3778_v59, %v674_v23  ;;  %4266 = vmatmul.mubr.msk.f32.vlgmr.msra.gmra.mxu1 %vm458_vm1, %v4842_v24 }
  0xf8   : > { %4286 = vmatmul.mubr.msk.f32.vlgmr.msra.gmra.mxu0 %vm458_vm1, %v709_v25  ;;  %4298 = vmatpush3.msra.mxu1 %v3802_v55  ;;  %v4875_v36 = vld [vmem:[#allocation3 + $0x41] sm:$0xff]  ;;  %v992_v50 = vld [vmem:[#allocation3 + $0x12] sm:$0xff] }
  0xf9   : > { %4268 = vmatprep.mubr.msk.f32.mxu1 %vm458_vm1, %v4851_v29  ;;  %707 = vst.msk [vmem:[#allocation3 + $0x81] sm:$0xff] %vm458_vm1, %v698_v27  ;;  %v697_v31 = vmax.f32 %v689_v28, 0.0  ;;  %4288 = vmatprep.mubr.msk.f32.mxu0 %vm458_vm1, %v4855_v30  ;;  %v4877_v37 = vld [vmem:[#allocation3 + $0x40] sm:$0xff]  ;;  %v5080_v17 = vld [vmem:[#allocation3 + $0x91] sm:$0xff] }
  0xfa   : > { %4299 = vmatprep.subr.mxu1 %v3801_v26  ;;  %v4863_v33 = vld [vmem:[#allocation3 + $0x31] sm:$0xff]  ;;  %4318 = vmatpush3.msra.mxu0 %v3814_v56  ;;  %v3824_v56 = vld [vmem:[%s5549_s6 + $0x88] sm:$0xff]  ;;  %5565 = vst [vmem:[#allocation7_spill] sm:$0xff] %v5080_v17 }
  0xfb   : > { %v4865_v34 = vld [vmem:[#allocation3 + $0x30] sm:$0xff]  ;;  %4300 = vmatpush3.msra.mxu1 %v3801_v26  ;;  %706 = vst.msk [vmem:[#allocation3 + $0x71] sm:$0xff] %vm458_vm1, %v697_v31  ;;  %4319 = vmatprep.subr.mxu0 %v3813_v35  ;;  %v4951_v58 = vld [vmem:[#allocation3 + $0x42] sm:$0xff] }
  0xfc   : > { %4269 = vmatmul.mubr.msk.f32.gmra.mxu1 %vm458_vm1, %v4863_v33  ;;  %4289 = vmatmul.mubr.msk.f32.gmra.mxu0 %vm458_vm1, %v4865_v34  ;;  %v4897_v42 = vld [vmem:[#allocation3 + $0x61] sm:$0xff]  ;;  %v4939_v55 = vld [vmem:[#allocation3 + $0x32] sm:$0xff] }
  0xfd   : > { %4271 = vmatprep.mubr.msk.f32.mxu1 %vm458_vm1, %v4875_v36  ;;  %4291 = vmatprep.mubr.msk.f32.mxu0 %vm458_vm1, %v4877_v37  ;;  %v4899_v43 = vld [vmem:[#allocation3 + $0x60] sm:$0xff]  ;;  %v5099_v18 = vld [vmem:[#allocation3 + $0x92] sm:$0xff] }
  0xfe   : > { %4301 = vmatprep.subr.mxu1 %v3800_v32  ;;  %v4886_v39 = vld [vmem:[#allocation3 + $0x51] sm:$0xff]  ;;  %4320 = vmatpush3.msra.mxu0 %v3813_v35  ;;  %v4969_v62 = vld [vmem:[#allocation3 + $0x62] sm:$0xff]  ;;  %5566 = vst [vmem:[#allocation8_spill] sm:$0xff] %v5099_v18 }
  0xff   : > { %v4888_v40 = vld [vmem:[#allocation3 + $0x50] sm:$0xff]  ;;  %4302 = vmatpush3.msra.mxu1 %v3800_v32  ;;  %4321 = vmatprep.subr.mxu0 %v3812_v41 }
 0x100   : > { %4272 = vmatmul.mubr.msk.f32.gmra.mxu1 %vm458_vm1, %v4886_v39  ;;  %4292 = vmatmul.mubr.msk.f32.gmra.mxu0 %vm458_vm1, %v4888_v40  ;;  %v4957_v59 = vld [vmem:[#allocation3 + $0x52] sm:$0xff]  ;;  %v4980_v1 = vld [vmem:[#allocation3 + $0x80] sm:$0xff] }
 0x101   : > { %4274 = vmatprep.mubr.msk.f32.mxu1 %vm458_vm1, %v4897_v42  ;;  %4294 = vmatprep.mubr.msk.f32.mxu0 %vm458_vm1, %v4899_v43  ;;  %v1298_v9 = vld [vmem:[#allocation3 + $0x81] sm:$0xff] }
 0x102   : > { %4303 = vmatprep.subr.mxu1 %v3799_v38  ;;  %v4908_v45 = vld [vmem:[#allocation3 + $0x71] sm:$0xff]  ;;  %4322 = vmatpush3.msra.mxu0 %v3812_v41  ;;  %v1448_v10 = vld [vmem:[#allocation3 + $0x82] sm:$0xff] }
 0x103   : > { %v4910_v46 = vld [vmem:[#allocation3 + $0x70] sm:$0xff]  ;;  %4304 = vmatpush3.msra.mxu1 %v3799_v38  ;;  %4323 = vmatprep.subr.mxu0 %v3811_v44 }
 0x104   : > { %4275 = vmatmul.mubr.msk.f32.gmra.mxu1 %vm458_vm1, %v4908_v45  ;;  %4295 = vmatmul.mubr.msk.f32.gmra.mxu0 %vm458_vm1, %v4910_v46  ;;  %v4978_v0 = vld [vmem:[#allocation3 + $0x72] sm:$0xff] }
 0x105   : > { %4325 = vmatprep.mubr.msk.f32.mxu0 %vm458_vm1, %v709_v25  ;;  %4305 = vmatprep.mubr.msk.f32.mxu1 %vm458_vm1, %v4912_v47 }
 0x106   : > { %4324 = vmatpush3.msra.mxu0 %v3811_v44  ;;  %4337 = vmatprep.subr.mxu1 %v3826_v48 }
 0x107   : > { %4357 = vmatprep.subr.mxu0 %v3838_v49 }
 0x108   : > { %4306 = vmatmul.mubr.msk.f32.vlgmr.msra.gmra.mxu1 %vm458_vm1, %v992_v50  ;;  %4326 = vmatmul.mubr.msk.f32.vlgmr.msra.gmra.mxu0 %vm458_vm1, %v4855_v30 }
 0x109   : > { %4338 = vmatpush3.msra.mxu1 %v3826_v48  ;;  %4308 = vmatprep.mubr.msk.f32.mxu1 %vm458_vm1, %v4933_v52 }
 0x10a   : > { %4328 = vmatprep.mubr.msk.f32.mxu0 %vm458_vm1, %v4865_v34  ;;  %4339 = vmatprep.subr.mxu1 %v3825_v51 }
 0x10b   : > { %4340 = vmatpush3.msra.mxu1 %v3825_v51  ;;  %4358 = vmatpush3.msra.mxu0 %v3838_v49 }
 0x10c   : > { %4309 = vmatmul.mubr.msk.f32.gmra.mxu1 %vm458_vm1, %v4939_v55  ;;  %4329 = vmatmul.mubr.msk.f32.gmra.mxu0 %vm458_vm1, %v4877_v37 }
 0x10d   : > { %4311 = vmatprep.mubr.msk.f32.mxu1 %vm458_vm1, %v4951_v58  ;;  %4331 = vmatprep.mubr.msk.f32.mxu0 %vm458_vm1, %v4888_v40 }
 0x10e   : > { %4341 = vmatprep.subr.mxu1 %v3824_v56  ;;  %4359 = vmatprep.subr.mxu0 %v3837_v57 }
 0x10f   : > { %4342 = vmatpush3.msra.mxu1 %v3824_v56  ;;  %4360 = vmatpush3.msra.mxu0 %v3837_v57 }
 0x110   : > { %4312 = vmatmul.mubr.msk.f32.gmra.mxu1 %vm458_vm1, %v4957_v59  ;;  %4332 = vmatmul.mubr.msk.f32.gmra.mxu0 %vm458_vm1, %v4899_v43 }
 0x111   : > { %4314 = vmatprep.mubr.msk.f32.mxu1 %vm458_vm1, %v4969_v62  ;;  %4334 = vmatprep.mubr.msk.f32.mxu0 %vm458_vm1, %v4910_v46 }
 0x112   : > { %4343 = vmatprep.subr.mxu1 %v3823_v60  ;;  %4361 = vmatprep.subr.mxu0 %v3836_v61 }
 0x113   : > { %4344 = vmatpush3.msra.mxu1 %v3823_v60  ;;  %4362 = vmatpush3.msra.mxu0 %v3836_v61 }
 0x114   : > { %4315 = vmatmul.mubr.msk.f32.gmra.mxu1 %vm458_vm1, %v4978_v0  ;;  %4335 = vmatmul.mubr.msk.f32.gmra.mxu0 %vm458_vm1, %v4980_v1 }
 0x115   : > { %4345 = vmatprep.mubr.msk.f32.mxu1 %vm458_vm1, %v4842_v24  ;;  %4365 = vmatprep.mubr.msk.f32.mxu0 %vm458_vm1, %v992_v50 }
 0x116   : > { %4363 = vmatprep.subr.mxu0 %v3835_v63  ;;  %4377 = vmatprep.subr.mxu1 %v3850_v2 }
 0x117   : > { %4364 = vmatpush3.msra.mxu0 %v3835_v63 }
 0x118   : > { %4346 = vmatmul.mubr.msk.f32.vlgmr.msra.gmra.mxu1 %vm458_vm1, %v4851_v29  ;;  %4366 = vmatmul.mubr.msk.f32.vlgmr.msra.gmra.mxu0 %vm458_vm1, %v4933_v52 }
 0x119   : > { %4378 = vmatpush3.msra.mxu1 %v3850_v2  ;;  %4348 = vmatprep.mubr.msk.f32.mxu1 %vm458_vm1, %v4863_v33 }
 0x11a   : > { %4368 = vmatprep.mubr.msk.f32.mxu0 %vm458_vm1, %v4939_v55  ;;  %4379 = vmatprep.subr.mxu1 %v3849_v3 }
 0x11b   : > { %4380 = vmatpush3.msra.mxu1 %v3849_v3  ;;  %4397 = vmatprep.subr.mxu0 %v3862_v4 }
 0x11c   : > { %4349 = vmatmul.mubr.msk.f32.gmra.mxu1 %vm458_vm1, %v4875_v36  ;;  %4369 = vmatmul.mubr.msk.f32.gmra.mxu0 %vm458_vm1, %v4951_v58 }
 0x11d   : > { %4351 = vmatprep.mubr.msk.f32.mxu1 %vm458_vm1, %v4886_v39  ;;  %4371 = vmatprep.mubr.msk.f32.mxu0 %vm458_vm1, %v4957_v59 }
 0x11e   : > { %4381 = vmatprep.subr.mxu1 %v3848_v5  ;;  %4398 = vmatpush3.msra.mxu0 %v3862_v4 }
 0x11f   : > { %4382 = vmatpush3.msra.mxu1 %v3848_v5  ;;  %4399 = vmatprep.subr.mxu0 %v3861_v6 }
 0x120   : > { %4352 = vmatmul.mubr.msk.f32.gmra.mxu1 %vm458_vm1, %v4897_v42  ;;  %4372 = vmatmul.mubr.msk.f32.gmra.mxu0 %vm458_vm1, %v4969_v62 }
 0x121   : > { %4354 = vmatprep.mubr.msk.f32.mxu1 %vm458_vm1, %v4908_v45  ;;  %4374 = vmatprep.mubr.msk.f32.mxu0 %vm458_vm1, %v4978_v0 }
 0x122   : > { %4383 = vmatprep.subr.mxu1 %v3847_v7  ;;  %4400 = vmatpush3.msra.mxu0 %v3861_v6 }
 0x123   : > { %4384 = vmatpush3.msra.mxu1 %v3847_v7  ;;  %4401 = vmatprep.subr.mxu0 %v3860_v8 }
 0x124   : > { %4355 = vmatmul.mubr.msk.f32.gmra.mxu1 %vm458_vm1, %v1298_v9  ;;  %4375 = vmatmul.mubr.msk.f32.gmra.mxu0 %vm458_vm1, %v1448_v10 }
 0x125   : > { %4385 = vmatprep.mubr.msk.f32.mxu1 %vm458_vm1, %v4855_v30  ;;  %4402 = vmatpush3.msra.mxu0 %v3860_v8 }
 0x126   : > { %4405 = vmatprep.mubr.msk.f32.mxu0 %vm458_vm1, %v4851_v29  ;;  %4403 = vmatprep.subr.mxu0 %v3859_v11 }
 0x127   : > { %4404 = vmatpush3.msra.mxu0 %v3859_v11  ;;  %4417 = vmatprep.subr.mxu1 %v3874_v12 }
 0x128   : > { %4386 = vmatmul.mubr.msk.f32.vlgmr.msra.gmra.mxu1 %vm458_vm1, %v4865_v34  ;;  %4406 = vmatmul.mubr.msk.f32.vlgmr.msra.gmra.mxu0 %vm458_vm1, %v4863_v33 }
 0x129   : > { %4418 = vmatpush3.msra.mxu1 %v3874_v12  ;;  %4388 = vmatprep.mubr.msk.f32.mxu1 %vm458_vm1, %v4877_v37 }
 0x12a   : > { %4408 = vmatprep.mubr.msk.f32.mxu0 %vm458_vm1, %v4875_v36  ;;  %4419 = vmatprep.subr.mxu1 %v3873_v13 }
 0x12b   : > { %4420 = vmatpush3.msra.mxu1 %v3873_v13 }
 0x12c   : > { %4389 = vmatmul.mubr.msk.f32.gmra.mxu1 %vm458_vm1, %v4888_v40  ;;  %4409 = vmatmul.mubr.msk.f32.gmra.mxu0 %vm458_vm1, %v4886_v39 }
 0x12d   : > { %4391 = vmatprep.mubr.msk.f32.mxu1 %vm458_vm1, %v4899_v43  ;;  %4411 = vmatprep.mubr.msk.f32.mxu0 %vm458_vm1, %v4897_v42 }
 0x12e   : > { %4421 = vmatprep.subr.mxu1 %v3872_v14 }
 0x12f   : > { %4422 = vmatpush3.msra.mxu1 %v3872_v14 }
 0x130   : > { %4392 = vmatmul.mubr.msk.f32.gmra.mxu1 %vm458_vm1, %v4910_v46  ;;  %4412 = vmatmul.mubr.msk.f32.gmra.mxu0 %vm458_vm1, %v4908_v45 }
 0x131   : > { %4394 = vmatprep.mubr.msk.f32.mxu1 %vm458_vm1, %v4980_v1  ;;  %4414 = vmatprep.mubr.msk.f32.mxu0 %vm458_vm1, %v1298_v9 }
 0x132   : > { %4423 = vmatprep.subr.mxu1 %v3871_v15 }
 0x133   : > { %4424 = vmatpush3.msra.mxu1 %v3871_v15 }
 0x134   : > { %4395 = vmatmul.mubr.msk.f32.gmra.mxu1 %vm458_vm1, %v5078_v16  ;;  %4415 = vmatmul.mubr.msk.f32.gmra.mxu0 %vm458_vm1, %v5080_v17 }
 0x135   : > { %4425 = vmatprep.mubr.msk.f32.mxu1 %vm458_vm1, %v4933_v52 }
 0x138   : > { %4426 = vmatmul.mubr.msk.f32.vlgmr.msra.gmra.mxu1 %vm458_vm1, %v4939_v55 }
 0x139   : > { %4428 = vmatprep.mubr.msk.f32.mxu1 %vm458_vm1, %v4951_v58 }
 0x13c   : > { %4429 = vmatmul.mubr.msk.f32.gmra.mxu1 %vm458_vm1, %v4957_v59 }
 0x13d   : > { %4431 = vmatprep.mubr.msk.f32.mxu1 %vm458_vm1, %v4969_v62 }
 0x140   : > { %4432 = vmatmul.mubr.msk.f32.gmra.mxu1 %vm458_vm1, %v4978_v0 }
 0x141   : > { %4434 = vmatprep.mubr.msk.f32.mxu1 %vm458_vm1, %v1448_v10 }
 0x144   : > { %4435 = vmatmul.mubr.msk.f32.gmra.mxu1 %vm458_vm1, %v5099_v18 }
 0x145   : > { %4463 = vmatprep.mubr.msk.f32.mxu1 %vm458_vm1, %v4817_v53 }
 0x1b7   : > { %v4267_v19 = vpop.f32.mrf.mxu1 }
 0x1b8   : > { %v4287_v20 = vpop.f32.mrf.mxu0 }
 0x1b9   : > { %v823_v21 = vpop.f32.mrf.mxu1  ;;  %v958_v10 = vadd.f32 %v4287_v20, %v4267_v19 }
 0x1ba   : > { %v952_v22 = vpop.f32.mrf.mxu0 }
 0x1bb   : > { %v953_v5 = vadd.f32 %v952_v22, %v823_v21  ;;  %v2131_v22 = vld [vmem:[%s5552_s9 + $0x10] sm:$0x3] }
 0x1bc   : > { %v4270_v23 = vpop.f32.mrf.mxu1  ;;  %v4290_v24 = vpop.f32.mrf.mxu0  ;;  %4437 = vmatprep.subr.msk.mxu0 %vm552_vm0, %v2131_v22 }
 0x1bd   : > { %v968_v17 = vadd.f32 %v4290_v24, %v4270_v23  ;;  %4438 = vmatpush3.msk.msra.mxu0 %vm552_vm0, %v2131_v22 }
 0x1be   : > { %v833_v25 = vpop.f32.mrf.mxu1  ;;  %v962_v26 = vpop.f32.mrf.mxu0 }
 0x1bf   : > { %v963_v11 = vadd.f32 %v962_v26, %v833_v25 }
 0x1c0   : > { %v5105_v27 = vpop.f32.mrf.mxu1  ;;  %v5107_v28 = vpop.f32.mrf.mxu0 }
 0x1c1   : > { %v978_v23 = vadd.f32 %v5107_v28, %v5105_v27 }
 0x1c2   : > { %v843_v29 = vpop.f32.mrf.mxu1  ;;  %v972_v30 = vpop.f32.mrf.mxu0 }
 0x1c3   : > { %v973_v47 = vadd.f32 %v972_v30, %v843_v29 }
 0x1c4   : > { %v5109_v31 = vpop.f32.mrf.mxu1  ;;  %v5111_v32 = vpop.f32.mrf.mxu0 }
 0x1c5   : > { %v988_v27 = vadd.f32 %v5111_v32, %v5109_v31 }
 0x1c6   : > { %v853_v33 = vpop.f32.mrf.mxu1  ;;  %v982_v53 = vpop.f32.mrf.mxu0 }
 0x1c8   : > { %v4307_v34 = vpop.f32.mrf.mxu1  ;;  %v4327_v35 = vpop.f32.mrf.mxu0 }
 0x1c9   : > { %v1134_v14 = vadd.f32 %v4307_v34, %v958_v10 }
 0x1ca   : > { %v1094_v36 = vpop.f32.mrf.mxu1  ;;  %v1244_v37 = vpop.f32.mrf.mxu0 }
 0x1cb   : > { %v1133_v8 = vadd.f32 %v1094_v36, %v953_v5  ;;  %v1284_v19 = vadd.f32 %v4327_v35, %v1134_v14 }
 0x1cc   : > { %v4310_v38 = vpop.f32.mrf.mxu1  ;;  %v4330_v39 = vpop.f32.mrf.mxu0 }
 0x1cd   : > { %v1283_v15 = vadd.f32 %v1244_v37, %v1133_v8 }
 0x1ce   : > { %v1104_v40 = vpop.f32.mrf.mxu1  ;;  %v1254_v41 = vpop.f32.mrf.mxu0 }
 0x1cf   : > { %v1135_v18 = vadd.f32 %v1104_v40, %v963_v11 }
 0x1d0   : > { %v4313_v42 = vpop.f32.mrf.mxu1  ;;  %v5113_v43 = vpop.f32.mrf.mxu0 }
 0x1d1   : > { %v1285_v20 = vadd.f32 %v1254_v41, %v1135_v18  ;;  %v1138_v36 = vadd.f32 %v4313_v42, %v978_v23 }
 0x1d2   : > { %v1114_v44 = vpop.f32.mrf.mxu1  ;;  %v1264_v45 = vpop.f32.mrf.mxu0 }
 0x1d3   : > { %v1137_v25 = vadd.f32 %v1114_v44, %v973_v47  ;;  %v2130_v47 = vld [vmem:[%s5552_s9 + $0x8] sm:$0xff]  ;;  %v1288_v41 = vadd.f32 %v5113_v43, %v1138_v36 }
 0x1d4   : > { %v5115_v46 = vpop.f32.mrf.mxu1  ;;  %v5117_v48 = vpop.f32.mrf.mxu0  ;;  %4439 = vmatprep.subr.mxu0 %v2130_v47 }
 0x1d5   : > { %v1287_v18 = vadd.f32 %v1264_v45, %v1137_v25  ;;  %4440 = vmatpush3.msra.mxu0 %v2130_v47  ;;  %v1140_v42 = vadd.f32 %v5115_v46, %v988_v27 }
 0x1d6   : > { %v1124_v49 = vpop.f32.mrf.mxu1  ;;  %v5119_v50 = vpop.f32.mrf.mxu0 }
 0x1d7   : > { %v1290_v43 = vadd.f32 %v5117_v48, %v1140_v42 }
 0x1d8   : > { %v4347_v51 = vpop.f32.mrf.mxu1  ;;  %v4367_v52 = vpop.f32.mrf.mxu0 }
 0x1d9   : > { %v1434_v26 = vadd.f32 %v4347_v51, %v1284_v19 }
 0x1da   : > { %v1394_v55 = vpop.f32.mrf.mxu1  ;;  %v1544_v56 = vpop.f32.mrf.mxu0 }
 0x1db   : > { %v1433_v54 = vadd.f32 %v1394_v55, %v1283_v15 }
 0x1dc   : > { %v4350_v57 = vpop.f32.mrf.mxu1  ;;  %v5121_v58 = vpop.f32.mrf.mxu0 }
 0x1dd   : > { %v1583_v29 = vadd.f32 %v1544_v56, %v1433_v54  ;;  %v1584_v54 = vadd.f32 %v4367_v52, %v1434_v26 }
 0x1de   : > { %v1404_v59 = vpop.f32.mrf.mxu1  ;;  %v1554_v60 = vpop.f32.mrf.mxu0 }
 0x1df   : > { %v1435_v30 = vadd.f32 %v1404_v59, %v1285_v20 }
 0x1e0   : > { %v5123_v61 = vpop.f32.mrf.mxu1  ;;  %v5125_v62 = vpop.f32.mrf.mxu0 }
 0x1e1   : > { %v1438_v31 = vadd.f32 %v5123_v61, %v1288_v41 }
 0x1e2   : > { %v1414_v63 = vpop.f32.mrf.mxu1  ;;  %v5127_v0 = vpop.f32.mrf.mxu0 }
 0x1e3   : > { %v1588_v61 = vadd.f32 %v5125_v62, %v1438_v31 }
 0x1e4   : > { %v5129_v1 = vpop.f32.mrf.mxu1  ;;  %v5131_v2 = vpop.f32.mrf.mxu0 }
 0x1e5   : > { %5567 = vst [vmem:[#allocation9_spill] sm:$0xff] %v5129_v1  ;;  %5568 = vst [vmem:[#allocation10_spill] sm:$0xff] %v5131_v2  ;;  %v1136_v2 = vadd.f32 %v4310_v38, %v968_v17  ;;  %v983_v17 = vadd.f32 %v982_v53, %v853_v33  ;;  %v1585_v53 = vadd.f32 %v1554_v60, %v1435_v30 }
 0x1e6   : > { %v1424_v3 = vpop.f32.mrf.mxu1  ;;  %v5133_v4 = vpop.f32.mrf.mxu0 }
 0x1e7   : > { %v1286_v34 = vadd.f32 %v4330_v39, %v1136_v2  ;;  %v1139_v35 = vadd.f32 %v1124_v49, %v983_v17  ;;  %v1437_v39 = vadd.f32 %v1414_v63, %v1287_v18 }
 0x1e8   : > { %v4387_v6 = vpop.f32.mrf.mxu1  ;;  %v5135_v7 = vpop.f32.mrf.mxu0 }
 0x1e9   : > { %v1436_v28 = vadd.f32 %v4350_v57, %v1286_v34  ;;  %v1289_v45 = vadd.f32 %v5119_v50, %v1139_v35  ;;  %v1735_v49 = vadd.f32 %v4387_v6, %v1584_v54  ;;  %v1587_v52 = vadd.f32 %v5127_v0, %v1437_v39  ;;  %v2129_v50 = vld [vmem:[%s5552_s9] sm:$0xff] }
 0x1ea   : > { %v1695_v9 = vpop.f32.mrf.mxu1  ;;  %v1845_v12 = vpop.f32.mrf.mxu0  ;;  %4441 = vmatprep.subr.mxu0 %v2129_v50 }
 0x1eb   : > { %v1734_v40 = vadd.f32 %v1695_v9, %v1583_v29  ;;  %v1586_v59 = vadd.f32 %v5121_v58, %v1436_v28  ;;  %v1439_v57 = vadd.f32 %v1424_v3, %v1289_v45  ;;  %4442 = vmatpush3.msra.mxu0 %v2129_v50 }
 0x1ec   : > { %v4390_v13 = vpop.f32.mrf.mxu1  ;;  %v5137_v1 = vpop.f32.mrf.mxu0  ;;  %v5569_v48 = vld [vmem:[#allocation9_spill] sm:$0xff]  ;;  %v5570_v22 = vld [vmem:[#allocation10_spill] sm:$0xff] }
 0x1ed   : > { %v1884_v55 = vadd.f32 %v1845_v12, %v1734_v40  ;;  %v1737_v63 = vadd.f32 %v4390_v13, %v1586_v59  ;;  %v1440_v6 = vadd.f32 %v5569_v48, %v1290_v43  ;;  %v1589_v8 = vadd.f32 %v5133_v4, %v1439_v57  ;;  %v3884_v40 = vld [vmem:[%s5551_s8] ss:$0 sm:$0xff] }
 0x1ee   : > { %v1705_v16 = vpop.f32.mrf.mxu1  ;;  %v1855_v37 = vpop.f32.mrf.mxu0 }
 0x1ef   : > { %v1736_v56 = vadd.f32 %v1705_v16, %v1585_v53  ;;  %v1885_v16 = vadd.f32 %v5135_v7, %v1735_v49  ;;  %v1887_v11 = vadd.f32 %v5137_v1, %v1737_v63  ;;  %v1590_v19 = vadd.f32 %v5570_v22, %v1440_v6  ;;  %v3919_v22 = vld [vmem:[%s5555_s12 + $0x58] sm:$0xff] }
 0x1f0   : > { %v5139_v21 = vpop.f32.mrf.mxu1  ;;  %v4413_v44 = vpop.f32.mrf.mxu0 }
 0x1f1   : > { %v1886_v5 = vadd.f32 %v1855_v37, %v1736_v56  ;;  %v1739_v12 = vadd.f32 %v5139_v21, %v1588_v61 }
 0x1f2   : > { %v1715_v24 = vpop.f32.mrf.mxu1  ;;  %v1865_v46 = vpop.f32.mrf.mxu0 }
 0x1f3   : > { %v1738_v58 = vadd.f32 %v1715_v24, %v1587_v52  ;;  %v1889_v23 = vadd.f32 %v4413_v44, %v1739_v12  ;;  %v2321_v12 = vld [vmem:[%s5555_s12 + $0x10] sm:$0xff] }
 0x1f4   : > { %v4396_v38 = vpop.f32.mrf.mxu1  ;;  %v4416_v0 = vpop.f32.mrf.mxu0 }
 0x1f5   : > { %v1888_v13 = vadd.f32 %v1865_v46, %v1738_v58  ;;  %v1741_v24 = vadd.f32 %v4396_v38, %v1590_v19  ;;  %v3883_v38 = vld [vmem:[%s5550_s7] ss:$0 sm:$0xff]  ;;  %v3931_v19 = vld [vmem:[%s5555_s12 + $0x78] sm:$0xff] }
 0x1f6   : > { %v1725_v33 = vpop.f32.mrf.mxu1  ;;  %v1875_v62 = vpop.f32.mrf.mxu0 }
 0x1f7   : > { %v1740_v14 = vadd.f32 %v1725_v33, %v1589_v8  ;;  %v1891_v29 = vadd.f32 %v4416_v0, %v1741_v24 }
 0x1f8   : > { %v4427_v51 = vpop.f32.mrf.mxu1 }
 0x1f9   : > { %v2035_v9 = vadd.f32 %v4427_v51, %v1885_v16  ;;  %v1890_v17 = vadd.f32 %v1875_v62, %v1740_v14  ;;  %v2320_v14 = vld [vmem:[%s5555_s12 + $0x8] sm:$0xff]  ;;  %v3896_v62 = vld [vmem:[%s5555_s12 + $0x20] sm:$0xff] }
 0x1fa   : > { %v1995_v32 = vpop.f32.mrf.mxu1 }
 0x1fb   : > { %v2034_v60 = vadd.f32 %v1995_v32, %v1884_v55 }
 0x1fc   : > { %v4430_v2 = vpop.f32.mrf.mxu1 }
 0x1fd   : > { %2050 = vrot.lane.b32.xlu0 %v2034_v60, %s4655_s20  ;;  %v2037_v20 = vadd.f32 %v4430_v2, %v1887_v11  ;;  %v2322_v11 = vld [vmem:[%s5555_s12 + $0x18] sm:$0xff] }
 0x1fe   : > { %v2005_v3 = vpop.f32.mrf.mxu1  ;;  %4475 = vmatprep.subr.mxu0 %v2322_v11 }
 0x1ff   : > { %v2036_v10 = vadd.f32 %v2005_v3, %v1886_v5 }
 0x200   : > { %v4433_v7 = vpop.f32.mrf.mxu1 }
 0x201   : > { %2052 = vrot.lane.b32.xlu0 %v2035_v9, %s4655_s20  ;;  %2054 = vrot.lane.b32.xlu1 %v2036_v10, %s4655_s20  ;;  %v2039_v21 = vadd.f32 %v4433_v7, %v1889_v23  ;;  %v5571_v9 = vld [vmem:[#allocation4_spill] sm:$0xff]  ;;  %v3899_v10 = vld [vmem:[%s5555_s12 + $0x38] sm:$0xff]  ;;  %v3898_v7 = vld [vmem:[%s5555_s12 + $0x30] sm:$0xff] }
 0x202   : > { %v2015_v15 = vpop.f32.mrf.mxu1  ;;  %4455 = vmatprep.subr.mxu1 %v3899_v10 }
 0x203   : > { %v2038_v25 = vadd.f32 %v2015_v15, %v1888_v13  ;;  %4456 = vmatpush3.msra.mxu1 %v3899_v10  ;;  %v3897_v13 = vld [vmem:[%s5555_s12 + $0x28] sm:$0xff]  ;;  %v2319_v15 = vld [vmem:[%s5555_s12] sm:$0xff]  ;;  %v3943_v10 = vld [vmem:[%s5555_s12 + $0x98] sm:$0xff] }
 0x204   : > { %v4436_v4 = vpop.f32.mrf.mxu1  ;;  %4457 = vmatprep.subr.mxu1 %v3898_v7 }
 0x205   : > { %2056 = vrot.lane.b32.xlu1 %v2037_v20, %s4655_s20  ;;  %2058 = vrot.lane.b32.xlu0 %v2038_v25, %s4655_s20  ;;  %v2041_v30 = vadd.f32 %v4436_v4, %v1891_v29  ;;  %v3894_v20 = vld [vmem:[%s5553_s10] ss:$0 sm:$0xff] }
 0x206   : > { %v2025_v1 = vpop.f32.mrf.mxu1  ;;  %4458 = vmatpush3.msra.mxu1 %v3898_v7  ;;  %v3895_v4 = vld [vmem:[%s5554_s11] ss:$0 sm:$0xff]  ;;  %v5572_v7 = vld [vmem:[#allocation5_spill] sm:$0xff] }
 0x207   : > { %v2040_v26 = vadd.f32 %v2025_v1, %v1890_v17  ;;  %4459 = vmatprep.subr.mxu1 %v3897_v13 }
 0x208   : > { %4460 = vmatpush3.msra.mxu1 %v3897_v13  ;;  %v3942_v13 = vld [vmem:[%s5555_s12 + $0x90] sm:$0xff] }
 0x209   : > { %2060 = vrot.lane.b32.xlu1 %v2039_v21, %s4655_s20  ;;  %2062 = vrot.lane.b32.xlu0 %v2040_v26, %s4655_s20 }
 0x20a   : > { %4461 = vmatprep.subr.mxu1 %v3896_v62 }
 0x20b   : > { %4462 = vmatpush3.msra.mxu1 %v3896_v62 }
 0x20c   : > { %4495 = vmatprep.subr.mxu1 %v3919_v22 }
 0x20d   : > { %2064 = vrot.lane.b32.xlu1 %v2041_v30, %s4655_s20  ;;  %s440_s20 = scalar_lea.vmem %s5556_s13, %s4002_s14 }
 0x26f   : > { %v2051_v34 = vpop.permute.xlu0 %2050 }
 0x270   : > { %2075 = vst.msk [vmem:[#allocation2] sm:$0xff] %vm2074_vm4, %v2051_v34 }
 0x273   : > { %v2053_v36 = vpop.permute.xlu0 %2052  ;;  %v2055_v37 = vpop.permute.xlu1 %2054 }
 0x274   : > { %2076 = vst.msk [vmem:[#allocation2 + $0x8] sm:$0xff] %vm2074_vm4, %v2053_v36  ;;  %2077 = vst.msk [vmem:[#allocation2 + $0x10] sm:$0xff] %vm2074_vm4, %v2055_v37 }
 0x277   : > { %v2057_v47 = vpop.permute.xlu1 %2056  ;;  %v2059_v18 = vpop.permute.xlu0 %2058  ;;  %v2083_v35 = vld [vmem:[#allocation2] sm:$0xff] }
 0x278   : > { %2078 = vst.msk [vmem:[#allocation2 + $0x18] sm:$0xff] %vm2074_vm4, %v2057_v47  ;;  %2079 = vst.msk [vmem:[#allocation2 + $0x20] sm:$0xff] %vm2074_vm4, %v2059_v18  ;;  %v2098_v27 = vmul.f32 %v3883_v38, %v2083_v35 }
 0x27a   : > { %v2113_v28 = vadd.f32 %v3884_v40, %v2098_v27 }
 0x27b   : > { %v2061_v33 = vpop.permute.xlu1 %2060  ;;  %v2063_v54 = vpop.permute.xlu0 %2062  ;;  %v2084_v53 = vld [vmem:[#allocation2 + $0x8] sm:$0xff]  ;;  %v2085_v39 = vld [vmem:[#allocation2 + $0x10] sm:$0xff] }
 0x27c   : > { %2080 = vst.msk [vmem:[#allocation2 + $0x28] sm:$0xff] %vm2074_vm4, %v2061_v33  ;;  %2081 = vst.msk [vmem:[#allocation2 + $0x30] sm:$0xff] %vm2074_vm4, %v2063_v54  ;;  %v2121_v41 = vmax.f32 %v2113_v28, 0.0  ;;  %v2099_v42 = vmul.f32 %v3883_v38, %v2084_v53  ;;  %v2100_v44 = vmul.f32 %v3883_v38, %v2085_v39 }
 0x27e   : > { %4443 = vmatprep.mubr.msk.f32.mxu0 %vm2132_vm5, %v2121_v41  ;;  %v2114_v51 = vadd.f32 %v3884_v40, %v2099_v42  ;;  %v2115_v45 = vadd.f32 %v3884_v40, %v2100_v44 }
 0x27f   : > { %v2065_v49 = vpop.permute.xlu1 %2064  ;;  %v2086_v55 = vld [vmem:[#allocation2 + $0x18] sm:$0xff]  ;;  %v2087_v56 = vld [vmem:[#allocation2 + $0x20] sm:$0xff] }
 0x280   : > { %2082 = vst.msk [vmem:[#allocation2 + $0x38] sm:$0xff] %vm2074_vm4, %v2065_v49  ;;  %v2122_v59 = vmax.f32 %v2114_v51, 0.0  ;;  %v2123_v31 = vmax.f32 %v2115_v45, 0.0  ;;  %v2101_v32 = vmul.f32 %v3883_v38, %v2086_v55  ;;  %v2102_v52 = vmul.f32 %v3883_v38, %v2087_v56 }
 0x282   : > { %4444 = vmatmul.mubr.msk.f32.vlgmr.msra.gmra.mxu0 %vm2132_vm5, %v2122_v59  ;;  %v2116_v57 = vadd.f32 %v3884_v40, %v2101_v32  ;;  %v2117_v60 = vadd.f32 %v3884_v40, %v2102_v52  ;;  %v3918_v59 = vld [vmem:[%s5555_s12 + $0x50] sm:$0xff] }
 0x283   : > { %4446 = vmatprep.mubr.msk.f32.mxu0 %vm2132_vm5, %v2123_v31  ;;  %v2088_v43 = vld [vmem:[#allocation2 + $0x28] sm:$0xff]  ;;  %v2089_v63 = vld [vmem:[#allocation2 + $0x30] sm:$0xff]  ;;  %4476 = vmatpush3.msra.mxu0 %v2322_v11  ;;  %v3955_v11 = vld [vmem:[%s5555_s12 + $0xb8] sm:$0xff] }
 0x284   : > { %v2124_v46 = vmax.f32 %v2116_v57, 0.0  ;;  %v2125_v2 = vmax.f32 %v2117_v60, 0.0  ;;  %v2103_v50 = vmul.f32 %v3883_v38, %v2088_v43  ;;  %v2104_v16 = vmul.f32 %v3883_v38, %v2089_v63  ;;  %4477 = vmatprep.subr.mxu0 %v2321_v12  ;;  %v3917_v43 = vld [vmem:[%s5555_s12 + $0x48] sm:$0xff] }
 0x285   : > { %4478 = vmatpush3.msra.mxu0 %v2321_v12 }
 0x286   : > { %4447 = vmatmul.mubr.msk.f32.gmra.mxu0 %vm2132_vm5, %v2124_v46  ;;  %v2118_v5 = vadd.f32 %v3884_v40, %v2103_v50  ;;  %v2119_v58 = vadd.f32 %v3884_v40, %v2104_v16  ;;  %4479 = vmatprep.subr.mxu0 %v2320_v14 }
 0x287   : > { %4449 = vmatprep.mubr.msk.f32.mxu0 %vm2132_vm5, %v2125_v2  ;;  %v2090_v61 = vld [vmem:[#allocation2 + $0x38] sm:$0xff]  ;;  %4480 = vmatpush3.msra.mxu0 %v2320_v14  ;;  %v3930_v2 = vld [vmem:[%s5555_s12 + $0x70] sm:$0xff] }
 0x288   : > { %v2126_v0 = vmax.f32 %v2118_v5, 0.0  ;;  %v2127_v3 = vmax.f32 %v2119_v58, 0.0  ;;  %v2105_v48 = vmul.f32 %v3883_v38, %v2090_v61  ;;  %4481 = vmatprep.subr.mxu0 %v2319_v15  ;;  %v3916_v5 = vld [vmem:[%s5555_s12 + $0x40] sm:$0xff] }
 0x289   : > { %4482 = vmatpush3.msra.mxu0 %v2319_v15  ;;  %v3941_v15 = vld [vmem:[%s5555_s12 + $0x88] sm:$0xff] }
 0x28a   : > { %4450 = vmatmul.mubr.msk.f32.gmra.mxu0 %vm2132_vm5, %v2126_v0  ;;  %v2120_v6 = vadd.f32 %v3884_v40, %v2105_v48  ;;  %4515 = vmatprep.subr.mxu0 %v3931_v19  ;;  %v3929_v0 = vld [vmem:[%s5555_s12 + $0x68] sm:$0xff] }
 0x28b   : > { %4452 = vmatprep.mubr.msk.f32.mxu0 %vm2132_vm5, %v2127_v3 }
 0x28c   : > { %v2128_v8 = vmax.f32 %v2120_v6, 0.0  ;;  %v3928_v6 = vld [vmem:[%s5555_s12 + $0x60] sm:$0xff] }
 0x28e   : > { %4453 = vmatmul.mubr.msk.f32.gmra.mxu0 %vm2132_vm5, %v2128_v8 }
 0x28f   : > { %4483 = vmatprep.mubr.msk.f32.mxu0 %vm458_vm1, %v5571_v9 }
 0x342   : > { %v4445_v25 = vpop.f32.mrf.mxu0 }
 0x343   : > { %v2273_v23 = vmul.f32 %v4445_v25, %v3894_v20  ;;  %v3940_v25 = vld [vmem:[%s5555_s12 + $0x80] sm:$0xff] }
 0x344   : > { %v2226_v24 = vpop.f32.mrf.mxu0 }
 0x345   : > { %v2288_v17 = vadd.f32 %v3895_v4, %v2273_v23  ;;  %v2272_v1 = vmul.f32 %v3894_v20, %v2226_v24  ;;  %v3952_v24 = vld [vmem:[%s5555_s12 + $0xa0] sm:$0xff] }
 0x346   : > { %v4448_v21 = vpop.f32.mrf.mxu0 }
 0x347   : > { %v2296_v26 = vmax.f32 %v2288_v17, 0.0  ;;  %v2287_v29 = vadd.f32 %v3895_v4, %v2272_v1  ;;  %v2275_v30 = vmul.f32 %v4448_v21, %v3894_v20  ;;  %v3967_v21 = vld [vmem:[%s5555_s12 + $0xd8] sm:$0xff] }
 0x348   : > { %v2236_v34 = vpop.f32.mrf.mxu0 }
 0x349   : > { %2304 = vst.msk [vmem:[#allocation3 + $0x21] sm:$0xff] %vm458_vm1, %v2296_v26  ;;  %v2295_v36 = vmax.f32 %v2287_v29, 0.0  ;;  %v2290_v37 = vadd.f32 %v3895_v4, %v2275_v30  ;;  %v2274_v38 = vmul.f32 %v3894_v20, %v2236_v34  ;;  %v3966_v26 = vld [vmem:[%s5555_s12 + $0xd0] sm:$0xff]  ;;  %v3979_v29 = vld [vmem:[%s5555_s12 + $0xf8] sm:$0xff]  ;;  %v3965_v30 = vld [vmem:[%s5555_s12 + $0xc8] sm:$0xff] }
 0x34a   : > { %v4451_v47 = vpop.f32.mrf.mxu0  ;;  %v3978_v34 = vld [vmem:[%s5555_s12 + $0xf0] sm:$0xff] }
 0x34b   : > { %2303 = vst.msk [vmem:[#allocation3 + $0x11] sm:$0xff] %vm458_vm1, %v2295_v36  ;;  %v2298_v18 = vmax.f32 %v2290_v37, 0.0  ;;  %v2289_v35 = vadd.f32 %v3895_v4, %v2274_v38  ;;  %v2277_v40 = vmul.f32 %v4451_v47, %v3894_v20  ;;  %v3964_v36 = vld [vmem:[%s5555_s12 + $0xc0] sm:$0xff]  ;;  %v3977_v37 = vld [vmem:[%s5555_s12 + $0xe8] sm:$0xff] }
 0x34c   : > { %v2246_v27 = vpop.f32.mrf.mxu0 }
 0x34d   : > { %2306 = vst.msk [vmem:[#allocation3 + $0x41] sm:$0xff] %vm458_vm1, %v2298_v18  ;;  %v2297_v28 = vmax.f32 %v2289_v35, 0.0  ;;  %v2292_v33 = vadd.f32 %v3895_v4, %v2277_v40  ;;  %v2276_v54 = vmul.f32 %v3894_v20, %v2246_v27  ;;  %v3976_v18 = vld [vmem:[%s5555_s12 + $0xe0] sm:$0xff]  ;;  %v3991_v35 = vld [vmem:[%s5555_s12 + $0x118] sm:$0xff]  ;;  %v3990_v40 = vld [vmem:[%s5555_s12 + $0x110] sm:$0xff] }
 0x34e   : > { %v4454_v53 = vpop.f32.mrf.mxu0  ;;  %v3989_v27 = vld [vmem:[%s5555_s12 + $0x108] sm:$0xff] }
 0x34f   : > { %2305 = vst.msk [vmem:[#allocation3 + $0x31] sm:$0xff] %vm458_vm1, %v2297_v28  ;;  %v2300_v39 = vmax.f32 %v2292_v33, 0.0  ;;  %v2291_v41 = vadd.f32 %v3895_v4, %v2276_v54  ;;  %v2279_v42 = vmul.f32 %v4454_v53, %v3894_v20  ;;  %v3988_v28 = vld [vmem:[%s5555_s12 + $0x100] sm:$0xff]  ;;  %v5573_v33 = vld [vmem:[#allocation6_spill] sm:$0xff]  ;;  %v5574_v54 = vld [vmem:[#allocation7_spill] sm:$0xff] }
 0x350   : > { %v2256_v44 = vpop.f32.mrf.mxu0  ;;  %v5252_v52 = vld [vmem:[#allocation3 + $0x21] sm:$0xff] }
 0x351   : > { %2308 = vst.msk [vmem:[#allocation3 + $0x61] sm:$0xff] %vm458_vm1, %v2300_v39  ;;  %v2299_v51 = vmax.f32 %v2291_v41, 0.0  ;;  %v2294_v45 = vadd.f32 %v3895_v4, %v2279_v42  ;;  %v2278_v49 = vmul.f32 %v3894_v20, %v2256_v44  ;;  %v5256_v57 = vld [vmem:[#allocation3 + $0x20] sm:$0xff] }
 0x352   : > { %v5243_v55 = vld [vmem:[#allocation3 + $0x11] sm:$0xff]  ;;  %v5332_v14 = vld [vmem:[#allocation3 + $0x22] sm:$0xff] }
 0x353   : > { %v2312_v56 = vld [vmem:[#allocation3 + $0x10] sm:$0xff]  ;;  %2307 = vst.msk [vmem:[#allocation3 + $0x51] sm:$0xff] %vm458_vm1, %v2299_v51  ;;  %v2302_v31 = vmax.f32 %v2294_v45, 0.0  ;;  %v2293_v32 = vadd.f32 %v3895_v4, %v2278_v49  ;;  %4464 = vmatmul.mubr.msk.f32.vlgmr.msra.gmra.mxu1 %vm458_vm1, %v5243_v55  ;;  %v3953_v4 = vld [vmem:[%s5555_s12 + $0xa8] sm:$0xff]  ;;  %v5575_v53 = vld [vmem:[#allocation8_spill] sm:$0xff] }
 0x354   : > { %4484 = vmatmul.mubr.msk.f32.vlgmr.msra.gmra.mxu0 %vm458_vm1, %v2312_v56  ;;  %4496 = vmatpush3.msra.mxu1 %v3919_v22  ;;  %v5276_v50 = vld [vmem:[#allocation3 + $0x41] sm:$0xff]  ;;  %v2595_v12 = vld [vmem:[#allocation3 + $0x12] sm:$0xff] }
 0x355   : > { %4466 = vmatprep.mubr.msk.f32.mxu1 %vm458_vm1, %v5252_v52  ;;  %2310 = vst.msk [vmem:[#allocation3 + $0x81] sm:$0xff] %vm458_vm1, %v2302_v31  ;;  %v2301_v60 = vmax.f32 %v2293_v32, 0.0  ;;  %4486 = vmatprep.mubr.msk.f32.mxu0 %vm458_vm1, %v5256_v57  ;;  %v5278_v16 = vld [vmem:[#allocation3 + $0x40] sm:$0xff]  ;;  %v3954_v22 = vld [vmem:[%s5555_s12 + $0xb0] sm:$0xff] }
 0x356   : > { %4497 = vmatprep.subr.mxu1 %v3918_v59  ;;  %v5264_v63 = vld [vmem:[#allocation3 + $0x31] sm:$0xff]  ;;  %4516 = vmatpush3.msra.mxu0 %v3931_v19  ;;  %v5350_v19 = vld [vmem:[#allocation3 + $0x42] sm:$0xff] }
 0x357   : > { %v5266_v46 = vld [vmem:[#allocation3 + $0x30] sm:$0xff]  ;;  %4498 = vmatpush3.msra.mxu1 %v3918_v59  ;;  %2309 = vst.msk [vmem:[#allocation3 + $0x71] sm:$0xff] %vm458_vm1, %v2301_v60  ;;  %4517 = vmatprep.subr.mxu0 %v3930_v2 }
 0x358   : > { %4467 = vmatmul.mubr.msk.f32.gmra.mxu1 %vm458_vm1, %v5264_v63  ;;  %4487 = vmatmul.mubr.msk.f32.gmra.mxu0 %vm458_vm1, %v5266_v46  ;;  %v5298_v3 = vld [vmem:[#allocation3 + $0x61] sm:$0xff]  ;;  %v5338_v62 = vld [vmem:[#allocation3 + $0x32] sm:$0xff] }
 0x359   : > { %4469 = vmatprep.mubr.msk.f32.mxu1 %vm458_vm1, %v5276_v50  ;;  %4489 = vmatprep.mubr.msk.f32.mxu0 %vm458_vm1, %v5278_v16  ;;  %v5300_v48 = vld [vmem:[#allocation3 + $0x60] sm:$0xff] }
 0x35a   : > { %4499 = vmatprep.subr.mxu1 %v3917_v43  ;;  %v5287_v58 = vld [vmem:[#allocation3 + $0x51] sm:$0xff]  ;;  %4518 = vmatpush3.msra.mxu0 %v3930_v2  ;;  %v5368_v23 = vld [vmem:[#allocation3 + $0x62] sm:$0xff] }
 0x35b   : > { %v5289_v61 = vld [vmem:[#allocation3 + $0x50] sm:$0xff]  ;;  %4500 = vmatpush3.msra.mxu1 %v3917_v43  ;;  %4519 = vmatprep.subr.mxu0 %v3929_v0 }
 0x35c   : > { %4470 = vmatmul.mubr.msk.f32.gmra.mxu1 %vm458_vm1, %v5287_v58  ;;  %4490 = vmatmul.mubr.msk.f32.gmra.mxu0 %vm458_vm1, %v5289_v61  ;;  %v5356_v20 = vld [vmem:[#allocation3 + $0x52] sm:$0xff]  ;;  %v5379_v1 = vld [vmem:[#allocation3 + $0x80] sm:$0xff] }
 0x35d   : > { %4472 = vmatprep.mubr.msk.f32.mxu1 %vm458_vm1, %v5298_v3  ;;  %4492 = vmatprep.mubr.msk.f32.mxu0 %vm458_vm1, %v5300_v48  ;;  %v2901_v38 = vld [vmem:[#allocation3 + $0x81] sm:$0xff] }
 0x35e   : > { %4501 = vmatprep.subr.mxu1 %v3916_v5  ;;  %v5309_v8 = vld [vmem:[#allocation3 + $0x71] sm:$0xff]  ;;  %4520 = vmatpush3.msra.mxu0 %v3929_v0  ;;  %v3051_v47 = vld [vmem:[#allocation3 + $0x82] sm:$0xff] }
 0x35f   : > { %v5311_v9 = vld [vmem:[#allocation3 + $0x70] sm:$0xff]  ;;  %4502 = vmatpush3.msra.mxu1 %v3916_v5  ;;  %4521 = vmatprep.subr.mxu0 %v3928_v6 }
 0x360   : > { %4473 = vmatmul.mubr.msk.f32.gmra.mxu1 %vm458_vm1, %v5309_v8  ;;  %4493 = vmatmul.mubr.msk.f32.gmra.mxu0 %vm458_vm1, %v5311_v9  ;;  %v5377_v17 = vld [vmem:[#allocation3 + $0x72] sm:$0xff] }
 0x361   : > { %4523 = vmatprep.mubr.msk.f32.mxu0 %vm458_vm1, %v2312_v56  ;;  %4503 = vmatprep.mubr.msk.f32.mxu1 %vm458_vm1, %v5572_v7 }
 0x362   : > { %4522 = vmatpush3.msra.mxu0 %v3928_v6  ;;  %4535 = vmatprep.subr.mxu1 %v3943_v10 }
 0x363   : > { %4555 = vmatprep.subr.mxu0 %v3955_v11 }
 0x364   : > { %4504 = vmatmul.mubr.msk.f32.vlgmr.msra.gmra.mxu1 %vm458_vm1, %v2595_v12  ;;  %4524 = vmatmul.mubr.msk.f32.vlgmr.msra.gmra.mxu0 %vm458_vm1, %v5256_v57 }
 0x365   : > { %4536 = vmatpush3.msra.mxu1 %v3943_v10  ;;  %4506 = vmatprep.mubr.msk.f32.mxu1 %vm458_vm1, %v5332_v14 }
 0x366   : > { %4526 = vmatprep.mubr.msk.f32.mxu0 %vm458_vm1, %v5266_v46  ;;  %4537 = vmatprep.subr.mxu1 %v3942_v13 }
 0x367   : > { %4538 = vmatpush3.msra.mxu1 %v3942_v13  ;;  %4556 = vmatpush3.msra.mxu0 %v3955_v11 }
 0x368   : > { %4507 = vmatmul.mubr.msk.f32.gmra.mxu1 %vm458_vm1, %v5338_v62  ;;  %4527 = vmatmul.mubr.msk.f32.gmra.mxu0 %vm458_vm1, %v5278_v16 }
 0x369   : > { %4509 = vmatprep.mubr.msk.f32.mxu1 %vm458_vm1, %v5350_v19  ;;  %4529 = vmatprep.mubr.msk.f32.mxu0 %vm458_vm1, %v5289_v61 }
 0x36a   : > { %4539 = vmatprep.subr.mxu1 %v3941_v15  ;;  %4557 = vmatprep.subr.mxu0 %v3954_v22 }
 0x36b   : > { %4540 = vmatpush3.msra.mxu1 %v3941_v15  ;;  %4558 = vmatpush3.msra.mxu0 %v3954_v22 }
 0x36c   : > { %4510 = vmatmul.mubr.msk.f32.gmra.mxu1 %vm458_vm1, %v5356_v20  ;;  %4530 = vmatmul.mubr.msk.f32.gmra.mxu0 %vm458_vm1, %v5300_v48 }
 0x36d   : > { %4512 = vmatprep.mubr.msk.f32.mxu1 %vm458_vm1, %v5368_v23  ;;  %4532 = vmatprep.mubr.msk.f32.mxu0 %vm458_vm1, %v5311_v9 }
 0x36e   : > { %4541 = vmatprep.subr.mxu1 %v3940_v25  ;;  %4559 = vmatprep.subr.mxu0 %v3953_v4 }
 0x36f   : > { %4542 = vmatpush3.msra.mxu1 %v3940_v25  ;;  %4560 = vmatpush3.msra.mxu0 %v3953_v4 }
 0x370   : > { %4513 = vmatmul.mubr.msk.f32.gmra.mxu1 %vm458_vm1, %v5377_v17  ;;  %4533 = vmatmul.mubr.msk.f32.gmra.mxu0 %vm458_vm1, %v5379_v1 }
 0x371   : > { %4543 = vmatprep.mubr.msk.f32.mxu1 %vm458_vm1, %v5243_v55  ;;  %4563 = vmatprep.mubr.msk.f32.mxu0 %vm458_vm1, %v2595_v12 }
 0x372   : > { %4561 = vmatprep.subr.mxu0 %v3952_v24  ;;  %4575 = vmatprep.subr.mxu1 %v3967_v21 }
 0x373   : > { %4562 = vmatpush3.msra.mxu0 %v3952_v24 }
 0x374   : > { %4544 = vmatmul.mubr.msk.f32.vlgmr.msra.gmra.mxu1 %vm458_vm1, %v5252_v52  ;;  %4564 = vmatmul.mubr.msk.f32.vlgmr.msra.gmra.mxu0 %vm458_vm1, %v5332_v14 }
 0x375   : > { %4576 = vmatpush3.msra.mxu1 %v3967_v21  ;;  %4546 = vmatprep.mubr.msk.f32.mxu1 %vm458_vm1, %v5264_v63 }
 0x376   : > { %4566 = vmatprep.mubr.msk.f32.mxu0 %vm458_vm1, %v5338_v62  ;;  %4577 = vmatprep.subr.mxu1 %v3966_v26 }
 0x377   : > { %4578 = vmatpush3.msra.mxu1 %v3966_v26  ;;  %4595 = vmatprep.subr.mxu0 %v3979_v29 }
 0x378   : > { %4547 = vmatmul.mubr.msk.f32.gmra.mxu1 %vm458_vm1, %v5276_v50  ;;  %4567 = vmatmul.mubr.msk.f32.gmra.mxu0 %vm458_vm1, %v5350_v19 }
 0x379   : > { %4549 = vmatprep.mubr.msk.f32.mxu1 %vm458_vm1, %v5287_v58  ;;  %4569 = vmatprep.mubr.msk.f32.mxu0 %vm458_vm1, %v5356_v20 }
 0x37a   : > { %4579 = vmatprep.subr.mxu1 %v3965_v30  ;;  %4596 = vmatpush3.msra.mxu0 %v3979_v29 }
 0x37b   : > { %4580 = vmatpush3.msra.mxu1 %v3965_v30  ;;  %4597 = vmatprep.subr.mxu0 %v3978_v34 }
 0x37c   : > { %4550 = vmatmul.mubr.msk.f32.gmra.mxu1 %vm458_vm1, %v5298_v3  ;;  %4570 = vmatmul.mubr.msk.f32.gmra.mxu0 %vm458_vm1, %v5368_v23 }
 0x37d   : > { %4552 = vmatprep.mubr.msk.f32.mxu1 %vm458_vm1, %v5309_v8  ;;  %4572 = vmatprep.mubr.msk.f32.mxu0 %vm458_vm1, %v5377_v17 }
 0x37e   : > { %4581 = vmatprep.subr.mxu1 %v3964_v36  ;;  %4598 = vmatpush3.msra.mxu0 %v3978_v34 }
 0x37f   : > { %4582 = vmatpush3.msra.mxu1 %v3964_v36  ;;  %4599 = vmatprep.subr.mxu0 %v3977_v37 }
 0x380   : > { %4553 = vmatmul.mubr.msk.f32.gmra.mxu1 %vm458_vm1, %v2901_v38  ;;  %4573 = vmatmul.mubr.msk.f32.gmra.mxu0 %vm458_vm1, %v3051_v47 }
 0x381   : > { %4583 = vmatprep.mubr.msk.f32.mxu1 %vm458_vm1, %v5256_v57  ;;  %4600 = vmatpush3.msra.mxu0 %v3977_v37 }
 0x382   : > { %4603 = vmatprep.mubr.msk.f32.mxu0 %vm458_vm1, %v5252_v52  ;;  %4601 = vmatprep.subr.mxu0 %v3976_v18 }
 0x383   : > { %4602 = vmatpush3.msra.mxu0 %v3976_v18  ;;  %4615 = vmatprep.subr.mxu1 %v3991_v35 }
 0x384   : > { %4584 = vmatmul.mubr.msk.f32.vlgmr.msra.gmra.mxu1 %vm458_vm1, %v5266_v46  ;;  %4604 = vmatmul.mubr.msk.f32.vlgmr.msra.gmra.mxu0 %vm458_vm1, %v5264_v63 }
 0x385   : > { %4616 = vmatpush3.msra.mxu1 %v3991_v35  ;;  %4586 = vmatprep.mubr.msk.f32.mxu1 %vm458_vm1, %v5278_v16 }
 0x386   : > { %4606 = vmatprep.mubr.msk.f32.mxu0 %vm458_vm1, %v5276_v50  ;;  %4617 = vmatprep.subr.mxu1 %v3990_v40 }
 0x387   : > { %4618 = vmatpush3.msra.mxu1 %v3990_v40 }
 0x388   : > { %4587 = vmatmul.mubr.msk.f32.gmra.mxu1 %vm458_vm1, %v5289_v61  ;;  %4607 = vmatmul.mubr.msk.f32.gmra.mxu0 %vm458_vm1, %v5287_v58 }
 0x389   : > { %4589 = vmatprep.mubr.msk.f32.mxu1 %vm458_vm1, %v5300_v48  ;;  %4609 = vmatprep.mubr.msk.f32.mxu0 %vm458_vm1, %v5298_v3 }
 0x38a   : > { %4619 = vmatprep.subr.mxu1 %v3989_v27 }
 0x38b   : > { %4620 = vmatpush3.msra.mxu1 %v3989_v27 }
 0x38c   : > { %4590 = vmatmul.mubr.msk.f32.gmra.mxu1 %vm458_vm1, %v5311_v9  ;;  %4610 = vmatmul.mubr.msk.f32.gmra.mxu0 %vm458_vm1, %v5309_v8 }
 0x38d   : > { %4592 = vmatprep.mubr.msk.f32.mxu1 %vm458_vm1, %v5379_v1  ;;  %4612 = vmatprep.mubr.msk.f32.mxu0 %vm458_vm1, %v2901_v38 }
 0x38e   : > { %4621 = vmatprep.subr.mxu1 %v3988_v28 }
 0x38f   : > { %4622 = vmatpush3.msra.mxu1 %v3988_v28 }
 0x390   : > { %4593 = vmatmul.mubr.msk.f32.gmra.mxu1 %vm458_vm1, %v5573_v33  ;;  %4613 = vmatmul.mubr.msk.f32.gmra.mxu0 %vm458_vm1, %v5574_v54 }
 0x391   : > { %4623 = vmatprep.mubr.msk.f32.mxu1 %vm458_vm1, %v5332_v14 }
 0x394   : > { %4624 = vmatmul.mubr.msk.f32.vlgmr.msra.gmra.mxu1 %vm458_vm1, %v5338_v62 }
 0x395   : > { %4626 = vmatprep.mubr.msk.f32.mxu1 %vm458_vm1, %v5350_v19 }
 0x398   : > { %4627 = vmatmul.mubr.msk.f32.gmra.mxu1 %vm458_vm1, %v5356_v20 }
 0x399   : > { %4629 = vmatprep.mubr.msk.f32.mxu1 %vm458_vm1, %v5368_v23 }
 0x39c   : > { %4630 = vmatmul.mubr.msk.f32.gmra.mxu1 %vm458_vm1, %v5377_v17 }
 0x39d   : > { %4632 = vmatprep.mubr.msk.f32.mxu1 %vm458_vm1, %v3051_v47 }
 0x3a0   : > { %4633 = vmatmul.mubr.msk.f32.gmra.mxu1 %vm458_vm1, %v5575_v53 }
 0x413   : > { %v4465_v39 = vpop.f32.mrf.mxu1 }
 0x414   : > { %v4485_v41 = vpop.f32.mrf.mxu0 }
 0x415   : > { %v2426_v42 = vpop.f32.mrf.mxu1  ;;  %v2561_v1 = vadd.f32 %v4485_v41, %v4465_v39 }
 0x416   : > { %v2555_v44 = vpop.f32.mrf.mxu0 }
 0x417   : > { %v2556_v29 = vadd.f32 %v2555_v44, %v2426_v42 }
 0x418   : > { %v4468_v51 = vpop.f32.mrf.mxu1  ;;  %v4488_v45 = vpop.f32.mrf.mxu0 }
 0x419   : > { %v2571_v37 = vadd.f32 %v4488_v45, %v4468_v51 }
 0x41a   : > { %v2436_v49 = vpop.f32.mrf.mxu1  ;;  %v2565_v55 = vpop.f32.mrf.mxu0 }
 0x41b   : > { %v2566_v18 = vadd.f32 %v2565_v55, %v2436_v49 }
 0x41c   : > { %v4471_v56 = vpop.f32.mrf.mxu1  ;;  %v4491_v59 = vpop.f32.mrf.mxu0 }
 0x41d   : > { %v2581_v27 = vadd.f32 %v4491_v59, %v4471_v56 }
 0x41e   : > { %v2446_v31 = vpop.f32.mrf.mxu1  ;;  %v2575_v32 = vpop.f32.mrf.mxu0 }
 0x41f   : > { %v2576_v39 = vadd.f32 %v2575_v32, %v2446_v31 }
 0x420   : > { %v4474_v52 = vpop.f32.mrf.mxu1  ;;  %v4494_v57 = vpop.f32.mrf.mxu0 }
 0x421   : > { %v2591_v51 = vadd.f32 %v4494_v57, %v4474_v52 }
 0x422   : > { %v5496_v60 = vpop.f32.mrf.mxu1  ;;  %v2585_v43 = vpop.f32.mrf.mxu0 }
 0x423   : > { %v2586_v55 = vadd.f32 %v2585_v43, %v5496_v60 }
 0x424   : > { %v4505_v63 = vpop.f32.mrf.mxu1  ;;  %v4525_v46 = vpop.f32.mrf.mxu0 }
 0x425   : > { %v2737_v30 = vadd.f32 %v4505_v63, %v2561_v1 }
 0x426   : > { %v2697_v2 = vpop.f32.mrf.mxu1  ;;  %v2847_v50 = vpop.f32.mrf.mxu0 }
 0x427   : > { %v2736_v38 = vadd.f32 %v2697_v2, %v2556_v29  ;;  %v2887_v35 = vadd.f32 %v4525_v46, %v2737_v30 }
 0x428   : > { %v4508_v16 = vpop.f32.mrf.mxu1  ;;  %v4528_v5 = vpop.f32.mrf.mxu0 }
 0x429   : > { %v2739_v40 = vadd.f32 %v4508_v16, %v2571_v37  ;;  %v2886_v54 = vadd.f32 %v2847_v50, %v2736_v38 }
 0x42a   : > { %v2707_v58 = vpop.f32.mrf.mxu1  ;;  %v2857_v61 = vpop.f32.mrf.mxu0 }
 0x42b   : > { %v2738_v53 = vadd.f32 %v2707_v58, %v2566_v18 }
 0x42c   : > { %v4511_v0 = vpop.f32.mrf.mxu1  ;;  %v4531_v3 = vpop.f32.mrf.mxu0 }
 0x42d   : > { %v2741_v41 = vadd.f32 %v4511_v0, %v2581_v27  ;;  %v2888_v45 = vadd.f32 %v2857_v61, %v2738_v53 }
 0x42e   : > { %v2717_v48 = vpop.f32.mrf.mxu1  ;;  %v2867_v6 = vpop.f32.mrf.mxu0 }
 0x42f   : > { %v2740_v44 = vadd.f32 %v2717_v48, %v2576_v39  ;;  %v2891_v56 = vadd.f32 %v4531_v3, %v2741_v41 }
 0x430   : > { %v4514_v8 = vpop.f32.mrf.mxu1  ;;  %v5498_v9 = vpop.f32.mrf.mxu0 }
 0x431   : > { %v2743_v46 = vadd.f32 %v4514_v8, %v2591_v51  ;;  %v2890_v31 = vadd.f32 %v2867_v6, %v2740_v44 }
 0x432   : > { %v2727_v10 = vpop.f32.mrf.mxu1  ;;  %v5500_v11 = vpop.f32.mrf.mxu0 }
 0x433   : > { %5576 = vst [vmem:[#allocation9_spill] sm:$0xff] %v5500_v11  ;;  %v2742_v32 = vadd.f32 %v2727_v10, %v2586_v55  ;;  %v2893_v57 = vadd.f32 %v5498_v9, %v2743_v46 }
 0x434   : > { %v4545_v7 = vpop.f32.mrf.mxu1  ;;  %v4565_v12 = vpop.f32.mrf.mxu0 }
 0x436   : > { %v2997_v13 = vpop.f32.mrf.mxu1  ;;  %v3147_v14 = vpop.f32.mrf.mxu0 }
 0x437   : > { %v3036_v42 = vadd.f32 %v2997_v13, %v2886_v54 }
 0x438   : > { %v4548_v62 = vpop.f32.mrf.mxu1  ;;  %v4568_v15 = vpop.f32.mrf.mxu0 }
 0x439   : > { %v3186_v50 = vadd.f32 %v3147_v14, %v3036_v42 }
 0x43a   : > { %v3007_v22 = vpop.f32.mrf.mxu1  ;;  %v3157_v19 = vpop.f32.mrf.mxu0  ;;  %v5579_v43 = vld [vmem:[#allocation9_spill] sm:$0xff] }
 0x43b   : > { %v3038_v16 = vadd.f32 %v3007_v22, %v2888_v45  ;;  %v2892_v3 = vadd.f32 %v5579_v43, %v2742_v32 }
 0x43c   : > { %v4551_v20 = vpop.f32.mrf.mxu1  ;;  %v4571_v25 = vpop.f32.mrf.mxu0 }
 0x43d   : > { %v3041_v0 = vadd.f32 %v4551_v20, %v2891_v56  ;;  %v3188_v61 = vadd.f32 %v3157_v19, %v3038_v16 }
 0x43e   : > { %v3017_v4 = vpop.f32.mrf.mxu1  ;;  %v3167_v23 = vpop.f32.mrf.mxu0 }
 0x43f   : > { %v3040_v29 = vadd.f32 %v3017_v4, %v2890_v31  ;;  %v3191_v8 = vadd.f32 %v4571_v25, %v3041_v0 }
 0x440   : > { %v4554_v24 = vpop.f32.mrf.mxu1  ;;  %v5502_v17 = vpop.f32.mrf.mxu0 }
 0x441   : > { %5577 = vst [vmem:[#allocation10_spill] sm:$0xff] %v5502_v17  ;;  %v3037_v17 = vadd.f32 %v4545_v7, %v2887_v35  ;;  %v3043_v22 = vadd.f32 %v4554_v24, %v2893_v57 }
 0x442   : > { %v3027_v21 = vpop.f32.mrf.mxu1  ;;  %v5504_v26 = vpop.f32.mrf.mxu0 }
 0x443   : > { %5578 = vst [vmem:[#allocation4_spill] sm:$0xff] %v5504_v26  ;;  %v2889_v26 = vadd.f32 %v4528_v5, %v2739_v40  ;;  %v3187_v2 = vadd.f32 %v4565_v12, %v3037_v17  ;;  %v3190_v17 = vadd.f32 %v3167_v23, %v3040_v29 }
 0x444   : > { %v4585_v34 = vpop.f32.mrf.mxu1  ;;  %v4605_v36 = vpop.f32.mrf.mxu0 }
 0x445   : > { %v3039_v49 = vadd.f32 %v4548_v62, %v2889_v26  ;;  %v3337_v58 = vadd.f32 %v4585_v34, %v3187_v2 }
 0x446   : > { %v3297_v47 = vpop.f32.mrf.mxu1  ;;  %v3447_v28 = vpop.f32.mrf.mxu0 }
 0x447   : > { %v3189_v48 = vadd.f32 %v4568_v15, %v3039_v49  ;;  %v3336_v13 = vadd.f32 %v3297_v47, %v3186_v50  ;;  %v3487_v12 = vadd.f32 %v4605_v36, %v3337_v58  ;;  %v3042_v15 = vadd.f32 %v3027_v21, %v2892_v3 }
 0x448   : > { %v4588_v33 = vpop.f32.mrf.mxu1  ;;  %v4608_v63 = vpop.f32.mrf.mxu0  ;;  %v5580_v36 = vld [vmem:[#allocation10_spill] sm:$0xff] }
 0x449   : > { %v3339_v60 = vadd.f32 %v4588_v33, %v3189_v48  ;;  %v3486_v6 = vadd.f32 %v3447_v28, %v3336_v13  ;;  %v3193_v37 = vadd.f32 %v5580_v36, %v3043_v22 }
 0x44a   : > { %v3307_v11 = vpop.f32.mrf.mxu1  ;;  %v3457_v5 = vpop.f32.mrf.mxu0  ;;  %v5581_v23 = vld [vmem:[#allocation4_spill] sm:$0xff] }
 0x44b   : > { %v3338_v10 = vadd.f32 %v3307_v11, %v3188_v61  ;;  %v3489_v30 = vadd.f32 %v4608_v63, %v3339_v60  ;;  %v3192_v18 = vadd.f32 %v5581_v23, %v3042_v15 }
 0x44c   : > { %v4591_v1 = vpop.f32.mrf.mxu1  ;;  %v4611_v14 = vpop.f32.mrf.mxu0 }
 0x44d   : > { %v3341_v4 = vadd.f32 %v4591_v1, %v3191_v8  ;;  %v3488_v25 = vadd.f32 %v3457_v5, %v3338_v10 }
 0x44e   : > { %v3317_v59 = vpop.f32.mrf.mxu1  ;;  %v3467_v9 = vpop.f32.mrf.mxu0 }
 0x44f   : > { %v3340_v38 = vadd.f32 %v3317_v59, %v3190_v17  ;;  %v3491_v21 = vadd.f32 %v4611_v14, %v3341_v4 }
 0x450   : > { %v4594_v7 = vpop.f32.mrf.mxu1  ;;  %v4614_v11 = vpop.f32.mrf.mxu0 }
 0x451   : > { %v3343_v35 = vadd.f32 %v4594_v7, %v3193_v37  ;;  %v3490_v28 = vadd.f32 %v3467_v9, %v3340_v38 }
 0x452   : > { %v3327_v52 = vpop.f32.mrf.mxu1  ;;  %v3477_v53 = vpop.f32.mrf.mxu0 }
 0x453   : > { %v3342_v33 = vadd.f32 %v3327_v52, %v3192_v18  ;;  %v3493_v41 = vadd.f32 %v4614_v11, %v3343_v35 }
 0x454   : > { %v4625_v62 = vpop.f32.mrf.mxu1 }
 0x455   : > { %v3637_v20 = vadd.f32 %v4625_v62, %v3487_v12  ;;  %v3492_v63 = vadd.f32 %v3477_v53, %v3342_v33 }
 0x456   : > { %v3597_v26 = vpop.f32.mrf.mxu1 }
 0x457   : > { %v3636_v34 = vadd.f32 %v3597_v26, %v3486_v6  ;;  %3654 = vrot.lane.b32.xlu1 %v3637_v20, %s4656_s17 }
 0x458   : > { %v4628_v19 = vpop.f32.mrf.mxu1 }
 0x459   : > { %v3639_v47 = vadd.f32 %v4628_v19, %v3489_v30  ;;  %3652 = vrot.lane.b32.xlu0 %v3636_v34, %s4656_s17 }
 0x45a   : > { %v3607_v24 = vpop.f32.mrf.mxu1 }
 0x45b   : > { %v3638_v40 = vadd.f32 %v3607_v24, %v3488_v25  ;;  %3658 = vrot.lane.b32.xlu1 %v3639_v47, %s4656_s17 }
 0x45c   : > { %v4631_v27 = vpop.f32.mrf.mxu1 }
 0x45d   : > { %v3641_v54 = vadd.f32 %v4631_v27, %v3491_v21  ;;  %3656 = vrot.lane.b32.xlu0 %v3638_v40, %s4656_s17 }
 0x45e   : > { %v3617_v39 = vpop.f32.mrf.mxu1 }
 0x45f   : > { %v3640_v42 = vadd.f32 %v3617_v39, %v3490_v28  ;;  %3662 = vrot.lane.b32.xlu1 %v3641_v54, %s4656_s17 }
 0x460   : > { %v4634_v44 = vpop.f32.mrf.mxu1 }
 0x461   : > { %v3643_v1 = vadd.f32 %v4634_v44, %v3493_v41  ;;  %3660 = vrot.lane.b32.xlu0 %v3640_v42, %s4656_s17 }
 0x462   : > { %v3627_v51 = vpop.f32.mrf.mxu1 }
 0x463   : > { %v3642_v45 = vadd.f32 %v3627_v51, %v3492_v63  ;;  %3666 = vrot.lane.b32.xlu1 %v3643_v1, %s4656_s17 }
 0x465   : > { %3664 = vrot.lane.b32.xlu0 %v3642_v45, %s4656_s17 }
 0x4c9   : > { %v3655_v2 = vpop.permute.xlu1 %3654 }
 0x4ca   : > { %3678 = vst.msk [vmem:[#allocation2 + $0x8] sm:$0xff] %vm3676_vm6, %v3655_v2 }
 0x4cb   : > { %v3653_v49 = vpop.permute.xlu0 %3652 }
 0x4cc   : > { %3677 = vst.msk [vmem:[#allocation2] sm:$0xff] %vm3676_vm6, %v3653_v49 }
 0x4cd   : > { %v3659_v55 = vpop.permute.xlu1 %3658 }
 0x4ce   : > { %3680 = vst.msk [vmem:[#allocation2 + $0x18] sm:$0xff] %vm3676_vm6, %v3659_v55 }
 0x4cf   : > { %v3657_v56 = vpop.permute.xlu0 %3656 }
 0x4d0   : > { %3679 = vst.msk [vmem:[#allocation2 + $0x10] sm:$0xff] %vm3676_vm6, %v3657_v56 }
 0x4d1   : > { %v3686_v59 = vld [vmem:[#allocation2 + $0x8] sm:$0xff]  ;;  %v3663_v46 = vpop.permute.xlu1 %3662 }
 0x4d2   : > { %3695 = vst.msk [vmem:[%s440_s20 + $0x8] sm:$0xff] %vm3693_vm7, %v3686_v59 }
 0x4d3   : > { %3682 = vst.msk [vmem:[#allocation2 + $0x28] sm:$0xff] %vm3676_vm6, %v3663_v46  ;;  %v3685_v50 = vld [vmem:[#allocation2] sm:$0xff]  ;;  %v3661_v16 = vpop.permute.xlu0 %3660 }
 0x4d4   : > { %3694 = vst.msk [vmem:[%s440_s20] sm:$0xff] %vm3693_vm7, %v3685_v50 }
 0x4d5   : > { %3681 = vst.msk [vmem:[#allocation2 + $0x20] sm:$0xff] %vm3676_vm6, %v3661_v16  ;;  %v3688_v58 = vld [vmem:[#allocation2 + $0x18] sm:$0xff]  ;;  %v3667_v31 = vpop.permute.xlu1 %3666 }
 0x4d6   : > { %3697 = vst.msk [vmem:[%s440_s20 + $0x18] sm:$0xff] %vm3693_vm7, %v3688_v58 }
 0x4d7   : > { %3684 = vst.msk [vmem:[#allocation2 + $0x38] sm:$0xff] %vm3676_vm6, %v3667_v31  ;;  %v3687_v32 = vld [vmem:[#allocation2 + $0x10] sm:$0xff]  ;;  %v3665_v0 = vpop.permute.xlu0 %3664 }
 0x4d8   : > { %3696 = vst.msk [vmem:[%s440_s20 + $0x10] sm:$0xff] %vm3693_vm7, %v3687_v32 }
 0x4d9   : > { %3683 = vst.msk [vmem:[#allocation2 + $0x30] sm:$0xff] %vm3676_vm6, %v3665_v0 }
 0x4da   : > { %v3690_v5 = vld [vmem:[#allocation2 + $0x28] sm:$0xff] }
 0x4db   : > { %3699 = vst.msk [vmem:[%s440_s20 + $0x28] sm:$0xff] %vm3693_vm7, %v3690_v5 }
 0x4dc   : > { %v3689_v7 = vld [vmem:[#allocation2 + $0x20] sm:$0xff] }
 0x4dd   : > { %3698 = vst.msk [vmem:[%s440_s20 + $0x20] sm:$0xff] %vm3693_vm7, %v3689_v7 }
 0x4de   : > { %v3692_v48 = vld [vmem:[#allocation2 + $0x38] sm:$0xff] }
 0x4df   : > { %3701 = vst.msk [vmem:[%s440_s20 + $0x38] sm:$0xff] %vm3693_vm7, %v3692_v48 }
 0x4e0   : > { %v3691_v13 = vld [vmem:[#allocation2 + $0x30] sm:$0xff] }
 0x4e1   : > { %3700 = vst.msk [vmem:[%s440_s20 + $0x30] sm:$0xff] %vm3693_vm7, %v3691_v13 }
 0x4e2 PF: > { %s23_s25 = sadd.s32 1, %s4652_s25  }
 0x4e3   : > { %p20_p4 = scmp.ge.s32.totalorder %s23_s25, 4  }
 0x4e5   :  { %22 = sbr.rel (!%p20_p4) target bundleno = 1 (0x1), region = 120 }

// kernel: densenet_forward.4
= control target key start
LH: loop header
LB: loop body
LE: loop exit
PB: predicated region body
PF: predicated region fallthrough
CT: control target
= control target key end

     0   :  { %s11761_s25 = smov 0   ;;  %s15281_s0 = inlined_call_operand.vmem [shape: f32[2,16,16,4], index: 0, kind: input, shape index: {}]   ;;  %s15282_s1 = inlined_call_operand.vmem [shape: f32[1,4], index: 1, kind: input, shape index: {}]   ;;  %s15283_s2 = inlined_call_operand.vmem [shape: f32[1,4], index: 2, kind: input, shape index: {}]   ;;  %s15284_s3 = inlined_call_operand.vmem [shape: f32[4,32], index: 3, kind: input, shape index: {}]   ;;  %s15285_s4 = inlined_call_operand.vmem [shape: f32[1,32], index: 4, kind: input, shape index: {}]   ;;  %s15286_s5 = inlined_call_operand.vmem [shape: f32[1,32], index: 5, kind: input, shape index: {}]   ;;  %s15287_s6 = inlined_call_operand.vmem [shape: f32[9,32,8], index: 6, kind: input, shape index: {}]   ;;  %s15288_s7 = inlined_call_operand.vmem [shape: f32[1,12], index: 7, kind: input, shape index: {}]   ;;  %s15289_s8 = inlined_call_operand.vmem [shape: f32[1,12], index: 8, kind: input, shape index: {}]   ;;  %s15290_s9 = inlined_call_operand.vmem [shape: f32[12,32], index: 9, kind: input, shape index: {}]   ;;  %s15291_s10 = inlined_call_operand.vmem [shape: f32[1,32], index: 10, kind: input, shape index: {}]   ;;  %s15292_s11 = inlined_call_operand.vmem [shape: f32[1,32], index: 11, kind: input, shape index: {}]   ;;  %s15293_s12 = inlined_call_operand.vmem [shape: f32[9,32,8], index: 12, kind: input, shape index: {}]   ;;  %s15294_s13 = inlined_call_operand.vmem [shape: f32[2,16,16,20], index: 13, kind: output, shape index: {}]  }
   0x1 LB: > { %s9117_s26 = sadd.s32 4294967295, %s11686_s25   ;;  %p9121_p0 = scmp.ge.s32.totalorder %s11686_s25, 1  ;;  %s11686_s25 = sphi %s11761_s25, %s23_s25  }
   0x2   : > { %p387_p1 = scmp.lt.s32.totalorder %s11686_s25, 3 }
   0x4   : > { %p388_p2 = pnand %p9121_p0, %p387_p1 }
   0x6   : > { %391 = sbr.rel (%p388_p2) target bundleno = 1693 (0x69d), region = 72 }
   0xb   : > { %v704_v0 = vld [vmem:[%s15284_s3] sm:$0xf]  ;;  %vm801_vm0 = vcmask 1043456   ;;  %p431_p3 = scmp.lt.s32.totalorder %s9117_s26, 1  ;;  %vm506_vm1 = vcmask 261120   ;;  %vm509_vm2 = vcmask 254976  }
   0xc   : > { %10559 = vmatprep.subr.msk.mxu0 %vm801_vm0, %v704_v0  ;;  %v11688_v1 = vmov 0.0   ;;  %vm473_vm3 = vcmask 31744   ;;  %v11862_v14 = vld [vmem:[%s15282_s1] ss:$0 sm:$0xff]  ;;  %s11689_s16 = smov 4   ;;  %vm4747_vm4 = vcmask 97312  }
   0xd   : > { %10560 = vmatpush3.msk.msra.mxu0 %vm801_vm0, %v704_v0  ;;  %s15627_s26 = smov (!%p431_p3, %s9117_s26), 1  ;;  %512 = vst.msk [vmem:[#allocation3 + $0x20] sm:$0xff] %vm506_vm1, %v11688_v1  ;;  %507 = vst.msk [vmem:[#allocation3] sm:$0xff] %vm506_vm1, %v11688_v1  ;;  %v11879_v21 = vld [vmem:[%s15283_s2] ss:$0 sm:$0xff]  ;;  %vm4924_vm5 = vcmask 97280  }
   0xe   : > { %513 = vst.msk [vmem:[#allocation3 + $0x28] sm:$0x3] %vm509_vm2, %v11688_v1  ;;  %510 = vst.msk [vmem:[#allocation3 + $0x10] sm:$0x3] %vm509_vm2, %v11688_v1  ;;  %s9842_s29 = sshll.u32 %s15627_s26, 8  ;;  %s11690_s30 = smov 12  }
   0xf   : > { %508 = vst.msk [vmem:[#allocation3 + $0x8] sm:$0xff] %vm506_vm1, %v11688_v1  ;;  %511 = vst.msk [vmem:[#allocation3 + $0x18] sm:$0xff] %vm506_vm1, %v11688_v1  ;;  %s11836_s15 = scalar_lea.vmem %s15281_s0, %s9842_s29  ;;  %vm8964_vm6 = vcmask 162912   ;;  %vm9029_vm7 = vcmask 162816  }
  0x10   : > { %514 = vst.msk [vmem:[#allocation3 + $0x30] sm:$0xff] %vm506_vm1, %v11688_v1  ;;  %515 = vst.msk [vmem:[#allocation3 + $0x38] sm:$0xff] %vm506_vm1, %v11688_v1  ;;  %v441_v2 = vld [vmem:[%s11836_s15] sm:$0xff]  ;;  %v442_v3 = vld [vmem:[%s11836_s15 + $0x8] sm:$0xff] }
  0x11   : > { %516 = vst.msk [vmem:[#allocation3 + $0x40] sm:$0x3] %vm509_vm2, %v11688_v1  ;;  %519 = vst.msk [vmem:[#allocation3 + $0x58] sm:$0x3] %vm509_vm2, %v11688_v1  ;;  %v443_v4 = vld [vmem:[%s11836_s15 + $0x10] sm:$0xff]  ;;  %v444_v5 = vld [vmem:[%s11836_s15 + $0x18] sm:$0xff] }
  0x12   : > { %517 = vst.msk [vmem:[#allocation3 + $0x48] sm:$0xff] %vm506_vm1, %v11688_v1  ;;  %518 = vst.msk [vmem:[#allocation3 + $0x50] sm:$0xff] %vm506_vm1, %v11688_v1  ;;  %v445_v6 = vld [vmem:[%s11836_s15 + $0x20] sm:$0xff]  ;;  %v446_v7 = vld [vmem:[%s11836_s15 + $0x28] sm:$0xff] }
  0x13   : > { %520 = vst.msk [vmem:[#allocation3 + $0x60] sm:$0xff] %vm506_vm1, %v11688_v1  ;;  %521 = vst.msk [vmem:[#allocation3 + $0x68] sm:$0xff] %vm506_vm1, %v11688_v1  ;;  %v447_v8 = vld [vmem:[%s11836_s15 + $0x30] sm:$0xff]  ;;  %v448_v9 = vld [vmem:[%s11836_s15 + $0x38] sm:$0xff] }
  0x14   : > { %522 = vst.msk [vmem:[#allocation3 + $0x70] sm:$0x3] %vm509_vm2, %v11688_v1  ;;  %525 = vst.msk [vmem:[#allocation3 + $0x88] sm:$0x3] %vm509_vm2, %v11688_v1  ;;  %v449_v10 = vld [vmem:[%s11836_s15 + $0x40] sm:$0xff]  ;;  %v450_v11 = vld [vmem:[%s11836_s15 + $0x48] sm:$0xff] }
  0x15   : > { %523 = vst.msk [vmem:[#allocation3 + $0x78] sm:$0xff] %vm506_vm1, %v11688_v1  ;;  %524 = vst.msk [vmem:[#allocation3 + $0x80] sm:$0xff] %vm506_vm1, %v11688_v1  ;;  %v451_v12 = vld [vmem:[%s11836_s15 + $0x50] sm:$0xff]  ;;  %v452_v13 = vld [vmem:[%s11836_s15 + $0x58] sm:$0xff] }
  0x16   : > { %526 = vst.msk [vmem:[#allocation3 + $0x90] sm:$0xff] %vm506_vm1, %v11688_v1  ;;  %527 = vst.msk [vmem:[#allocation3 + $0x98] sm:$0xff] %vm506_vm1, %v11688_v1  ;;  %v453_v15 = vld [vmem:[%s11836_s15 + $0x60] sm:$0xff]  ;;  %v454_v16 = vld [vmem:[%s11836_s15 + $0x68] sm:$0xff] }
  0x17   : > { %528 = vst.msk [vmem:[#allocation3 + $0xa0] sm:$0x3] %vm509_vm2, %v11688_v1  ;;  %531 = vst.msk [vmem:[#allocation3 + $0xb8] sm:$0x3] %vm509_vm2, %v11688_v1  ;;  %v455_v17 = vld [vmem:[%s11836_s15 + $0x70] sm:$0xff]  ;;  %v456_v18 = vld [vmem:[%s11836_s15 + $0x78] sm:$0xff] }
  0x18   : > { %529 = vst.msk [vmem:[#allocation3 + $0xa8] sm:$0xff] %vm506_vm1, %v11688_v1  ;;  %530 = vst.msk [vmem:[#allocation3 + $0xb0] sm:$0xff] %vm506_vm1, %v11688_v1  ;;  %v457_v19 = vld [vmem:[%s11836_s15 + $0x80] sm:$0xff]  ;;  %v458_v20 = vld [vmem:[%s11836_s15 + $0x88] sm:$0xff] }
  0x19   : > { %532 = vst.msk [vmem:[#allocation3 + $0xc0] sm:$0xff] %vm506_vm1, %v11688_v1  ;;  %533 = vst.msk [vmem:[#allocation3 + $0xc8] sm:$0xff] %vm506_vm1, %v11688_v1  ;;  %v459_v22 = vld [vmem:[%s11836_s15 + $0x90] sm:$0xff]  ;;  %v460_v23 = vld [vmem:[%s11836_s15 + $0x98] sm:$0xff] }
  0x1a   : > { %534 = vst.msk [vmem:[#allocation3 + $0xd0] sm:$0x3] %vm509_vm2, %v11688_v1  ;;  %537 = vst.msk [vmem:[#allocation3 + $0xe8] sm:$0x3] %vm509_vm2, %v11688_v1  ;;  %v461_v24 = vld [vmem:[%s11836_s15 + $0xa0] sm:$0xff]  ;;  %v462_v25 = vld [vmem:[%s11836_s15 + $0xa8] sm:$0xff] }
  0x1b   : > { %535 = vst.msk [vmem:[#allocation3 + $0xd8] sm:$0xff] %vm506_vm1, %v11688_v1  ;;  %536 = vst.msk [vmem:[#allocation3 + $0xe0] sm:$0xff] %vm506_vm1, %v11688_v1  ;;  %v463_v26 = vld [vmem:[%s11836_s15 + $0xb0] sm:$0xff]  ;;  %v464_v27 = vld [vmem:[%s11836_s15 + $0xb8] sm:$0xff] }
  0x1c   : > { %538 = vst.msk [vmem:[#allocation3 + $0xf0] sm:$0xff] %vm506_vm1, %v11688_v1  ;;  %539 = vst.msk [vmem:[#allocation3 + $0xf8] sm:$0xff] %vm506_vm1, %v11688_v1  ;;  %v465_v56 = vld [vmem:[%s11836_s15 + $0xc0] sm:$0xff]  ;;  %v466_v57 = vld [vmem:[%s11836_s15 + $0xc8] sm:$0xff] }
  0x1d   : > { %540 = vst.msk [vmem:[#allocation3 + $0x100] sm:$0x3] %vm509_vm2, %v11688_v1  ;;  %543 = vst.msk [vmem:[#allocation3 + $0x118] sm:$0x3] %vm509_vm2, %v11688_v1  ;;  %v467_v58 = vld [vmem:[%s11836_s15 + $0xd0] sm:$0xff]  ;;  %v468_v62 = vld [vmem:[%s11836_s15 + $0xd8] sm:$0xff] }
  0x1e   : > { %541 = vst.msk [vmem:[#allocation3 + $0x108] sm:$0xff] %vm506_vm1, %v11688_v1  ;;  %542 = vst.msk [vmem:[#allocation3 + $0x110] sm:$0xff] %vm506_vm1, %v11688_v1  ;;  %v469_v63 = vld [vmem:[%s11836_s15 + $0xe0] sm:$0xff]  ;;  %v470_v0 = vld [vmem:[%s11836_s15 + $0xe8] sm:$0xff] }
  0x1f   : > { %544 = vst.msk [vmem:[#allocation3 + $0x120] sm:$0xff] %vm506_vm1, %v11688_v1  ;;  %545 = vst.msk [vmem:[#allocation3 + $0x128] sm:$0xff] %vm506_vm1, %v11688_v1 }
  0x20   : > { %546 = vst.msk [vmem:[#allocation3 + $0x130] sm:$0x3] %vm509_vm2, %v11688_v1  ;;  %549 = vst.msk [vmem:[#allocation3 + $0x148] sm:$0x3] %vm509_vm2, %v11688_v1 }
  0x21   : > { %547 = vst.msk [vmem:[#allocation3 + $0x138] sm:$0xff] %vm506_vm1, %v11688_v1  ;;  %548 = vst.msk [vmem:[#allocation3 + $0x140] sm:$0xff] %vm506_vm1, %v11688_v1 }
  0x22   : > { %550 = vst.msk [vmem:[#allocation3 + $0x150] sm:$0xff] %vm506_vm1, %v11688_v1  ;;  %551 = vst.msk [vmem:[#allocation3 + $0x158] sm:$0xff] %vm506_vm1, %v11688_v1 }
  0x23   : > { %552 = vst.msk [vmem:[#allocation3 + $0x160] sm:$0x3] %vm509_vm2, %v11688_v1  ;;  %555 = vst.msk [vmem:[#allocation3 + $0x178] sm:$0x3] %vm509_vm2, %v11688_v1 }
  0x24   : > { %553 = vst.msk [vmem:[#allocation3 + $0x168] sm:$0xff] %vm506_vm1, %v11688_v1  ;;  %554 = vst.msk [vmem:[#allocation3 + $0x170] sm:$0xff] %vm506_vm1, %v11688_v1 }
  0x25   : > { %556 = vst.msk [vmem:[#allocation3 + $0x180] sm:$0xff] %vm506_vm1, %v11688_v1  ;;  %557 = vst.msk [vmem:[#allocation3 + $0x188] sm:$0xff] %vm506_vm1, %v11688_v1 }
  0x26   : > { %558 = vst.msk [vmem:[#allocation3 + $0x190] sm:$0x3] %vm509_vm2, %v11688_v1  ;;  %561 = vst.msk [vmem:[#allocation3 + $0x1a8] sm:$0x3] %vm509_vm2, %v11688_v1 }
  0x27   : > { %559 = vst.msk [vmem:[#allocation3 + $0x198] sm:$0xff] %vm506_vm1, %v11688_v1  ;;  %560 = vst.msk [vmem:[#allocation3 + $0x1a0] sm:$0xff] %vm506_vm1, %v11688_v1 }
  0x28   : > { %474 = vst.msk [vmem:[#allocation2] sm:$0xff] %vm473_vm3, %v441_v2  ;;  %475 = vst.msk [vmem:[#allocation2 + $0x8] sm:$0xff] %vm473_vm3, %v442_v3  ;;  %v471_v2 = vld [vmem:[%s11836_s15 + $0xf0] sm:$0xff]  ;;  %v472_v3 = vld [vmem:[%s11836_s15 + $0xf8] sm:$0xff] }
  0x29   : > { %476 = vst.msk [vmem:[#allocation2 + $0x10] sm:$0xff] %vm473_vm3, %v443_v4  ;;  %477 = vst.msk [vmem:[#allocation2 + $0x18] sm:$0xff] %vm473_vm3, %v444_v5 }
  0x2a   : > { %478 = vst.msk [vmem:[#allocation2 + $0x20] sm:$0xff] %vm473_vm3, %v445_v6  ;;  %479 = vst.msk [vmem:[#allocation2 + $0x28] sm:$0xff] %vm473_vm3, %v446_v7 }
  0x2b   : > { %480 = vst.msk [vmem:[#allocation2 + $0x30] sm:$0xff] %vm473_vm3, %v447_v8  ;;  %481 = vst.msk [vmem:[#allocation2 + $0x38] sm:$0xff] %vm473_vm3, %v448_v9 }
  0x2c   : > { %482 = vst.msk [vmem:[#allocation2 + $0x40] sm:$0xff] %vm473_vm3, %v449_v10  ;;  %483 = vst.msk [vmem:[#allocation2 + $0x48] sm:$0xff] %vm473_vm3, %v450_v11 }
  0x2d   : > { %484 = vst.msk [vmem:[#allocation2 + $0x50] sm:$0xff] %vm473_vm3, %v451_v12  ;;  %485 = vst.msk [vmem:[#allocation2 + $0x58] sm:$0xff] %vm473_vm3, %v452_v13 }
  0x2e   : > { %486 = vst.msk [vmem:[#allocation2 + $0x60] sm:$0xff] %vm473_vm3, %v453_v15  ;;  %487 = vst.msk [vmem:[#allocation2 + $0x68] sm:$0xff] %vm473_vm3, %v454_v16 }
  0x2f   : > { %488 = vst.msk [vmem:[#allocation2 + $0x70] sm:$0xff] %vm473_vm3, %v455_v17  ;;  %489 = vst.msk [vmem:[#allocation2 + $0x78] sm:$0xff] %vm473_vm3, %v456_v18  ;;  %v562_v28 = vld [vmem:[#allocation2] sm:$0xff]  ;;  %v563_v29 = vld [vmem:[#allocation2 + $0x8] sm:$0xff] }
  0x30   : > { %490 = vst.msk [vmem:[#allocation2 + $0x80] sm:$0xff] %vm473_vm3, %v457_v19  ;;  %491 = vst.msk [vmem:[#allocation2 + $0x88] sm:$0xff] %vm473_vm3, %v458_v20  ;;  %v564_v30 = vld [vmem:[#allocation2 + $0x10] sm:$0xff]  ;;  %v601_v31 = vmul.f32 %v11862_v14, %v562_v28  ;;  %v602_v32 = vmul.f32 %v11862_v14, %v563_v29  ;;  %v565_v34 = vld [vmem:[#allocation2 + $0x18] sm:$0xff] }
  0x31   : > { %492 = vst.msk [vmem:[#allocation2 + $0x90] sm:$0xff] %vm473_vm3, %v459_v22  ;;  %493 = vst.msk [vmem:[#allocation2 + $0x98] sm:$0xff] %vm473_vm3, %v460_v23  ;;  %v603_v33 = vmul.f32 %v11862_v14, %v564_v30  ;;  %v566_v35 = vld [vmem:[#allocation2 + $0x20] sm:$0xff]  ;;  %v567_v36 = vld [vmem:[#allocation2 + $0x28] sm:$0xff]  ;;  %v604_v37 = vmul.f32 %v11862_v14, %v565_v34 }
  0x32   : > { %494 = vst.msk [vmem:[#allocation2 + $0xa0] sm:$0xff] %vm473_vm3, %v461_v24  ;;  %495 = vst.msk [vmem:[#allocation2 + $0xa8] sm:$0xff] %vm473_vm3, %v462_v25  ;;  %v605_v38 = vmul.f32 %v11862_v14, %v566_v35  ;;  %v568_v39 = vld [vmem:[#allocation2 + $0x30] sm:$0xff]  ;;  %v640_v40 = vadd.f32 %v11879_v21, %v601_v31  ;;  %v641_v41 = vadd.f32 %v11879_v21, %v602_v32  ;;  %v569_v50 = vld [vmem:[#allocation2 + $0x38] sm:$0xff] }
  0x33   : > { %496 = vst.msk [vmem:[#allocation2 + $0xb0] sm:$0xff] %vm473_vm3, %v463_v26  ;;  %497 = vst.msk [vmem:[#allocation2 + $0xb8] sm:$0xff] %vm473_vm3, %v464_v27  ;;  %v642_v42 = vadd.f32 %v11879_v21, %v603_v33  ;;  %v643_v43 = vadd.f32 %v11879_v21, %v604_v37  ;;  %v606_v44 = vmul.f32 %v11862_v14, %v567_v36  ;;  %v570_v51 = vld [vmem:[#allocation2 + $0x40] sm:$0xff]  ;;  %v571_v52 = vld [vmem:[#allocation2 + $0x48] sm:$0xff] }
  0x34   : > { %v607_v45 = vmul.f32 %v11862_v14, %v568_v39  ;;  %v672_v46 = vmax.f32 %v640_v40, 0.0  ;;  %v673_v47 = vmax.f32 %v641_v41, 0.0  ;;  %v644_v49 = vadd.f32 %v11879_v21, %v605_v38  ;;  %498 = vst.msk [vmem:[#allocation2 + $0xc0] sm:$0xff] %vm473_vm3, %v465_v56  ;;  %499 = vst.msk [vmem:[#allocation2 + $0xc8] sm:$0xff] %vm473_vm3, %v466_v57  ;;  %v572_v1 = vld [vmem:[#allocation2 + $0x50] sm:$0xff]  ;;  %v573_v10 = vld [vmem:[#allocation2 + $0x58] sm:$0xff] }
  0x35   : > { %v674_v48 = vmax.f32 %v642_v42, 0.0  ;;  %v675_v53 = vmax.f32 %v643_v43, 0.0  ;;  %v645_v54 = vadd.f32 %v11879_v21, %v606_v44  ;;  %v608_v55 = vmul.f32 %v11862_v14, %v569_v50  ;;  %500 = vst.msk [vmem:[#allocation2 + $0xd0] sm:$0xff] %vm473_vm3, %v467_v58  ;;  %501 = vst.msk [vmem:[#allocation2 + $0xd8] sm:$0xff] %vm473_vm3, %v468_v62  ;;  %v574_v11 = vld [vmem:[#allocation2 + $0x60] sm:$0xff]  ;;  %v575_v19 = vld [vmem:[#allocation2 + $0x68] sm:$0xff] }
  0x36   : > { %10561 = vmatprep.mubr.msk.f32.mxu0 %vm473_vm3, %v672_v46  ;;  %v676_v59 = vmax.f32 %v644_v49, 0.0  ;;  %v646_v60 = vadd.f32 %v11879_v21, %v607_v45  ;;  %v609_v61 = vmul.f32 %v11862_v14, %v570_v51  ;;  %502 = vst.msk [vmem:[#allocation2 + $0xe0] sm:$0xff] %vm473_vm3, %v469_v63  ;;  %503 = vst.msk [vmem:[#allocation2 + $0xe8] sm:$0xff] %vm473_vm3, %v470_v0  ;;  %v576_v20 = vld [vmem:[#allocation2 + $0x70] sm:$0xff]  ;;  %v577_v28 = vld [vmem:[#allocation2 + $0x78] sm:$0xff] }
  0x37   : > { %10562 = vmatmul.mubr.msk.f32.vlgmr.msra.gmra.mxu0 %vm473_vm3, %v673_v47  ;;  %504 = vst.msk [vmem:[#allocation2 + $0xf0] sm:$0xff] %vm473_vm3, %v471_v2  ;;  %505 = vst.msk [vmem:[#allocation2 + $0xf8] sm:$0xff] %vm473_vm3, %v472_v3  ;;  %v677_v4 = vmax.f32 %v645_v54, 0.0  ;;  %v647_v5 = vadd.f32 %v11879_v21, %v608_v55  ;;  %v610_v6 = vmul.f32 %v11862_v14, %v571_v52  ;;  %v578_v29 = vld [vmem:[#allocation2 + $0x80] sm:$0xff]  ;;  %v579_v36 = vld [vmem:[#allocation2 + $0x88] sm:$0xff] }
  0x38   : > { %10564 = vmatprep.mubr.msk.f32.mxu0 %vm473_vm3, %v674_v48  ;;  %v678_v7 = vmax.f32 %v646_v60, 0.0  ;;  %v648_v8 = vadd.f32 %v11879_v21, %v609_v61  ;;  %v611_v9 = vmul.f32 %v11862_v14, %v572_v1  ;;  %v612_v15 = vmul.f32 %v11862_v14, %v573_v10  ;;  %v580_v37 = vld [vmem:[#allocation2 + $0x90] sm:$0xff]  ;;  %v581_v44 = vld [vmem:[#allocation2 + $0x98] sm:$0xff] }
  0x39   : > { %v679_v12 = vmax.f32 %v647_v5, 0.0  ;;  %v649_v13 = vadd.f32 %v11879_v21, %v610_v6  ;;  %v613_v18 = vmul.f32 %v11862_v14, %v574_v11  ;;  %v614_v24 = vmul.f32 %v11862_v14, %v575_v19  ;;  %v582_v45 = vld [vmem:[#allocation2 + $0xa0] sm:$0xff]  ;;  %v583_v52 = vld [vmem:[#allocation2 + $0xa8] sm:$0xff] }
  0x3a   : > { %v680_v16 = vmax.f32 %v648_v8, 0.0  ;;  %v650_v17 = vadd.f32 %v11879_v21, %v611_v9  ;;  %v651_v23 = vadd.f32 %v11879_v21, %v612_v15  ;;  %v615_v27 = vmul.f32 %v11862_v14, %v576_v20  ;;  %v585_v60 = vld [vmem:[#allocation2 + $0xb8] sm:$0xff] }
  0x3b   : > { %10565 = vmatmul.mubr.msk.f32.gmra.mxu0 %vm473_vm3, %v675_v53  ;;  %v681_v22 = vmax.f32 %v649_v13, 0.0  ;;  %v652_v26 = vadd.f32 %v11879_v21, %v613_v18  ;;  %v653_v31 = vadd.f32 %v11879_v21, %v614_v24  ;;  %v616_v32 = vmul.f32 %v11862_v14, %v577_v28  ;;  %v584_v53 = vld [vmem:[#allocation2 + $0xb0] sm:$0xff]  ;;  %v586_v61 = vld [vmem:[#allocation2 + $0xc0] sm:$0xff] }
  0x3c   : > { %10567 = vmatprep.mubr.msk.f32.mxu0 %vm473_vm3, %v676_v59  ;;  %v682_v25 = vmax.f32 %v650_v17, 0.0  ;;  %v683_v30 = vmax.f32 %v651_v23, 0.0  ;;  %v654_v34 = vadd.f32 %v11879_v21, %v615_v27  ;;  %v617_v35 = vmul.f32 %v11862_v14, %v578_v29  ;;  %v588_v5 = vld [vmem:[#allocation2 + $0xd0] sm:$0xff] }
  0x3d   : > { %v684_v33 = vmax.f32 %v652_v26, 0.0  ;;  %v685_v38 = vmax.f32 %v653_v31, 0.0  ;;  %v655_v39 = vadd.f32 %v11879_v21, %v616_v32  ;;  %v618_v40 = vmul.f32 %v11862_v14, %v579_v36  ;;  %v590_v13 = vld [vmem:[#allocation2 + $0xe0] sm:$0xff] }
  0x3e   : > { %v686_v41 = vmax.f32 %v654_v34, 0.0  ;;  %v656_v42 = vadd.f32 %v11879_v21, %v617_v35  ;;  %v619_v43 = vmul.f32 %v11862_v14, %v580_v37  ;;  %v620_v48 = vmul.f32 %v11862_v14, %v581_v44  ;;  %v592_v23 = vld [vmem:[#allocation2 + $0xf0] sm:$0xff]  ;;  %v9163_v44 = vld [vmem:[%s15287_s6 + $0x20] sm:$0xff] }
  0x3f   : > { %10568 = vmatmul.mubr.msk.f32.gmra.mxu0 %vm473_vm3, %v677_v4  ;;  %v687_v46 = vmax.f32 %v655_v39, 0.0  ;;  %v657_v47 = vadd.f32 %v11879_v21, %v618_v40  ;;  %v621_v51 = vmul.f32 %v11862_v14, %v582_v45  ;;  %v622_v56 = vmul.f32 %v11862_v14, %v583_v52  ;;  %v587_v4 = vld [vmem:[#allocation2 + $0xc8] sm:$0xff]  ;;  %v1208_v40 = vld [vmem:[%s15287_s6 + $0x18] sm:$0xff]  ;;  %v1205_v45 = vld [vmem:[%s15287_s6] sm:$0xff] }
  0x40   : > { %10570 = vmatprep.mubr.msk.f32.mxu0 %vm473_vm3, %v678_v7  ;;  %v688_v49 = vmax.f32 %v656_v42, 0.0  ;;  %v658_v50 = vadd.f32 %v11879_v21, %v619_v43  ;;  %v659_v55 = vadd.f32 %v11879_v21, %v620_v48  ;;  %v623_v59 = vmul.f32 %v11862_v14, %v584_v53  ;;  %10665 = vmatprep.subr.mxu0 %v1208_v40  ;;  %v9164_v42 = vld [vmem:[%s15287_s6 + $0x28] sm:$0xff]  ;;  %v9231_v53 = vld [vmem:[%s15287_s6 + $0x40] sm:$0xff] }
  0x41   : > { %v689_v54 = vmax.f32 %v657_v47, 0.0  ;;  %v660_v58 = vadd.f32 %v11879_v21, %v621_v51  ;;  %v661_v63 = vadd.f32 %v11879_v21, %v622_v56  ;;  %v624_v0 = vmul.f32 %v11862_v14, %v585_v60  ;;  %10666 = vmatpush3.msra.mxu0 %v1208_v40  ;;  %v1206_v43 = vld [vmem:[%s15287_s6 + $0x8] sm:$0xff]  ;;  %v1173_v47 = vld [vmem:[#allocation3] sm:$0xff]  ;;  %v9233_v51 = vld [vmem:[%s15287_s6 + $0x50] sm:$0xff] }
  0x42   : > { %v690_v57 = vmax.f32 %v658_v50, 0.0  ;;  %v691_v62 = vmax.f32 %v659_v55, 0.0  ;;  %v662_v2 = vadd.f32 %v11879_v21, %v623_v59  ;;  %v625_v3 = vmul.f32 %v11862_v14, %v586_v61  ;;  %v1210_v48 = vld [vmem:[#allocation3 + $0x9] sm:$0xff]  ;;  %v9234_v50 = vld [vmem:[%s15287_s6 + $0x58] sm:$0xff]  ;;  %v12069_v59 = vld [vmem:[%s15285_s4] ss:$0 sm:$0xff] }
  0x43   : > { %10571 = vmatmul.mubr.msk.f32.gmra.mxu0 %vm473_vm3, %v679_v12  ;;  %v692_v1 = vmax.f32 %v660_v58, 0.0  ;;  %v693_v6 = vmax.f32 %v661_v63, 0.0  ;;  %v663_v7 = vadd.f32 %v11879_v21, %v624_v0  ;;  %v626_v8 = vmul.f32 %v11862_v14, %v587_v4  ;;  %v589_v12 = vld [vmem:[#allocation2 + $0xd8] sm:$0xff]  ;;  %v9232_v52 = vld [vmem:[%s15287_s6 + $0x48] sm:$0xff]  ;;  %v9269_v55 = vld [vmem:[%s15287_s6 + $0x70] sm:$0xff] }
  0x44   : > { %10573 = vmatprep.mubr.msk.f32.mxu0 %vm473_vm3, %v680_v16  ;;  %v694_v9 = vmax.f32 %v662_v2, 0.0  ;;  %v664_v10 = vadd.f32 %v11879_v21, %v625_v3  ;;  %v627_v11 = vmul.f32 %v11862_v14, %v588_v5  ;;  %v628_v17 = vmul.f32 %v11862_v14, %v589_v12  ;;  %v9268_v56 = vld [vmem:[%s15287_s6 + $0x68] sm:$0xff]  ;;  %v12063_v58 = vld [vmem:[%s15287_s6 + $0x98] sm:$0xff]  ;;  %v12074_v61 = vld [vmem:[%s15286_s5] ss:$0 sm:$0xff] }
  0x45   : > { %v695_v15 = vmax.f32 %v663_v7, 0.0  ;;  %v665_v16 = vadd.f32 %v11879_v21, %v626_v8  ;;  %v629_v20 = vmul.f32 %v11862_v14, %v590_v13  ;;  %v631_v29 = vmul.f32 %v11862_v14, %v592_v23  ;;  %v12084_v7 = vld [vmem:[%s15287_s6 + $0xb8] sm:$0xff] }
  0x46   : > { %v696_v18 = vmax.f32 %v664_v10, 0.0  ;;  %v666_v19 = vadd.f32 %v11879_v21, %v627_v11 }
  0x47   : > { %10574 = vmatmul.mubr.msk.f32.gmra.mxu0 %vm473_vm3, %v681_v22  ;;  %v591_v22 = vld [vmem:[#allocation2 + $0xe8] sm:$0xff]  ;;  %v697_v24 = vmax.f32 %v665_v16, 0.0  ;;  %v668_v28 = vadd.f32 %v11879_v21, %v629_v20  ;;  %v670_v35 = vadd.f32 %v11879_v21, %v631_v29 }
  0x48   : > { %10576 = vmatprep.mubr.msk.f32.mxu0 %vm473_vm3, %v682_v25  ;;  %v667_v25 = vadd.f32 %v11879_v21, %v628_v17  ;;  %v630_v26 = vmul.f32 %v11862_v14, %v591_v22  ;;  %v698_v27 = vmax.f32 %v666_v19, 0.0 }
  0x49   : > { %v700_v34 = vmax.f32 %v668_v28, 0.0 }
  0x4a   : > { %v699_v31 = vmax.f32 %v667_v25, 0.0  ;;  %v669_v32 = vadd.f32 %v11879_v21, %v630_v26 }
  0x4b   : > { %10577 = vmatmul.mubr.msk.f32.gmra.mxu0 %vm473_vm3, %v683_v30  ;;  %v593_v30 = vld [vmem:[#allocation2 + $0xf8] sm:$0xff] }
  0x4c   : > { %10579 = vmatprep.mubr.msk.f32.mxu0 %vm473_vm3, %v684_v33  ;;  %v632_v33 = vmul.f32 %v11862_v14, %v593_v30  ;;  %v701_v36 = vmax.f32 %v669_v32, 0.0  ;;  %v9166_v14 = vld [vmem:[%s15287_s6 + $0x38] sm:$0xff] }
  0x4d   : > { %10609 = vmatprep.subr.mxu1 %v9166_v14 }
  0x4e   : > { %v671_v37 = vadd.f32 %v11879_v21, %v632_v33  ;;  %10610 = vmatpush3.msra.mxu1 %v9166_v14  ;;  %v9165_v21 = vld [vmem:[%s15287_s6 + $0x30] sm:$0xff] }
  0x4f   : > { %10580 = vmatmul.mubr.msk.f32.gmra.mxu0 %vm473_vm3, %v685_v38  ;;  %v702_v38 = vmax.f32 %v670_v35, 0.0  ;;  %10611 = vmatprep.subr.mxu1 %v9165_v21 }
  0x50   : > { %10582 = vmatprep.mubr.msk.f32.mxu0 %vm473_vm3, %v686_v41  ;;  %v703_v39 = vmax.f32 %v671_v37, 0.0  ;;  %v1207_v41 = vld [vmem:[%s15287_s6 + $0x10] sm:$0xff]  ;;  %10612 = vmatpush3.msra.mxu1 %v9165_v21 }
  0x51   : > { %10667 = vmatprep.subr.mxu0 %v1207_v41  ;;  %10613 = vmatprep.subr.mxu1 %v9164_v42 }
  0x52   : > { %10668 = vmatpush3.msra.mxu0 %v1207_v41  ;;  %10614 = vmatpush3.msra.mxu1 %v9164_v42 }
  0x53   : > { %10583 = vmatmul.mubr.msk.f32.gmra.mxu0 %vm473_vm3, %v687_v46  ;;  %10669 = vmatprep.subr.mxu0 %v1206_v43  ;;  %v1209_v46 = vld [vmem:[#allocation3 + $0x1] sm:$0xff] }
  0x54   : > { %10585 = vmatprep.mubr.msk.f32.mxu0 %vm473_vm3, %v688_v49  ;;  %10670 = vmatpush3.msra.mxu0 %v1206_v43  ;;  %v1174_v49 = vld [vmem:[#allocation3 + $0x8] sm:$0xff] }
  0x55   : > { %10615 = vmatprep.subr.mxu1 %v9163_v44  ;;  %10671 = vmatprep.subr.mxu0 %v1205_v45 }
  0x56   : > { %10616 = vmatpush3.msra.mxu1 %v9163_v44  ;;  %10617 = vmatprep.mubr.msk.f32.mxu1 %vm506_vm1, %v1209_v46 }
  0x57   : > { %10586 = vmatmul.mubr.msk.f32.gmra.mxu0 %vm473_vm3, %v689_v54  ;;  %10618 = vmatmul.mubr.msk.f32.vlgmr.msra.gmra.mxu1 %vm506_vm1, %v1210_v48  ;;  %v9270_v54 = vld [vmem:[%s15287_s6 + $0x78] sm:$0xff] }
  0x58   : > { %10588 = vmatprep.mubr.msk.f32.mxu0 %vm473_vm3, %v690_v57  ;;  %10672 = vmatpush3.msra.mxu0 %v1205_v45  ;;  %v9267_v57 = vld [vmem:[%s15287_s6 + $0x60] sm:$0xff] }
  0x59   : > { %10721 = vmatprep.subr.mxu1 %v9234_v50  ;;  %10777 = vmatprep.subr.mxu0 %v9270_v54 }
  0x5a   : > { %10722 = vmatpush3.msra.mxu1 %v9234_v50 }
  0x5b   : > { %10589 = vmatmul.mubr.msk.f32.gmra.mxu0 %vm473_vm3, %v691_v62  ;;  %10723 = vmatprep.subr.mxu1 %v9233_v51 }
  0x5c   : > { %10591 = vmatprep.mubr.msk.f32.mxu0 %vm473_vm3, %v692_v1  ;;  %10724 = vmatpush3.msra.mxu1 %v9233_v51 }
  0x5d   : > { %10725 = vmatprep.subr.mxu1 %v9232_v52 }
  0x5e   : > { %10726 = vmatpush3.msra.mxu1 %v9232_v52 }
  0x5f   : > { %10592 = vmatmul.mubr.msk.f32.gmra.mxu0 %vm473_vm3, %v693_v6  ;;  %10727 = vmatprep.subr.mxu1 %v9231_v53 }
  0x60   : > { %10594 = vmatprep.mubr.msk.f32.mxu0 %vm473_vm3, %v694_v9  ;;  %10728 = vmatpush3.msra.mxu1 %v9231_v53 }
  0x61   : > { %10833 = vmatprep.subr.mxu1 %v12063_v58 }
  0x63   : > { %10595 = vmatmul.mubr.msk.f32.gmra.mxu0 %vm473_vm3, %v695_v15 }
  0x64   : > { %10597 = vmatprep.mubr.msk.f32.mxu0 %vm473_vm3, %v696_v18 }
  0x67   : > { %10598 = vmatmul.mubr.msk.f32.gmra.mxu0 %vm473_vm3, %v697_v24 }
  0x68   : > { %10600 = vmatprep.mubr.msk.f32.mxu0 %vm473_vm3, %v698_v27 }
  0x6b   : > { %10601 = vmatmul.mubr.msk.f32.gmra.mxu0 %vm473_vm3, %v699_v31 }
  0x6c   : > { %10603 = vmatprep.mubr.msk.f32.mxu0 %vm473_vm3, %v700_v34 }
  0x6f   : > { %10604 = vmatmul.mubr.msk.f32.gmra.mxu0 %vm473_vm3, %v701_v36 }
  0x70   : > { %10606 = vmatprep.mubr.msk.f32.mxu0 %vm473_vm3, %v702_v38 }
  0x73   : > { %10607 = vmatmul.mubr.msk.f32.gmra.mxu0 %vm473_vm3, %v703_v39 }
  0x74   : > { %10673 = vmatprep.mubr.msk.f32.mxu0 %vm506_vm1, %v1173_v47 }
  0x77   : > { %10674 = vmatmul.mubr.msk.f32.vlgmr.msra.gmra.mxu0 %vm506_vm1, %v1174_v49 }
  0x78   : > { %10778 = vmatpush3.msra.mxu0 %v9270_v54 }
  0x79   : > { %10779 = vmatprep.subr.mxu0 %v9269_v55 }
  0x7a   : > { %10780 = vmatpush3.msra.mxu0 %v9269_v55 }
  0x7b   : > { %10781 = vmatprep.subr.mxu0 %v9268_v56 }
  0x7c   : > { %10782 = vmatpush3.msra.mxu0 %v9268_v56 }
  0x7d   : > { %10783 = vmatprep.subr.mxu0 %v9267_v57 }
  0x7e   : > { %10784 = vmatpush3.msra.mxu0 %v9267_v57 }
  0x7f   : > { %10889 = vmatprep.subr.mxu0 %v12084_v7 }
  0xf7   : > { %v10563_v60 = vpop.f32.mrf.mxu0 }
  0xf8   : > { %v1038_v62 = vmul.f32 %v10563_v60, %v12069_v59 }
  0xf9   : > { %v871_v63 = vpop.f32.mrf.mxu0 }
  0xfa   : > { %v1077_v0 = vadd.f32 %v12074_v61, %v1038_v62  ;;  %v1037_v1 = vmul.f32 %v12069_v59, %v871_v63 }
  0xfb   : > { %v10566_v2 = vpop.f32.mrf.mxu0 }
  0xfc   : > { %v1109_v3 = vmax.f32 %v1077_v0, 0.0  ;;  %v1076_v4 = vadd.f32 %v12074_v61, %v1037_v1  ;;  %v1040_v5 = vmul.f32 %v10566_v2, %v12069_v59 }
  0xfd   : > { %v881_v6 = vpop.f32.mrf.mxu0 }
  0xfe   : > { %1142 = vst.msk [vmem:[#allocation3 + $0x21] sm:$0xff] %vm506_vm1, %v1109_v3  ;;  %v1108_v8 = vmax.f32 %v1076_v4, 0.0  ;;  %v1079_v9 = vadd.f32 %v12074_v61, %v1040_v5  ;;  %v1039_v10 = vmul.f32 %v12069_v59, %v881_v6 }
  0xff   : > { %v10569_v11 = vpop.f32.mrf.mxu0 }
 0x100   : > { %1141 = vst.msk [vmem:[#allocation3 + $0x19] sm:$0xff] %vm506_vm1, %v1108_v8  ;;  %v1111_v12 = vmax.f32 %v1079_v9, 0.0  ;;  %v1078_v13 = vadd.f32 %v12074_v61, %v1039_v10  ;;  %v1042_v15 = vmul.f32 %v10569_v11, %v12069_v59 }
 0x101   : > { %v891_v16 = vpop.f32.mrf.mxu0 }
 0x102   : > { %1144 = vst.msk [vmem:[#allocation3 + $0x39] sm:$0xff] %vm506_vm1, %v1111_v12  ;;  %v1110_v17 = vmax.f32 %v1078_v13, 0.0  ;;  %v1081_v18 = vadd.f32 %v12074_v61, %v1042_v15  ;;  %v1041_v19 = vmul.f32 %v12069_v59, %v891_v16 }
 0x103   : > { %v10572_v20 = vpop.f32.mrf.mxu0 }
 0x104   : > { %1143 = vst.msk [vmem:[#allocation3 + $0x31] sm:$0xff] %vm506_vm1, %v1110_v17  ;;  %v1113_v22 = vmax.f32 %v1081_v18, 0.0  ;;  %v1080_v23 = vadd.f32 %v12074_v61, %v1041_v19  ;;  %v1044_v24 = vmul.f32 %v10572_v20, %v12069_v59 }
 0x105   : > { %v901_v25 = vpop.f32.mrf.mxu0  ;;  %v12115_v36 = vld [vmem:[#allocation3 + $0x21] sm:$0xff] }
 0x106   : > { %1146 = vst.msk [vmem:[#allocation3 + $0x51] sm:$0xff] %vm506_vm1, %v1113_v22  ;;  %v1112_v26 = vmax.f32 %v1080_v23, 0.0  ;;  %v1083_v27 = vadd.f32 %v12074_v61, %v1044_v24  ;;  %v1043_v28 = vmul.f32 %v12069_v59, %v901_v25 }
 0x107   : > { %v10575_v29 = vpop.f32.mrf.mxu0  ;;  %v12102_v30 = vld [vmem:[#allocation3 + $0x19] sm:$0xff] }
 0x108   : > { %v12104_v31 = vld [vmem:[#allocation3 + $0x18] sm:$0xff]  ;;  %v12106_v32 = vld [vmem:[#allocation3 + $0x20] sm:$0xff]  ;;  %1145 = vst.msk [vmem:[#allocation3 + $0x49] sm:$0xff] %vm506_vm1, %v1112_v26  ;;  %v1115_v33 = vmax.f32 %v1083_v27, 0.0  ;;  %v1082_v34 = vadd.f32 %v12074_v61, %v1043_v28  ;;  %v1046_v35 = vmul.f32 %v10575_v29, %v12069_v59  ;;  %10620 = vmatprep.mubr.msk.f32.mxu1 %vm506_vm1, %v12102_v30 }
 0x109   : > { %10676 = vmatprep.mubr.msk.f32.mxu0 %vm506_vm1, %v12104_v31  ;;  %v911_v37 = vpop.f32.mrf.mxu0  ;;  %10621 = vmatmul.mubr.msk.f32.gmra.mxu1 %vm506_vm1, %v12115_v36  ;;  %v12137_v46 = vld [vmem:[#allocation3 + $0x39] sm:$0xff] }
 0x10a   : > { %10677 = vmatmul.mubr.msk.f32.gmra.mxu0 %vm506_vm1, %v12106_v32  ;;  %1148 = vst.msk [vmem:[#allocation3 + $0x69] sm:$0xff] %vm506_vm1, %v1115_v33  ;;  %v1114_v38 = vmax.f32 %v1082_v34, 0.0  ;;  %v1085_v39 = vadd.f32 %v12074_v61, %v1046_v35  ;;  %v1045_v14 = vmul.f32 %v12069_v59, %v911_v37 }
 0x10b   : > { %v10578_v40 = vpop.f32.mrf.mxu0  ;;  %v12124_v21 = vld [vmem:[#allocation3 + $0x31] sm:$0xff] }
 0x10c   : > { %v12126_v41 = vld [vmem:[#allocation3 + $0x30] sm:$0xff]  ;;  %v12128_v42 = vld [vmem:[#allocation3 + $0x38] sm:$0xff]  ;;  %1147 = vst.msk [vmem:[#allocation3 + $0x61] sm:$0xff] %vm506_vm1, %v1114_v38  ;;  %v1117_v43 = vmax.f32 %v1085_v39, 0.0  ;;  %v1084_v44 = vadd.f32 %v12074_v61, %v1045_v14  ;;  %v1048_v45 = vmul.f32 %v10578_v40, %v12069_v59  ;;  %10623 = vmatprep.mubr.msk.f32.mxu1 %vm506_vm1, %v12124_v21 }
 0x10d   : > { %10679 = vmatprep.mubr.msk.f32.mxu0 %vm506_vm1, %v12126_v41  ;;  %v921_v47 = vpop.f32.mrf.mxu0  ;;  %10624 = vmatmul.mubr.msk.f32.gmra.mxu1 %vm506_vm1, %v12137_v46  ;;  %v12159_v60 = vld [vmem:[#allocation3 + $0x51] sm:$0xff] }
 0x10e   : > { %10680 = vmatmul.mubr.msk.f32.gmra.mxu0 %vm506_vm1, %v12128_v42  ;;  %1150 = vst.msk [vmem:[#allocation3 + $0x81] sm:$0xff] %vm506_vm1, %v1117_v43  ;;  %v1116_v48 = vmax.f32 %v1084_v44, 0.0  ;;  %v1087_v49 = vadd.f32 %v12074_v61, %v1048_v45  ;;  %v1047_v50 = vmul.f32 %v12069_v59, %v921_v47 }
 0x10f   : > { %v10581_v51 = vpop.f32.mrf.mxu0  ;;  %v12146_v52 = vld [vmem:[#allocation3 + $0x49] sm:$0xff] }
 0x110   : > { %v12148_v53 = vld [vmem:[#allocation3 + $0x48] sm:$0xff]  ;;  %v12150_v54 = vld [vmem:[#allocation3 + $0x50] sm:$0xff]  ;;  %1149 = vst.msk [vmem:[#allocation3 + $0x79] sm:$0xff] %vm506_vm1, %v1116_v48  ;;  %v1119_v55 = vmax.f32 %v1087_v49, 0.0  ;;  %v1086_v56 = vadd.f32 %v12074_v61, %v1047_v50  ;;  %v1050_v57 = vmul.f32 %v10581_v51, %v12069_v59  ;;  %10626 = vmatprep.mubr.msk.f32.mxu1 %vm506_vm1, %v12146_v52 }
 0x111   : > { %10682 = vmatprep.mubr.msk.f32.mxu0 %vm506_vm1, %v12148_v53  ;;  %v931_v62 = vpop.f32.mrf.mxu0  ;;  %10627 = vmatmul.mubr.msk.f32.gmra.mxu1 %vm506_vm1, %v12159_v60  ;;  %v12181_v10 = vld [vmem:[#allocation3 + $0x69] sm:$0xff] }
 0x112   : > { %10683 = vmatmul.mubr.msk.f32.gmra.mxu0 %vm506_vm1, %v12150_v54  ;;  %1152 = vst.msk [vmem:[#allocation3 + $0x99] sm:$0xff] %vm506_vm1, %v1119_v55  ;;  %v1118_v63 = vmax.f32 %v1086_v56, 0.0  ;;  %v1089_v0 = vadd.f32 %v12074_v61, %v1050_v57  ;;  %v1049_v1 = vmul.f32 %v12069_v59, %v931_v62 }
 0x113   : > { %v10584_v2 = vpop.f32.mrf.mxu0  ;;  %v12168_v3 = vld [vmem:[#allocation3 + $0x61] sm:$0xff] }
 0x114   : > { %v12170_v4 = vld [vmem:[#allocation3 + $0x60] sm:$0xff]  ;;  %v12172_v5 = vld [vmem:[#allocation3 + $0x68] sm:$0xff]  ;;  %1151 = vst.msk [vmem:[#allocation3 + $0x91] sm:$0xff] %vm506_vm1, %v1118_v63  ;;  %v1121_v6 = vmax.f32 %v1089_v0, 0.0  ;;  %v1088_v8 = vadd.f32 %v12074_v61, %v1049_v1  ;;  %v1052_v9 = vmul.f32 %v10584_v2, %v12069_v59  ;;  %10629 = vmatprep.mubr.msk.f32.mxu1 %vm506_vm1, %v12168_v3 }
 0x115   : > { %10685 = vmatprep.mubr.msk.f32.mxu0 %vm506_vm1, %v12170_v4  ;;  %v941_v11 = vpop.f32.mrf.mxu0  ;;  %10630 = vmatmul.mubr.msk.f32.gmra.mxu1 %vm506_vm1, %v12181_v10  ;;  %v12203_v24 = vld [vmem:[#allocation3 + $0x81] sm:$0xff] }
 0x116   : > { %10686 = vmatmul.mubr.msk.f32.gmra.mxu0 %vm506_vm1, %v12172_v5  ;;  %1154 = vst.msk [vmem:[#allocation3 + $0xb1] sm:$0xff] %vm506_vm1, %v1121_v6  ;;  %v1120_v12 = vmax.f32 %v1088_v8, 0.0  ;;  %v1091_v13 = vadd.f32 %v12074_v61, %v1052_v9  ;;  %v1051_v15 = vmul.f32 %v12069_v59, %v941_v11 }
 0x117   : > { %v10587_v16 = vpop.f32.mrf.mxu0  ;;  %v12190_v17 = vld [vmem:[#allocation3 + $0x79] sm:$0xff] }
 0x118   : > { %v12192_v18 = vld [vmem:[#allocation3 + $0x78] sm:$0xff]  ;;  %v12194_v19 = vld [vmem:[#allocation3 + $0x80] sm:$0xff]  ;;  %1153 = vst.msk [vmem:[#allocation3 + $0xa9] sm:$0xff] %vm506_vm1, %v1120_v12  ;;  %v1123_v20 = vmax.f32 %v1091_v13, 0.0  ;;  %v1090_v22 = vadd.f32 %v12074_v61, %v1051_v15  ;;  %v1054_v23 = vmul.f32 %v10587_v16, %v12069_v59  ;;  %10632 = vmatprep.mubr.msk.f32.mxu1 %vm506_vm1, %v12190_v17 }
 0x119   : > { %10688 = vmatprep.mubr.msk.f32.mxu0 %vm506_vm1, %v12192_v18  ;;  %v951_v25 = vpop.f32.mrf.mxu0  ;;  %10633 = vmatmul.mubr.msk.f32.gmra.mxu1 %vm506_vm1, %v12203_v24  ;;  %v12225_v14 = vld [vmem:[#allocation3 + $0x99] sm:$0xff] }
 0x11a   : > { %10689 = vmatmul.mubr.msk.f32.gmra.mxu0 %vm506_vm1, %v12194_v19  ;;  %1156 = vst.msk [vmem:[#allocation3 + $0xc9] sm:$0xff] %vm506_vm1, %v1123_v20  ;;  %v1122_v26 = vmax.f32 %v1090_v22, 0.0  ;;  %v1093_v27 = vadd.f32 %v12074_v61, %v1054_v23  ;;  %v1053_v28 = vmul.f32 %v12069_v59, %v951_v25 }
 0x11b   : > { %v10590_v29 = vpop.f32.mrf.mxu0  ;;  %v12212_v33 = vld [vmem:[#allocation3 + $0x91] sm:$0xff] }
 0x11c   : > { %v12214_v34 = vld [vmem:[#allocation3 + $0x90] sm:$0xff]  ;;  %v12216_v35 = vld [vmem:[#allocation3 + $0x98] sm:$0xff]  ;;  %1155 = vst.msk [vmem:[#allocation3 + $0xc1] sm:$0xff] %vm506_vm1, %v1122_v26  ;;  %v1125_v37 = vmax.f32 %v1093_v27, 0.0  ;;  %v1092_v38 = vadd.f32 %v12074_v61, %v1053_v28  ;;  %v1056_v39 = vmul.f32 %v10590_v29, %v12069_v59  ;;  %10635 = vmatprep.mubr.msk.f32.mxu1 %vm506_vm1, %v12212_v33 }
 0x11d   : > { %10691 = vmatprep.mubr.msk.f32.mxu0 %vm506_vm1, %v12214_v34  ;;  %v961_v40 = vpop.f32.mrf.mxu0  ;;  %10636 = vmatmul.mubr.msk.f32.gmra.mxu1 %vm506_vm1, %v12225_v14  ;;  %v12247_v57 = vld [vmem:[#allocation3 + $0xb1] sm:$0xff] }
 0x11e   : > { %10692 = vmatmul.mubr.msk.f32.gmra.mxu0 %vm506_vm1, %v12216_v35  ;;  %1158 = vst.msk [vmem:[#allocation3 + $0xe1] sm:$0xff] %vm506_vm1, %v1125_v37  ;;  %v1124_v43 = vmax.f32 %v1092_v38, 0.0  ;;  %v1095_v44 = vadd.f32 %v12074_v61, %v1056_v39  ;;  %v1055_v45 = vmul.f32 %v12069_v59, %v961_v40 }
 0x11f   : > { %v10593_v47 = vpop.f32.mrf.mxu0  ;;  %v12234_v48 = vld [vmem:[#allocation3 + $0xa9] sm:$0xff] }
 0x120   : > { %v12236_v49 = vld [vmem:[#allocation3 + $0xa8] sm:$0xff]  ;;  %v12238_v50 = vld [vmem:[#allocation3 + $0xb0] sm:$0xff]  ;;  %1157 = vst.msk [vmem:[#allocation3 + $0xd9] sm:$0xff] %vm506_vm1, %v1124_v43  ;;  %v1127_v51 = vmax.f32 %v1095_v44, 0.0  ;;  %v1094_v55 = vadd.f32 %v12074_v61, %v1055_v45  ;;  %v1058_v56 = vmul.f32 %v10593_v47, %v12069_v59  ;;  %10638 = vmatprep.mubr.msk.f32.mxu1 %vm506_vm1, %v12234_v48 }
 0x121   : > { %10694 = vmatprep.mubr.msk.f32.mxu0 %vm506_vm1, %v12236_v49  ;;  %v971_v62 = vpop.f32.mrf.mxu0  ;;  %10639 = vmatmul.mubr.msk.f32.gmra.mxu1 %vm506_vm1, %v12247_v57  ;;  %v12269_v15 = vld [vmem:[#allocation3 + $0xc9] sm:$0xff] }
 0x122   : > { %10695 = vmatmul.mubr.msk.f32.gmra.mxu0 %vm506_vm1, %v12238_v50  ;;  %1160 = vst.msk [vmem:[#allocation3 + $0xf9] sm:$0xff] %vm506_vm1, %v1127_v51  ;;  %v1126_v63 = vmax.f32 %v1094_v55, 0.0  ;;  %v1097_v0 = vadd.f32 %v12074_v61, %v1058_v56  ;;  %v1057_v1 = vmul.f32 %v12069_v59, %v971_v62 }
 0x123   : > { %v10596_v2 = vpop.f32.mrf.mxu0  ;;  %v12256_v6 = vld [vmem:[#allocation3 + $0xc1] sm:$0xff] }
 0x124   : > { %v12258_v8 = vld [vmem:[#allocation3 + $0xc0] sm:$0xff]  ;;  %v12260_v9 = vld [vmem:[#allocation3 + $0xc8] sm:$0xff]  ;;  %1159 = vst.msk [vmem:[#allocation3 + $0xf1] sm:$0xff] %vm506_vm1, %v1126_v63  ;;  %v1129_v11 = vmax.f32 %v1097_v0, 0.0  ;;  %v1096_v12 = vadd.f32 %v12074_v61, %v1057_v1  ;;  %v1060_v13 = vmul.f32 %v10596_v2, %v12069_v59  ;;  %10641 = vmatprep.mubr.msk.f32.mxu1 %vm506_vm1, %v12256_v6 }
 0x125   : > { %10697 = vmatprep.mubr.msk.f32.mxu0 %vm506_vm1, %v12258_v8  ;;  %v981_v16 = vpop.f32.mrf.mxu0  ;;  %10642 = vmatmul.mubr.msk.f32.gmra.mxu1 %vm506_vm1, %v12269_v15  ;;  %v12291_v39 = vld [vmem:[#allocation3 + $0xe1] sm:$0xff] }
 0x126   : > { %10698 = vmatmul.mubr.msk.f32.gmra.mxu0 %vm506_vm1, %v12260_v9  ;;  %1162 = vst.msk [vmem:[#allocation3 + $0x111] sm:$0xff] %vm506_vm1, %v1129_v11  ;;  %v1128_v20 = vmax.f32 %v1096_v12, 0.0  ;;  %v1099_v22 = vadd.f32 %v12074_v61, %v1060_v13  ;;  %v1059_v23 = vmul.f32 %v12069_v59, %v981_v16 }
 0x127   : > { %v10599_v25 = vpop.f32.mrf.mxu0  ;;  %v12278_v26 = vld [vmem:[#allocation3 + $0xd9] sm:$0xff] }
 0x128   : > { %v12280_v27 = vld [vmem:[#allocation3 + $0xd8] sm:$0xff]  ;;  %v12282_v28 = vld [vmem:[#allocation3 + $0xe0] sm:$0xff]  ;;  %1161 = vst.msk [vmem:[#allocation3 + $0x109] sm:$0xff] %vm506_vm1, %v1128_v20  ;;  %v1131_v29 = vmax.f32 %v1099_v22, 0.0  ;;  %v1098_v37 = vadd.f32 %v12074_v61, %v1059_v23  ;;  %v1062_v38 = vmul.f32 %v10599_v25, %v12069_v59  ;;  %10644 = vmatprep.mubr.msk.f32.mxu1 %vm506_vm1, %v12278_v26 }
 0x129   : > { %10700 = vmatprep.mubr.msk.f32.mxu0 %vm506_vm1, %v12280_v27  ;;  %v991_v40 = vpop.f32.mrf.mxu0  ;;  %10645 = vmatmul.mubr.msk.f32.gmra.mxu1 %vm506_vm1, %v12291_v39  ;;  %v12313_v1 = vld [vmem:[#allocation3 + $0xf9] sm:$0xff] }
 0x12a   : > { %10701 = vmatmul.mubr.msk.f32.gmra.mxu0 %vm506_vm1, %v12282_v28  ;;  %1164 = vst.msk [vmem:[#allocation3 + $0x129] sm:$0xff] %vm506_vm1, %v1131_v29  ;;  %v1130_v43 = vmax.f32 %v1098_v37, 0.0  ;;  %v1101_v44 = vadd.f32 %v12074_v61, %v1062_v38  ;;  %v1061_v45 = vmul.f32 %v12069_v59, %v991_v40 }
 0x12b   : > { %v10602_v47 = vpop.f32.mrf.mxu0  ;;  %v12300_v51 = vld [vmem:[#allocation3 + $0xf1] sm:$0xff] }
 0x12c   : > { %v12302_v55 = vld [vmem:[#allocation3 + $0xf0] sm:$0xff]  ;;  %v12304_v56 = vld [vmem:[#allocation3 + $0xf8] sm:$0xff]  ;;  %1163 = vst.msk [vmem:[#allocation3 + $0x121] sm:$0xff] %vm506_vm1, %v1130_v43  ;;  %v1133_v62 = vmax.f32 %v1101_v44, 0.0  ;;  %v1100_v63 = vadd.f32 %v12074_v61, %v1061_v45  ;;  %v1064_v0 = vmul.f32 %v10602_v47, %v12069_v59  ;;  %10647 = vmatprep.mubr.msk.f32.mxu1 %vm506_vm1, %v12300_v51 }
 0x12d   : > { %10703 = vmatprep.mubr.msk.f32.mxu0 %vm506_vm1, %v12302_v55  ;;  %v1001_v2 = vpop.f32.mrf.mxu0  ;;  %10648 = vmatmul.mubr.msk.f32.gmra.mxu1 %vm506_vm1, %v12313_v1  ;;  %v12335_v38 = vld [vmem:[#allocation3 + $0x111] sm:$0xff] }
 0x12e   : > { %10704 = vmatmul.mubr.msk.f32.gmra.mxu0 %vm506_vm1, %v12304_v56  ;;  %1166 = vst.msk [vmem:[#allocation3 + $0x141] sm:$0xff] %vm506_vm1, %v1133_v62  ;;  %v1132_v11 = vmax.f32 %v1100_v63, 0.0  ;;  %v1103_v12 = vadd.f32 %v12074_v61, %v1064_v0  ;;  %v1063_v13 = vmul.f32 %v12069_v59, %v1001_v2 }
 0x12f   : > { %v10605_v16 = vpop.f32.mrf.mxu0  ;;  %v12322_v20 = vld [vmem:[#allocation3 + $0x109] sm:$0xff] }
 0x130   : > { %v12324_v22 = vld [vmem:[#allocation3 + $0x108] sm:$0xff]  ;;  %v12326_v23 = vld [vmem:[#allocation3 + $0x110] sm:$0xff]  ;;  %1165 = vst.msk [vmem:[#allocation3 + $0x139] sm:$0xff] %vm506_vm1, %v1132_v11  ;;  %v1135_v25 = vmax.f32 %v1103_v12, 0.0  ;;  %v1102_v29 = vadd.f32 %v12074_v61, %v1063_v13  ;;  %v1066_v37 = vmul.f32 %v10605_v16, %v12069_v59  ;;  %10650 = vmatprep.mubr.msk.f32.mxu1 %vm506_vm1, %v12322_v20 }
 0x131   : > { %15320 = vst [vmem:[#allocation4_spill] sm:$0xff] %v12324_v22  ;;  %15321 = vst [vmem:[#allocation5_spill] sm:$0xff] %v12326_v23  ;;  %10706 = vmatprep.mubr.msk.f32.mxu0 %vm506_vm1, %v12324_v22  ;;  %v1011_v40 = vpop.f32.mrf.mxu0  ;;  %10651 = vmatmul.mubr.msk.f32.gmra.mxu1 %vm506_vm1, %v12335_v38  ;;  %v12356_v12 = vld [vmem:[#allocation3 + $0x129] sm:$0xff] }
 0x132   : > { %10707 = vmatmul.mubr.msk.f32.gmra.mxu0 %vm506_vm1, %v12326_v23  ;;  %1168 = vst.msk [vmem:[#allocation3 + $0x159] sm:$0xff] %vm506_vm1, %v1135_v25  ;;  %v1134_v43 = vmax.f32 %v1102_v29, 0.0  ;;  %v1105_v44 = vadd.f32 %v12074_v61, %v1066_v37  ;;  %v1065_v45 = vmul.f32 %v12069_v59, %v1011_v40 }
 0x133   : > { %v12344_v47 = vld [vmem:[#allocation3 + $0x121] sm:$0xff]  ;;  %v10608_v0 = vpop.f32.mrf.mxu0 }
 0x134   : > { %v12346_v62 = vld [vmem:[#allocation3 + $0x120] sm:$0xff]  ;;  %v12348_v63 = vld [vmem:[#allocation3 + $0x128] sm:$0xff]  ;;  %1167 = vst.msk [vmem:[#allocation3 + $0x151] sm:$0xff] %vm506_vm1, %v1134_v43  ;;  %v1137_v2 = vmax.f32 %v1105_v44, 0.0  ;;  %v1104_v11 = vadd.f32 %v12074_v61, %v1065_v45  ;;  %10653 = vmatprep.mubr.msk.f32.mxu1 %vm506_vm1, %v12344_v47  ;;  %v1068_v13 = vmul.f32 %v10608_v0, %v12069_v59 }
 0x135   : > { %15322 = vst [vmem:[#allocation6_spill] sm:$0xff] %v12346_v62  ;;  %15323 = vst [vmem:[#allocation7_spill] sm:$0xff] %v12348_v63  ;;  %10709 = vmatprep.mubr.msk.f32.mxu0 %vm506_vm1, %v12346_v62  ;;  %10654 = vmatmul.mubr.msk.f32.gmra.mxu1 %vm506_vm1, %v12356_v12  ;;  %v1021_v16 = vpop.f32.mrf.mxu0  ;;  %v12377_v45 = vld [vmem:[#allocation3 + $0x141] sm:$0xff] }
 0x136   : > { %10710 = vmatmul.mubr.msk.f32.gmra.mxu0 %vm506_vm1, %v12348_v63  ;;  %1170 = vst.msk [vmem:[#allocation3 + $0x171] sm:$0xff] %vm506_vm1, %v1137_v2  ;;  %v1136_v25 = vmax.f32 %v1104_v11, 0.0  ;;  %v1107_v29 = vadd.f32 %v12074_v61, %v1068_v13  ;;  %v1067_v37 = vmul.f32 %v12069_v59, %v1021_v16  ;;  %15325 = vst [vmem:[#allocation9_spill] sm:$0xff] %v12377_v45 }
 0x137   : > { %v12366_v40 = vld [vmem:[#allocation3 + $0x139] sm:$0xff] }
 0x138   : > { %v12368_v43 = vld [vmem:[#allocation3 + $0x138] sm:$0xff]  ;;  %v12370_v44 = vld [vmem:[#allocation3 + $0x140] sm:$0xff]  ;;  %1169 = vst.msk [vmem:[#allocation3 + $0x169] sm:$0xff] %vm506_vm1, %v1136_v25  ;;  %10656 = vmatprep.mubr.msk.f32.mxu1 %vm506_vm1, %v12366_v40  ;;  %v1139_v0 = vmax.f32 %v1107_v29, 0.0  ;;  %v1106_v2 = vadd.f32 %v12074_v61, %v1067_v37 }
 0x139   : > { %15324 = vst [vmem:[#allocation8_spill] sm:$0xff] %v12368_v43  ;;  %10712 = vmatprep.mubr.msk.f32.mxu0 %vm506_vm1, %v12368_v43  ;;  %10657 = vmatmul.mubr.msk.f32.gmra.mxu1 %vm506_vm1, %v12377_v45  ;;  %v12395_v61 = vld [vmem:[#allocation3 + $0x159] sm:$0xff]  ;;  %v1888_v25 = vld [vmem:[#allocation3 + $0x2] sm:$0xff] }
 0x13a   : > { %10713 = vmatmul.mubr.msk.f32.gmra.mxu0 %vm506_vm1, %v12370_v44  ;;  %1172 = vst.msk [vmem:[#allocation3 + $0x189] sm:$0xff] %vm506_vm1, %v1139_v0  ;;  %v1138_v59 = vmax.f32 %v1106_v2, 0.0  ;;  %15327 = vst [vmem:[#allocation11_spill] sm:$0xff] %v12395_v61 }
 0x13b   : > { %v12385_v11 = vld [vmem:[#allocation3 + $0x151] sm:$0xff] }
 0x13c   : > { %15326 = vst [vmem:[#allocation10_spill] sm:$0xff] %v12385_v11  ;;  %v12387_v13 = vld [vmem:[#allocation3 + $0x150] sm:$0xff]  ;;  %v12389_v16 = vld [vmem:[#allocation3 + $0x158] sm:$0xff]  ;;  %10659 = vmatprep.mubr.msk.f32.mxu1 %vm506_vm1, %v12385_v11  ;;  %1171 = vst.msk [vmem:[#allocation3 + $0x181] sm:$0xff] %vm506_vm1, %v1138_v59  ;;  %v10675_v11 = vpop.f32.mrf.mxu0 }
 0x13d   : > { %10715 = vmatprep.mubr.msk.f32.mxu0 %vm506_vm1, %v12387_v13  ;;  %10660 = vmatmul.mubr.msk.f32.gmra.mxu1 %vm506_vm1, %v12395_v61  ;;  %v12412_v2 = vld [vmem:[#allocation3 + $0x171] sm:$0xff]  ;;  %v10619_v61 = vpop.f32.mrf.mxu1 }
 0x13e   : > { %10716 = vmatmul.mubr.msk.f32.gmra.mxu0 %vm506_vm1, %v12389_v16  ;;  %15329 = vst [vmem:[#allocation13_spill] sm:$0xff] %v12412_v2  ;;  %v1889_v59 = vld [vmem:[#allocation3 + $0xa] sm:$0xff]  ;;  %v12429_v45 = vadd.f32 %v10675_v11, %v10619_v61  ;;  %v9303_v11 = vld [vmem:[%s15287_s6 + $0x80] sm:$0xff]  ;;  %v12473_v61 = vld [vmem:[#allocation3 + $0x52] sm:$0xff] }
 0x13f   : > { %v12402_v29 = vld [vmem:[#allocation3 + $0x169] sm:$0xff] }
 0x140   : > { %15328 = vst [vmem:[#allocation12_spill] sm:$0xff] %v12402_v29  ;;  %v12404_v37 = vld [vmem:[#allocation3 + $0x168] sm:$0xff]  ;;  %v12406_v0 = vld [vmem:[#allocation3 + $0x170] sm:$0xff]  ;;  %10662 = vmatprep.mubr.msk.f32.mxu1 %vm506_vm1, %v12402_v29  ;;  %15330 = vst [vmem:[#allocation14_spill] sm:$0xff] %v12429_v45 }
 0x141   : > { %10718 = vmatprep.mubr.msk.f32.mxu0 %vm506_vm1, %v12404_v37  ;;  %10663 = vmatmul.mubr.msk.f32.gmra.mxu1 %vm506_vm1, %v12412_v2  ;;  %v9305_v29 = vld [vmem:[%s15287_s6 + $0x90] sm:$0xff]  ;;  %v12427_v2 = vld [vmem:[#allocation3 + $0x1a] sm:$0xff]  ;;  %v12590_v45 = vld [vmem:[#allocation3 + $0x122] sm:$0xff] }
 0x142   : > { %10719 = vmatmul.mubr.msk.f32.gmra.mxu0 %vm506_vm1, %v12406_v0  ;;  %10729 = vmatprep.mubr.msk.f32.mxu1 %vm506_vm1, %v1888_v25  ;;  %v9339_v25 = vld [vmem:[%s15287_s6 + $0xa0] sm:$0xff] }
 0x143   : > { %10785 = vmatprep.mubr.msk.f32.mxu0 %vm506_vm1, %v12104_v31  ;;  %v12436_v31 = vld [vmem:[#allocation3 + $0x22] sm:$0xff] }
 0x145   : > { %10730 = vmatmul.mubr.msk.f32.vlgmr.msra.gmra.mxu1 %vm506_vm1, %v1889_v59  ;;  %v12499_v59 = vld [vmem:[%s15287_s6 + $0xf8] sm:$0xff] }
 0x146   : > { %10786 = vmatmul.mubr.msk.f32.vlgmr.msra.gmra.mxu0 %vm506_vm1, %v12106_v32  ;;  %10834 = vmatpush3.msra.mxu1 %v12063_v58  ;;  %v9304_v32 = vld [vmem:[%s15287_s6 + $0x88] sm:$0xff]  ;;  %v9341_v58 = vld [vmem:[%s15287_s6 + $0xb0] sm:$0xff] }
 0x147   : > { %10732 = vmatprep.mubr.msk.f32.mxu1 %vm506_vm1, %v12427_v2  ;;  %10788 = vmatprep.mubr.msk.f32.mxu0 %vm506_vm1, %v12126_v41  ;;  %v12449_v41 = vld [vmem:[#allocation3 + $0x32] sm:$0xff] }
 0x148   : > { %10835 = vmatprep.subr.mxu1 %v9305_v29  ;;  %10890 = vmatpush3.msra.mxu0 %v12084_v7  ;;  %v12455_v7 = vld [vmem:[#allocation3 + $0x3a] sm:$0xff] }
 0x149   : > { %10836 = vmatpush3.msra.mxu1 %v9305_v29  ;;  %10891 = vmatprep.subr.mxu0 %v9341_v58  ;;  %v12494_v29 = vld [vmem:[#allocation3 + $0x6a] sm:$0xff] }
 0x14a   : > { %10733 = vmatmul.mubr.msk.f32.gmra.mxu1 %vm506_vm1, %v12436_v31  ;;  %10789 = vmatmul.mubr.msk.f32.gmra.mxu0 %vm506_vm1, %v12128_v42  ;;  %v9340_v42 = vld [vmem:[%s15287_s6 + $0xa8] sm:$0xff] }
 0x14b   : > { %10735 = vmatprep.mubr.msk.f32.mxu1 %vm506_vm1, %v12449_v41  ;;  %10791 = vmatprep.mubr.msk.f32.mxu0 %vm506_vm1, %v12148_v53  ;;  %v12467_v53 = vld [vmem:[#allocation3 + $0x4a] sm:$0xff] }
 0x14c   : > { %10837 = vmatprep.subr.mxu1 %v9304_v32  ;;  %10892 = vmatpush3.msra.mxu0 %v9341_v58  ;;  %v12566_v58 = vld [vmem:[#allocation3 + $0xf2] sm:$0xff] }
 0x14d   : > { %10838 = vmatpush3.msra.mxu1 %v9304_v32  ;;  %10893 = vmatprep.subr.mxu0 %v9340_v42  ;;  %v12518_v32 = vld [vmem:[#allocation3 + $0x92] sm:$0xff] }
 0x14e   : > { %10736 = vmatmul.mubr.msk.f32.gmra.mxu1 %vm506_vm1, %v12455_v7  ;;  %10792 = vmatmul.mubr.msk.f32.gmra.mxu0 %vm506_vm1, %v12150_v54  ;;  %v12481_v54 = vld [vmem:[%s15287_s6 + $0xd8] sm:$0xff] }
 0x14f   : > { %10738 = vmatprep.mubr.msk.f32.mxu1 %vm506_vm1, %v12467_v53  ;;  %10794 = vmatprep.mubr.msk.f32.mxu0 %vm506_vm1, %v12170_v4  ;;  %v12487_v4 = vld [vmem:[#allocation3 + $0x62] sm:$0xff] }
 0x150   : > { %10839 = vmatprep.subr.mxu1 %v9303_v11  ;;  %10894 = vmatpush3.msra.mxu0 %v9340_v42  ;;  %v12578_v42 = vld [vmem:[#allocation3 + $0x10a] sm:$0xff] }
 0x151   : > { %10840 = vmatpush3.msra.mxu1 %v9303_v11  ;;  %10895 = vmatprep.subr.mxu0 %v9339_v25  ;;  %v12572_v11 = vld [vmem:[#allocation3 + $0xfa] sm:$0xff] }
 0x152   : > { %10739 = vmatmul.mubr.msk.f32.gmra.mxu1 %vm506_vm1, %v12473_v61  ;;  %10795 = vmatmul.mubr.msk.f32.gmra.mxu0 %vm506_vm1, %v12172_v5  ;;  %v12505_v5 = vld [vmem:[#allocation3 + $0x7a] sm:$0xff] }
 0x153   : > { %10741 = vmatprep.mubr.msk.f32.mxu1 %vm506_vm1, %v12487_v4  ;;  %10797 = vmatprep.mubr.msk.f32.mxu0 %vm506_vm1, %v12192_v18  ;;  %v12512_v18 = vld [vmem:[#allocation3 + $0x82] sm:$0xff] }
 0x154   : > { %10945 = vmatprep.subr.mxu1 %v12481_v54  ;;  %10896 = vmatpush3.msra.mxu0 %v9339_v25  ;;  %v12584_v25 = vld [vmem:[#allocation3 + $0x112] sm:$0xff] }
 0x155   : > { %11001 = vmatprep.subr.mxu0 %v12499_v59 }
 0x156   : > { %10742 = vmatmul.mubr.msk.f32.gmra.mxu1 %vm506_vm1, %v12494_v29  ;;  %10798 = vmatmul.mubr.msk.f32.gmra.mxu0 %vm506_vm1, %v12194_v19  ;;  %v12524_v19 = vld [vmem:[#allocation3 + $0x9a] sm:$0xff] }
 0x157   : > { %10744 = vmatprep.mubr.msk.f32.mxu1 %vm506_vm1, %v12505_v5  ;;  %10800 = vmatprep.mubr.msk.f32.mxu0 %vm506_vm1, %v12214_v34  ;;  %v12530_v34 = vld [vmem:[#allocation3 + $0xaa] sm:$0xff] }
 0x15a   : > { %10745 = vmatmul.mubr.msk.f32.gmra.mxu1 %vm506_vm1, %v12512_v18  ;;  %10801 = vmatmul.mubr.msk.f32.gmra.mxu0 %vm506_vm1, %v12216_v35  ;;  %v12536_v35 = vld [vmem:[#allocation3 + $0xb2] sm:$0xff] }
 0x15b   : > { %10747 = vmatprep.mubr.msk.f32.mxu1 %vm506_vm1, %v12518_v32  ;;  %10803 = vmatprep.mubr.msk.f32.mxu0 %vm506_vm1, %v12236_v49  ;;  %v12542_v49 = vld [vmem:[#allocation3 + $0xc2] sm:$0xff] }
 0x15e   : > { %10748 = vmatmul.mubr.msk.f32.gmra.mxu1 %vm506_vm1, %v12524_v19  ;;  %10804 = vmatmul.mubr.msk.f32.gmra.mxu0 %vm506_vm1, %v12238_v50  ;;  %v12548_v50 = vld [vmem:[#allocation3 + $0xca] sm:$0xff] }
 0x15f   : > { %10750 = vmatprep.mubr.msk.f32.mxu1 %vm506_vm1, %v12530_v34  ;;  %10806 = vmatprep.mubr.msk.f32.mxu0 %vm506_vm1, %v12258_v8  ;;  %v12554_v8 = vld [vmem:[#allocation3 + $0xda] sm:$0xff] }
 0x162   : > { %10751 = vmatmul.mubr.msk.f32.gmra.mxu1 %vm506_vm1, %v12536_v35  ;;  %10807 = vmatmul.mubr.msk.f32.gmra.mxu0 %vm506_vm1, %v12260_v9  ;;  %v12560_v9 = vld [vmem:[#allocation3 + $0xe2] sm:$0xff] }
 0x163   : > { %10753 = vmatprep.mubr.msk.f32.mxu1 %vm506_vm1, %v12542_v49  ;;  %10809 = vmatprep.mubr.msk.f32.mxu0 %vm506_vm1, %v12280_v27 }
 0x166   : > { %10754 = vmatmul.mubr.msk.f32.gmra.mxu1 %vm506_vm1, %v12548_v50  ;;  %10810 = vmatmul.mubr.msk.f32.gmra.mxu0 %vm506_vm1, %v12282_v28 }
 0x167   : > { %10756 = vmatprep.mubr.msk.f32.mxu1 %vm506_vm1, %v12554_v8  ;;  %10812 = vmatprep.mubr.msk.f32.mxu0 %vm506_vm1, %v12302_v55 }
 0x16a   : > { %10757 = vmatmul.mubr.msk.f32.gmra.mxu1 %vm506_vm1, %v12560_v9  ;;  %10813 = vmatmul.mubr.msk.f32.gmra.mxu0 %vm506_vm1, %v12304_v56 }
 0x16b   : > { %10759 = vmatprep.mubr.msk.f32.mxu1 %vm506_vm1, %v12566_v58  ;;  %10815 = vmatprep.mubr.msk.f32.mxu0 %vm506_vm1, %v12324_v22  ;;  %v12622_v22 = vld [vmem:[#allocation3 + $0x15a] sm:$0xff] }
 0x16e   : > { %10760 = vmatmul.mubr.msk.f32.gmra.mxu1 %vm506_vm1, %v12572_v11  ;;  %10816 = vmatmul.mubr.msk.f32.gmra.mxu0 %vm506_vm1, %v12326_v23  ;;  %v12596_v23 = vld [vmem:[#allocation3 + $0x12a] sm:$0xff] }
 0x16f   : > { %10762 = vmatprep.mubr.msk.f32.mxu1 %vm506_vm1, %v12578_v42  ;;  %10818 = vmatprep.mubr.msk.f32.mxu0 %vm506_vm1, %v12346_v62  ;;  %v12602_v62 = vld [vmem:[#allocation3 + $0x13a] sm:$0xff] }
 0x172   : > { %10763 = vmatmul.mubr.msk.f32.gmra.mxu1 %vm506_vm1, %v12584_v25  ;;  %10819 = vmatmul.mubr.msk.f32.gmra.mxu0 %vm506_vm1, %v12348_v63  ;;  %v12608_v63 = vld [vmem:[#allocation3 + $0x142] sm:$0xff] }
 0x173   : > { %10765 = vmatprep.mubr.msk.f32.mxu1 %vm506_vm1, %v12590_v45  ;;  %10821 = vmatprep.mubr.msk.f32.mxu0 %vm506_vm1, %v12368_v43  ;;  %v12614_v43 = vld [vmem:[#allocation3 + $0x152] sm:$0xff] }
 0x176   : > { %10766 = vmatmul.mubr.msk.f32.gmra.mxu1 %vm506_vm1, %v12596_v23  ;;  %10822 = vmatmul.mubr.msk.f32.gmra.mxu0 %vm506_vm1, %v12370_v44  ;;  %v12620_v44 = vld [vmem:[#allocation3 + $0x180] sm:$0xff] }
 0x177   : > { %10768 = vmatprep.mubr.msk.f32.mxu1 %vm506_vm1, %v12602_v62  ;;  %10824 = vmatprep.mubr.msk.f32.mxu0 %vm506_vm1, %v12387_v13  ;;  %v12628_v13 = vld [vmem:[#allocation3 + $0x16a] sm:$0xff] }
 0x17a   : > { %10769 = vmatmul.mubr.msk.f32.gmra.mxu1 %vm506_vm1, %v12608_v63  ;;  %10825 = vmatmul.mubr.msk.f32.gmra.mxu0 %vm506_vm1, %v12389_v16  ;;  %v12634_v16 = vld [vmem:[#allocation3 + $0x188] sm:$0xff] }
 0x17b   : > { %10771 = vmatprep.mubr.msk.f32.mxu1 %vm506_vm1, %v12614_v43  ;;  %10827 = vmatprep.mubr.msk.f32.mxu0 %vm506_vm1, %v12404_v37  ;;  %v12636_v37 = vld [vmem:[#allocation3 + $0x172] sm:$0xff] }
 0x17e   : > { %10772 = vmatmul.mubr.msk.f32.gmra.mxu1 %vm506_vm1, %v12622_v22  ;;  %10828 = vmatmul.mubr.msk.f32.gmra.mxu0 %vm506_vm1, %v12406_v0  ;;  %v9377_v0 = vld [vmem:[%s15287_s6 + $0xd0] sm:$0xff] }
 0x17f   : > { %10774 = vmatprep.mubr.msk.f32.mxu1 %vm506_vm1, %v12628_v13  ;;  %10830 = vmatprep.mubr.msk.f32.mxu0 %vm506_vm1, %v12620_v44 }
 0x182   : > { %10775 = vmatmul.mubr.msk.f32.gmra.mxu1 %vm506_vm1, %v12636_v37  ;;  %10831 = vmatmul.mubr.msk.f32.gmra.mxu0 %vm506_vm1, %v12634_v16 }
 0x183   : > { %10841 = vmatprep.mubr.msk.f32.mxu1 %vm506_vm1, %v12102_v30  ;;  %10897 = vmatprep.mubr.msk.f32.mxu0 %vm506_vm1, %v12427_v2  ;;  %v9376_v30 = vld [vmem:[%s15287_s6 + $0xc8] sm:$0xff]  ;;  %v3842_v2 = vld [vmem:[#allocation3 + $0x51] sm:$0xff] }
 0x186   : > { %10842 = vmatmul.mubr.msk.f32.vlgmr.msra.gmra.mxu1 %vm506_vm1, %v12115_v36  ;;  %10898 = vmatmul.mubr.msk.f32.vlgmr.msra.gmra.mxu0 %vm506_vm1, %v12436_v31  ;;  %v9413_v36 = vld [vmem:[%s15287_s6 + $0xf0] sm:$0xff]  ;;  %v9448_v31 = vld [vmem:[%s15287_s6 + $0x108] sm:$0xff] }
 0x187   : > { %10946 = vmatpush3.msra.mxu1 %v12481_v54  ;;  %10844 = vmatprep.mubr.msk.f32.mxu1 %vm506_vm1, %v12124_v21  ;;  %v9375_v21 = vld [vmem:[%s15287_s6 + $0xc0] sm:$0xff] }
 0x188   : > { %10900 = vmatprep.mubr.msk.f32.mxu0 %vm506_vm1, %v12449_v41  ;;  %10947 = vmatprep.subr.mxu1 %v9377_v0 }
 0x189   : > { %10948 = vmatpush3.msra.mxu1 %v9377_v0  ;;  %11002 = vmatpush3.msra.mxu0 %v12499_v59  ;;  %v3847_v0 = vld [vmem:[#allocation3 + $0x91] sm:$0xff] }
 0x18a   : > { %10845 = vmatmul.mubr.msk.f32.gmra.mxu1 %vm506_vm1, %v12137_v46  ;;  %10901 = vmatmul.mubr.msk.f32.gmra.mxu0 %vm506_vm1, %v12455_v7  ;;  %v9412_v46 = vld [vmem:[%s15287_s6 + $0xe8] sm:$0xff] }
 0x18b   : > { %10847 = vmatprep.mubr.msk.f32.mxu1 %vm506_vm1, %v12146_v52  ;;  %10903 = vmatprep.mubr.msk.f32.mxu0 %vm506_vm1, %v12467_v53  ;;  %v9411_v52 = vld [vmem:[%s15287_s6 + $0xe0] sm:$0xff] }
 0x18c   : > { %10949 = vmatprep.subr.mxu1 %v9376_v30  ;;  %11003 = vmatprep.subr.mxu0 %v9413_v36  ;;  %v3453_v53 = vld [vmem:[#allocation3 + $0x60] sm:$0xff] }
 0x18d   : > { %10950 = vmatpush3.msra.mxu1 %v9376_v30  ;;  %11004 = vmatpush3.msra.mxu0 %v9413_v36 }
 0x18e   : > { %10848 = vmatmul.mubr.msk.f32.gmra.mxu1 %vm506_vm1, %v12159_v60  ;;  %10904 = vmatmul.mubr.msk.f32.gmra.mxu0 %vm506_vm1, %v12473_v61  ;;  %v12693_v60 = vld [vmem:[%s15287_s6 + $0x118] sm:$0xff]  ;;  %v3843_v61 = vld [vmem:[#allocation3 + $0x61] sm:$0xff] }
 0x18f   : > { %10850 = vmatprep.mubr.msk.f32.mxu1 %vm506_vm1, %v12168_v3  ;;  %10906 = vmatprep.mubr.msk.f32.mxu0 %vm506_vm1, %v12487_v4  ;;  %v15331_v3 = vld [vmem:[#allocation9_spill] sm:$0xff] }
 0x190   : > { %10951 = vmatprep.subr.mxu1 %v9375_v21  ;;  %11005 = vmatprep.subr.mxu0 %v9412_v46 }
 0x191   : > { %10952 = vmatpush3.msra.mxu1 %v9375_v21  ;;  %11006 = vmatpush3.msra.mxu0 %v9412_v46 }
 0x192   : > { %10851 = vmatmul.mubr.msk.f32.gmra.mxu1 %vm506_vm1, %v12181_v10  ;;  %10907 = vmatmul.mubr.msk.f32.gmra.mxu0 %vm506_vm1, %v12494_v29  ;;  %v15332_v10 = vld [vmem:[#allocation10_spill] sm:$0xff] }
 0x193   : > { %10853 = vmatprep.mubr.msk.f32.mxu1 %vm506_vm1, %v12190_v17  ;;  %10909 = vmatprep.mubr.msk.f32.mxu0 %vm506_vm1, %v12505_v5  ;;  %v15333_v17 = vld [vmem:[#allocation11_spill] sm:$0xff] }
 0x194   : > { %11007 = vmatprep.subr.mxu0 %v9411_v52  ;;  %11057 = vmatprep.subr.mxu1 %v12693_v60  ;;  %v3454_v5 = vld [vmem:[#allocation3 + $0x68] sm:$0xff] }
 0x195   : > { %11008 = vmatpush3.msra.mxu0 %v9411_v52  ;;  %v3458_v52 = vld [vmem:[#allocation3 + $0x98] sm:$0xff] }
 0x196   : > { %10854 = vmatmul.mubr.msk.f32.gmra.mxu1 %vm506_vm1, %v12203_v24  ;;  %10910 = vmatmul.mubr.msk.f32.gmra.mxu0 %vm506_vm1, %v12512_v18  ;;  %v15334_v24 = vld [vmem:[#allocation12_spill] sm:$0xff] }
 0x197   : > { %10856 = vmatprep.mubr.msk.f32.mxu1 %vm506_vm1, %v12212_v33  ;;  %10912 = vmatprep.mubr.msk.f32.mxu0 %vm506_vm1, %v12518_v32  ;;  %v15335_v33 = vld [vmem:[#allocation13_spill] sm:$0xff]  ;;  %v3844_v18 = vld [vmem:[#allocation3 + $0x69] sm:$0xff]  ;;  %v9447_v32 = vld [vmem:[%s15287_s6 + $0x100] sm:$0xff] }
 0x19a   : > { %10857 = vmatmul.mubr.msk.f32.gmra.mxu1 %vm506_vm1, %v12225_v14  ;;  %10913 = vmatmul.mubr.msk.f32.gmra.mxu0 %vm506_vm1, %v12524_v19  ;;  %v12788_v14 = vld [vmem:[#allocation3 + $0x181] sm:$0xff] }
 0x19b   : > { %10859 = vmatprep.mubr.msk.f32.mxu1 %vm506_vm1, %v12234_v48  ;;  %10915 = vmatprep.mubr.msk.f32.mxu0 %vm506_vm1, %v12530_v34  ;;  %v12790_v48 = vld [vmem:[#allocation3 + $0x182] sm:$0xff] }
 0x19e   : > { %10860 = vmatmul.mubr.msk.f32.gmra.mxu1 %vm506_vm1, %v12247_v57  ;;  %10916 = vmatmul.mubr.msk.f32.gmra.mxu0 %vm506_vm1, %v12536_v35  ;;  %v12796_v57 = vld [vmem:[#allocation3 + $0x189] sm:$0xff]  ;;  %v3455_v35 = vld [vmem:[#allocation3 + $0x78] sm:$0xff] }
 0x19f   : > { %10862 = vmatprep.mubr.msk.f32.mxu1 %vm506_vm1, %v12256_v6  ;;  %10918 = vmatprep.mubr.msk.f32.mxu0 %vm506_vm1, %v12542_v49  ;;  %v12798_v6 = vld [vmem:[#allocation3 + $0x18a] sm:$0xff]  ;;  %v3845_v49 = vld [vmem:[#allocation3 + $0x79] sm:$0xff] }
 0x1a2   : > { %10863 = vmatmul.mubr.msk.f32.gmra.mxu1 %vm506_vm1, %v12269_v15  ;;  %10919 = vmatmul.mubr.msk.f32.gmra.mxu0 %vm506_vm1, %v12548_v50  ;;  %v3449_v15 = vld [vmem:[#allocation3 + $0x30] sm:$0xff] }
 0x1a3   : > { %10865 = vmatprep.mubr.msk.f32.mxu1 %vm506_vm1, %v12278_v26  ;;  %10921 = vmatprep.mubr.msk.f32.mxu0 %vm506_vm1, %v12554_v8  ;;  %v3839_v26 = vld [vmem:[#allocation3 + $0x31] sm:$0xff] }
 0x1a6   : > { %10866 = vmatmul.mubr.msk.f32.gmra.mxu1 %vm506_vm1, %v12291_v39  ;;  %10922 = vmatmul.mubr.msk.f32.gmra.mxu0 %vm506_vm1, %v12560_v9  ;;  %v3450_v39 = vld [vmem:[#allocation3 + $0x38] sm:$0xff] }
 0x1a7   : > { %10868 = vmatprep.mubr.msk.f32.mxu1 %vm506_vm1, %v12300_v51  ;;  %10924 = vmatprep.mubr.msk.f32.mxu0 %vm506_vm1, %v12566_v58 }
 0x1aa   : > { %10869 = vmatmul.mubr.msk.f32.gmra.mxu1 %vm506_vm1, %v12313_v1  ;;  %10925 = vmatmul.mubr.msk.f32.gmra.mxu0 %vm506_vm1, %v12572_v11  ;;  %v3456_v11 = vld [vmem:[#allocation3 + $0x80] sm:$0xff] }
 0x1ab   : > { %10871 = vmatprep.mubr.msk.f32.mxu1 %vm506_vm1, %v12322_v20  ;;  %10927 = vmatprep.mubr.msk.f32.mxu0 %vm506_vm1, %v12578_v42  ;;  %v3846_v42 = vld [vmem:[#allocation3 + $0x81] sm:$0xff] }
 0x1ae   : > { %10872 = vmatmul.mubr.msk.f32.gmra.mxu1 %vm506_vm1, %v12335_v38  ;;  %10928 = vmatmul.mubr.msk.f32.gmra.mxu0 %vm506_vm1, %v12584_v25 }
 0x1af   : > { %10874 = vmatprep.mubr.msk.f32.mxu1 %vm506_vm1, %v12344_v47  ;;  %10930 = vmatprep.mubr.msk.f32.mxu0 %vm506_vm1, %v12590_v45  ;;  %v3452_v45 = vld [vmem:[#allocation3 + $0x50] sm:$0xff] }
 0x1b2   : > { %10875 = vmatmul.mubr.msk.f32.gmra.mxu1 %vm506_vm1, %v12356_v12  ;;  %10931 = vmatmul.mubr.msk.f32.gmra.mxu0 %vm506_vm1, %v12596_v23  ;;  %v9449_v23 = vld [vmem:[%s15287_s6 + $0x110] sm:$0xff]  ;;  %v12813_v12 = vpop.f32.mrf.mxu1 }
 0x1b3   : > { %10877 = vmatprep.mubr.msk.f32.mxu1 %vm506_vm1, %v12366_v40  ;;  %10933 = vmatprep.mubr.msk.f32.mxu0 %vm506_vm1, %v12602_v62  ;;  %v3451_v62 = vld [vmem:[#allocation3 + $0x48] sm:$0xff] }
 0x1b6   : > { %10878 = vmatmul.mubr.msk.f32.gmra.mxu1 %vm506_vm1, %v15331_v3  ;;  %10934 = vmatmul.mubr.msk.f32.gmra.mxu0 %vm506_vm1, %v12608_v63  ;;  %v3841_v63 = vld [vmem:[#allocation3 + $0x49] sm:$0xff] }
 0x1b7   : > { %10880 = vmatprep.mubr.msk.f32.mxu1 %vm506_vm1, %v15332_v10  ;;  %10936 = vmatprep.mubr.msk.f32.mxu0 %vm506_vm1, %v12614_v43  ;;  %v12815_v43 = vpop.f32.mrf.mxu0 }
 0x1ba   : > { %10881 = vmatmul.mubr.msk.f32.gmra.mxu1 %vm506_vm1, %v15333_v17  ;;  %10937 = vmatmul.mubr.msk.f32.gmra.mxu0 %vm506_vm1, %v12622_v22  ;;  %v3840_v22 = vld [vmem:[#allocation3 + $0x39] sm:$0xff]  ;;  %v3459_v17 = vld [vmem:[#allocation3 + $0xa8] sm:$0xff] }
 0x1bb   : > { %10883 = vmatprep.mubr.msk.f32.mxu1 %vm506_vm1, %v15334_v24  ;;  %10939 = vmatprep.mubr.msk.f32.mxu0 %vm506_vm1, %v12628_v13  ;;  %v3849_v24 = vld [vmem:[#allocation3 + $0xa9] sm:$0xff] }
 0x1be   : > { %10884 = vmatmul.mubr.msk.f32.gmra.mxu1 %vm506_vm1, %v15335_v33  ;;  %10940 = vmatmul.mubr.msk.f32.gmra.mxu0 %vm506_vm1, %v12636_v37  ;;  %v3457_v37 = vld [vmem:[#allocation3 + $0x90] sm:$0xff] }
 0x1bf   : > { %10886 = vmatprep.mubr.msk.f32.mxu1 %vm506_vm1, %v12788_v14  ;;  %10942 = vmatprep.mubr.msk.f32.mxu0 %vm506_vm1, %v12790_v48 }
 0x1c2   : > { %10887 = vmatmul.mubr.msk.f32.gmra.mxu1 %vm506_vm1, %v12796_v57  ;;  %10943 = vmatmul.mubr.msk.f32.gmra.mxu0 %vm506_vm1, %v12798_v6 }
 0x1c3   : > { %10953 = vmatprep.mubr.msk.f32.mxu1 %vm506_vm1, %v3449_v15  ;;  %11009 = vmatprep.mubr.msk.f32.mxu0 %vm506_vm1, %v3839_v26 }
 0x1c6   : > { %10954 = vmatmul.mubr.msk.f32.vlgmr.msra.gmra.mxu1 %vm506_vm1, %v3450_v39  ;;  %11010 = vmatmul.mubr.msk.f32.vlgmr.msra.gmra.mxu0 %vm506_vm1, %v3840_v22  ;;  %v3460_v22 = vld [vmem:[#allocation3 + $0xb0] sm:$0xff] }
 0x1c7   : > { %11058 = vmatpush3.msra.mxu1 %v12693_v60  ;;  %10956 = vmatprep.mubr.msk.f32.mxu1 %vm506_vm1, %v3451_v62  ;;  %v3848_v60 = vld [vmem:[#allocation3 + $0x99] sm:$0xff] }
 0x1c8   : > { %11012 = vmatprep.mubr.msk.f32.mxu0 %vm506_vm1, %v3841_v63  ;;  %11059 = vmatprep.subr.mxu1 %v9449_v23 }
 0x1c9   : > { %11060 = vmatpush3.msra.mxu1 %v9449_v23  ;;  %v10622_v41 = vpop.f32.mrf.mxu1  ;;  %v3850_v23 = vld [vmem:[#allocation3 + $0xb1] sm:$0xff] }
 0x1ca   : > { %v10678_v7 = vpop.f32.mrf.mxu0  ;;  %10957 = vmatmul.mubr.msk.f32.gmra.mxu1 %vm506_vm1, %v3452_v45  ;;  %11013 = vmatmul.mubr.msk.f32.gmra.mxu0 %vm506_vm1, %v3842_v2  ;;  %v3461_v45 = vld [vmem:[#allocation3 + $0xc0] sm:$0xff] }
 0x1cb   : > { %v12823_v54 = vadd.f32 %v10678_v7, %v10622_v41  ;;  %10959 = vmatprep.mubr.msk.f32.mxu1 %vm506_vm1, %v3453_v53  ;;  %11015 = vmatprep.mubr.msk.f32.mxu0 %vm506_vm1, %v3843_v61  ;;  %v1418_v4 = vpop.f32.mrf.mxu1  ;;  %v3851_v2 = vld [vmem:[#allocation3 + $0xc1] sm:$0xff] }
 0x1cc   : > { %v1739_v29 = vpop.f32.mrf.mxu0  ;;  %11061 = vmatprep.subr.mxu1 %v9448_v31  ;;  %v3462_v61 = vld [vmem:[#allocation3 + $0xc8] sm:$0xff] }
 0x1cd   : > { %v12827_v59 = vadd.f32 %v1739_v29, %v1418_v4  ;;  %11062 = vmatpush3.msra.mxu1 %v9448_v31  ;;  %v10625_v19 = vpop.f32.mrf.mxu1  ;;  %v3852_v4 = vld [vmem:[#allocation3 + $0xc9] sm:$0xff] }
 0x1ce   : > { %v10681_v34 = vpop.f32.mrf.mxu0  ;;  %10960 = vmatmul.mubr.msk.f32.gmra.mxu1 %vm506_vm1, %v3454_v5  ;;  %11016 = vmatmul.mubr.msk.f32.gmra.mxu0 %vm506_vm1, %v3844_v18  ;;  %v3853_v18 = vld [vmem:[#allocation3 + $0xd9] sm:$0xff] }
 0x1cf   : > { %v12834_v50 = vadd.f32 %v10681_v34, %v10625_v19  ;;  %10962 = vmatprep.mubr.msk.f32.mxu1 %vm506_vm1, %v3455_v35  ;;  %11018 = vmatprep.mubr.msk.f32.mxu0 %vm506_vm1, %v3845_v49  ;;  %v1428_v8 = vpop.f32.mrf.mxu1  ;;  %v3854_v49 = vld [vmem:[#allocation3 + $0xe1] sm:$0xff] }
 0x1d0   : > { %v1749_v9 = vpop.f32.mrf.mxu0  ;;  %11063 = vmatprep.subr.mxu1 %v9447_v32 }
 0x1d1   : > { %v12838_v58 = vadd.f32 %v1749_v9, %v1428_v8  ;;  %11064 = vmatpush3.msra.mxu1 %v9447_v32  ;;  %v10628_v25 = vpop.f32.mrf.mxu1 }
 0x1d2   : > { %v10684_v13 = vpop.f32.mrf.mxu0  ;;  %10963 = vmatmul.mubr.msk.f32.gmra.mxu1 %vm506_vm1, %v3456_v11  ;;  %11019 = vmatmul.mubr.msk.f32.gmra.mxu0 %vm506_vm1, %v3846_v42 }
 0x1d3   : > { %v12842_v30 = vadd.f32 %v10684_v13, %v10628_v25  ;;  %10965 = vmatprep.mubr.msk.f32.mxu1 %vm506_vm1, %v3457_v37  ;;  %11021 = vmatprep.mubr.msk.f32.mxu0 %vm506_vm1, %v3847_v0  ;;  %v1438_v36 = vpop.f32.mrf.mxu1  ;;  %v15336_v0 = vld [vmem:[#allocation4_spill] sm:$0xff] }
 0x1d4   : > { %v1759_v21 = vpop.f32.mrf.mxu0 }
 0x1d5   : > { %v12846_v46 = vadd.f32 %v1759_v21, %v1438_v36  ;;  %v10631_v3 = vpop.f32.mrf.mxu1 }
 0x1d6   : > { %v10687_v10 = vpop.f32.mrf.mxu0  ;;  %10966 = vmatmul.mubr.msk.f32.gmra.mxu1 %vm506_vm1, %v3458_v52  ;;  %11022 = vmatmul.mubr.msk.f32.gmra.mxu0 %vm506_vm1, %v3848_v60  ;;  %v15338_v52 = vld [vmem:[#allocation5_spill] sm:$0xff] }
 0x1d7   : > { %v12850_v33 = vadd.f32 %v10687_v10, %v10631_v3  ;;  %10968 = vmatprep.mubr.msk.f32.mxu1 %vm506_vm1, %v3459_v17  ;;  %11024 = vmatprep.mubr.msk.f32.mxu0 %vm506_vm1, %v3849_v24  ;;  %v1448_v15 = vpop.f32.mrf.mxu1  ;;  %v3860_v3 = vld [vmem:[#allocation3 + $0x129] sm:$0xff] }
 0x1d8   : > { %v1769_v26 = vpop.f32.mrf.mxu0  ;;  %v15342_v24 = vld [vmem:[#allocation7_spill] sm:$0xff] }
 0x1d9   : > { %v12854_v39 = vadd.f32 %v1769_v26, %v1448_v15  ;;  %v10634_v62 = vpop.f32.mrf.mxu1  ;;  %v15343_v15 = vld [vmem:[#allocation8_spill] sm:$0xff] }
 0x1da   : > { %v10690_v63 = vpop.f32.mrf.mxu0  ;;  %10969 = vmatmul.mubr.msk.f32.gmra.mxu1 %vm506_vm1, %v3460_v22  ;;  %11025 = vmatmul.mubr.msk.f32.gmra.mxu0 %vm506_vm1, %v3850_v23  ;;  %v3472_v22 = vld [vmem:[#allocation3 + $0x140] sm:$0xff] }
 0x1db   : > { %v12858_v31 = vadd.f32 %v10690_v63, %v10634_v62  ;;  %10971 = vmatprep.mubr.msk.f32.mxu1 %vm506_vm1, %v3461_v45  ;;  %11027 = vmatprep.mubr.msk.f32.mxu0 %vm506_vm1, %v3851_v2  ;;  %v1458_v41 = vpop.f32.mrf.mxu1  ;;  %v3862_v23 = vld [vmem:[#allocation3 + $0x141] sm:$0xff]  ;;  %v3473_v45 = vld [vmem:[#allocation3 + $0x150] sm:$0xff] }
 0x1dc   : > { %v1779_v7 = vpop.f32.mrf.mxu0  ;;  %v3863_v2 = vld [vmem:[#allocation3 + $0x151] sm:$0xff] }
 0x1dd   : > { %v12862_v53 = vadd.f32 %v1779_v7, %v1458_v41  ;;  %v10637_v29 = vpop.f32.mrf.mxu1 }
 0x1de   : > { %v10693_v5 = vpop.f32.mrf.mxu0  ;;  %10972 = vmatmul.mubr.msk.f32.gmra.mxu1 %vm506_vm1, %v3462_v61  ;;  %11028 = vmatmul.mubr.msk.f32.gmra.mxu0 %vm506_vm1, %v3852_v4  ;;  %v3474_v61 = vld [vmem:[#allocation3 + $0x158] sm:$0xff] }
 0x1df   : > { %v12866_v32 = vadd.f32 %v10693_v5, %v10637_v29  ;;  %10974 = vmatprep.mubr.msk.f32.mxu1 %vm506_vm1, %v12280_v27  ;;  %11030 = vmatprep.mubr.msk.f32.mxu0 %vm506_vm1, %v3853_v18  ;;  %v1468_v19 = vpop.f32.mrf.mxu1  ;;  %v3864_v4 = vld [vmem:[#allocation3 + $0x159] sm:$0xff]  ;;  %v3475_v18 = vld [vmem:[#allocation3 + $0x168] sm:$0xff] }
 0x1e0   : > { %v1789_v34 = vpop.f32.mrf.mxu0 }
 0x1e1   : > { %v12871_v35 = vadd.f32 %v1789_v34, %v1468_v19  ;;  %v10640_v8 = vpop.f32.mrf.mxu1  ;;  %v3865_v19 = vld [vmem:[#allocation3 + $0x169] sm:$0xff] }
 0x1e2   : > { %v10696_v9 = vpop.f32.mrf.mxu0  ;;  %10975 = vmatmul.mubr.msk.f32.gmra.mxu1 %vm506_vm1, %v12282_v28  ;;  %11031 = vmatmul.mubr.msk.f32.gmra.mxu0 %vm506_vm1, %v3854_v49 }
 0x1e3   : > { %v12876_v11 = vadd.f32 %v10696_v9, %v10640_v8  ;;  %10977 = vmatprep.mubr.msk.f32.mxu1 %vm506_vm1, %v12302_v55  ;;  %11033 = vmatprep.mubr.msk.f32.mxu0 %vm506_vm1, %v12300_v51  ;;  %v1478_v27 = vpop.f32.mrf.mxu1  ;;  %v3476_v9 = vld [vmem:[#allocation3 + $0x170] sm:$0xff] }
 0x1e4   : > { %v1799_v42 = vpop.f32.mrf.mxu0 }
 0x1e5   : > { %v12882_v25 = vadd.f32 %v1799_v42, %v1478_v27  ;;  %v10643_v13 = vpop.f32.mrf.mxu1  ;;  %v3866_v27 = vld [vmem:[#allocation3 + $0x171] sm:$0xff] }
 0x1e6   : > { %v10699_v37 = vpop.f32.mrf.mxu0  ;;  %10978 = vmatmul.mubr.msk.f32.gmra.mxu1 %vm506_vm1, %v12304_v56  ;;  %11034 = vmatmul.mubr.msk.f32.gmra.mxu0 %vm506_vm1, %v12313_v1  ;;  %v15339_v1 = vld [vmem:[#allocation6_spill] sm:$0xff] }
 0x1e7   : > { %v12888_v28 = vadd.f32 %v10699_v37, %v10643_v13  ;;  %10980 = vmatprep.mubr.msk.f32.mxu1 %vm506_vm1, %v15336_v0  ;;  %11036 = vmatprep.mubr.msk.f32.mxu0 %vm506_vm1, %v12322_v20  ;;  %v12894_v51 = vpop.f32.mrf.mxu1 }
 0x1e8   : > { %v12896_v55 = vpop.f32.mrf.mxu0 }
 0x1e9   : > { %15337 = vst [vmem:[#allocation9_spill] sm:$0xff] %v12896_v55  ;;  %v10646_v36 = vpop.f32.mrf.mxu1 }
 0x1ea   : > { %v10702_v21 = vpop.f32.mrf.mxu0  ;;  %10981 = vmatmul.mubr.msk.f32.gmra.mxu1 %vm506_vm1, %v15338_v52  ;;  %11037 = vmatmul.mubr.msk.f32.gmra.mxu0 %vm506_vm1, %v12335_v38  ;;  %v3869_v52 = vld [vmem:[#allocation3 + $0x199] sm:$0xff] }
 0x1eb   : > { %v12902_v56 = vadd.f32 %v10702_v21, %v10646_v36  ;;  %10983 = vmatprep.mubr.msk.f32.mxu1 %vm506_vm1, %v15339_v1  ;;  %11039 = vmatprep.mubr.msk.f32.mxu0 %vm506_vm1, %v12344_v47  ;;  %v12908_v20 = vpop.f32.mrf.mxu1  ;;  %v3479_v21 = vld [vmem:[#allocation3 + $0x198] sm:$0xff] }
 0x1ec   : > { %15340 = vst [vmem:[#allocation10_spill] sm:$0xff] %v12908_v20  ;;  %v12910_v60 = vpop.f32.mrf.mxu0 }
 0x1ed   : > { %15341 = vst [vmem:[#allocation11_spill] sm:$0xff] %v12910_v60  ;;  %v10649_v10 = vpop.f32.mrf.mxu1 }
 0x1ee   : > { %v10705_v17 = vpop.f32.mrf.mxu0  ;;  %10984 = vmatmul.mubr.msk.f32.gmra.mxu1 %vm506_vm1, %v15342_v24  ;;  %11040 = vmatmul.mubr.msk.f32.gmra.mxu0 %vm506_vm1, %v3860_v3 }
 0x1ef   : > { %v12915_v38 = vadd.f32 %v10705_v17, %v10649_v10  ;;  %10986 = vmatprep.mubr.msk.f32.mxu1 %vm506_vm1, %v15343_v15  ;;  %11042 = vmatprep.mubr.msk.f32.mxu0 %vm506_vm1, %v12366_v40  ;;  %v12921_v47 = vpop.f32.mrf.mxu1 }
 0x1f0   : > { %15344 = vst [vmem:[#allocation12_spill] sm:$0xff] %v12921_v47  ;;  %v12923_v26 = vpop.f32.mrf.mxu0 }
 0x1f1   : > { %15345 = vst [vmem:[#allocation13_spill] sm:$0xff] %v12923_v26  ;;  %v10652_v62 = vpop.f32.mrf.mxu1 }
 0x1f2   : > { %v10708_v63 = vpop.f32.mrf.mxu0  ;;  %10987 = vmatmul.mubr.msk.f32.gmra.mxu1 %vm506_vm1, %v3472_v22  ;;  %11043 = vmatmul.mubr.msk.f32.gmra.mxu0 %vm506_vm1, %v3862_v23 }
 0x1f3   : > { %v12927_v41 = vadd.f32 %v10708_v63, %v10652_v62  ;;  %10989 = vmatprep.mubr.msk.f32.mxu1 %vm506_vm1, %v3473_v45  ;;  %11045 = vmatprep.mubr.msk.f32.mxu0 %vm506_vm1, %v3863_v2  ;;  %v12931_v40 = vpop.f32.mrf.mxu1  ;;  %v4230_v63 = vld [vmem:[#allocation3 + $0x3a] sm:$0xff] }
 0x1f4   : > { %15346 = vst [vmem:[#allocation4_spill] sm:$0xff] %v12931_v40  ;;  %v12933_v7 = vpop.f32.mrf.mxu0 }
 0x1f5   : > { %15347 = vst [vmem:[#allocation5_spill] sm:$0xff] %v12933_v7  ;;  %v10655_v29 = vpop.f32.mrf.mxu1 }
 0x1f6   : > { %v10711_v5 = vpop.f32.mrf.mxu0  ;;  %10990 = vmatmul.mubr.msk.f32.gmra.mxu1 %vm506_vm1, %v3474_v61  ;;  %11046 = vmatmul.mubr.msk.f32.gmra.mxu0 %vm506_vm1, %v3864_v4  ;;  %v4231_v61 = vld [vmem:[#allocation3 + $0x4a] sm:$0xff]  ;;  %v15356_v4 = vld [vmem:[#allocation14_spill] sm:$0xff] }
 0x1f7   : > { %v12937_v34 = vadd.f32 %v10711_v5, %v10655_v29  ;;  %10992 = vmatprep.mubr.msk.f32.mxu1 %vm506_vm1, %v3475_v18  ;;  %11048 = vmatprep.mubr.msk.f32.mxu0 %vm506_vm1, %v3865_v19  ;;  %v12941_v49 = vpop.f32.mrf.mxu1 }
 0x1f8   : > { %15348 = vst [vmem:[#allocation6_spill] sm:$0xff] %v12941_v49  ;;  %v12943_v8 = vpop.f32.mrf.mxu0 }
 0x1f9   : > { %15349 = vst [vmem:[#allocation7_spill] sm:$0xff] %v12943_v8  ;;  %v10658_v42 = vpop.f32.mrf.mxu1 }
 0x1fa   : > { %v10714_v13 = vpop.f32.mrf.mxu0  ;;  %10993 = vmatmul.mubr.msk.f32.gmra.mxu1 %vm506_vm1, %v3476_v9  ;;  %11049 = vmatmul.mubr.msk.f32.gmra.mxu0 %vm506_vm1, %v3866_v27  ;;  %v4232_v9 = vld [vmem:[#allocation3 + $0x52] sm:$0xff] }
 0x1fb   : > { %v12947_v37 = vadd.f32 %v10714_v13, %v10658_v42  ;;  %10995 = vmatprep.mubr.msk.f32.mxu1 %vm506_vm1, %v12620_v44  ;;  %11051 = vmatprep.mubr.msk.f32.mxu0 %vm506_vm1, %v12788_v14  ;;  %v12953_v0 = vpop.f32.mrf.mxu1  ;;  %v3480_v44 = vld [vmem:[#allocation3 + $0x1a0] sm:$0xff] }
 0x1fc   : > { %15350 = vst [vmem:[#allocation8_spill] sm:$0xff] %v12953_v0  ;;  %v12955_v36 = vpop.f32.mrf.mxu0  ;;  %v3870_v14 = vld [vmem:[#allocation3 + $0x1a1] sm:$0xff] }
 0x1fd   : > { %15351 = vst [vmem:[#allocation15_spill] sm:$0xff] %v12955_v36  ;;  %v10661_v1 = vpop.f32.mrf.mxu1  ;;  %v4233_v13 = vld [vmem:[#allocation3 + $0x62] sm:$0xff] }
 0x1fe   : > { %v10717_v3 = vpop.f32.mrf.mxu0  ;;  %10996 = vmatmul.mubr.msk.f32.gmra.mxu1 %vm506_vm1, %v12634_v16  ;;  %11052 = vmatmul.mubr.msk.f32.gmra.mxu0 %vm506_vm1, %v12796_v57  ;;  %v4229_v16 = vld [vmem:[#allocation3 + $0x32] sm:$0xff] }
 0x1ff   : > { %v12961_v10 = vadd.f32 %v10717_v3, %v10661_v1  ;;  %10998 = vmatprep.mubr.msk.f32.mxu1 %vm506_vm1, %v3479_v21  ;;  %11054 = vmatprep.mubr.msk.f32.mxu0 %vm506_vm1, %v3869_v52  ;;  %v12965_v17 = vpop.f32.mrf.mxu1 }
 0x200   : > { %15352 = vst [vmem:[#allocation16_spill] sm:$0xff] %v12965_v17  ;;  %v12967_v24 = vpop.f32.mrf.mxu0 }
 0x201   : > { %15353 = vst [vmem:[#allocation17_spill] sm:$0xff] %v12967_v24  ;;  %v10664_v15 = vpop.f32.mrf.mxu1 }
 0x202   : > { %v10720_v22 = vpop.f32.mrf.mxu0  ;;  %10999 = vmatmul.mubr.msk.f32.gmra.mxu1 %vm506_vm1, %v3480_v44  ;;  %11055 = vmatmul.mubr.msk.f32.gmra.mxu0 %vm506_vm1, %v3870_v14  ;;  %v4234_v14 = vld [vmem:[#allocation3 + $0x6a] sm:$0xff] }
 0x203   : > { %v12971_v57 = vadd.f32 %v10720_v22, %v10664_v15  ;;  %11065 = vmatprep.mubr.msk.f32.mxu1 %vm506_vm1, %v4229_v16  ;;  %v12974_v23 = vpop.f32.mrf.mxu1  ;;  %v4235_v16 = vld [vmem:[#allocation3 + $0x7a] sm:$0xff] }
 0x204   : > { %15354 = vst [vmem:[#allocation18_spill] sm:$0xff] %v12974_v23  ;;  %v12976_v62 = vpop.f32.mrf.mxu0 }
 0x205   : > { %15355 = vst [vmem:[#allocation19_spill] sm:$0xff] %v12976_v62  ;;  %v10731_v45 = vpop.f32.mrf.mxu1 }
 0x206   : > { %v10787_v2 = vpop.f32.mrf.mxu0  ;;  %11066 = vmatmul.mubr.msk.f32.vlgmr.msra.gmra.mxu1 %vm506_vm1, %v4230_v63  ;;  %v2247_v29 = vadd.f32 %v10731_v45, %v15356_v4 }
 0x207   : > { %11068 = vmatprep.mubr.msk.f32.mxu1 %vm506_vm1, %v4231_v61  ;;  %v12981_v5 = vpop.f32.mrf.mxu1 }
 0x208   : > { %v12983_v18 = vpop.f32.mrf.mxu0  ;;  %v12985_v19 = vadd.f32 %v10787_v2, %v2247_v29 }
 0x20a   : > { %v10734_v27 = vpop.f32.mrf.mxu1  ;;  %v10790_v42 = vpop.f32.mrf.mxu0  ;;  %11069 = vmatmul.mubr.msk.f32.gmra.mxu1 %vm506_vm1, %v4232_v9  ;;  %v4237_v9 = vld [vmem:[#allocation3 + $0x92] sm:$0xff] }
 0x20b   : > { %v2249_v21 = vadd.f32 %v10734_v27, %v12823_v54  ;;  %11071 = vmatprep.mubr.msk.f32.mxu1 %vm506_vm1, %v4233_v13 }
 0x20c   : > { %v2097_v52 = vpop.f32.mrf.mxu1  ;;  %v12990_v1 = vpop.f32.mrf.mxu0 }
 0x20d   : > { %v12992_v3 = vadd.f32 %v10790_v42, %v2249_v21  ;;  %v12995_v44 = vadd.f32 %v2097_v52, %v12827_v59  ;;  %v4236_v59 = vld [vmem:[#allocation3 + $0x82] sm:$0xff] }
 0x20e   : > { %v10737_v15 = vpop.f32.mrf.mxu1  ;;  %v10793_v22 = vpop.f32.mrf.mxu0  ;;  %11072 = vmatmul.mubr.msk.f32.gmra.mxu1 %vm506_vm1, %v4234_v14 }
 0x20f   : > { %v2251_v63 = vadd.f32 %v10737_v15, %v12834_v50  ;;  %11074 = vmatprep.mubr.msk.f32.mxu1 %vm506_vm1, %v4235_v16  ;;  %v4239_v15 = vld [vmem:[#allocation3 + $0xaa] sm:$0xff] }
 0x210   : > { %v2107_v54 = vpop.f32.mrf.mxu1  ;;  %v13000_v45 = vpop.f32.mrf.mxu0 }
 0x211   : > { %v13002_v2 = vadd.f32 %v10793_v22, %v2251_v63  ;;  %v13005_v61 = vadd.f32 %v2107_v54, %v12838_v58  ;;  %v4238_v58 = vld [vmem:[#allocation3 + $0x9a] sm:$0xff] }
 0x212   : > { %v10740_v4 = vpop.f32.mrf.mxu1  ;;  %v10796_v29 = vpop.f32.mrf.mxu0  ;;  %11075 = vmatmul.mubr.msk.f32.gmra.mxu1 %vm506_vm1, %v4236_v59 }
 0x213   : > { %v2253_v27 = vadd.f32 %v10740_v4, %v12842_v30  ;;  %11077 = vmatprep.mubr.msk.f32.mxu1 %vm506_vm1, %v4237_v9 }
 0x214   : > { %v2117_v50 = vpop.f32.mrf.mxu1  ;;  %v13010_v42 = vpop.f32.mrf.mxu0 }
 0x215   : > { %v13012_v13 = vadd.f32 %v10796_v29, %v2253_v27  ;;  %v13015_v21 = vadd.f32 %v2117_v50, %v12846_v46  ;;  %v4240_v46 = vld [vmem:[#allocation3 + $0xb2] sm:$0xff]  ;;  %v4241_v29 = vld [vmem:[#allocation3 + $0xc2] sm:$0xff] }
 0x216   : > { %v10743_v52 = vpop.f32.mrf.mxu1  ;;  %v10799_v14 = vpop.f32.mrf.mxu0  ;;  %11078 = vmatmul.mubr.msk.f32.gmra.mxu1 %vm506_vm1, %v4238_v58 }
 0x217   : > { %v2255_v22 = vadd.f32 %v10743_v52, %v12850_v33  ;;  %11080 = vmatprep.mubr.msk.f32.mxu1 %vm506_vm1, %v4239_v15  ;;  %v4243_v15 = vld [vmem:[#allocation3 + $0xda] sm:$0xff] }
 0x218   : > { %v2127_v30 = vpop.f32.mrf.mxu1  ;;  %v13020_v16 = vpop.f32.mrf.mxu0 }
 0x219   : > { %v13022_v63 = vadd.f32 %v10799_v14, %v2255_v22  ;;  %v13025_v54 = vadd.f32 %v2127_v30, %v12854_v39  ;;  %v4242_v39 = vld [vmem:[#allocation3 + $0xca] sm:$0xff] }
 0x21a   : > { %v10746_v59 = vpop.f32.mrf.mxu1  ;;  %v10802_v4 = vpop.f32.mrf.mxu0  ;;  %11081 = vmatmul.mubr.msk.f32.gmra.mxu1 %vm506_vm1, %v4240_v46 }
 0x21b   : > { %v2257_v9 = vadd.f32 %v10746_v59, %v12858_v31  ;;  %11083 = vmatprep.mubr.msk.f32.mxu1 %vm506_vm1, %v4241_v29 }
 0x21c   : > { %v2137_v33 = vpop.f32.mrf.mxu1  ;;  %v13030_v27 = vpop.f32.mrf.mxu0 }
 0x21d   : > { %v13032_v50 = vadd.f32 %v10802_v4, %v2257_v9  ;;  %v13035_v58 = vadd.f32 %v2137_v33, %v12862_v53  ;;  %v4244_v53 = vld [vmem:[#allocation3 + $0xe2] sm:$0xff]  ;;  %v4245_v9 = vld [vmem:[#allocation3 + $0xf2] sm:$0xff] }
 0x21e   : > { %v10749_v52 = vpop.f32.mrf.mxu1  ;;  %v10805_v14 = vpop.f32.mrf.mxu0  ;;  %11084 = vmatmul.mubr.msk.f32.gmra.mxu1 %vm506_vm1, %v4242_v39 }
 0x21f   : > { %v2259_v22 = vadd.f32 %v10749_v52, %v12866_v32  ;;  %11086 = vmatprep.mubr.msk.f32.mxu1 %vm506_vm1, %v4243_v15 }
 0x220   : > { %v2147_v31 = vpop.f32.mrf.mxu1  ;;  %v13040_v30 = vpop.f32.mrf.mxu0 }
 0x221   : > { %v13042_v46 = vadd.f32 %v10805_v14, %v2259_v22  ;;  %v13045_v59 = vadd.f32 %v2147_v31, %v12871_v35  ;;  %v4246_v35 = vld [vmem:[#allocation3 + $0xfa] sm:$0xff]  ;;  %v4247_v31 = vld [vmem:[#allocation3 + $0x10a] sm:$0xff] }
 0x222   : > { %v10752_v4 = vpop.f32.mrf.mxu1  ;;  %v10808_v29 = vpop.f32.mrf.mxu0  ;;  %11087 = vmatmul.mubr.msk.f32.gmra.mxu1 %vm506_vm1, %v4244_v53 }
 0x223   : > { %v2261_v33 = vadd.f32 %v10752_v4, %v12876_v11  ;;  %11089 = vmatprep.mubr.msk.f32.mxu1 %vm506_vm1, %v4245_v9 }
 0x224   : > { %v2157_v32 = vpop.f32.mrf.mxu1  ;;  %v13050_v39 = vpop.f32.mrf.mxu0 }
 0x225   : > { %15357 = vst [vmem:[#allocation14_spill] sm:$0xff] %v13050_v39  ;;  %v13052_v52 = vadd.f32 %v10808_v29, %v2261_v33  ;;  %v13055_v14 = vadd.f32 %v2157_v32, %v12882_v25  ;;  %v4248_v29 = vld [vmem:[#allocation3 + $0x112] sm:$0xff]  ;;  %v4249_v32 = vld [vmem:[#allocation3 + $0x122] sm:$0xff] }
 0x226   : > { %v10755_v15 = vpop.f32.mrf.mxu1  ;;  %v10811_v22 = vpop.f32.mrf.mxu0  ;;  %11090 = vmatmul.mubr.msk.f32.gmra.mxu1 %vm506_vm1, %v4246_v35 }
 0x227   : > { %15358 = vst [vmem:[#allocation20_spill] sm:$0xff] %v13055_v14  ;;  %v2263_v53 = vadd.f32 %v10755_v15, %v12888_v28  ;;  %11092 = vmatprep.mubr.msk.f32.mxu1 %vm506_vm1, %v4247_v31  ;;  %v4250_v31 = vld [vmem:[#allocation3 + $0x12a] sm:$0xff] }
 0x228   : > { %v13060_v11 = vpop.f32.mrf.mxu1  ;;  %v13062_v4 = vpop.f32.mrf.mxu0 }
 0x229   : > { %15359 = vst [vmem:[#allocation21_spill] sm:$0xff] %v13060_v11  ;;  %15360 = vst [vmem:[#allocation22_spill] sm:$0xff] %v13062_v4  ;;  %v13064_v9 = vadd.f32 %v10811_v22, %v2263_v53  ;;  %v4251_v53 = vld [vmem:[#allocation3 + $0x13a] sm:$0xff] }
 0x22a   : > { %v10758_v33 = vpop.f32.mrf.mxu1  ;;  %v10814_v25 = vpop.f32.mrf.mxu0  ;;  %11093 = vmatmul.mubr.msk.f32.gmra.mxu1 %vm506_vm1, %v4248_v29 }
 0x22b   : > { %v2265_v62 = vadd.f32 %v10758_v33, %v12902_v56  ;;  %11095 = vmatprep.mubr.msk.f32.mxu1 %vm506_vm1, %v4249_v32  ;;  %v4252_v32 = vld [vmem:[#allocation3 + $0x142] sm:$0xff] }
 0x22c   : > { %v13069_v35 = vpop.f32.mrf.mxu1  ;;  %v13071_v28 = vpop.f32.mrf.mxu0 }
 0x22d   : > { %15361 = vst [vmem:[#allocation23_spill] sm:$0xff] %v13069_v35  ;;  %15362 = vst [vmem:[#allocation24_spill] sm:$0xff] %v13071_v28  ;;  %v13073_v15 = vadd.f32 %v10814_v25, %v2265_v62  ;;  %v4253_v25 = vld [vmem:[#allocation3 + $0x152] sm:$0xff] }
 0x22e   : > { %v10761_v23 = vpop.f32.mrf.mxu1  ;;  %v10817_v22 = vpop.f32.mrf.mxu0  ;;  %11096 = vmatmul.mubr.msk.f32.gmra.mxu1 %vm506_vm1, %v4250_v31 }
 0x22f   : > { %v2267_v24 = vadd.f32 %v10761_v23, %v12915_v38  ;;  %11098 = vmatprep.mubr.msk.f32.mxu1 %vm506_vm1, %v4251_v53  ;;  %v4254_v53 = vld [vmem:[#allocation3 + $0x15a] sm:$0xff] }
 0x230   : > { %v13078_v29 = vpop.f32.mrf.mxu1  ;;  %v13080_v56 = vpop.f32.mrf.mxu0 }
 0x231   : > { %15363 = vst [vmem:[#allocation25_spill] sm:$0xff] %v13078_v29  ;;  %15364 = vst [vmem:[#allocation26_spill] sm:$0xff] %v13080_v56  ;;  %v13082_v33 = vadd.f32 %v10817_v22, %v2267_v24  ;;  %v4255_v22 = vld [vmem:[#allocation3 + $0x16a] sm:$0xff] }
 0x232   : > { %v10764_v17 = vpop.f32.mrf.mxu1  ;;  %v10820_v62 = vpop.f32.mrf.mxu0  ;;  %11099 = vmatmul.mubr.msk.f32.gmra.mxu1 %vm506_vm1, %v4252_v32 }
 0x233   : > { %v2269_v36 = vadd.f32 %v10764_v17, %v12927_v41  ;;  %11101 = vmatprep.mubr.msk.f32.mxu1 %vm506_vm1, %v4253_v25  ;;  %v4256_v25 = vld [vmem:[#allocation3 + $0x172] sm:$0xff] }
 0x234   : > { %v13087_v31 = vpop.f32.mrf.mxu1  ;;  %v13089_v38 = vpop.f32.mrf.mxu0 }
 0x235   : > { %15365 = vst [vmem:[#allocation27_spill] sm:$0xff] %v13087_v31  ;;  %15366 = vst [vmem:[#allocation28_spill] sm:$0xff] %v13089_v38  ;;  %v13091_v23 = vadd.f32 %v10820_v62, %v2269_v36 }
 0x236   : > { %v10767_v0 = vpop.f32.mrf.mxu1  ;;  %v10823_v24 = vpop.f32.mrf.mxu0  ;;  %11102 = vmatmul.mubr.msk.f32.gmra.mxu1 %vm506_vm1, %v4254_v53 }
 0x237   : > { %v2271_v8 = vadd.f32 %v10767_v0, %v12937_v34  ;;  %11104 = vmatprep.mubr.msk.f32.mxu1 %vm506_vm1, %v4255_v22  ;;  %v4259_v0 = vld [vmem:[#allocation3 + $0x19a] sm:$0xff] }
 0x238   : > { %v13096_v32 = vpop.f32.mrf.mxu1  ;;  %v13098_v41 = vpop.f32.mrf.mxu0 }
 0x239   : > { %15367 = vst [vmem:[#allocation29_spill] sm:$0xff] %v13096_v32  ;;  %15368 = vst [vmem:[#allocation30_spill] sm:$0xff] %v13098_v41  ;;  %v13100_v17 = vadd.f32 %v10823_v24, %v2271_v8 }
 0x23a   : > { %v10770_v38 = vpop.f32.mrf.mxu1  ;;  %v10826_v36 = vpop.f32.mrf.mxu0  ;;  %11105 = vmatmul.mubr.msk.f32.gmra.mxu1 %vm506_vm1, %v4256_v25 }
 0x23b   : > { %v2273_v62 = vadd.f32 %v10770_v38, %v12947_v37  ;;  %11107 = vmatprep.mubr.msk.f32.mxu1 %vm506_vm1, %v12790_v48  ;;  %v4260_v37 = vld [vmem:[#allocation3 + $0x1a2] sm:$0xff] }
 0x23c   : > { %v13106_v53 = vpop.f32.mrf.mxu1  ;;  %v13108_v34 = vpop.f32.mrf.mxu0 }
 0x23d   : > { %15369 = vst [vmem:[#allocation31_spill] sm:$0xff] %v13106_v53  ;;  %15370 = vst [vmem:[#allocation32_spill] sm:$0xff] %v13108_v34  ;;  %v13110_v22 = vadd.f32 %v10826_v36, %v2273_v62 }
 0x23e   : > { %v10773_v41 = vpop.f32.mrf.mxu1  ;;  %v10829_v8 = vpop.f32.mrf.mxu0  ;;  %11108 = vmatmul.mubr.msk.f32.gmra.mxu1 %vm506_vm1, %v12798_v6 }
 0x23f   : > { %v2275_v24 = vadd.f32 %v10773_v41, %v12961_v10  ;;  %11110 = vmatprep.mubr.msk.f32.mxu1 %vm506_vm1, %v4259_v0 }
 0x240   : > { %v13116_v38 = vpop.f32.mrf.mxu1  ;;  %v13118_v48 = vpop.f32.mrf.mxu0 }
 0x241   : > { %15371 = vst [vmem:[#allocation33_spill] sm:$0xff] %v13116_v38  ;;  %15372 = vst [vmem:[#allocation34_spill] sm:$0xff] %v13118_v48  ;;  %v13120_v25 = vadd.f32 %v10829_v8, %v2275_v24 }
 0x242   : > { %v10776_v34 = vpop.f32.mrf.mxu1  ;;  %v10832_v53 = vpop.f32.mrf.mxu0  ;;  %11111 = vmatmul.mubr.msk.f32.gmra.mxu1 %vm506_vm1, %v4260_v37 }
 0x243   : > { %v2277_v36 = vadd.f32 %v10776_v34, %v12971_v57 }
 0x244   : > { %v13124_v62 = vpop.f32.mrf.mxu1  ;;  %v13126_v6 = vpop.f32.mrf.mxu0 }
 0x245   : > { %15373 = vst [vmem:[#allocation35_spill] sm:$0xff] %v13124_v62  ;;  %15374 = vst [vmem:[#allocation36_spill] sm:$0xff] %v13126_v6  ;;  %v13128_v10 = vadd.f32 %v10832_v53, %v2277_v36 }
 0x246   : > { %v10843_v41 = vpop.f32.mrf.mxu1  ;;  %v10899_v0 = vpop.f32.mrf.mxu0 }
 0x247   : > { %v3027_v38 = vadd.f32 %v10843_v41, %v12985_v19 }
 0x248   : > { %v13131_v32 = vpop.f32.mrf.mxu1  ;;  %v13133_v8 = vpop.f32.mrf.mxu0 }
 0x249   : > { %v13135_v24 = vadd.f32 %v10899_v0, %v3027_v38 }
 0x24a   : > { %v10846_v48 = vpop.f32.mrf.mxu1  ;;  %v10902_v37 = vpop.f32.mrf.mxu0 }
 0x24b   : > { %v3029_v57 = vadd.f32 %v10846_v48, %v12992_v3 }
 0x24c   : > { %v13138_v34 = vpop.f32.mrf.mxu1  ;;  %v13140_v62 = vpop.f32.mrf.mxu0 }
 0x24d   : > { %v13142_v53 = vadd.f32 %v10902_v37, %v3029_v57 }
 0x24e   : > { %v10849_v36 = vpop.f32.mrf.mxu1  ;;  %v10905_v6 = vpop.f32.mrf.mxu0 }
 0x24f   : > { %v3031_v19 = vadd.f32 %v10849_v36, %v13002_v2 }
 0x250   : > { %v13145_v41 = vpop.f32.mrf.mxu1  ;;  %v13147_v49 = vpop.f32.mrf.mxu0 }
 0x251   : > { %v13149_v38 = vadd.f32 %v10905_v6, %v3031_v19 }
 0x252   : > { %v10852_v0 = vpop.f32.mrf.mxu1  ;;  %v10908_v31 = vpop.f32.mrf.mxu0 }
 0x253   : > { %v3033_v3 = vadd.f32 %v10852_v0, %v13012_v13 }
 0x254   : > { %v13152_v48 = vpop.f32.mrf.mxu1  ;;  %v13154_v56 = vpop.f32.mrf.mxu0 }
 0x255   : > { %v13156_v37 = vadd.f32 %v10908_v31, %v3033_v3 }
 0x256   : > { %v10855_v57 = vpop.f32.mrf.mxu1  ;;  %v10911_v7 = vpop.f32.mrf.mxu0 }
 0x257   : > { %v3035_v2 = vadd.f32 %v10855_v57, %v13022_v63 }
 0x258   : > { %v13159_v36 = vpop.f32.mrf.mxu1  ;;  %v13161_v40 = vpop.f32.mrf.mxu0 }
 0x259   : > { %v13163_v6 = vadd.f32 %v10911_v7, %v3035_v2 }
 0x25a   : > { %v10858_v19 = vpop.f32.mrf.mxu1  ;;  %v10914_v29 = vpop.f32.mrf.mxu0 }
 0x25b   : > { %v3037_v13 = vadd.f32 %v10858_v19, %v13032_v50 }
 0x25c   : > { %v13166_v0 = vpop.f32.mrf.mxu1  ;;  %v13168_v28 = vpop.f32.mrf.mxu0 }
 0x25d   : > { %15375 = vst [vmem:[#allocation37_spill] sm:$0xff] %v13168_v28  ;;  %v13170_v31 = vadd.f32 %v10914_v29, %v3037_v13 }
 0x25e   : > { %v10861_v3 = vpop.f32.mrf.mxu1  ;;  %v10917_v26 = vpop.f32.mrf.mxu0 }
 0x25f   : > { %v3039_v63 = vadd.f32 %v10861_v3, %v13042_v46 }
 0x260   : > { %v13173_v57 = vpop.f32.mrf.mxu1  ;;  %v13175_v47 = vpop.f32.mrf.mxu0 }
 0x261   : > { %15376 = vst [vmem:[#allocation38_spill] sm:$0xff] %v13173_v57  ;;  %15377 = vst [vmem:[#allocation39_spill] sm:$0xff] %v13175_v47  ;;  %v13177_v7 = vadd.f32 %v10917_v26, %v3039_v63 }
 0x262   : > { %v10864_v2 = vpop.f32.mrf.mxu1  ;;  %v10920_v35 = vpop.f32.mrf.mxu0 }
 0x263   : > { %v3041_v50 = vadd.f32 %v10864_v2, %v13052_v52 }
 0x264   : > { %v13180_v19 = vpop.f32.mrf.mxu1  ;;  %v13182_v4 = vpop.f32.mrf.mxu0 }
 0x265   : > { %15378 = vst [vmem:[#allocation40_spill] sm:$0xff] %v13180_v19  ;;  %15379 = vst [vmem:[#allocation41_spill] sm:$0xff] %v13182_v4  ;;  %v13184_v29 = vadd.f32 %v10920_v35, %v3041_v50 }
 0x266   : > { %v10867_v13 = vpop.f32.mrf.mxu1  ;;  %v10923_v60 = vpop.f32.mrf.mxu0 }
 0x267   : > { %v3043_v46 = vadd.f32 %v10867_v13, %v13064_v9 }
 0x268   : > { %v13187_v3 = vpop.f32.mrf.mxu1  ;;  %v13189_v20 = vpop.f32.mrf.mxu0 }
 0x269   : > { %15380 = vst [vmem:[#allocation42_spill] sm:$0xff] %v13187_v3  ;;  %15381 = vst [vmem:[#allocation43_spill] sm:$0xff] %v13189_v20  ;;  %v13191_v26 = vadd.f32 %v10923_v60, %v3043_v46 }
 0x26a   : > { %v10870_v63 = vpop.f32.mrf.mxu1  ;;  %v10926_v47 = vpop.f32.mrf.mxu0 }
 0x26b   : > { %v3045_v52 = vadd.f32 %v10870_v63, %v13073_v15 }
 0x26c   : > { %v13194_v2 = vpop.f32.mrf.mxu1  ;;  %v13196_v19 = vpop.f32.mrf.mxu0 }
 0x26d   : > { %15382 = vst [vmem:[#allocation44_spill] sm:$0xff] %v13194_v2  ;;  %15383 = vst [vmem:[#allocation45_spill] sm:$0xff] %v13196_v19  ;;  %v13198_v35 = vadd.f32 %v10926_v47, %v3045_v52 }
 0x26e   : > { %v10873_v50 = vpop.f32.mrf.mxu1  ;;  %v10929_v4 = vpop.f32.mrf.mxu0 }
 0x26f   : > { %v3047_v9 = vadd.f32 %v10873_v50, %v13082_v33 }
 0x270   : > { %v13201_v13 = vpop.f32.mrf.mxu1  ;;  %v13203_v3 = vpop.f32.mrf.mxu0 }
 0x271   : > { %15384 = vst [vmem:[#allocation46_spill] sm:$0xff] %v13201_v13  ;;  %15385 = vst [vmem:[#allocation47_spill] sm:$0xff] %v13203_v3  ;;  %v13205_v60 = vadd.f32 %v10929_v4, %v3047_v9 }
 0x272   : > { %v10876_v46 = vpop.f32.mrf.mxu1  ;;  %v10932_v20 = vpop.f32.mrf.mxu0 }
 0x273   : > { %v3049_v15 = vadd.f32 %v10876_v46, %v13091_v23 }
 0x274   : > { %v13208_v63 = vpop.f32.mrf.mxu1  ;;  %v13210_v2 = vpop.f32.mrf.mxu0 }
 0x275   : > { %15386 = vst [vmem:[#allocation48_spill] sm:$0xff] %v13208_v63  ;;  %15387 = vst [vmem:[#allocation49_spill] sm:$0xff] %v13210_v2  ;;  %v13212_v47 = vadd.f32 %v10932_v20, %v3049_v15 }
 0x276   : > { %v10879_v52 = vpop.f32.mrf.mxu1  ;;  %v10935_v19 = vpop.f32.mrf.mxu0 }
 0x277   : > { %v3051_v33 = vadd.f32 %v10879_v52, %v13100_v17 }
 0x278   : > { %v13215_v50 = vpop.f32.mrf.mxu1  ;;  %v13217_v13 = vpop.f32.mrf.mxu0 }
 0x279   : > { %15388 = vst [vmem:[#allocation50_spill] sm:$0xff] %v13215_v50  ;;  %15389 = vst [vmem:[#allocation51_spill] sm:$0xff] %v13217_v13  ;;  %v13219_v4 = vadd.f32 %v10935_v19, %v3051_v33 }
 0x27a   : > { %v10882_v9 = vpop.f32.mrf.mxu1  ;;  %v10938_v3 = vpop.f32.mrf.mxu0 }
 0x27b   : > { %v3053_v23 = vadd.f32 %v10882_v9, %v13110_v22 }
 0x27c   : > { %v13222_v46 = vpop.f32.mrf.mxu1  ;;  %v13224_v63 = vpop.f32.mrf.mxu0 }
 0x27d   : > { %15390 = vst [vmem:[#allocation52_spill] sm:$0xff] %v13222_v46  ;;  %15391 = vst [vmem:[#allocation53_spill] sm:$0xff] %v13224_v63  ;;  %v13226_v20 = vadd.f32 %v10938_v3, %v3053_v23 }
 0x27e   : > { %v10885_v15 = vpop.f32.mrf.mxu1  ;;  %v10941_v2 = vpop.f32.mrf.mxu0 }
 0x27f   : > { %v3055_v17 = vadd.f32 %v10885_v15, %v13120_v25 }
 0x280   : > { %v13229_v52 = vpop.f32.mrf.mxu1  ;;  %v13231_v50 = vpop.f32.mrf.mxu0 }
 0x281   : > { %15392 = vst [vmem:[#allocation54_spill] sm:$0xff] %v13229_v52  ;;  %15393 = vst [vmem:[#allocation55_spill] sm:$0xff] %v13231_v50  ;;  %v13233_v19 = vadd.f32 %v10941_v2, %v3055_v17 }
 0x282   : > { %v10888_v33 = vpop.f32.mrf.mxu1  ;;  %v10944_v13 = vpop.f32.mrf.mxu0 }
 0x283   : > { %v3057_v22 = vadd.f32 %v10888_v33, %v13128_v10  ;;  %v4923_v10 = vld [vmem:[%s15290_s9 + $0x8] sm:$0xf] }
 0x284   : > { %v13236_v9 = vpop.f32.mrf.mxu1  ;;  %v13238_v46 = vpop.f32.mrf.mxu0  ;;  %11113 = vmatprep.subr.msk.mxu0 %vm801_vm0, %v4923_v10 }
 0x285   : > { %15394 = vst [vmem:[#allocation56_spill] sm:$0xff] %v13236_v9  ;;  %15395 = vst [vmem:[#allocation57_spill] sm:$0xff] %v13238_v46  ;;  %v13240_v3 = vadd.f32 %v10944_v13, %v3057_v22  ;;  %v4922_v13 = vld [vmem:[%s15290_s9] sm:$0xff]  ;;  %11114 = vmatpush3.msk.msra.mxu0 %vm801_vm0, %v4923_v10 }
 0x286   : > { %v10955_v23 = vpop.f32.mrf.mxu1  ;;  %v13242_v63 = vpop.f32.mrf.mxu0  ;;  %11115 = vmatprep.subr.mxu0 %v4922_v13 }
 0x287   : > { %v13245_v25 = vadd.f32 %v10955_v23, %v13135_v24  ;;  %11116 = vmatpush3.msra.mxu0 %v4922_v13 }
 0x288   : > { %v13247_v15 = vpop.f32.mrf.mxu1  ;;  %v13249_v2 = vpop.f32.mrf.mxu0 }
 0x28a   : > { %v10958_v17 = vpop.f32.mrf.mxu1  ;;  %v13264_v24 = vpop.f32.mrf.mxu0 }
 0x28b   : > { %v13252_v50 = vadd.f32 %v10958_v17, %v13142_v53 }
 0x28c   : > { %v13260_v33 = vpop.f32.mrf.mxu1  ;;  %v13271_v17 = vpop.f32.mrf.mxu0 }
 0x28e   : > { %v10961_v22 = vpop.f32.mrf.mxu1  ;;  %v13278_v11 = vpop.f32.mrf.mxu0 }
 0x28f   : > { %v13267_v53 = vadd.f32 %v10961_v22, %v13149_v38 }
 0x290   : > { %v13269_v23 = vpop.f32.mrf.mxu1  ;;  %v13285_v38 = vpop.f32.mrf.mxu0 }
 0x292   : > { %v10964_v46 = vpop.f32.mrf.mxu1 }
 0x293   : > { %v13274_v9 = vadd.f32 %v10964_v46, %v13156_v37  ;;  %v13292_v37 = vpop.f32.mrf.mxu0 }
 0x294   : > { %v13276_v52 = vpop.f32.mrf.mxu1 }
 0x295   : > { %15396 = vst [vmem:[#allocation58_spill] sm:$0xff] %v13274_v9 }
 0x296   : > { %v10967_v10 = vpop.f32.mrf.mxu1 }
 0x297   : > { %v13281_v39 = vadd.f32 %v10967_v10, %v13163_v6  ;;  %v13299_v6 = vpop.f32.mrf.mxu0 }
 0x298   : > { %v13283_v14 = vpop.f32.mrf.mxu1 }
 0x299   : > { %15397 = vst [vmem:[#allocation59_spill] sm:$0xff] %v13281_v39 }
 0x29a   : > { %v10970_v13 = vpop.f32.mrf.mxu1 }
 0x29b   : > { %v13288_v22 = vadd.f32 %v10970_v13, %v13170_v31  ;;  %v13306_v31 = vpop.f32.mrf.mxu0 }
 0x29c   : > { %v13290_v57 = vpop.f32.mrf.mxu1 }
 0x29d   : > { %15398 = vst [vmem:[#allocation60_spill] sm:$0xff] %v13288_v22  ;;  %15399 = vst [vmem:[#allocation61_spill] sm:$0xff] %v13290_v57 }
 0x29e   : > { %v10973_v46 = vpop.f32.mrf.mxu1 }
 0x29f   : > { %v13295_v9 = vadd.f32 %v10973_v46, %v13177_v7  ;;  %v13313_v7 = vpop.f32.mrf.mxu0 }
 0x2a0   : > { %v13297_v28 = vpop.f32.mrf.mxu1 }
 0x2a1   : > { %15400 = vst [vmem:[#allocation62_spill] sm:$0xff] %v13295_v9  ;;  %15401 = vst [vmem:[#allocation63_spill] sm:$0xff] %v13297_v28 }
 0x2a2   : > { %v10976_v10 = vpop.f32.mrf.mxu1 }
 0x2a3   : > { %v13302_v39 = vadd.f32 %v10976_v10, %v13184_v29  ;;  %v13320_v29 = vpop.f32.mrf.mxu0 }
 0x2a4   : > { %v13304_v55 = vpop.f32.mrf.mxu1 }
 0x2a5   : > { %15402 = vst [vmem:[#allocation64_spill] sm:$0xff] %v13302_v39  ;;  %15403 = vst [vmem:[#allocation65_spill] sm:$0xff] %v13304_v55 }
 0x2a6   : > { %v10979_v13 = vpop.f32.mrf.mxu1 }
 0x2a7   : > { %v13309_v22 = vadd.f32 %v10979_v13, %v13191_v26  ;;  %v13327_v26 = vpop.f32.mrf.mxu0 }
 0x2a8   : > { %v13311_v57 = vpop.f32.mrf.mxu1 }
 0x2a9   : > { %15404 = vst [vmem:[#allocation66_spill] sm:$0xff] %v13309_v22  ;;  %15405 = vst [vmem:[#allocation67_spill] sm:$0xff] %v13311_v57 }
 0x2aa   : > { %v10982_v46 = vpop.f32.mrf.mxu1 }
 0x2ab   : > { %v13316_v9 = vadd.f32 %v10982_v46, %v13198_v35  ;;  %v1730_v35 = vadd.f32 %v12815_v43, %v12813_v12  ;;  %v13336_v46 = vpop.f32.mrf.mxu0 }
 0x2ac   : > { %v13318_v28 = vpop.f32.mrf.mxu1 }
 0x2ad   : > { %15406 = vst [vmem:[#allocation68_spill] sm:$0xff] %v13316_v9  ;;  %15407 = vst [vmem:[#allocation69_spill] sm:$0xff] %v13318_v28  ;;  %v2246_v28 = vadd.f32 %v12981_v5, %v1730_v35 }
 0x2ae   : > { %v10985_v10 = vpop.f32.mrf.mxu1 }
 0x2af   : > { %v13323_v39 = vadd.f32 %v10985_v10, %v13205_v60 }
 0x2b0   : > { %v13325_v55 = vpop.f32.mrf.mxu1 }
 0x2b1   : > { %15408 = vst [vmem:[#allocation70_spill] sm:$0xff] %v13323_v39  ;;  %15409 = vst [vmem:[#allocation71_spill] sm:$0xff] %v13325_v55  ;;  %v13344_v39 = vpop.f32.mrf.mxu0 }
 0x2b2   : > { %v10988_v13 = vpop.f32.mrf.mxu1 }
 0x2b3   : > { %v13330_v22 = vadd.f32 %v10988_v13, %v13212_v47  ;;  %v2636_v47 = vadd.f32 %v12983_v18, %v2246_v28  ;;  %v13353_v43 = vpop.f32.mrf.mxu0 }
 0x2b4   : > { %v13332_v57 = vpop.f32.mrf.mxu1 }
 0x2b5   : > { %15410 = vst [vmem:[#allocation72_spill] sm:$0xff] %v13330_v22  ;;  %v3026_v12 = vadd.f32 %v13131_v32, %v2636_v47  ;;  %v13364_v28 = vpop.f32.mrf.mxu0  ;;  %v2640_v32 = vadd.f32 %v13000_v45, %v13005_v61 }
 0x2b6   : > { %v10991_v9 = vpop.f32.mrf.mxu1 }
 0x2b7   : > { %v13340_v60 = vadd.f32 %v10991_v9, %v13219_v4  ;;  %v2638_v4 = vadd.f32 %v12990_v1, %v12995_v44  ;;  %v3416_v18 = vadd.f32 %v13133_v8, %v3026_v12  ;;  %v13376_v8 = vpop.f32.mrf.mxu0  ;;  %v2642_v12 = vadd.f32 %v13010_v42, %v13015_v21 }
 0x2b8   : > { %v13342_v10 = vpop.f32.mrf.mxu1 }
 0x2b9   : > { %v3807_v47 = vadd.f32 %v13247_v15, %v3416_v18  ;;  %v3032_v15 = vadd.f32 %v13152_v48, %v2642_v12  ;;  %v13384_v18 = vpop.f32.mrf.mxu0 }
 0x2ba   : > { %v10994_v55 = vpop.f32.mrf.mxu1 }
 0x2bb   : > { %v13348_v13 = vadd.f32 %v10994_v55, %v13226_v20  ;;  %v3028_v55 = vadd.f32 %v13138_v34, %v2638_v4  ;;  %v3422_v48 = vadd.f32 %v13154_v56, %v3032_v15 }
 0x2bc   : > { %v13350_v22 = vpop.f32.mrf.mxu1 }
 0x2bd   : > { %15411 = vst [vmem:[#allocation73_spill] sm:$0xff] %v13348_v13  ;;  %v3418_v44 = vadd.f32 %v13140_v62, %v3028_v55  ;;  %v4198_v55 = vadd.f32 %v13242_v63, %v13245_v25  ;;  %v4200_v25 = vadd.f32 %v13264_v24, %v13252_v50 }
 0x2be   : > { %v10997_v5 = vpop.f32.mrf.mxu1 }
 0x2bf   : > { %v13358_v9 = vadd.f32 %v10997_v5, %v13233_v19  ;;  %v3030_v19 = vadd.f32 %v13145_v41, %v2640_v32  ;;  %v4197_v5 = vadd.f32 %v13249_v2, %v3807_v47  ;;  %v3809_v45 = vadd.f32 %v13260_v33, %v3418_v44 }
 0x2c0   : > { %v13360_v35 = vpop.f32.mrf.mxu1  ;;  %v2644_v41 = vadd.f32 %v13020_v16, %v13025_v54  ;;  %v2646_v16 = vadd.f32 %v13030_v27, %v13035_v58  ;;  %v13397_v54 = vpop.f32.mrf.mxu0  ;;  %v2648_v47 = vadd.f32 %v13040_v30, %v13045_v59  ;;  %v15414_v59 = vld [vmem:[#allocation38_spill] sm:$0xff] }
 0x2c1   : > { %v4199_v42 = vadd.f32 %v13271_v17, %v3809_v45  ;;  %v3813_v17 = vadd.f32 %v13276_v52, %v3422_v48  ;;  %v4202_v52 = vadd.f32 %v13278_v11, %v13267_v53  ;;  %v15416_v11 = vld [vmem:[#allocation14_spill] sm:$0xff] }
 0x2c2   : > { %v11000_v20 = vpop.f32.mrf.mxu1  ;;  %v3034_v2 = vadd.f32 %v13159_v36, %v2644_v41  ;;  %v3036_v32 = vadd.f32 %v13166_v0, %v2646_v16  ;;  %v13409_v44 = vpop.f32.mrf.mxu0  ;;  %v3038_v12 = vadd.f32 %v15414_v59, %v2648_v47  ;;  %v15419_v41 = vld [vmem:[#allocation61_spill] sm:$0xff]  ;;  %v15427_v47 = vld [vmem:[#allocation63_spill] sm:$0xff] }
 0x2c3   : > { %v13370_v13 = vadd.f32 %v11000_v20, %v13240_v3  ;;  %v3420_v3 = vadd.f32 %v13147_v49, %v3030_v19  ;;  %v4203_v24 = vadd.f32 %v13299_v6, %v3813_v17  ;;  %v15417_v6 = vld [vmem:[#allocation21_spill] sm:$0xff]  ;;  %v15425_v17 = vld [vmem:[#allocation23_spill] sm:$0xff] }
 0x2c4   : > { %v13372_v1 = vpop.f32.mrf.mxu1  ;;  %v3424_v36 = vadd.f32 %v13161_v40, %v3034_v2  ;;  %v15412_v40 = vld [vmem:[#allocation9_spill] sm:$0xff]  ;;  %v15422_v2 = vld [vmem:[#allocation39_spill] sm:$0xff] }
 0x2c5   : > { %v3811_v21 = vadd.f32 %v13269_v23, %v3420_v3  ;;  %v1810_v0 = vadd.f32 %v15412_v40, %v12894_v51 }
 0x2c6   : > { %v11067_v34 = vpop.f32.mrf.mxu1 }
 0x2c7   : > { %v4588_v33 = vadd.f32 %v11067_v34, %v4198_v55  ;;  %v4201_v23 = vadd.f32 %v13285_v38, %v3811_v21  ;;  %v3815_v38 = vadd.f32 %v13283_v14, %v3424_v36  ;;  %v15413_v34 = vld [vmem:[#allocation37_spill] sm:$0xff]  ;;  %v2262_v3 = vadd.f32 %v15417_v6, %v1810_v0  ;;  %v13424_v14 = vpop.f32.mrf.mxu0  ;;  %v15421_v21 = vld [vmem:[#allocation11_spill] sm:$0xff] }
 0x2c8   : > { %v4428_v61 = vpop.f32.mrf.mxu1  ;;  %v3426_v30 = vadd.f32 %v15413_v34, %v3036_v32  ;;  %v15426_v32 = vld [vmem:[#allocation59_spill] sm:$0xff]  ;;  %v15430_v0 = vld [vmem:[#allocation41_spill] sm:$0xff]  ;;  %v15431_v34 = vld [vmem:[#allocation42_spill] sm:$0xff] }
 0x2c9   : > { %v4587_v4 = vadd.f32 %v4428_v61, %v4197_v5  ;;  %v15415_v61 = vld [vmem:[#allocation20_spill] sm:$0xff]  ;;  %v4205_v51 = vadd.f32 %v13313_v7, %v3815_v38 }
 0x2ca   : > { %v11070_v62 = vpop.f32.mrf.mxu1  ;;  %v2650_v53 = vadd.f32 %v15416_v11, %v15415_v61  ;;  %v3817_v55 = vadd.f32 %v15419_v41, %v3426_v30 }
 0x2cb   : > { %4651 = vrot.lane.b32.xlu0 %v4587_v4, %s11689_s16  ;;  %v4590_v27 = vadd.f32 %v11070_v62, %v4200_v25  ;;  %v15418_v4 = vld [vmem:[#allocation58_spill] sm:$0xff] }
 0x2cc   : > { %v4438_v49 = vpop.f32.mrf.mxu1  ;;  %v4204_v62 = vadd.f32 %v13292_v37, %v15418_v4  ;;  %v15435_v4 = vld [vmem:[#allocation65_spill] sm:$0xff] }
 0x2cd   : > { %v4589_v20 = vadd.f32 %v4438_v49, %v4199_v42  ;;  %v15420_v42 = vld [vmem:[#allocation10_spill] sm:$0xff] }
 0x2ce   : > { %v11073_v63 = vpop.f32.mrf.mxu1  ;;  %v1820_v49 = vadd.f32 %v15421_v21, %v15420_v42  ;;  %v15438_v42 = vld [vmem:[#allocation43_spill] sm:$0xff] }
 0x2cf   : > { %4653 = vrot.lane.b32.xlu0 %v4588_v33, %s11689_s16  ;;  %4655 = vrot.lane.b32.xlu1 %v4589_v20, %s11689_s16  ;;  %v4592_v5 = vadd.f32 %v11073_v63, %v4202_v52  ;;  %v3428_v33 = vadd.f32 %v15422_v2, %v3038_v12  ;;  %v15423_v20 = vld [vmem:[#allocation40_spill] sm:$0xff] }
 0x2d0   : > { %v4448_v56 = vpop.f32.mrf.mxu1  ;;  %v3040_v16 = vadd.f32 %v15423_v20, %v2650_v53  ;;  %v2264_v7 = vadd.f32 %v15425_v17, %v1820_v49  ;;  %v15434_v53 = vld [vmem:[#allocation60_spill] sm:$0xff]  ;;  %v15440_v20 = vld [vmem:[#allocation26_spill] sm:$0xff] }
 0x2d1   : > { %v4591_v58 = vadd.f32 %v4448_v56, %v4201_v23  ;;  %v15424_v23 = vld [vmem:[#allocation22_spill] sm:$0xff]  ;;  %v13438_v56 = vpop.f32.mrf.mxu0  ;;  %v3819_v52 = vadd.f32 %v15427_v47, %v3428_v33  ;;  %v4208_v6 = vadd.f32 %v13320_v29, %v15434_v53  ;;  %v15439_v49 = vld [vmem:[#allocation44_spill] sm:$0xff]  ;;  %v15453_v53 = vld [vmem:[#allocation15_spill] sm:$0xff] }
 0x2d2   : > { %v11076_v50 = vpop.f32.mrf.mxu1  ;;  %v2652_v37 = vadd.f32 %v15424_v23, %v2262_v3  ;;  %v15442_v23 = vld [vmem:[#allocation62_spill] sm:$0xff] }
 0x2d3   : > { %4657 = vrot.lane.b32.xlu1 %v4590_v27, %s11689_s16  ;;  %4659 = vrot.lane.b32.xlu0 %v4591_v58, %s11689_s16  ;;  %v4594_v63 = vadd.f32 %v11076_v50, %v4204_v62  ;;  %v4206_v27 = vadd.f32 %v13306_v31, %v15426_v32  ;;  %v4207_v58 = vadd.f32 %v13327_v26, %v3817_v55  ;;  %v15428_v50 = vld [vmem:[#allocation12_spill] sm:$0xff]  ;;  %v13452_v61 = vpop.f32.mrf.mxu0 }
 0x2d4   : > { %v4458_v19 = vpop.f32.mrf.mxu1  ;;  %v3042_v30 = vadd.f32 %v15431_v34, %v2652_v37  ;;  %v4209_v3 = vadd.f32 %v13344_v39, %v3819_v52  ;;  %v4210_v37 = vadd.f32 %v13336_v46, %v15442_v23  ;;  %v15446_v52 = vld [vmem:[#allocation45_spill] sm:$0xff] }
 0x2d5   : > { %v4593_v45 = vadd.f32 %v4458_v19, %v4203_v24  ;;  %v15429_v24 = vld [vmem:[#allocation13_spill] sm:$0xff]  ;;  %v3430_v19 = vadd.f32 %v15430_v0, %v3040_v16  ;;  %v15441_v16 = vld [vmem:[#allocation27_spill] sm:$0xff] }
 0x2d6   : > { %v11079_v15 = vpop.f32.mrf.mxu1  ;;  %v1830_v38 = vadd.f32 %v15429_v24, %v15428_v50  ;;  %v3432_v21 = vadd.f32 %v15438_v42, %v3042_v30  ;;  %v15447_v24 = vld [vmem:[#allocation46_spill] sm:$0xff]  ;;  %v15449_v34 = vld [vmem:[#allocation29_spill] sm:$0xff] }
 0x2d7   : > { %4661 = vrot.lane.b32.xlu1 %v4592_v5, %s11689_s16  ;;  %4663 = vrot.lane.b32.xlu0 %v4593_v45, %s11689_s16  ;;  %v4596_v59 = vadd.f32 %v11079_v15, %v4206_v27  ;;  %v15432_v5 = vld [vmem:[#allocation24_spill] sm:$0xff]  ;;  %v15433_v45 = vld [vmem:[#allocation25_spill] sm:$0xff]  ;;  %v3821_v62 = vadd.f32 %v15435_v4, %v3430_v19  ;;  %v15445_v27 = vld [vmem:[#allocation7_spill] sm:$0xff] }
 0x2d8   : > { %v4468_v48 = vpop.f32.mrf.mxu1  ;;  %v2654_v31 = vadd.f32 %v15432_v5, %v2264_v7  ;;  %v2266_v26 = vadd.f32 %v15433_v45, %v1830_v38  ;;  %v15436_v15 = vld [vmem:[#allocation4_spill] sm:$0xff]  ;;  %v15443_v7 = vld [vmem:[#allocation67_spill] sm:$0xff]  ;;  %v15451_v45 = vld [vmem:[#allocation69_spill] sm:$0xff] }
 0x2d9   : > { %v4595_v25 = vadd.f32 %v4468_v48, %v4205_v51  ;;  %v15437_v51 = vld [vmem:[#allocation5_spill] sm:$0xff]  ;;  %v4211_v17 = vadd.f32 %v13364_v28, %v3821_v62  ;;  %v3823_v32 = vadd.f32 %v15443_v7, %v3432_v21  ;;  %v15448_v19 = vld [vmem:[#allocation28_spill] sm:$0xff]  ;;  %v15454_v4 = vld [vmem:[#allocation47_spill] sm:$0xff] }
 0x2da   : > { %v11082_v36 = vpop.f32.mrf.mxu1  ;;  %v1840_v41 = vadd.f32 %v15437_v51, %v15436_v15  ;;  %v3044_v48 = vadd.f32 %v15439_v49, %v2654_v31  ;;  %v2656_v29 = vadd.f32 %v15440_v20, %v2266_v26  ;;  %v15455_v15 = vld [vmem:[#allocation48_spill] sm:$0xff]  ;;  %v15456_v42 = vld [vmem:[#allocation30_spill] sm:$0xff]  ;;  %v15457_v21 = vld [vmem:[#allocation31_spill] sm:$0xff] }
 0x2db   : > { %4665 = vrot.lane.b32.xlu1 %v4594_v63, %s11689_s16  ;;  %4667 = vrot.lane.b32.xlu0 %v4595_v25, %s11689_s16  ;;  %v4598_v2 = vadd.f32 %v11082_v36, %v4208_v6  ;;  %v13466_v63 = vpop.f32.mrf.mxu0  ;;  %v15444_v36 = vld [vmem:[#allocation6_spill] sm:$0xff]  ;;  %v4213_v31 = vadd.f32 %v13384_v18, %v3823_v32 }
 0x2dc   : > { %v4478_v40 = vpop.f32.mrf.mxu1  ;;  %v2268_v39 = vadd.f32 %v15441_v16, %v1840_v41  ;;  %v3434_v50 = vadd.f32 %v15446_v52, %v3044_v48  ;;  %v3046_v38 = vadd.f32 %v15447_v24, %v2656_v29  ;;  %v15459_v29 = vld [vmem:[#allocation71_spill] sm:$0xff]  ;;  %v15463_v32 = vld [vmem:[#allocation50_spill] sm:$0xff]  ;;  %v15465_v52 = vld [vmem:[#allocation33_spill] sm:$0xff] }
 0x2dd   : > { %v4597_v12 = vadd.f32 %v4478_v40, %v4207_v58  ;;  %v1850_v58 = vadd.f32 %v15445_v27, %v15444_v36  ;;  %v13480_v30 = vpop.f32.mrf.mxu0 }
 0x2de   : > { %v11085_v11 = vpop.f32.mrf.mxu1  ;;  %v2658_v46 = vadd.f32 %v15448_v19, %v2268_v39  ;;  %v3825_v26 = vadd.f32 %v15451_v45, %v3434_v50  ;;  %v3436_v62 = vadd.f32 %v15454_v4, %v3046_v38  ;;  %v15460_v39 = vld [vmem:[#allocation16_spill] sm:$0xff]  ;;  %v15473_v4 = vld [vmem:[#allocation70_spill] sm:$0xff] }
 0x2df   : > { %4669 = vrot.lane.b32.xlu1 %v4596_v59, %s11689_s16  ;;  %4671 = vrot.lane.b32.xlu0 %v4597_v12, %s11689_s16  ;;  %v4600_v40 = vadd.f32 %v11085_v11, %v4210_v37  ;;  %v2270_v28 = vadd.f32 %v15449_v34, %v1850_v58  ;;  %v15450_v12 = vld [vmem:[#allocation64_spill] sm:$0xff]  ;;  %v4158_v49 = vpop.f32.mrf.mxu0  ;;  %v15468_v34 = vld [vmem:[#allocation19_spill] sm:$0xff] }
 0x2e0   : > { %v4488_v55 = vpop.f32.mrf.mxu1  ;;  %v4212_v5 = vadd.f32 %v13353_v43, %v15450_v12  ;;  %v15452_v11 = vld [vmem:[#allocation8_spill] sm:$0xff]  ;;  %v3048_v51 = vadd.f32 %v15455_v15, %v2658_v46  ;;  %v4215_v20 = vadd.f32 %v13409_v44, %v3825_v26  ;;  %v3827_v16 = vadd.f32 %v15459_v29, %v3436_v62  ;;  %v15467_v46 = vld [vmem:[#allocation18_spill] sm:$0xff]  ;;  %v15469_v12 = vld [vmem:[#allocation51_spill] sm:$0xff] }
 0x2e1   : > { %v4599_v33 = vadd.f32 %v4488_v55, %v4209_v3  ;;  %v1860_v6 = vadd.f32 %v15453_v53, %v15452_v11  ;;  %v2660_v43 = vadd.f32 %v15456_v42, %v2270_v28  ;;  %v11050_v50 = vpop.f32.mrf.mxu0  ;;  %v15466_v38 = vld [vmem:[#allocation68_spill] sm:$0xff]  ;;  %v1880_v28 = vadd.f32 %v15468_v34, %v15467_v46  ;;  %v15471_v53 = vld [vmem:[#allocation34_spill] sm:$0xff] }
 0x2e2   : > { %v11088_v25 = vpop.f32.mrf.mxu1  ;;  %v4218_v62 = vadd.f32 %v13424_v14, %v15473_v4  ;;  %v15477_v14 = vld [vmem:[#allocation72_spill] sm:$0xff] }
 0x2e3   : > { %4673 = vrot.lane.b32.xlu1 %v4598_v2, %s11689_s16  ;;  %4675 = vrot.lane.b32.xlu0 %v4599_v33, %s11689_s16  ;;  %v4602_v41 = vadd.f32 %v11088_v25, %v4212_v5  ;;  %v2272_v18 = vadd.f32 %v15457_v21, %v1860_v6  ;;  %v15458_v2 = vld [vmem:[#allocation66_spill] sm:$0xff]  ;;  %v15461_v25 = vld [vmem:[#allocation17_spill] sm:$0xff]  ;;  %v3050_v36 = vadd.f32 %v15463_v32, %v2660_v43  ;;  %v15472_v6 = vld [vmem:[#allocation35_spill] sm:$0xff] }
 0x2e4   : > { %v4498_v47 = vpop.f32.mrf.mxu1  ;;  %v4214_v33 = vadd.f32 %v13376_v8, %v15458_v2  ;;  %v1870_v23 = vadd.f32 %v15461_v25, %v15460_v39  ;;  %v15475_v43 = vld [vmem:[#allocation54_spill] sm:$0xff]  ;;  %v15476_v2 = vld [vmem:[#allocation36_spill] sm:$0xff]  ;;  %v15478_v25 = vld [vmem:[#allocation55_spill] sm:$0xff] }
 0x2e5   : > { %v4601_v0 = vadd.f32 %v4498_v47, %v4211_v17  ;;  %v15462_v17 = vld [vmem:[#allocation49_spill] sm:$0xff]  ;;  %v15464_v47 = vld [vmem:[#allocation32_spill] sm:$0xff]  ;;  %v3440_v5 = vadd.f32 %v15469_v12, %v3050_v36 }
 0x2e6   : > { %v11091_v59 = vpop.f32.mrf.mxu1  ;;  %v3438_v7 = vadd.f32 %v15462_v17, %v3048_v51  ;;  %v2662_v8 = vadd.f32 %v15464_v47, %v2272_v18  ;;  %v2274_v44 = vadd.f32 %v15465_v52, %v1870_v23 }
 0x2e7   : > { %4677 = vrot.lane.b32.xlu1 %v4600_v40, %s11689_s16  ;;  %4679 = vrot.lane.b32.xlu0 %v4601_v0, %s11689_s16  ;;  %v4604_v27 = vadd.f32 %v11091_v59, %v4214_v33  ;;  %v4216_v40 = vadd.f32 %v13397_v54, %v15466_v38  ;;  %v4217_v0 = vadd.f32 %v13438_v56, %v3827_v16 }
 0x2e8   : > { %v4508_v3 = vpop.f32.mrf.mxu1  ;;  %v3829_v19 = vadd.f32 %v13332_v57, %v3438_v7  ;;  %v2664_v54 = vadd.f32 %v15471_v53, %v2274_v44  ;;  %v2276_v56 = vadd.f32 %v15472_v6, %v1880_v28  ;;  %v3831_v51 = vadd.f32 %v13342_v10, %v3440_v5 }
 0x2e9   : > { %v4603_v55 = vadd.f32 %v4508_v3, %v4213_v31  ;;  %v15470_v31 = vld [vmem:[#allocation52_spill] sm:$0xff]  ;;  %v4168_v3 = vpop.f32.mrf.mxu0 }
 0x2ea   : > { %v11094_v48 = vpop.f32.mrf.mxu1  ;;  %v3052_v45 = vadd.f32 %v15470_v31, %v2662_v8  ;;  %v4219_v15 = vadd.f32 %v13466_v63, %v3829_v19  ;;  %v3054_v21 = vadd.f32 %v15475_v43, %v2664_v54  ;;  %v2666_v33 = vadd.f32 %v15476_v2, %v2276_v56  ;;  %v15480_v8 = vld [vmem:[#allocation57_spill] sm:$0xff]  ;;  %v13569_v56 = vld [vmem:[%s15288_s7] ss:$0 sm:$0xff] }
 0x2eb   : > { %4681 = vrot.lane.b32.xlu1 %v4602_v41, %s11689_s16  ;;  %4683 = vrot.lane.b32.xlu0 %v4603_v55, %s11689_s16  ;;  %v4606_v26 = vadd.f32 %v11094_v48, %v4216_v40  ;;  %v15474_v55 = vld [vmem:[#allocation53_spill] sm:$0xff]  ;;  %v4220_v63 = vadd.f32 %v13452_v61, %v15477_v14  ;;  %v4221_v16 = vadd.f32 %v4158_v49, %v3831_v51 }
 0x2ec   : > { %v4518_v37 = vpop.f32.mrf.mxu1  ;;  %v3442_v42 = vadd.f32 %v15474_v55, %v3052_v45  ;;  %v3444_v23 = vadd.f32 %v15478_v25, %v3054_v21  ;;  %v15481_v40 = vld [vmem:[#allocation73_spill] sm:$0xff] }
 0x2ed   : > { %v4605_v58 = vadd.f32 %v4518_v37, %v4215_v20  ;;  %v11053_v20 = vpop.f32.mrf.mxu0  ;;  %v15479_v37 = vld [vmem:[#allocation56_spill] sm:$0xff] }
 0x2ee   : > { %v11097_v24 = vpop.f32.mrf.mxu1  ;;  %v3833_v10 = vadd.f32 %v13350_v22, %v3442_v42  ;;  %v3056_v17 = vadd.f32 %v15479_v37, %v2666_v33  ;;  %v3835_v49 = vadd.f32 %v13360_v35, %v3444_v23 }
 0x2ef   : > { %4685 = vrot.lane.b32.xlu1 %v4604_v27, %s11689_s16  ;;  %4687 = vrot.lane.b32.xlu0 %v4605_v58, %s11689_s16  ;;  %v4608_v18 = vadd.f32 %v11097_v24, %v4218_v62  ;;  %v4178_v36 = vpop.f32.mrf.mxu0  ;;  %v4222_v58 = vadd.f32 %v13480_v30, %v13340_v60  ;;  %v13574_v62 = vld [vmem:[%s15289_s8] ss:$0 sm:$0xff] }
 0x2f0   : > { %v4528_v59 = vpop.f32.mrf.mxu1  ;;  %v4223_v61 = vadd.f32 %v4168_v3, %v3833_v10  ;;  %v3446_v52 = vadd.f32 %v15480_v8, %v3056_v17  ;;  %v4225_v19 = vadd.f32 %v4178_v36, %v3835_v49 }
 0x2f1   : > { %v4607_v11 = vadd.f32 %v4528_v59, %v4217_v0  ;;  %v11056_v22 = vpop.f32.mrf.mxu0  ;;  %v4224_v0 = vadd.f32 %v11050_v50, %v15481_v40  ;;  %v4226_v59 = vadd.f32 %v11053_v20, %v13358_v9  ;;  %v9523_v9 = vld [vmem:[%s15293_s12 + $0x38] sm:$0xff] }
 0x2f2   : > { %v11100_v57 = vpop.f32.mrf.mxu1  ;;  %v3837_v46 = vadd.f32 %v13372_v1, %v3446_v52  ;;  %v4228_v1 = vadd.f32 %v11056_v22, %v13370_v13  ;;  %11165 = vmatprep.subr.mxu1 %v9523_v9  ;;  %v9521_v13 = vld [vmem:[%s15293_s12 + $0x28] sm:$0xff] }
 0x2f3   : > { %4689 = vrot.lane.b32.xlu1 %v4606_v26, %s11689_s16  ;;  %4691 = vrot.lane.b32.xlu0 %v4607_v11, %s11689_s16  ;;  %v4610_v7 = vadd.f32 %v11100_v57, %v4220_v63  ;;  %v4188_v60 = vpop.f32.mrf.mxu0  ;;  %v9522_v26 = vld [vmem:[%s15293_s12 + $0x30] sm:$0xff]  ;;  %v9520_v11 = vld [vmem:[%s15293_s12 + $0x20] sm:$0xff] }
 0x2f4   : > { %v4538_v41 = vpop.f32.mrf.mxu1  ;;  %v4227_v12 = vadd.f32 %v4188_v60, %v3837_v46  ;;  %11166 = vmatpush3.msra.mxu1 %v9523_v9 }
 0x2f5   : > { %v4609_v48 = vadd.f32 %v4538_v41, %v4219_v15  ;;  %11167 = vmatprep.subr.mxu1 %v9522_v26 }
 0x2f6   : > { %v11103_v29 = vpop.f32.mrf.mxu1  ;;  %11168 = vmatpush3.msra.mxu1 %v9522_v26 }
 0x2f7   : > { %4693 = vrot.lane.b32.xlu1 %v4608_v18, %s11689_s16  ;;  %4695 = vrot.lane.b32.xlu0 %v4609_v48, %s11689_s16  ;;  %v4612_v44 = vadd.f32 %v11103_v29, %v4222_v58 }
 0x2f8   : > { %v4548_v39 = vpop.f32.mrf.mxu1  ;;  %11169 = vmatprep.subr.mxu1 %v9521_v13 }
 0x2f9   : > { %v4611_v32 = vadd.f32 %v4548_v39, %v4221_v16  ;;  %11170 = vmatpush3.msra.mxu1 %v9521_v13 }
 0x2fa   : > { %v11106_v27 = vpop.f32.mrf.mxu1  ;;  %11171 = vmatprep.subr.mxu1 %v9520_v11 }
 0x2fb   : > { %4697 = vrot.lane.b32.xlu1 %v4610_v7, %s11689_s16  ;;  %4699 = vrot.lane.b32.xlu0 %v4611_v32, %s11689_s16  ;;  %v4614_v30 = vadd.f32 %v11106_v27, %v4224_v0 }
 0x2fc   : > { %v4558_v47 = vpop.f32.mrf.mxu1  ;;  %11172 = vmatpush3.msra.mxu1 %v9520_v11 }
 0x2fd   : > { %v4613_v24 = vadd.f32 %v4558_v47, %v4223_v61 }
 0x2fe   : > { %v11109_v38 = vpop.f32.mrf.mxu1 }
 0x2ff   : > { %4701 = vrot.lane.b32.xlu1 %v4612_v44, %s11689_s16  ;;  %4703 = vrot.lane.b32.xlu0 %v4613_v24, %s11689_s16  ;;  %v4616_v5 = vadd.f32 %v11109_v38, %v4226_v59 }
 0x300   : > { %v4568_v35 = vpop.f32.mrf.mxu1 }
 0x301   : > { %v4615_v34 = vadd.f32 %v4568_v35, %v4225_v19 }
 0x302   : > { %v11112_v28 = vpop.f32.mrf.mxu1 }
 0x303   : > { %4705 = vrot.lane.b32.xlu1 %v4614_v30, %s11689_s16  ;;  %4707 = vrot.lane.b32.xlu0 %v4615_v34, %s11689_s16  ;;  %v4618_v45 = vadd.f32 %v11112_v28, %v4228_v1 }
 0x304   : > { %v4578_v50 = vpop.f32.mrf.mxu1 }
 0x305   : > { %v4617_v31 = vadd.f32 %v4578_v50, %v4227_v12 }
 0x307   : > { %4709 = vrot.lane.b32.xlu1 %v4616_v5, %s11689_s16  ;;  %4711 = vrot.lane.b32.xlu0 %v4617_v31, %s11689_s16 }
 0x30b   : > { %4713 = vrot.lane.b32.xlu1 %v4618_v45, %s11689_s16  ;;  %s15183_s16 = scalar_lea.vmem %s15294_s13, %s9842_s29 }
 0x33d   : > { %v4652_v53 = vpop.permute.xlu0 %4651 }
 0x33e   : > { %4748 = vst.msk [vmem:[#allocation2] sm:$0xff] %vm4747_vm4, %v4652_v53 }
 0x341   : > { %v4654_v54 = vpop.permute.xlu0 %4653  ;;  %v4656_v6 = vpop.permute.xlu1 %4655 }
 0x342   : > { %4749 = vst.msk [vmem:[#allocation2 + $0x8] sm:$0xff] %vm4747_vm4, %v4654_v54  ;;  %4750 = vst.msk [vmem:[#allocation2 + $0x10] sm:$0xff] %vm4747_vm4, %v4656_v6 }
 0x345   : > { %v4658_v3 = vpop.permute.xlu1 %4657  ;;  %v4660_v57 = vpop.permute.xlu0 %4659  ;;  %v4780_v4 = vld [vmem:[#allocation2] sm:$0xff] }
 0x346   : > { %4751 = vst.msk [vmem:[#allocation2 + $0x18] sm:$0xff] %vm4747_vm4, %v4658_v3  ;;  %4752 = vst.msk [vmem:[#allocation2 + $0x20] sm:$0xff] %vm4747_vm4, %v4660_v57  ;;  %v4819_v15 = vmul.f32 %v13569_v56, %v4780_v4 }
 0x348   : > { %v4858_v51 = vadd.f32 %v13574_v62, %v4819_v15 }
 0x349   : > { %v4662_v41 = vpop.permute.xlu1 %4661  ;;  %v4664_v55 = vpop.permute.xlu0 %4663  ;;  %v4781_v42 = vld [vmem:[#allocation2 + $0x8] sm:$0xff]  ;;  %v4782_v43 = vld [vmem:[#allocation2 + $0x10] sm:$0xff] }
 0x34a   : > { %4753 = vst.msk [vmem:[#allocation2 + $0x28] sm:$0xff] %vm4747_vm4, %v4662_v41  ;;  %4754 = vst.msk [vmem:[#allocation2 + $0x30] sm:$0xff] %vm4747_vm4, %v4664_v55  ;;  %v4890_v21 = vmax.f32 %v4858_v51, 0.0  ;;  %v4820_v18 = vmul.f32 %v13569_v56, %v4781_v42  ;;  %v4821_v48 = vmul.f32 %v13569_v56, %v4782_v43 }
 0x34c   : > { %11117 = vmatprep.mubr.msk.f32.mxu0 %vm4924_vm5, %v4890_v21  ;;  %v4859_v2 = vadd.f32 %v13574_v62, %v4820_v18  ;;  %v4860_v33 = vadd.f32 %v13574_v62, %v4821_v48 }
 0x34d   : > { %v4666_v20 = vpop.permute.xlu1 %4665  ;;  %v4668_v29 = vpop.permute.xlu0 %4667  ;;  %v4783_v14 = vld [vmem:[#allocation2 + $0x18] sm:$0xff]  ;;  %v4784_v63 = vld [vmem:[#allocation2 + $0x20] sm:$0xff] }
 0x34e   : > { %4755 = vst.msk [vmem:[#allocation2 + $0x38] sm:$0xff] %vm4747_vm4, %v4666_v20  ;;  %4756 = vst.msk [vmem:[#allocation2 + $0x40] sm:$0xff] %vm4747_vm4, %v4668_v29  ;;  %v4891_v16 = vmax.f32 %v4859_v2, 0.0  ;;  %v4892_v10 = vmax.f32 %v4860_v33, 0.0  ;;  %v4822_v39 = vmul.f32 %v13569_v56, %v4783_v14  ;;  %v4823_v25 = vmul.f32 %v13569_v56, %v4784_v63 }
 0x350   : > { %11118 = vmatmul.mubr.msk.f32.vlgmr.msra.gmra.mxu0 %vm4924_vm5, %v4891_v16  ;;  %v4861_v23 = vadd.f32 %v13574_v62, %v4822_v39  ;;  %v4862_v37 = vadd.f32 %v13574_v62, %v4823_v25 }
 0x351   : > { %11120 = vmatprep.mubr.msk.f32.mxu0 %vm4924_vm5, %v4892_v10  ;;  %v4670_v17 = vpop.permute.xlu1 %4669  ;;  %v4672_v7 = vpop.permute.xlu0 %4671  ;;  %v4785_v32 = vld [vmem:[#allocation2 + $0x28] sm:$0xff]  ;;  %v4786_v36 = vld [vmem:[#allocation2 + $0x30] sm:$0xff] }
 0x352   : > { %4757 = vst.msk [vmem:[#allocation2 + $0x48] sm:$0xff] %vm4747_vm4, %v4670_v17  ;;  %4758 = vst.msk [vmem:[#allocation2 + $0x50] sm:$0xff] %vm4747_vm4, %v4672_v7  ;;  %v4893_v27 = vmax.f32 %v4861_v23, 0.0  ;;  %v4894_v58 = vmax.f32 %v4862_v37, 0.0  ;;  %v4824_v61 = vmul.f32 %v13569_v56, %v4785_v32  ;;  %v4825_v49 = vmul.f32 %v13569_v56, %v4786_v36 }
 0x354   : > { %11121 = vmatmul.mubr.msk.f32.gmra.mxu0 %vm4924_vm5, %v4893_v27  ;;  %v4863_v22 = vadd.f32 %v13574_v62, %v4824_v61  ;;  %v4864_v47 = vadd.f32 %v13574_v62, %v4825_v49 }
 0x355   : > { %11123 = vmatprep.mubr.msk.f32.mxu0 %vm4924_vm5, %v4894_v58  ;;  %v4674_v8 = vpop.permute.xlu1 %4673  ;;  %v4676_v52 = vpop.permute.xlu0 %4675  ;;  %v4787_v44 = vld [vmem:[#allocation2 + $0x38] sm:$0xff]  ;;  %v4788_v24 = vld [vmem:[#allocation2 + $0x40] sm:$0xff] }
 0x356   : > { %4759 = vst.msk [vmem:[#allocation2 + $0x58] sm:$0xff] %vm4747_vm4, %v4674_v8  ;;  %4760 = vst.msk [vmem:[#allocation2 + $0x60] sm:$0xff] %vm4747_vm4, %v4676_v52  ;;  %v4895_v38 = vmax.f32 %v4863_v22, 0.0  ;;  %v4896_v40 = vmax.f32 %v4864_v47, 0.0  ;;  %v4826_v0 = vmul.f32 %v13569_v56, %v4787_v44  ;;  %v4827_v19 = vmul.f32 %v13569_v56, %v4788_v24 }
 0x358   : > { %11124 = vmatmul.mubr.msk.f32.gmra.mxu0 %vm4924_vm5, %v4895_v38  ;;  %v4865_v46 = vadd.f32 %v13574_v62, %v4826_v0  ;;  %v4866_v60 = vadd.f32 %v13574_v62, %v4827_v19 }
 0x359   : > { %11126 = vmatprep.mubr.msk.f32.mxu0 %vm4924_vm5, %v4896_v40  ;;  %v4678_v35 = vpop.permute.xlu1 %4677  ;;  %v4680_v30 = vpop.permute.xlu0 %4679  ;;  %v4789_v34 = vld [vmem:[#allocation2 + $0x48] sm:$0xff]  ;;  %v4790_v28 = vld [vmem:[#allocation2 + $0x50] sm:$0xff] }
 0x35a   : > { %4761 = vst.msk [vmem:[#allocation2 + $0x68] sm:$0xff] %vm4747_vm4, %v4678_v35  ;;  %4762 = vst.msk [vmem:[#allocation2 + $0x70] sm:$0xff] %vm4747_vm4, %v4680_v30  ;;  %v4897_v59 = vmax.f32 %v4865_v46, 0.0  ;;  %v4898_v12 = vmax.f32 %v4866_v60, 0.0  ;;  %v4828_v50 = vmul.f32 %v13569_v56, %v4789_v34  ;;  %v4829_v5 = vmul.f32 %v13569_v56, %v4790_v28 }
 0x35c   : > { %11127 = vmatmul.mubr.msk.f32.gmra.mxu0 %vm4924_vm5, %v4897_v59  ;;  %v4867_v31 = vadd.f32 %v13574_v62, %v4828_v50  ;;  %v4868_v1 = vadd.f32 %v13574_v62, %v4829_v5 }
 0x35d   : > { %11129 = vmatprep.mubr.msk.f32.mxu0 %vm4924_vm5, %v4898_v12  ;;  %v4682_v45 = vpop.permute.xlu1 %4681  ;;  %v4684_v9 = vpop.permute.xlu0 %4683  ;;  %v4791_v26 = vld [vmem:[#allocation2 + $0x58] sm:$0xff]  ;;  %v4792_v13 = vld [vmem:[#allocation2 + $0x60] sm:$0xff] }
 0x35e   : > { %4763 = vst.msk [vmem:[#allocation2 + $0x78] sm:$0xff] %vm4747_vm4, %v4682_v45  ;;  %4764 = vst.msk [vmem:[#allocation2 + $0x80] sm:$0xff] %vm4747_vm4, %v4684_v9  ;;  %v4899_v11 = vmax.f32 %v4867_v31, 0.0  ;;  %v4900_v53 = vmax.f32 %v4868_v1, 0.0  ;;  %v4830_v54 = vmul.f32 %v13569_v56, %v4791_v26  ;;  %v4831_v6 = vmul.f32 %v13569_v56, %v4792_v13 }
 0x360   : > { %11130 = vmatmul.mubr.msk.f32.gmra.mxu0 %vm4924_vm5, %v4899_v11  ;;  %v4869_v3 = vadd.f32 %v13574_v62, %v4830_v54  ;;  %v4870_v57 = vadd.f32 %v13574_v62, %v4831_v6 }
 0x361   : > { %11132 = vmatprep.mubr.msk.f32.mxu0 %vm4924_vm5, %v4900_v53  ;;  %v4686_v4 = vpop.permute.xlu1 %4685  ;;  %v4688_v15 = vpop.permute.xlu0 %4687  ;;  %v4793_v51 = vld [vmem:[#allocation2 + $0x68] sm:$0xff]  ;;  %v4794_v41 = vld [vmem:[#allocation2 + $0x70] sm:$0xff] }
 0x362   : > { %4765 = vst.msk [vmem:[#allocation2 + $0x88] sm:$0xff] %vm4747_vm4, %v4686_v4  ;;  %4766 = vst.msk [vmem:[#allocation2 + $0x90] sm:$0xff] %vm4747_vm4, %v4688_v15  ;;  %v4901_v55 = vmax.f32 %v4869_v3, 0.0  ;;  %v4902_v42 = vmax.f32 %v4870_v57, 0.0  ;;  %v4832_v43 = vmul.f32 %v13569_v56, %v4793_v51  ;;  %v4833_v21 = vmul.f32 %v13569_v56, %v4794_v41 }
 0x364   : > { %11133 = vmatmul.mubr.msk.f32.gmra.mxu0 %vm4924_vm5, %v4901_v55  ;;  %v4871_v18 = vadd.f32 %v13574_v62, %v4832_v43  ;;  %v4872_v48 = vadd.f32 %v13574_v62, %v4833_v21 }
 0x365   : > { %11135 = vmatprep.mubr.msk.f32.mxu0 %vm4924_vm5, %v4902_v42  ;;  %v4690_v2 = vpop.permute.xlu1 %4689  ;;  %v4692_v33 = vpop.permute.xlu0 %4691  ;;  %v4795_v20 = vld [vmem:[#allocation2 + $0x78] sm:$0xff]  ;;  %v4796_v29 = vld [vmem:[#allocation2 + $0x80] sm:$0xff] }
 0x366   : > { %4767 = vst.msk [vmem:[#allocation2 + $0x98] sm:$0xff] %vm4747_vm4, %v4690_v2  ;;  %4768 = vst.msk [vmem:[#allocation2 + $0xa0] sm:$0xff] %vm4747_vm4, %v4692_v33  ;;  %v4903_v14 = vmax.f32 %v4871_v18, 0.0  ;;  %v4904_v63 = vmax.f32 %v4872_v48, 0.0  ;;  %v4834_v16 = vmul.f32 %v13569_v56, %v4795_v20  ;;  %v4835_v10 = vmul.f32 %v13569_v56, %v4796_v29 }
 0x368   : > { %11136 = vmatmul.mubr.msk.f32.gmra.mxu0 %vm4924_vm5, %v4903_v14  ;;  %v4873_v39 = vadd.f32 %v13574_v62, %v4834_v16  ;;  %v4874_v25 = vadd.f32 %v13574_v62, %v4835_v10 }
 0x369   : > { %11138 = vmatprep.mubr.msk.f32.mxu0 %vm4924_vm5, %v4904_v63  ;;  %v4694_v23 = vpop.permute.xlu1 %4693  ;;  %v4696_v37 = vpop.permute.xlu0 %4695  ;;  %v4797_v17 = vld [vmem:[#allocation2 + $0x88] sm:$0xff]  ;;  %v4798_v7 = vld [vmem:[#allocation2 + $0x90] sm:$0xff] }
 0x36a   : > { %4769 = vst.msk [vmem:[#allocation2 + $0xa8] sm:$0xff] %vm4747_vm4, %v4694_v23  ;;  %4770 = vst.msk [vmem:[#allocation2 + $0xb0] sm:$0xff] %vm4747_vm4, %v4696_v37  ;;  %v4905_v32 = vmax.f32 %v4873_v39, 0.0  ;;  %v4906_v36 = vmax.f32 %v4874_v25, 0.0  ;;  %v4836_v27 = vmul.f32 %v13569_v56, %v4797_v17  ;;  %v4837_v58 = vmul.f32 %v13569_v56, %v4798_v7 }
 0x36c   : > { %11139 = vmatmul.mubr.msk.f32.gmra.mxu0 %vm4924_vm5, %v4905_v32  ;;  %v4875_v61 = vadd.f32 %v13574_v62, %v4836_v27  ;;  %v4876_v49 = vadd.f32 %v13574_v62, %v4837_v58 }
 0x36d   : > { %11141 = vmatprep.mubr.msk.f32.mxu0 %vm4924_vm5, %v4906_v36  ;;  %v4698_v22 = vpop.permute.xlu1 %4697  ;;  %v4700_v47 = vpop.permute.xlu0 %4699  ;;  %v4799_v8 = vld [vmem:[#allocation2 + $0x98] sm:$0xff]  ;;  %v4800_v52 = vld [vmem:[#allocation2 + $0xa0] sm:$0xff] }
 0x36e   : > { %4771 = vst.msk [vmem:[#allocation2 + $0xb8] sm:$0xff] %vm4747_vm4, %v4698_v22  ;;  %4772 = vst.msk [vmem:[#allocation2 + $0xc0] sm:$0xff] %vm4747_vm4, %v4700_v47  ;;  %v4907_v44 = vmax.f32 %v4875_v61, 0.0  ;;  %v4908_v24 = vmax.f32 %v4876_v49, 0.0  ;;  %v4838_v38 = vmul.f32 %v13569_v56, %v4799_v8  ;;  %v4839_v40 = vmul.f32 %v13569_v56, %v4800_v52  ;;  %v5426_v47 = vld [vmem:[%s15293_s12 + $0x18] sm:$0xff]  ;;  %v5425_v8 = vld [vmem:[%s15293_s12 + $0x10] sm:$0xff] }
 0x36f   : > { %11221 = vmatprep.subr.mxu0 %v5426_v47  ;;  %v5427_v52 = vld [vmem:[#allocation3 + $0x1] sm:$0xff] }
 0x370   : > { %11142 = vmatmul.mubr.msk.f32.gmra.mxu0 %vm4924_vm5, %v4907_v44  ;;  %v4877_v0 = vadd.f32 %v13574_v62, %v4838_v38  ;;  %v4878_v19 = vadd.f32 %v13574_v62, %v4839_v40  ;;  %v5391_v44 = vld [vmem:[#allocation3] sm:$0xff]  ;;  %11173 = vmatprep.mubr.msk.f32.mxu1 %vm506_vm1, %v5427_v52  ;;  %v5392_v38 = vld [vmem:[#allocation3 + $0x8] sm:$0xff]  ;;  %v9591_v40 = vld [vmem:[%s15293_s12 + $0x58] sm:$0xff] }
 0x371   : > { %11144 = vmatprep.mubr.msk.f32.mxu0 %vm4924_vm5, %v4908_v24  ;;  %v4702_v46 = vpop.permute.xlu1 %4701  ;;  %v4704_v60 = vpop.permute.xlu0 %4703  ;;  %v4801_v35 = vld [vmem:[#allocation2 + $0xa8] sm:$0xff]  ;;  %v4802_v30 = vld [vmem:[#allocation2 + $0xb0] sm:$0xff]  ;;  %11222 = vmatpush3.msra.mxu0 %v5426_v47 }
 0x372   : > { %4773 = vst.msk [vmem:[#allocation2 + $0xc8] sm:$0xff] %vm4747_vm4, %v4702_v46  ;;  %4774 = vst.msk [vmem:[#allocation2 + $0xd0] sm:$0xff] %vm4747_vm4, %v4704_v60  ;;  %v4909_v34 = vmax.f32 %v4877_v0, 0.0  ;;  %v4910_v28 = vmax.f32 %v4878_v19, 0.0  ;;  %v4840_v59 = vmul.f32 %v13569_v56, %v4801_v35  ;;  %v4841_v12 = vmul.f32 %v13569_v56, %v4802_v30  ;;  %11223 = vmatprep.subr.mxu0 %v5425_v8  ;;  %v5428_v24 = vld [vmem:[#allocation3 + $0x9] sm:$0xff]  ;;  %v9588_v46 = vld [vmem:[%s15293_s12 + $0x40] sm:$0xff] }
 0x373   : > { %11224 = vmatpush3.msra.mxu0 %v5425_v8  ;;  %11174 = vmatmul.mubr.msk.f32.vlgmr.msra.gmra.mxu1 %vm506_vm1, %v5428_v24  ;;  %v9590_v0 = vld [vmem:[%s15293_s12 + $0x50] sm:$0xff]  ;;  %v9589_v19 = vld [vmem:[%s15293_s12 + $0x48] sm:$0xff]  ;;  %v9627_v60 = vld [vmem:[%s15293_s12 + $0x78] sm:$0xff] }
 0x374   : > { %11145 = vmatmul.mubr.msk.f32.gmra.mxu0 %vm4924_vm5, %v4909_v34  ;;  %v4879_v50 = vadd.f32 %v13574_v62, %v4840_v59  ;;  %v4880_v5 = vadd.f32 %v13574_v62, %v4841_v12  ;;  %11277 = vmatprep.subr.mxu1 %v9591_v40  ;;  %v9626_v35 = vld [vmem:[%s15293_s12 + $0x70] sm:$0xff]  ;;  %v9625_v30 = vld [vmem:[%s15293_s12 + $0x68] sm:$0xff]  ;;  %v9624_v34 = vld [vmem:[%s15293_s12 + $0x60] sm:$0xff] }
 0x375   : > { %11147 = vmatprep.mubr.msk.f32.mxu0 %vm4924_vm5, %v4910_v28  ;;  %v4706_v31 = vpop.permute.xlu1 %4705  ;;  %v4708_v1 = vpop.permute.xlu0 %4707  ;;  %v4803_v45 = vld [vmem:[#allocation2 + $0xb8] sm:$0xff]  ;;  %v4804_v9 = vld [vmem:[#allocation2 + $0xc0] sm:$0xff]  ;;  %11278 = vmatpush3.msra.mxu1 %v9591_v40 }
 0x376   : > { %4775 = vst.msk [vmem:[#allocation2 + $0xd8] sm:$0xff] %vm4747_vm4, %v4706_v31  ;;  %4776 = vst.msk [vmem:[#allocation2 + $0xe0] sm:$0xff] %vm4747_vm4, %v4708_v1  ;;  %v4911_v26 = vmax.f32 %v4879_v50, 0.0  ;;  %v4912_v13 = vmax.f32 %v4880_v5, 0.0  ;;  %v4842_v11 = vmul.f32 %v13569_v56, %v4803_v45  ;;  %v4843_v53 = vmul.f32 %v13569_v56, %v4804_v9  ;;  %11279 = vmatprep.subr.mxu1 %v9590_v0  ;;  %v13744_v28 = vld [vmem:[%s15293_s12 + $0x98] sm:$0xff] }
 0x377   : > { %11280 = vmatpush3.msra.mxu1 %v9590_v0  ;;  %v13750_v59 = vld [vmem:[%s15291_s10] ss:$0 sm:$0xff] }
 0x378   : > { %11148 = vmatmul.mubr.msk.f32.gmra.mxu0 %vm4924_vm5, %v4911_v26  ;;  %v4881_v54 = vadd.f32 %v13574_v62, %v4842_v11  ;;  %v4882_v6 = vadd.f32 %v13574_v62, %v4843_v53  ;;  %11281 = vmatprep.subr.mxu1 %v9589_v19  ;;  %v13755_v50 = vld [vmem:[%s15292_s11] ss:$0 sm:$0xff] }
 0x379   : > { %11150 = vmatprep.mubr.msk.f32.mxu0 %vm4924_vm5, %v4912_v13  ;;  %v4710_v3 = vpop.permute.xlu1 %4709  ;;  %v4712_v57 = vpop.permute.xlu0 %4711  ;;  %v4805_v4 = vld [vmem:[#allocation2 + $0xc8] sm:$0xff]  ;;  %v4806_v15 = vld [vmem:[#allocation2 + $0xd0] sm:$0xff]  ;;  %11282 = vmatpush3.msra.mxu1 %v9589_v19 }
 0x37a   : > { %4777 = vst.msk [vmem:[#allocation2 + $0xe8] sm:$0xff] %vm4747_vm4, %v4710_v3  ;;  %4778 = vst.msk [vmem:[#allocation2 + $0xf0] sm:$0xff] %vm4747_vm4, %v4712_v57  ;;  %v4913_v51 = vmax.f32 %v4881_v54, 0.0  ;;  %v4914_v41 = vmax.f32 %v4882_v6, 0.0  ;;  %v4844_v55 = vmul.f32 %v13569_v56, %v4805_v4  ;;  %v4845_v42 = vmul.f32 %v13569_v56, %v4806_v15  ;;  %11283 = vmatprep.subr.mxu1 %v9588_v46  ;;  %v13765_v54 = vld [vmem:[%s15293_s12 + $0xb8] sm:$0xff] }
 0x37b   : > { %11284 = vmatpush3.msra.mxu1 %v9588_v46 }
 0x37c   : > { %11151 = vmatmul.mubr.msk.f32.gmra.mxu0 %vm4924_vm5, %v4913_v51  ;;  %v4883_v43 = vadd.f32 %v13574_v62, %v4844_v55  ;;  %v4884_v21 = vadd.f32 %v13574_v62, %v4845_v42  ;;  %11389 = vmatprep.subr.mxu1 %v13744_v28 }
 0x37d   : > { %11153 = vmatprep.mubr.msk.f32.mxu0 %vm4924_vm5, %v4914_v41  ;;  %v4714_v18 = vpop.permute.xlu1 %4713  ;;  %v4807_v48 = vld [vmem:[#allocation2 + $0xd8] sm:$0xff]  ;;  %v4808_v2 = vld [vmem:[#allocation2 + $0xe0] sm:$0xff] }
 0x37e   : > { %4779 = vst.msk [vmem:[#allocation2 + $0xf8] sm:$0xff] %vm4747_vm4, %v4714_v18  ;;  %v4915_v33 = vmax.f32 %v4883_v43, 0.0  ;;  %v4916_v20 = vmax.f32 %v4884_v21, 0.0  ;;  %v4846_v29 = vmul.f32 %v13569_v56, %v4807_v48  ;;  %v4847_v14 = vmul.f32 %v13569_v56, %v4808_v2 }
 0x380   : > { %11154 = vmatmul.mubr.msk.f32.gmra.mxu0 %vm4924_vm5, %v4915_v33  ;;  %v4885_v63 = vadd.f32 %v13574_v62, %v4846_v29  ;;  %v4886_v16 = vadd.f32 %v13574_v62, %v4847_v14 }
 0x381   : > { %11156 = vmatprep.mubr.msk.f32.mxu0 %vm4924_vm5, %v4916_v20  ;;  %v4809_v10 = vld [vmem:[#allocation2 + $0xe8] sm:$0xff]  ;;  %v4810_v39 = vld [vmem:[#allocation2 + $0xf0] sm:$0xff] }
 0x382   : > { %v4917_v25 = vmax.f32 %v4885_v63, 0.0  ;;  %v4918_v23 = vmax.f32 %v4886_v16, 0.0  ;;  %v4848_v37 = vmul.f32 %v13569_v56, %v4809_v10  ;;  %v4849_v17 = vmul.f32 %v13569_v56, %v4810_v39 }
 0x384   : > { %11157 = vmatmul.mubr.msk.f32.gmra.mxu0 %vm4924_vm5, %v4917_v25  ;;  %v4887_v7 = vadd.f32 %v13574_v62, %v4848_v37  ;;  %v4888_v32 = vadd.f32 %v13574_v62, %v4849_v17 }
 0x385   : > { %11159 = vmatprep.mubr.msk.f32.mxu0 %vm4924_vm5, %v4918_v23  ;;  %v4811_v36 = vld [vmem:[#allocation2 + $0xf8] sm:$0xff] }
 0x386   : > { %v4919_v27 = vmax.f32 %v4887_v7, 0.0  ;;  %v4920_v58 = vmax.f32 %v4888_v32, 0.0  ;;  %v4850_v61 = vmul.f32 %v13569_v56, %v4811_v36  ;;  %v5424_v56 = vld [vmem:[%s15293_s12 + $0x8] sm:$0xff] }
 0x387   : > { %11225 = vmatprep.subr.mxu0 %v5424_v56 }
 0x388   : > { %11160 = vmatmul.mubr.msk.f32.gmra.mxu0 %vm4924_vm5, %v4919_v27  ;;  %v4889_v49 = vadd.f32 %v13574_v62, %v4850_v61  ;;  %v5423_v62 = vld [vmem:[%s15293_s12] sm:$0xff] }
 0x389   : > { %11162 = vmatprep.mubr.msk.f32.mxu0 %vm4924_vm5, %v4920_v58  ;;  %11226 = vmatpush3.msra.mxu0 %v5424_v56 }
 0x38a   : > { %v4921_v22 = vmax.f32 %v4889_v49, 0.0  ;;  %11227 = vmatprep.subr.mxu0 %v5423_v62 }
 0x38b   : > { %11228 = vmatpush3.msra.mxu0 %v5423_v62 }
 0x38c   : > { %11163 = vmatmul.mubr.msk.f32.gmra.mxu0 %vm4924_vm5, %v4921_v22  ;;  %11333 = vmatprep.subr.mxu0 %v9627_v60 }
 0x38d   : > { %11229 = vmatprep.mubr.msk.f32.mxu0 %vm506_vm1, %v5391_v44 }
 0x390   : > { %11230 = vmatmul.mubr.msk.f32.vlgmr.msra.gmra.mxu0 %vm506_vm1, %v5392_v38 }
 0x391   : > { %11334 = vmatpush3.msra.mxu0 %v9627_v60 }
 0x392   : > { %11335 = vmatprep.subr.mxu0 %v9626_v35 }
 0x393   : > { %11336 = vmatpush3.msra.mxu0 %v9626_v35 }
 0x394   : > { %11337 = vmatprep.subr.mxu0 %v9625_v30 }
 0x395   : > { %11338 = vmatpush3.msra.mxu0 %v9625_v30 }
 0x396   : > { %11339 = vmatprep.subr.mxu0 %v9624_v34 }
 0x397   : > { %11340 = vmatpush3.msra.mxu0 %v9624_v34 }
 0x398   : > { %11445 = vmatprep.subr.mxu0 %v13765_v54 }
 0x410   : > { %v11119_v12 = vpop.f32.mrf.mxu0 }
 0x411   : > { %v5257_v5 = vmul.f32 %v11119_v12, %v13750_v59 }
 0x412   : > { %v5090_v31 = vpop.f32.mrf.mxu0 }
 0x413   : > { %v5296_v1 = vadd.f32 %v13755_v50, %v5257_v5  ;;  %v5256_v45 = vmul.f32 %v13750_v59, %v5090_v31 }
 0x414   : > { %v11122_v9 = vpop.f32.mrf.mxu0 }
 0x415   : > { %v5328_v26 = vmax.f32 %v5296_v1, 0.0  ;;  %v5295_v13 = vadd.f32 %v13755_v50, %v5256_v45  ;;  %v5259_v11 = vmul.f32 %v11122_v9, %v13750_v59 }
 0x416   : > { %v5100_v53 = vpop.f32.mrf.mxu0 }
 0x417   : > { %5360 = vst.msk [vmem:[#allocation3 + $0x21] sm:$0xff] %vm506_vm1, %v5328_v26  ;;  %v5327_v6 = vmax.f32 %v5295_v13, 0.0  ;;  %v5298_v3 = vadd.f32 %v13755_v50, %v5259_v11  ;;  %v5258_v57 = vmul.f32 %v13750_v59, %v5100_v53 }
 0x418   : > { %v11125_v4 = vpop.f32.mrf.mxu0 }
 0x419   : > { %5359 = vst.msk [vmem:[#allocation3 + $0x19] sm:$0xff] %vm506_vm1, %v5327_v6  ;;  %v5330_v15 = vmax.f32 %v5298_v3, 0.0  ;;  %v5297_v51 = vadd.f32 %v13755_v50, %v5258_v57  ;;  %v5261_v41 = vmul.f32 %v11125_v4, %v13750_v59 }
 0x41a   : > { %v5110_v55 = vpop.f32.mrf.mxu0 }
 0x41b   : > { %5362 = vst.msk [vmem:[#allocation3 + $0x39] sm:$0xff] %vm506_vm1, %v5330_v15  ;;  %v5329_v42 = vmax.f32 %v5297_v51, 0.0  ;;  %v5300_v43 = vadd.f32 %v13755_v50, %v5261_v41  ;;  %v5260_v21 = vmul.f32 %v13750_v59, %v5110_v55 }
 0x41c   : > { %v11128_v18 = vpop.f32.mrf.mxu0 }
 0x41d   : > { %5361 = vst.msk [vmem:[#allocation3 + $0x31] sm:$0xff] %vm506_vm1, %v5329_v42  ;;  %v5332_v48 = vmax.f32 %v5300_v43, 0.0  ;;  %v5299_v2 = vadd.f32 %v13755_v50, %v5260_v21  ;;  %v5263_v33 = vmul.f32 %v11128_v18, %v13750_v59 }
 0x41e   : > { %v5120_v20 = vpop.f32.mrf.mxu0  ;;  %v13796_v7 = vld [vmem:[#allocation3 + $0x21] sm:$0xff] }
 0x41f   : > { %5364 = vst.msk [vmem:[#allocation3 + $0x51] sm:$0xff] %vm506_vm1, %v5332_v48  ;;  %v5331_v29 = vmax.f32 %v5299_v2, 0.0  ;;  %v5302_v14 = vadd.f32 %v13755_v50, %v5263_v33  ;;  %v5262_v63 = vmul.f32 %v13750_v59, %v5120_v20 }
 0x420   : > { %v11131_v16 = vpop.f32.mrf.mxu0  ;;  %v13783_v10 = vld [vmem:[#allocation3 + $0x19] sm:$0xff] }
 0x421   : > { %v13785_v39 = vld [vmem:[#allocation3 + $0x18] sm:$0xff]  ;;  %v13787_v25 = vld [vmem:[#allocation3 + $0x20] sm:$0xff]  ;;  %5363 = vst.msk [vmem:[#allocation3 + $0x49] sm:$0xff] %vm506_vm1, %v5331_v29  ;;  %v5334_v23 = vmax.f32 %v5302_v14, 0.0  ;;  %v5301_v37 = vadd.f32 %v13755_v50, %v5262_v63  ;;  %v5265_v17 = vmul.f32 %v11131_v16, %v13750_v59  ;;  %11176 = vmatprep.mubr.msk.f32.mxu1 %vm506_vm1, %v13783_v10 }
 0x422   : > { %11232 = vmatprep.mubr.msk.f32.mxu0 %vm506_vm1, %v13785_v39  ;;  %v5130_v32 = vpop.f32.mrf.mxu0  ;;  %11177 = vmatmul.mubr.msk.f32.gmra.mxu1 %vm506_vm1, %v13796_v7  ;;  %v13818_v52 = vld [vmem:[#allocation3 + $0x39] sm:$0xff] }
 0x423   : > { %11233 = vmatmul.mubr.msk.f32.gmra.mxu0 %vm506_vm1, %v13787_v25  ;;  %5366 = vst.msk [vmem:[#allocation3 + $0x69] sm:$0xff] %vm506_vm1, %v5334_v23  ;;  %v5333_v36 = vmax.f32 %v5301_v37, 0.0  ;;  %v5304_v27 = vadd.f32 %v13755_v50, %v5265_v17  ;;  %v5264_v58 = vmul.f32 %v13750_v59, %v5130_v32 }
 0x424   : > { %v11134_v61 = vpop.f32.mrf.mxu0  ;;  %v13805_v49 = vld [vmem:[#allocation3 + $0x31] sm:$0xff] }
 0x425   : > { %v13807_v22 = vld [vmem:[#allocation3 + $0x30] sm:$0xff]  ;;  %v13809_v47 = vld [vmem:[#allocation3 + $0x38] sm:$0xff]  ;;  %5365 = vst.msk [vmem:[#allocation3 + $0x61] sm:$0xff] %vm506_vm1, %v5333_v36  ;;  %v5336_v8 = vmax.f32 %v5304_v27, 0.0  ;;  %v5303_v56 = vadd.f32 %v13755_v50, %v5264_v58  ;;  %v5267_v62 = vmul.f32 %v11134_v61, %v13750_v59  ;;  %11179 = vmatprep.mubr.msk.f32.mxu1 %vm506_vm1, %v13805_v49 }
 0x426   : > { %11235 = vmatprep.mubr.msk.f32.mxu0 %vm506_vm1, %v13807_v22  ;;  %v5140_v44 = vpop.f32.mrf.mxu0  ;;  %11180 = vmatmul.mubr.msk.f32.gmra.mxu1 %vm506_vm1, %v13818_v52  ;;  %v13840_v12 = vld [vmem:[#allocation3 + $0x51] sm:$0xff] }
 0x427   : > { %11236 = vmatmul.mubr.msk.f32.gmra.mxu0 %vm506_vm1, %v13809_v47  ;;  %5368 = vst.msk [vmem:[#allocation3 + $0x81] sm:$0xff] %vm506_vm1, %v5336_v8  ;;  %v5335_v24 = vmax.f32 %v5303_v56, 0.0  ;;  %v5306_v38 = vadd.f32 %v13755_v50, %v5267_v62  ;;  %v5266_v40 = vmul.f32 %v13750_v59, %v5140_v44 }
 0x428   : > { %v11137_v0 = vpop.f32.mrf.mxu0  ;;  %v13827_v19 = vld [vmem:[#allocation3 + $0x49] sm:$0xff] }
 0x429   : > { %v13829_v46 = vld [vmem:[#allocation3 + $0x48] sm:$0xff]  ;;  %v13831_v60 = vld [vmem:[#allocation3 + $0x50] sm:$0xff]  ;;  %5367 = vst.msk [vmem:[#allocation3 + $0x79] sm:$0xff] %vm506_vm1, %v5335_v24  ;;  %v5338_v35 = vmax.f32 %v5306_v38, 0.0  ;;  %v5305_v30 = vadd.f32 %v13755_v50, %v5266_v40  ;;  %v5269_v34 = vmul.f32 %v11137_v0, %v13750_v59  ;;  %11182 = vmatprep.mubr.msk.f32.mxu1 %vm506_vm1, %v13827_v19 }
 0x42a   : > { %11238 = vmatprep.mubr.msk.f32.mxu0 %vm506_vm1, %v13829_v46  ;;  %v5150_v5 = vpop.f32.mrf.mxu0  ;;  %11183 = vmatmul.mubr.msk.f32.gmra.mxu1 %vm506_vm1, %v13840_v12  ;;  %v13862_v57 = vld [vmem:[#allocation3 + $0x69] sm:$0xff] }
 0x42b   : > { %11239 = vmatmul.mubr.msk.f32.gmra.mxu0 %vm506_vm1, %v13831_v60  ;;  %5370 = vst.msk [vmem:[#allocation3 + $0x99] sm:$0xff] %vm506_vm1, %v5338_v35  ;;  %v5337_v31 = vmax.f32 %v5305_v30, 0.0  ;;  %v5308_v1 = vadd.f32 %v13755_v50, %v5269_v34  ;;  %v5268_v45 = vmul.f32 %v13750_v59, %v5150_v5 }
 0x42c   : > { %v11140_v9 = vpop.f32.mrf.mxu0  ;;  %v13849_v26 = vld [vmem:[#allocation3 + $0x61] sm:$0xff] }
 0x42d   : > { %v13851_v13 = vld [vmem:[#allocation3 + $0x60] sm:$0xff]  ;;  %v13853_v11 = vld [vmem:[#allocation3 + $0x68] sm:$0xff]  ;;  %5369 = vst.msk [vmem:[#allocation3 + $0x91] sm:$0xff] %vm506_vm1, %v5337_v31  ;;  %v5340_v53 = vmax.f32 %v5308_v1, 0.0  ;;  %v5307_v6 = vadd.f32 %v13755_v50, %v5268_v45  ;;  %v5271_v3 = vmul.f32 %v11140_v9, %v13750_v59  ;;  %11185 = vmatprep.mubr.msk.f32.mxu1 %vm506_vm1, %v13849_v26 }
 0x42e   : > { %11241 = vmatprep.mubr.msk.f32.mxu0 %vm506_vm1, %v13851_v13  ;;  %v5160_v4 = vpop.f32.mrf.mxu0  ;;  %11186 = vmatmul.mubr.msk.f32.gmra.mxu1 %vm506_vm1, %v13862_v57  ;;  %v13884_v33 = vld [vmem:[#allocation3 + $0x81] sm:$0xff] }
 0x42f   : > { %11242 = vmatmul.mubr.msk.f32.gmra.mxu0 %vm506_vm1, %v13853_v11  ;;  %5372 = vst.msk [vmem:[#allocation3 + $0xb1] sm:$0xff] %vm506_vm1, %v5340_v53  ;;  %v5339_v15 = vmax.f32 %v5307_v6, 0.0  ;;  %v5310_v51 = vadd.f32 %v13755_v50, %v5271_v3  ;;  %v5270_v41 = vmul.f32 %v13750_v59, %v5160_v4 }
 0x430   : > { %v11143_v55 = vpop.f32.mrf.mxu0  ;;  %v13871_v42 = vld [vmem:[#allocation3 + $0x79] sm:$0xff] }
 0x431   : > { %v13873_v43 = vld [vmem:[#allocation3 + $0x78] sm:$0xff]  ;;  %v13875_v21 = vld [vmem:[#allocation3 + $0x80] sm:$0xff]  ;;  %5371 = vst.msk [vmem:[#allocation3 + $0xa9] sm:$0xff] %vm506_vm1, %v5339_v15  ;;  %v5342_v18 = vmax.f32 %v5310_v51, 0.0  ;;  %v5309_v48 = vadd.f32 %v13755_v50, %v5270_v41  ;;  %v5273_v2 = vmul.f32 %v11143_v55, %v13750_v59  ;;  %11188 = vmatprep.mubr.msk.f32.mxu1 %vm506_vm1, %v13871_v42 }
 0x432   : > { %11244 = vmatprep.mubr.msk.f32.mxu0 %vm506_vm1, %v13873_v43  ;;  %v5170_v20 = vpop.f32.mrf.mxu0  ;;  %11189 = vmatmul.mubr.msk.f32.gmra.mxu1 %vm506_vm1, %v13884_v33  ;;  %v13906_v58 = vld [vmem:[#allocation3 + $0x99] sm:$0xff] }
 0x433   : > { %11245 = vmatmul.mubr.msk.f32.gmra.mxu0 %vm506_vm1, %v13875_v21  ;;  %5374 = vst.msk [vmem:[#allocation3 + $0xc9] sm:$0xff] %vm506_vm1, %v5342_v18  ;;  %v5341_v29 = vmax.f32 %v5309_v48, 0.0  ;;  %v5312_v14 = vadd.f32 %v13755_v50, %v5273_v2  ;;  %v5272_v63 = vmul.f32 %v13750_v59, %v5170_v20 }
 0x434   : > { %v11146_v16 = vpop.f32.mrf.mxu0  ;;  %v13893_v23 = vld [vmem:[#allocation3 + $0x91] sm:$0xff] }
 0x435   : > { %v13895_v37 = vld [vmem:[#allocation3 + $0x90] sm:$0xff]  ;;  %v13897_v17 = vld [vmem:[#allocation3 + $0x98] sm:$0xff]  ;;  %5373 = vst.msk [vmem:[#allocation3 + $0xc1] sm:$0xff] %vm506_vm1, %v5341_v29  ;;  %v5344_v32 = vmax.f32 %v5312_v14, 0.0  ;;  %v5311_v36 = vadd.f32 %v13755_v50, %v5272_v63  ;;  %v5275_v27 = vmul.f32 %v11146_v16, %v13750_v59  ;;  %11191 = vmatprep.mubr.msk.f32.mxu1 %vm506_vm1, %v13893_v23 }
 0x436   : > { %11247 = vmatprep.mubr.msk.f32.mxu0 %vm506_vm1, %v13895_v37  ;;  %v5180_v61 = vpop.f32.mrf.mxu0  ;;  %11192 = vmatmul.mubr.msk.f32.gmra.mxu1 %vm506_vm1, %v13906_v58  ;;  %v13928_v34 = vld [vmem:[#allocation3 + $0xb1] sm:$0xff] }
 0x437   : > { %11248 = vmatmul.mubr.msk.f32.gmra.mxu0 %vm506_vm1, %v13897_v17  ;;  %5376 = vst.msk [vmem:[#allocation3 + $0xe1] sm:$0xff] %vm506_vm1, %v5344_v32  ;;  %v5343_v8 = vmax.f32 %v5311_v36, 0.0  ;;  %v5314_v56 = vadd.f32 %v13755_v50, %v5275_v27  ;;  %v5274_v62 = vmul.f32 %v13750_v59, %v5180_v61 }
 0x438   : > { %v11149_v44 = vpop.f32.mrf.mxu0  ;;  %v13915_v24 = vld [vmem:[#allocation3 + $0xa9] sm:$0xff] }
 0x439   : > { %v13917_v38 = vld [vmem:[#allocation3 + $0xa8] sm:$0xff]  ;;  %v13919_v40 = vld [vmem:[#allocation3 + $0xb0] sm:$0xff]  ;;  %5375 = vst.msk [vmem:[#allocation3 + $0xd9] sm:$0xff] %vm506_vm1, %v5343_v8  ;;  %v5346_v0 = vmax.f32 %v5314_v56, 0.0  ;;  %v5313_v35 = vadd.f32 %v13755_v50, %v5274_v62  ;;  %v5277_v30 = vmul.f32 %v11149_v44, %v13750_v59  ;;  %11194 = vmatprep.mubr.msk.f32.mxu1 %vm506_vm1, %v13915_v24 }
 0x43a   : > { %11250 = vmatprep.mubr.msk.f32.mxu0 %vm506_vm1, %v13917_v38  ;;  %v5190_v5 = vpop.f32.mrf.mxu0  ;;  %11195 = vmatmul.mubr.msk.f32.gmra.mxu1 %vm506_vm1, %v13928_v34  ;;  %v13950_v41 = vld [vmem:[#allocation3 + $0xc9] sm:$0xff] }
 0x43b   : > { %11251 = vmatmul.mubr.msk.f32.gmra.mxu0 %vm506_vm1, %v13919_v40  ;;  %5378 = vst.msk [vmem:[#allocation3 + $0xf9] sm:$0xff] %vm506_vm1, %v5346_v0  ;;  %v5345_v31 = vmax.f32 %v5313_v35, 0.0  ;;  %v5316_v1 = vadd.f32 %v13755_v50, %v5277_v30  ;;  %v5276_v45 = vmul.f32 %v13750_v59, %v5190_v5 }
 0x43c   : > { %v11152_v9 = vpop.f32.mrf.mxu0  ;;  %v13937_v53 = vld [vmem:[#allocation3 + $0xc1] sm:$0xff] }
 0x43d   : > { %v13939_v6 = vld [vmem:[#allocation3 + $0xc0] sm:$0xff]  ;;  %v13941_v3 = vld [vmem:[#allocation3 + $0xc8] sm:$0xff]  ;;  %5377 = vst.msk [vmem:[#allocation3 + $0xf1] sm:$0xff] %vm506_vm1, %v5345_v31  ;;  %v5348_v4 = vmax.f32 %v5316_v1, 0.0  ;;  %v5315_v15 = vadd.f32 %v13755_v50, %v5276_v45  ;;  %v5279_v51 = vmul.f32 %v11152_v9, %v13750_v59  ;;  %11197 = vmatprep.mubr.msk.f32.mxu1 %vm506_vm1, %v13937_v53 }
 0x43e   : > { %11253 = vmatprep.mubr.msk.f32.mxu0 %vm506_vm1, %v13939_v6  ;;  %v5200_v55 = vpop.f32.mrf.mxu0  ;;  %11198 = vmatmul.mubr.msk.f32.gmra.mxu1 %vm506_vm1, %v13950_v41  ;;  %v13972_v27 = vld [vmem:[#allocation3 + $0xe1] sm:$0xff] }
 0x43f   : > { %11254 = vmatmul.mubr.msk.f32.gmra.mxu0 %vm506_vm1, %v13941_v3  ;;  %5380 = vst.msk [vmem:[#allocation3 + $0x111] sm:$0xff] %vm506_vm1, %v5348_v4  ;;  %v5347_v18 = vmax.f32 %v5315_v15, 0.0  ;;  %v5318_v48 = vadd.f32 %v13755_v50, %v5279_v51  ;;  %v5278_v2 = vmul.f32 %v13750_v59, %v5200_v55 }
 0x440   : > { %v11155_v20 = vpop.f32.mrf.mxu0  ;;  %v13959_v29 = vld [vmem:[#allocation3 + $0xd9] sm:$0xff] }
 0x441   : > { %v13961_v14 = vld [vmem:[#allocation3 + $0xd8] sm:$0xff]  ;;  %v13963_v63 = vld [vmem:[#allocation3 + $0xe0] sm:$0xff]  ;;  %5379 = vst.msk [vmem:[#allocation3 + $0x109] sm:$0xff] %vm506_vm1, %v5347_v18  ;;  %v5350_v16 = vmax.f32 %v5318_v48, 0.0  ;;  %v5317_v32 = vadd.f32 %v13755_v50, %v5278_v2  ;;  %v5281_v36 = vmul.f32 %v11155_v20, %v13750_v59  ;;  %11200 = vmatprep.mubr.msk.f32.mxu1 %vm506_vm1, %v13959_v29 }
 0x442   : > { %11256 = vmatprep.mubr.msk.f32.mxu0 %vm506_vm1, %v13961_v14  ;;  %v5210_v61 = vpop.f32.mrf.mxu0  ;;  %11201 = vmatmul.mubr.msk.f32.gmra.mxu1 %vm506_vm1, %v13972_v27  ;;  %v13994_v45 = vld [vmem:[#allocation3 + $0xf9] sm:$0xff] }
 0x443   : > { %11257 = vmatmul.mubr.msk.f32.gmra.mxu0 %vm506_vm1, %v13963_v63  ;;  %5382 = vst.msk [vmem:[#allocation3 + $0x129] sm:$0xff] %vm506_vm1, %v5350_v16  ;;  %v5349_v8 = vmax.f32 %v5317_v32, 0.0  ;;  %v5320_v56 = vadd.f32 %v13755_v50, %v5281_v36  ;;  %v5280_v62 = vmul.f32 %v13750_v59, %v5210_v61 }
 0x444   : > { %v11158_v44 = vpop.f32.mrf.mxu0  ;;  %v13981_v0 = vld [vmem:[#allocation3 + $0xf1] sm:$0xff] }
 0x445   : > { %v13983_v35 = vld [vmem:[#allocation3 + $0xf0] sm:$0xff]  ;;  %v13985_v30 = vld [vmem:[#allocation3 + $0xf8] sm:$0xff]  ;;  %5381 = vst.msk [vmem:[#allocation3 + $0x121] sm:$0xff] %vm506_vm1, %v5349_v8  ;;  %v5352_v5 = vmax.f32 %v5320_v56, 0.0  ;;  %v5319_v31 = vadd.f32 %v13755_v50, %v5280_v62  ;;  %v5283_v1 = vmul.f32 %v11158_v44, %v13750_v59  ;;  %11203 = vmatprep.mubr.msk.f32.mxu1 %vm506_vm1, %v13981_v0 }
 0x446   : > { %15482 = vst [vmem:[#allocation9_spill] sm:$0xff] %v13983_v35  ;;  %15483 = vst [vmem:[#allocation37_spill] sm:$0xff] %v13985_v30  ;;  %11259 = vmatprep.mubr.msk.f32.mxu0 %vm506_vm1, %v13983_v35  ;;  %v5220_v9 = vpop.f32.mrf.mxu0  ;;  %11204 = vmatmul.mubr.msk.f32.gmra.mxu1 %vm506_vm1, %v13994_v45  ;;  %v14016_v36 = vld [vmem:[#allocation3 + $0x111] sm:$0xff] }
 0x447   : > { %11260 = vmatmul.mubr.msk.f32.gmra.mxu0 %vm506_vm1, %v13985_v30  ;;  %5384 = vst.msk [vmem:[#allocation3 + $0x141] sm:$0xff] %vm506_vm1, %v5352_v5  ;;  %v5351_v4 = vmax.f32 %v5319_v31, 0.0  ;;  %v5322_v15 = vadd.f32 %v13755_v50, %v5283_v1  ;;  %v5282_v51 = vmul.f32 %v13750_v59, %v5220_v9 }
 0x448   : > { %v11161_v55 = vpop.f32.mrf.mxu0  ;;  %v14003_v18 = vld [vmem:[#allocation3 + $0x109] sm:$0xff] }
 0x449   : > { %v14005_v48 = vld [vmem:[#allocation3 + $0x108] sm:$0xff]  ;;  %v14007_v2 = vld [vmem:[#allocation3 + $0x110] sm:$0xff]  ;;  %5383 = vst.msk [vmem:[#allocation3 + $0x139] sm:$0xff] %vm506_vm1, %v5351_v4  ;;  %v5354_v20 = vmax.f32 %v5322_v15, 0.0  ;;  %v5321_v16 = vadd.f32 %v13755_v50, %v5282_v51  ;;  %v5285_v32 = vmul.f32 %v11161_v55, %v13750_v59  ;;  %11206 = vmatprep.mubr.msk.f32.mxu1 %vm506_vm1, %v14003_v18 }
 0x44a   : > { %15484 = vst [vmem:[#allocation38_spill] sm:$0xff] %v14005_v48  ;;  %15485 = vst [vmem:[#allocation20_spill] sm:$0xff] %v14007_v2  ;;  %11262 = vmatprep.mubr.msk.f32.mxu0 %vm506_vm1, %v14005_v48  ;;  %v5230_v61 = vpop.f32.mrf.mxu0  ;;  %11207 = vmatmul.mubr.msk.f32.gmra.mxu1 %vm506_vm1, %v14016_v36  ;;  %v14038_v51 = vld [vmem:[#allocation3 + $0x129] sm:$0xff] }
 0x44b   : > { %11263 = vmatmul.mubr.msk.f32.gmra.mxu0 %vm506_vm1, %v14007_v2  ;;  %5386 = vst.msk [vmem:[#allocation3 + $0x159] sm:$0xff] %vm506_vm1, %v5354_v20  ;;  %v5353_v8 = vmax.f32 %v5321_v16, 0.0  ;;  %v5324_v56 = vadd.f32 %v13755_v50, %v5285_v32  ;;  %v5284_v62 = vmul.f32 %v13750_v59, %v5230_v61 }
 0x44c   : > { %v11164_v44 = vpop.f32.mrf.mxu0  ;;  %v14025_v5 = vld [vmem:[#allocation3 + $0x121] sm:$0xff] }
 0x44d   : > { %v14027_v31 = vld [vmem:[#allocation3 + $0x120] sm:$0xff]  ;;  %v14029_v1 = vld [vmem:[#allocation3 + $0x128] sm:$0xff]  ;;  %5385 = vst.msk [vmem:[#allocation3 + $0x151] sm:$0xff] %vm506_vm1, %v5353_v8  ;;  %v5356_v9 = vmax.f32 %v5324_v56, 0.0  ;;  %v5323_v4 = vadd.f32 %v13755_v50, %v5284_v62  ;;  %v5287_v15 = vmul.f32 %v11164_v44, %v13750_v59  ;;  %11209 = vmatprep.mubr.msk.f32.mxu1 %vm506_vm1, %v14025_v5 }
 0x44e   : > { %15486 = vst [vmem:[#allocation14_spill] sm:$0xff] %v14027_v31  ;;  %15487 = vst [vmem:[#allocation21_spill] sm:$0xff] %v14029_v1  ;;  %11265 = vmatprep.mubr.msk.f32.mxu0 %vm506_vm1, %v14027_v31  ;;  %v5240_v55 = vpop.f32.mrf.mxu0  ;;  %11210 = vmatmul.mubr.msk.f32.gmra.mxu1 %vm506_vm1, %v14038_v51 }
 0x44f   : > { %11266 = vmatmul.mubr.msk.f32.gmra.mxu0 %vm506_vm1, %v14029_v1  ;;  %5388 = vst.msk [vmem:[#allocation3 + $0x171] sm:$0xff] %vm506_vm1, %v5356_v9  ;;  %v5355_v20 = vmax.f32 %v5323_v4, 0.0  ;;  %v5326_v16 = vadd.f32 %v13755_v50, %v5287_v15  ;;  %v5286_v32 = vmul.f32 %v13750_v59, %v5240_v55  ;;  %v14059_v9 = vld [vmem:[#allocation3 + $0x141] sm:$0xff] }
 0x450   : > { %v14047_v61 = vld [vmem:[#allocation3 + $0x139] sm:$0xff] }
 0x451   : > { %v14049_v8 = vld [vmem:[#allocation3 + $0x138] sm:$0xff]  ;;  %v14051_v56 = vld [vmem:[#allocation3 + $0x140] sm:$0xff]  ;;  %5387 = vst.msk [vmem:[#allocation3 + $0x169] sm:$0xff] %vm506_vm1, %v5355_v20  ;;  %v5358_v62 = vmax.f32 %v5326_v16, 0.0  ;;  %v5325_v44 = vadd.f32 %v13755_v50, %v5286_v32  ;;  %11212 = vmatprep.mubr.msk.f32.mxu1 %vm506_vm1, %v14047_v61 }
 0x452   : > { %15488 = vst [vmem:[#allocation58_spill] sm:$0xff] %v14049_v8  ;;  %15489 = vst [vmem:[#allocation61_spill] sm:$0xff] %v14051_v56  ;;  %11268 = vmatprep.mubr.msk.f32.mxu0 %vm506_vm1, %v14049_v8  ;;  %11213 = vmatmul.mubr.msk.f32.gmra.mxu1 %vm506_vm1, %v14059_v9  ;;  %v14077_v55 = vld [vmem:[#allocation3 + $0x159] sm:$0xff]  ;;  %v6106_v20 = vld [vmem:[#allocation3 + $0x2] sm:$0xff] }
 0x453   : > { %11269 = vmatmul.mubr.msk.f32.gmra.mxu0 %vm506_vm1, %v14051_v56  ;;  %5390 = vst.msk [vmem:[#allocation3 + $0x189] sm:$0xff] %vm506_vm1, %v5358_v62  ;;  %v5357_v59 = vmax.f32 %v5325_v44, 0.0  ;;  %15492 = vst [vmem:[#allocation39_spill] sm:$0xff] %v14077_v55 }
 0x454   : > { %v14066_v4 = vld [vmem:[#allocation3 + $0x151] sm:$0xff] }
 0x455   : > { %v14068_v50 = vld [vmem:[#allocation3 + $0x150] sm:$0xff]  ;;  %v14070_v15 = vld [vmem:[#allocation3 + $0x158] sm:$0xff]  ;;  %5389 = vst.msk [vmem:[#allocation3 + $0x181] sm:$0xff] %vm506_vm1, %v5357_v59  ;;  %11215 = vmatprep.mubr.msk.f32.mxu1 %vm506_vm1, %v14066_v4 }
 0x456   : > { %15490 = vst [vmem:[#allocation10_spill] sm:$0xff] %v14068_v50  ;;  %15491 = vst [vmem:[#allocation11_spill] sm:$0xff] %v14070_v15  ;;  %11271 = vmatprep.mubr.msk.f32.mxu0 %vm506_vm1, %v14068_v50  ;;  %11216 = vmatmul.mubr.msk.f32.gmra.mxu1 %vm506_vm1, %v14077_v55  ;;  %v14093_v44 = vld [vmem:[#allocation3 + $0x171] sm:$0xff]  ;;  %v14108_v55 = vld [vmem:[#allocation3 + $0x1a] sm:$0xff] }
 0x457   : > { %11272 = vmatmul.mubr.msk.f32.gmra.mxu0 %vm506_vm1, %v14070_v15  ;;  %15495 = vst [vmem:[#allocation23_spill] sm:$0xff] %v14093_v44  ;;  %v6107_v59 = vld [vmem:[#allocation3 + $0xa] sm:$0xff] }
 0x458   : > { %v14083_v16 = vld [vmem:[#allocation3 + $0x169] sm:$0xff] }
 0x459   : > { %15493 = vst [vmem:[#allocation40_spill] sm:$0xff] %v14083_v16  ;;  %v14085_v32 = vld [vmem:[#allocation3 + $0x168] sm:$0xff]  ;;  %v14087_v62 = vld [vmem:[#allocation3 + $0x170] sm:$0xff]  ;;  %11218 = vmatprep.mubr.msk.f32.mxu1 %vm506_vm1, %v14083_v16 }
 0x45a   : > { %15494 = vst [vmem:[#allocation22_spill] sm:$0xff] %v14085_v32  ;;  %11274 = vmatprep.mubr.msk.f32.mxu0 %vm506_vm1, %v14085_v32  ;;  %11219 = vmatmul.mubr.msk.f32.gmra.mxu1 %vm506_vm1, %v14093_v44  ;;  %v9662_v16 = vld [vmem:[%s15293_s12 + $0x90] sm:$0xff] }
 0x45b   : > { %11275 = vmatmul.mubr.msk.f32.gmra.mxu0 %vm506_vm1, %v14087_v62  ;;  %11285 = vmatprep.mubr.msk.f32.mxu1 %vm506_vm1, %v6106_v20  ;;  %v9661_v20 = vld [vmem:[%s15293_s12 + $0x88] sm:$0xff] }
 0x45c   : > { %11341 = vmatprep.mubr.msk.f32.mxu0 %vm506_vm1, %v13785_v39  ;;  %v14115_v39 = vld [vmem:[#allocation3 + $0x22] sm:$0xff] }
 0x45e   : > { %11286 = vmatmul.mubr.msk.f32.vlgmr.msra.gmra.mxu1 %vm506_vm1, %v6107_v59  ;;  %v9660_v59 = vld [vmem:[%s15293_s12 + $0x80] sm:$0xff] }
 0x45f   : > { %11342 = vmatmul.mubr.msk.f32.vlgmr.msra.gmra.mxu0 %vm506_vm1, %v13787_v25  ;;  %11390 = vmatpush3.msra.mxu1 %v13744_v28  ;;  %v9698_v28 = vld [vmem:[%s15293_s12 + $0xb0] sm:$0xff] }
 0x460   : > { %11288 = vmatprep.mubr.msk.f32.mxu1 %vm506_vm1, %v14108_v55  ;;  %11344 = vmatprep.mubr.msk.f32.mxu0 %vm506_vm1, %v13807_v22  ;;  %v14128_v25 = vld [vmem:[#allocation3 + $0x32] sm:$0xff]  ;;  %v11231_v22 = vpop.f32.mrf.mxu0 }
 0x461   : > { %11391 = vmatprep.subr.mxu1 %v9662_v16  ;;  %11446 = vmatpush3.msra.mxu0 %v13765_v54  ;;  %v11175_v54 = vpop.f32.mrf.mxu1 }
 0x462   : > { %11392 = vmatpush3.msra.mxu1 %v9662_v16  ;;  %11447 = vmatprep.subr.mxu0 %v9698_v28  ;;  %v14134_v16 = vld [vmem:[#allocation3 + $0x3a] sm:$0xff]  ;;  %v14142_v44 = vadd.f32 %v11231_v22, %v11175_v54  ;;  %v14175_v54 = vld [vmem:[#allocation3 + $0x6a] sm:$0xff] }
 0x463   : > { %11289 = vmatmul.mubr.msk.f32.gmra.mxu1 %vm506_vm1, %v14115_v39  ;;  %11345 = vmatmul.mubr.msk.f32.gmra.mxu0 %vm506_vm1, %v13809_v47  ;;  %v9697_v47 = vld [vmem:[%s15293_s12 + $0xa8] sm:$0xff]  ;;  %v14180_v22 = vld [vmem:[%s15293_s12 + $0xf8] sm:$0xff] }
 0x464   : > { %11291 = vmatprep.mubr.msk.f32.mxu1 %vm506_vm1, %v14128_v25  ;;  %11347 = vmatprep.mubr.msk.f32.mxu0 %vm506_vm1, %v13829_v46  ;;  %15496 = vst [vmem:[#allocation59_spill] sm:$0xff] %v14142_v44  ;;  %v14148_v46 = vld [vmem:[#allocation3 + $0x4a] sm:$0xff] }
 0x465   : > { %11393 = vmatprep.subr.mxu1 %v9661_v20  ;;  %11448 = vmatpush3.msra.mxu0 %v9698_v28  ;;  %v9696_v28 = vld [vmem:[%s15293_s12 + $0xa0] sm:$0xff]  ;;  %v14259_v44 = vld [vmem:[#allocation3 + $0x10a] sm:$0xff] }
 0x466   : > { %11394 = vmatpush3.msra.mxu1 %v9661_v20  ;;  %11449 = vmatprep.subr.mxu0 %v9697_v47  ;;  %v14154_v20 = vld [vmem:[#allocation3 + $0x52] sm:$0xff] }
 0x467   : > { %11292 = vmatmul.mubr.msk.f32.gmra.mxu1 %vm506_vm1, %v14134_v16  ;;  %11348 = vmatmul.mubr.msk.f32.gmra.mxu0 %vm506_vm1, %v13831_v60  ;;  %v14162_v60 = vld [vmem:[%s15293_s12 + $0xd8] sm:$0xff] }
 0x468   : > { %11294 = vmatprep.mubr.msk.f32.mxu1 %vm506_vm1, %v14148_v46  ;;  %11350 = vmatprep.mubr.msk.f32.mxu0 %vm506_vm1, %v13851_v13  ;;  %v14168_v13 = vld [vmem:[#allocation3 + $0x62] sm:$0xff] }
 0x469   : > { %11395 = vmatprep.subr.mxu1 %v9660_v59  ;;  %11450 = vmatpush3.msra.mxu0 %v9697_v47  ;;  %v14247_v47 = vld [vmem:[#allocation3 + $0xf2] sm:$0xff] }
 0x46a   : > { %11396 = vmatpush3.msra.mxu1 %v9660_v59  ;;  %11451 = vmatprep.subr.mxu0 %v9696_v28  ;;  %v14199_v59 = vld [vmem:[#allocation3 + $0x92] sm:$0xff] }
 0x46b   : > { %11295 = vmatmul.mubr.msk.f32.gmra.mxu1 %vm506_vm1, %v14154_v20  ;;  %11351 = vmatmul.mubr.msk.f32.gmra.mxu0 %vm506_vm1, %v13853_v11  ;;  %v14186_v11 = vld [vmem:[#allocation3 + $0x7a] sm:$0xff] }
 0x46c   : > { %11297 = vmatprep.mubr.msk.f32.mxu1 %vm506_vm1, %v14168_v13  ;;  %11353 = vmatprep.mubr.msk.f32.mxu0 %vm506_vm1, %v13873_v43  ;;  %v14193_v43 = vld [vmem:[#allocation3 + $0x82] sm:$0xff] }
 0x46d   : > { %11501 = vmatprep.subr.mxu1 %v14162_v60  ;;  %11452 = vmatpush3.msra.mxu0 %v9696_v28  ;;  %v14253_v28 = vld [vmem:[#allocation3 + $0xfa] sm:$0xff] }
 0x46e   : > { %11557 = vmatprep.subr.mxu0 %v14180_v22 }
 0x46f   : > { %11298 = vmatmul.mubr.msk.f32.gmra.mxu1 %vm506_vm1, %v14175_v54  ;;  %11354 = vmatmul.mubr.msk.f32.gmra.mxu0 %vm506_vm1, %v13875_v21  ;;  %v14205_v21 = vld [vmem:[#allocation3 + $0x9a] sm:$0xff] }
 0x470   : > { %11300 = vmatprep.mubr.msk.f32.mxu1 %vm506_vm1, %v14186_v11  ;;  %11356 = vmatprep.mubr.msk.f32.mxu0 %vm506_vm1, %v13895_v37  ;;  %v14211_v37 = vld [vmem:[#allocation3 + $0xaa] sm:$0xff] }
 0x473   : > { %11301 = vmatmul.mubr.msk.f32.gmra.mxu1 %vm506_vm1, %v14193_v43  ;;  %11357 = vmatmul.mubr.msk.f32.gmra.mxu0 %vm506_vm1, %v13897_v17  ;;  %v14217_v17 = vld [vmem:[#allocation3 + $0xb2] sm:$0xff] }
 0x474   : > { %11303 = vmatprep.mubr.msk.f32.mxu1 %vm506_vm1, %v14199_v59  ;;  %11359 = vmatprep.mubr.msk.f32.mxu0 %vm506_vm1, %v13917_v38  ;;  %v14223_v38 = vld [vmem:[#allocation3 + $0xc2] sm:$0xff] }
 0x477   : > { %11304 = vmatmul.mubr.msk.f32.gmra.mxu1 %vm506_vm1, %v14205_v21  ;;  %11360 = vmatmul.mubr.msk.f32.gmra.mxu0 %vm506_vm1, %v13919_v40  ;;  %v14229_v40 = vld [vmem:[#allocation3 + $0xca] sm:$0xff] }
 0x478   : > { %11306 = vmatprep.mubr.msk.f32.mxu1 %vm506_vm1, %v14211_v37  ;;  %11362 = vmatprep.mubr.msk.f32.mxu0 %vm506_vm1, %v13939_v6  ;;  %v14235_v6 = vld [vmem:[#allocation3 + $0xda] sm:$0xff] }
 0x47b   : > { %11307 = vmatmul.mubr.msk.f32.gmra.mxu1 %vm506_vm1, %v14217_v17  ;;  %11363 = vmatmul.mubr.msk.f32.gmra.mxu0 %vm506_vm1, %v13941_v3  ;;  %v14241_v3 = vld [vmem:[#allocation3 + $0xe2] sm:$0xff] }
 0x47c   : > { %11309 = vmatprep.mubr.msk.f32.mxu1 %vm506_vm1, %v14223_v38  ;;  %11365 = vmatprep.mubr.msk.f32.mxu0 %vm506_vm1, %v13961_v14 }
 0x47f   : > { %11310 = vmatmul.mubr.msk.f32.gmra.mxu1 %vm506_vm1, %v14229_v40  ;;  %11366 = vmatmul.mubr.msk.f32.gmra.mxu0 %vm506_vm1, %v13963_v63 }
 0x480   : > { %11312 = vmatprep.mubr.msk.f32.mxu1 %vm506_vm1, %v14235_v6  ;;  %11368 = vmatprep.mubr.msk.f32.mxu0 %vm506_vm1, %v13983_v35  ;;  %v14309_v35 = vld [vmem:[#allocation3 + $0x180] sm:$0xff] }
 0x483   : > { %11313 = vmatmul.mubr.msk.f32.gmra.mxu1 %vm506_vm1, %v14241_v3  ;;  %11369 = vmatmul.mubr.msk.f32.gmra.mxu0 %vm506_vm1, %v13985_v30  ;;  %v14265_v30 = vld [vmem:[#allocation3 + $0x112] sm:$0xff] }
 0x484   : > { %11315 = vmatprep.mubr.msk.f32.mxu1 %vm506_vm1, %v14247_v47  ;;  %11371 = vmatprep.mubr.msk.f32.mxu0 %vm506_vm1, %v14005_v48  ;;  %v14271_v48 = vld [vmem:[#allocation3 + $0x122] sm:$0xff] }
 0x487   : > { %11316 = vmatmul.mubr.msk.f32.gmra.mxu1 %vm506_vm1, %v14253_v28  ;;  %11372 = vmatmul.mubr.msk.f32.gmra.mxu0 %vm506_vm1, %v14007_v2  ;;  %v14277_v2 = vld [vmem:[#allocation3 + $0x12a] sm:$0xff] }
 0x488   : > { %11318 = vmatprep.mubr.msk.f32.mxu1 %vm506_vm1, %v14259_v44  ;;  %11374 = vmatprep.mubr.msk.f32.mxu0 %vm506_vm1, %v14027_v31  ;;  %v14283_v31 = vld [vmem:[#allocation3 + $0x13a] sm:$0xff] }
 0x48b   : > { %11319 = vmatmul.mubr.msk.f32.gmra.mxu1 %vm506_vm1, %v14265_v30  ;;  %11375 = vmatmul.mubr.msk.f32.gmra.mxu0 %vm506_vm1, %v14029_v1  ;;  %v14289_v1 = vld [vmem:[#allocation3 + $0x142] sm:$0xff] }
 0x48c   : > { %11321 = vmatprep.mubr.msk.f32.mxu1 %vm506_vm1, %v14271_v48  ;;  %11377 = vmatprep.mubr.msk.f32.mxu0 %vm506_vm1, %v14049_v8  ;;  %v14295_v8 = vld [vmem:[#allocation3 + $0x152] sm:$0xff] }
 0x48f   : > { %11322 = vmatmul.mubr.msk.f32.gmra.mxu1 %vm506_vm1, %v14277_v2  ;;  %11378 = vmatmul.mubr.msk.f32.gmra.mxu0 %vm506_vm1, %v14051_v56  ;;  %v14301_v56 = vld [vmem:[#allocation3 + $0x15a] sm:$0xff] }
 0x490   : > { %11324 = vmatprep.mubr.msk.f32.mxu1 %vm506_vm1, %v14283_v31  ;;  %11380 = vmatprep.mubr.msk.f32.mxu0 %vm506_vm1, %v14068_v50  ;;  %v14307_v50 = vld [vmem:[#allocation3 + $0x16a] sm:$0xff] }
 0x493   : > { %11325 = vmatmul.mubr.msk.f32.gmra.mxu1 %vm506_vm1, %v14289_v1  ;;  %11381 = vmatmul.mubr.msk.f32.gmra.mxu0 %vm506_vm1, %v14070_v15  ;;  %v14315_v15 = vld [vmem:[#allocation3 + $0x172] sm:$0xff] }
 0x494   : > { %11327 = vmatprep.mubr.msk.f32.mxu1 %vm506_vm1, %v14295_v8  ;;  %11383 = vmatprep.mubr.msk.f32.mxu0 %vm506_vm1, %v14085_v32  ;;  %v14317_v32 = vld [vmem:[#allocation3 + $0x188] sm:$0xff] }
 0x497   : > { %11328 = vmatmul.mubr.msk.f32.gmra.mxu1 %vm506_vm1, %v14301_v56  ;;  %11384 = vmatmul.mubr.msk.f32.gmra.mxu0 %vm506_vm1, %v14087_v62  ;;  %v9734_v62 = vld [vmem:[%s15293_s12 + $0xd0] sm:$0xff] }
 0x498   : > { %11330 = vmatprep.mubr.msk.f32.mxu1 %vm506_vm1, %v14307_v50  ;;  %11386 = vmatprep.mubr.msk.f32.mxu0 %vm506_vm1, %v14309_v35 }
 0x49b   : > { %11331 = vmatmul.mubr.msk.f32.gmra.mxu1 %vm506_vm1, %v14315_v15  ;;  %11387 = vmatmul.mubr.msk.f32.gmra.mxu0 %vm506_vm1, %v14317_v32 }
 0x49c   : > { %11397 = vmatprep.mubr.msk.f32.mxu1 %vm506_vm1, %v13783_v10  ;;  %11453 = vmatprep.mubr.msk.f32.mxu0 %vm506_vm1, %v14108_v55  ;;  %v9733_v10 = vld [vmem:[%s15293_s12 + $0xc8] sm:$0xff]  ;;  %v7670_v55 = vld [vmem:[#allocation3 + $0x60] sm:$0xff] }
 0x49f   : > { %11398 = vmatmul.mubr.msk.f32.vlgmr.msra.gmra.mxu1 %vm506_vm1, %v13796_v7  ;;  %11454 = vmatmul.mubr.msk.f32.vlgmr.msra.gmra.mxu0 %vm506_vm1, %v14115_v39  ;;  %v9770_v7 = vld [vmem:[%s15293_s12 + $0xf0] sm:$0xff] }
 0x4a0   : > { %11502 = vmatpush3.msra.mxu1 %v14162_v60  ;;  %11400 = vmatprep.mubr.msk.f32.mxu1 %vm506_vm1, %v13805_v49  ;;  %v9732_v49 = vld [vmem:[%s15293_s12 + $0xc0] sm:$0xff]  ;;  %v8061_v60 = vld [vmem:[#allocation3 + $0x69] sm:$0xff] }
 0x4a1   : > { %11456 = vmatprep.mubr.msk.f32.mxu0 %vm506_vm1, %v14128_v25  ;;  %11503 = vmatprep.subr.mxu1 %v9734_v62 }
 0x4a2   : > { %11504 = vmatpush3.msra.mxu1 %v9734_v62  ;;  %11558 = vmatpush3.msra.mxu0 %v14180_v22 }
 0x4a3   : > { %11401 = vmatmul.mubr.msk.f32.gmra.mxu1 %vm506_vm1, %v13818_v52  ;;  %11457 = vmatmul.mubr.msk.f32.gmra.mxu0 %vm506_vm1, %v14134_v16  ;;  %v9769_v52 = vld [vmem:[%s15293_s12 + $0xe8] sm:$0xff] }
 0x4a4   : > { %11403 = vmatprep.mubr.msk.f32.mxu1 %vm506_vm1, %v13827_v19  ;;  %11459 = vmatprep.mubr.msk.f32.mxu0 %vm506_vm1, %v14148_v46  ;;  %v9768_v19 = vld [vmem:[%s15293_s12 + $0xe0] sm:$0xff] }
 0x4a5   : > { %11505 = vmatprep.subr.mxu1 %v9733_v10  ;;  %11559 = vmatprep.subr.mxu0 %v9770_v7 }
 0x4a6   : > { %11506 = vmatpush3.msra.mxu1 %v9733_v10  ;;  %11560 = vmatpush3.msra.mxu0 %v9770_v7 }
 0x4a7   : > { %11404 = vmatmul.mubr.msk.f32.gmra.mxu1 %vm506_vm1, %v13840_v12  ;;  %11460 = vmatmul.mubr.msk.f32.gmra.mxu0 %vm506_vm1, %v14154_v20  ;;  %v14374_v12 = vld [vmem:[%s15293_s12 + $0x118] sm:$0xff]  ;;  %v7671_v20 = vld [vmem:[#allocation3 + $0x68] sm:$0xff] }
 0x4a8   : > { %11406 = vmatprep.mubr.msk.f32.mxu1 %vm506_vm1, %v13849_v26  ;;  %11462 = vmatprep.mubr.msk.f32.mxu0 %vm506_vm1, %v14168_v13  ;;  %v15497_v26 = vld [vmem:[#allocation39_spill] sm:$0xff]  ;;  %v9804_v13 = vld [vmem:[%s15293_s12 + $0x100] sm:$0xff] }
 0x4a9   : > { %11507 = vmatprep.subr.mxu1 %v9732_v49  ;;  %11561 = vmatprep.subr.mxu0 %v9769_v52 }
 0x4aa   : > { %11508 = vmatpush3.msra.mxu1 %v9732_v49  ;;  %11562 = vmatpush3.msra.mxu0 %v9769_v52  ;;  %v7675_v52 = vld [vmem:[#allocation3 + $0x98] sm:$0xff] }
 0x4ab   : > { %11407 = vmatmul.mubr.msk.f32.gmra.mxu1 %vm506_vm1, %v13862_v57  ;;  %11463 = vmatmul.mubr.msk.f32.gmra.mxu0 %vm506_vm1, %v14175_v54  ;;  %v15498_v57 = vld [vmem:[#allocation40_spill] sm:$0xff] }
 0x4ac   : > { %11409 = vmatprep.mubr.msk.f32.mxu1 %vm506_vm1, %v13871_v42  ;;  %11465 = vmatprep.mubr.msk.f32.mxu0 %vm506_vm1, %v14186_v11  ;;  %v15499_v42 = vld [vmem:[#allocation23_spill] sm:$0xff]  ;;  %v7672_v11 = vld [vmem:[#allocation3 + $0x78] sm:$0xff] }
 0x4ad   : > { %11563 = vmatprep.subr.mxu0 %v9768_v19  ;;  %11613 = vmatprep.subr.mxu1 %v14374_v12 }
 0x4ae   : > { %11564 = vmatpush3.msra.mxu0 %v9768_v19  ;;  %v8065_v19 = vld [vmem:[#allocation3 + $0x99] sm:$0xff] }
 0x4af   : > { %11410 = vmatmul.mubr.msk.f32.gmra.mxu1 %vm506_vm1, %v13884_v33  ;;  %11466 = vmatmul.mubr.msk.f32.gmra.mxu0 %vm506_vm1, %v14193_v43  ;;  %v14469_v33 = vld [vmem:[#allocation3 + $0x181] sm:$0xff]  ;;  %v8062_v43 = vld [vmem:[#allocation3 + $0x79] sm:$0xff] }
 0x4b0   : > { %11412 = vmatprep.mubr.msk.f32.mxu1 %vm506_vm1, %v13893_v23  ;;  %11468 = vmatprep.mubr.msk.f32.mxu0 %vm506_vm1, %v14199_v59  ;;  %v14471_v23 = vld [vmem:[#allocation3 + $0x182] sm:$0xff] }
 0x4b3   : > { %11413 = vmatmul.mubr.msk.f32.gmra.mxu1 %vm506_vm1, %v13906_v58  ;;  %11469 = vmatmul.mubr.msk.f32.gmra.mxu0 %vm506_vm1, %v14205_v21  ;;  %v14477_v58 = vld [vmem:[#allocation3 + $0x189] sm:$0xff] }
 0x4b4   : > { %11415 = vmatprep.mubr.msk.f32.mxu1 %vm506_vm1, %v13915_v24  ;;  %11471 = vmatprep.mubr.msk.f32.mxu0 %vm506_vm1, %v14211_v37  ;;  %v14479_v24 = vld [vmem:[#allocation3 + $0x18a] sm:$0xff] }
 0x4b7   : > { %11416 = vmatmul.mubr.msk.f32.gmra.mxu1 %vm506_vm1, %v13928_v34  ;;  %11472 = vmatmul.mubr.msk.f32.gmra.mxu0 %vm506_vm1, %v14217_v17  ;;  %v7666_v34 = vld [vmem:[#allocation3 + $0x30] sm:$0xff] }
 0x4b8   : > { %11418 = vmatprep.mubr.msk.f32.mxu1 %vm506_vm1, %v13937_v53  ;;  %11474 = vmatprep.mubr.msk.f32.mxu0 %vm506_vm1, %v14223_v38  ;;  %v8056_v53 = vld [vmem:[#allocation3 + $0x31] sm:$0xff]  ;;  %v7673_v38 = vld [vmem:[#allocation3 + $0x80] sm:$0xff] }
 0x4bb   : > { %11419 = vmatmul.mubr.msk.f32.gmra.mxu1 %vm506_vm1, %v13950_v41  ;;  %11475 = vmatmul.mubr.msk.f32.gmra.mxu0 %vm506_vm1, %v14229_v40  ;;  %v7667_v41 = vld [vmem:[#allocation3 + $0x38] sm:$0xff]  ;;  %v8063_v40 = vld [vmem:[#allocation3 + $0x81] sm:$0xff] }
 0x4bc   : > { %11421 = vmatprep.mubr.msk.f32.mxu1 %vm506_vm1, %v13959_v29  ;;  %11477 = vmatprep.mubr.msk.f32.mxu0 %vm506_vm1, %v14235_v6  ;;  %v8057_v29 = vld [vmem:[#allocation3 + $0x39] sm:$0xff] }
 0x4bf   : > { %11422 = vmatmul.mubr.msk.f32.gmra.mxu1 %vm506_vm1, %v13972_v27  ;;  %11478 = vmatmul.mubr.msk.f32.gmra.mxu0 %vm506_vm1, %v14241_v3  ;;  %v9806_v27 = vld [vmem:[%s15293_s12 + $0x110] sm:$0xff] }
 0x4c0   : > { %11424 = vmatprep.mubr.msk.f32.mxu1 %vm506_vm1, %v13981_v0  ;;  %11480 = vmatprep.mubr.msk.f32.mxu0 %vm506_vm1, %v14247_v47  ;;  %v7674_v47 = vld [vmem:[#allocation3 + $0x90] sm:$0xff] }
 0x4c3   : > { %11425 = vmatmul.mubr.msk.f32.gmra.mxu1 %vm506_vm1, %v13994_v45  ;;  %11481 = vmatmul.mubr.msk.f32.gmra.mxu0 %vm506_vm1, %v14253_v28  ;;  %v8064_v28 = vld [vmem:[#allocation3 + $0x91] sm:$0xff] }
 0x4c4   : > { %11427 = vmatprep.mubr.msk.f32.mxu1 %vm506_vm1, %v14003_v18  ;;  %11483 = vmatprep.mubr.msk.f32.mxu0 %vm506_vm1, %v14259_v44  ;;  %v8060_v44 = vld [vmem:[#allocation3 + $0x61] sm:$0xff] }
 0x4c7   : > { %11428 = vmatmul.mubr.msk.f32.gmra.mxu1 %vm506_vm1, %v14016_v36  ;;  %11484 = vmatmul.mubr.msk.f32.gmra.mxu0 %vm506_vm1, %v14265_v30  ;;  %v7668_v30 = vld [vmem:[#allocation3 + $0x48] sm:$0xff] }
 0x4c8   : > { %11430 = vmatprep.mubr.msk.f32.mxu1 %vm506_vm1, %v14025_v5  ;;  %11486 = vmatprep.mubr.msk.f32.mxu0 %vm506_vm1, %v14271_v48  ;;  %v8058_v48 = vld [vmem:[#allocation3 + $0x49] sm:$0xff] }
 0x4cb   : > { %11431 = vmatmul.mubr.msk.f32.gmra.mxu1 %vm506_vm1, %v14038_v51  ;;  %11487 = vmatmul.mubr.msk.f32.gmra.mxu0 %vm506_vm1, %v14277_v2  ;;  %v14494_v2 = vpop.f32.mrf.mxu1 }
 0x4cc   : > { %11433 = vmatprep.mubr.msk.f32.mxu1 %vm506_vm1, %v14047_v61  ;;  %11489 = vmatprep.mubr.msk.f32.mxu0 %vm506_vm1, %v14283_v31  ;;  %v14496_v31 = vpop.f32.mrf.mxu0 }
 0x4cf   : > { %11434 = vmatmul.mubr.msk.f32.gmra.mxu1 %vm506_vm1, %v14059_v9  ;;  %11490 = vmatmul.mubr.msk.f32.gmra.mxu0 %vm506_vm1, %v14289_v1  ;;  %v7669_v1 = vld [vmem:[#allocation3 + $0x50] sm:$0xff] }
 0x4d0   : > { %11436 = vmatprep.mubr.msk.f32.mxu1 %vm506_vm1, %v14066_v4  ;;  %11492 = vmatprep.mubr.msk.f32.mxu0 %vm506_vm1, %v14295_v8  ;;  %v8059_v8 = vld [vmem:[#allocation3 + $0x51] sm:$0xff] }
 0x4d3   : > { %11437 = vmatmul.mubr.msk.f32.gmra.mxu1 %vm506_vm1, %v15497_v26  ;;  %11493 = vmatmul.mubr.msk.f32.gmra.mxu0 %vm506_vm1, %v14301_v56  ;;  %v9805_v56 = vld [vmem:[%s15293_s12 + $0x108] sm:$0xff] }
 0x4d4   : > { %11439 = vmatprep.mubr.msk.f32.mxu1 %vm506_vm1, %v15498_v57  ;;  %11495 = vmatprep.mubr.msk.f32.mxu0 %vm506_vm1, %v14307_v50 }
 0x4d7   : > { %11440 = vmatmul.mubr.msk.f32.gmra.mxu1 %vm506_vm1, %v15499_v42  ;;  %11496 = vmatmul.mubr.msk.f32.gmra.mxu0 %vm506_vm1, %v14315_v15  ;;  %v7676_v42 = vld [vmem:[#allocation3 + $0xa8] sm:$0xff] }
 0x4d8   : > { %11442 = vmatprep.mubr.msk.f32.mxu1 %vm506_vm1, %v14469_v33  ;;  %11498 = vmatprep.mubr.msk.f32.mxu0 %vm506_vm1, %v14471_v23 }
 0x4db   : > { %11443 = vmatmul.mubr.msk.f32.gmra.mxu1 %vm506_vm1, %v14477_v58  ;;  %11499 = vmatmul.mubr.msk.f32.gmra.mxu0 %vm506_vm1, %v14479_v24 }
 0x4dc   : > { %11509 = vmatprep.mubr.msk.f32.mxu1 %vm506_vm1, %v7666_v34  ;;  %11565 = vmatprep.mubr.msk.f32.mxu0 %vm506_vm1, %v8056_v53  ;;  %v8066_v34 = vld [vmem:[#allocation3 + $0xa9] sm:$0xff] }
 0x4df   : > { %11510 = vmatmul.mubr.msk.f32.vlgmr.msra.gmra.mxu1 %vm506_vm1, %v7667_v41  ;;  %11566 = vmatmul.mubr.msk.f32.vlgmr.msra.gmra.mxu0 %vm506_vm1, %v8057_v29 }
 0x4e0   : > { %11614 = vmatpush3.msra.mxu1 %v14374_v12  ;;  %11512 = vmatprep.mubr.msk.f32.mxu1 %vm506_vm1, %v7668_v30  ;;  %v7677_v30 = vld [vmem:[#allocation3 + $0xb0] sm:$0xff] }
 0x4e1   : > { %11568 = vmatprep.mubr.msk.f32.mxu0 %vm506_vm1, %v8058_v48  ;;  %11615 = vmatprep.subr.mxu1 %v9806_v27  ;;  %v8067_v48 = vld [vmem:[#allocation3 + $0xb1] sm:$0xff] }
 0x4e2   : > { %11616 = vmatpush3.msra.mxu1 %v9806_v27  ;;  %v11178_v50 = vpop.f32.mrf.mxu1 }
 0x4e3   : > { %v11234_v15 = vpop.f32.mrf.mxu0  ;;  %11513 = vmatmul.mubr.msk.f32.gmra.mxu1 %vm506_vm1, %v7669_v1  ;;  %11569 = vmatmul.mubr.msk.f32.gmra.mxu0 %vm506_vm1, %v8059_v8 }
 0x4e4   : > { %v14504_v39 = vadd.f32 %v11234_v15, %v11178_v50  ;;  %11515 = vmatprep.mubr.msk.f32.mxu1 %vm506_vm1, %v7670_v55  ;;  %11571 = vmatprep.mubr.msk.f32.mxu0 %vm506_vm1, %v8060_v44  ;;  %v5636_v25 = vpop.f32.mrf.mxu1  ;;  %v8068_v50 = vld [vmem:[#allocation3 + $0xc1] sm:$0xff] }
 0x4e5   : > { %v5957_v16 = vpop.f32.mrf.mxu0  ;;  %11617 = vmatprep.subr.mxu1 %v9805_v56 }
 0x4e6   : > { %v14508_v46 = vadd.f32 %v5957_v16, %v5636_v25  ;;  %11618 = vmatpush3.msra.mxu1 %v9805_v56  ;;  %v11181_v54 = vpop.f32.mrf.mxu1  ;;  %v7678_v56 = vld [vmem:[#allocation3 + $0xc0] sm:$0xff]  ;;  %v7679_v16 = vld [vmem:[#allocation3 + $0xc8] sm:$0xff] }
 0x4e7   : > { %v11237_v22 = vpop.f32.mrf.mxu0  ;;  %11516 = vmatmul.mubr.msk.f32.gmra.mxu1 %vm506_vm1, %v7671_v20  ;;  %11572 = vmatmul.mubr.msk.f32.gmra.mxu0 %vm506_vm1, %v8061_v60  ;;  %v8069_v20 = vld [vmem:[#allocation3 + $0xc9] sm:$0xff] }
 0x4e8   : > { %v14515_v59 = vadd.f32 %v11237_v22, %v11181_v54  ;;  %11518 = vmatprep.mubr.msk.f32.mxu1 %vm506_vm1, %v7672_v11  ;;  %11574 = vmatprep.mubr.msk.f32.mxu0 %vm506_vm1, %v8062_v43  ;;  %v5646_v21 = vpop.f32.mrf.mxu1  ;;  %v8070_v54 = vld [vmem:[#allocation3 + $0xd9] sm:$0xff] }
 0x4e9   : > { %v5967_v37 = vpop.f32.mrf.mxu0  ;;  %11619 = vmatprep.subr.mxu1 %v9804_v13 }
 0x4ea   : > { %v14519_v17 = vadd.f32 %v5967_v37, %v5646_v21  ;;  %11620 = vmatpush3.msra.mxu1 %v9804_v13  ;;  %v11184_v6 = vpop.f32.mrf.mxu1  ;;  %v8071_v37 = vld [vmem:[#allocation3 + $0xe1] sm:$0xff] }
 0x4eb   : > { %v11240_v3 = vpop.f32.mrf.mxu0  ;;  %11519 = vmatmul.mubr.msk.f32.gmra.mxu1 %vm506_vm1, %v7673_v38  ;;  %11575 = vmatmul.mubr.msk.f32.gmra.mxu0 %vm506_vm1, %v8063_v40 }
 0x4ec   : > { %v14523_v62 = vadd.f32 %v11240_v3, %v11184_v6  ;;  %11521 = vmatprep.mubr.msk.f32.mxu1 %vm506_vm1, %v7674_v47  ;;  %11577 = vmatprep.mubr.msk.f32.mxu0 %vm506_vm1, %v8064_v28  ;;  %v5656_v10 = vpop.f32.mrf.mxu1  ;;  %v15500_v3 = vld [vmem:[#allocation9_spill] sm:$0xff] }
 0x4ed   : > { %v5977_v7 = vpop.f32.mrf.mxu0 }
 0x4ee   : > { %v14527_v49 = vadd.f32 %v5977_v7, %v5656_v10  ;;  %v11187_v12 = vpop.f32.mrf.mxu1 }
 0x4ef   : > { %v11243_v26 = vpop.f32.mrf.mxu0  ;;  %11522 = vmatmul.mubr.msk.f32.gmra.mxu1 %vm506_vm1, %v7675_v52  ;;  %11578 = vmatmul.mubr.msk.f32.gmra.mxu0 %vm506_vm1, %v8065_v19  ;;  %v15501_v52 = vld [vmem:[#allocation37_spill] sm:$0xff]  ;;  %v15502_v19 = vld [vmem:[#allocation38_spill] sm:$0xff] }
 0x4f0   : > { %v14531_v53 = vadd.f32 %v11243_v26, %v11187_v12  ;;  %11524 = vmatprep.mubr.msk.f32.mxu1 %vm506_vm1, %v7676_v42  ;;  %11580 = vmatprep.mubr.msk.f32.mxu0 %vm506_vm1, %v8066_v34  ;;  %v5666_v41 = vpop.f32.mrf.mxu1 }
 0x4f1   : > { %v5987_v29 = vpop.f32.mrf.mxu0 }
 0x4f2   : > { %v14535_v27 = vadd.f32 %v5987_v29, %v5666_v41  ;;  %v11190_v1 = vpop.f32.mrf.mxu1  ;;  %v15503_v41 = vld [vmem:[#allocation20_spill] sm:$0xff]  ;;  %v15504_v29 = vld [vmem:[#allocation14_spill] sm:$0xff] }
 0x4f3   : > { %v11246_v8 = vpop.f32.mrf.mxu0  ;;  %11525 = vmatmul.mubr.msk.f32.gmra.mxu1 %vm506_vm1, %v7677_v30  ;;  %11581 = vmatmul.mubr.msk.f32.gmra.mxu0 %vm506_vm1, %v8067_v48 }
 0x4f4   : > { %v14539_v15 = vadd.f32 %v11246_v8, %v11190_v1  ;;  %11527 = vmatprep.mubr.msk.f32.mxu1 %vm506_vm1, %v7678_v56  ;;  %11583 = vmatprep.mubr.msk.f32.mxu0 %vm506_vm1, %v8068_v50  ;;  %v5676_v55 = vpop.f32.mrf.mxu1  ;;  %v15505_v56 = vld [vmem:[#allocation21_spill] sm:$0xff]  ;;  %v15506_v50 = vld [vmem:[#allocation58_spill] sm:$0xff] }
 0x4f5   : > { %v5997_v44 = vpop.f32.mrf.mxu0 }
 0x4f6   : > { %v14543_v25 = vadd.f32 %v5997_v44, %v5676_v55  ;;  %v11193_v60 = vpop.f32.mrf.mxu1 }
 0x4f7   : > { %v11249_v13 = vpop.f32.mrf.mxu0  ;;  %11528 = vmatmul.mubr.msk.f32.gmra.mxu1 %vm506_vm1, %v7679_v16  ;;  %11584 = vmatmul.mubr.msk.f32.gmra.mxu0 %vm506_vm1, %v8069_v20 }
 0x4f8   : > { %v14547_v22 = vadd.f32 %v11249_v13, %v11193_v60  ;;  %11530 = vmatprep.mubr.msk.f32.mxu1 %vm506_vm1, %v13961_v14  ;;  %11586 = vmatprep.mubr.msk.f32.mxu0 %vm506_vm1, %v8070_v54  ;;  %v5686_v11 = vpop.f32.mrf.mxu1  ;;  %v15507_v60 = vld [vmem:[#allocation61_spill] sm:$0xff]  ;;  %v15508_v13 = vld [vmem:[#allocation10_spill] sm:$0xff] }
 0x4f9   : > { %v6007_v43 = vpop.f32.mrf.mxu0 }
 0x4fa   : > { %v14552_v21 = vadd.f32 %v6007_v43, %v5686_v11  ;;  %v11196_v38 = vpop.f32.mrf.mxu1  ;;  %v8081_v43 = vld [vmem:[#allocation3 + $0x159] sm:$0xff] }
 0x4fb   : > { %v11252_v40 = vpop.f32.mrf.mxu0  ;;  %11531 = vmatmul.mubr.msk.f32.gmra.mxu1 %vm506_vm1, %v13963_v63  ;;  %11587 = vmatmul.mubr.msk.f32.gmra.mxu0 %vm506_vm1, %v8071_v37 }
 0x4fc   : > { %v14557_v6 = vadd.f32 %v11252_v40, %v11196_v38  ;;  %11533 = vmatprep.mubr.msk.f32.mxu1 %vm506_vm1, %v15500_v3  ;;  %11589 = vmatprep.mubr.msk.f32.mxu0 %vm506_vm1, %v13981_v0  ;;  %v5696_v14 = vpop.f32.mrf.mxu1  ;;  %v15509_v40 = vld [vmem:[#allocation11_spill] sm:$0xff]  ;;  %v15510_v3 = vld [vmem:[#allocation22_spill] sm:$0xff] }
 0x4fd   : > { %v6017_v47 = vpop.f32.mrf.mxu0 }
 0x4fe   : > { %v14563_v28 = vadd.f32 %v6017_v47, %v5696_v14  ;;  %v11199_v10 = vpop.f32.mrf.mxu1 }
 0x4ff   : > { %v11255_v7 = vpop.f32.mrf.mxu0  ;;  %11534 = vmatmul.mubr.msk.f32.gmra.mxu1 %vm506_vm1, %v15501_v52  ;;  %11590 = vmatmul.mubr.msk.f32.gmra.mxu0 %vm506_vm1, %v13994_v45 }
 0x500   : > { %v14569_v63 = vadd.f32 %v11255_v7, %v11199_v10  ;;  %11536 = vmatprep.mubr.msk.f32.mxu1 %vm506_vm1, %v15502_v19  ;;  %11592 = vmatprep.mubr.msk.f32.mxu0 %vm506_vm1, %v14003_v18  ;;  %v5706_v0 = vpop.f32.mrf.mxu1  ;;  %v7693_v10 = vld [vmem:[#allocation3 + $0x170] sm:$0xff] }
 0x501   : > { %v6027_v12 = vpop.f32.mrf.mxu0  ;;  %v8083_v7 = vld [vmem:[#allocation3 + $0x171] sm:$0xff] }
 0x502   : > { %v14575_v26 = vadd.f32 %v6027_v12, %v5706_v0  ;;  %v11202_v42 = vpop.f32.mrf.mxu1 }
 0x503   : > { %v11258_v34 = vpop.f32.mrf.mxu0  ;;  %11537 = vmatmul.mubr.msk.f32.gmra.mxu1 %vm506_vm1, %v15503_v41  ;;  %11593 = vmatmul.mubr.msk.f32.gmra.mxu0 %vm506_vm1, %v14016_v36 }
 0x504   : > { %v14581_v45 = vadd.f32 %v11258_v34, %v11202_v42  ;;  %11539 = vmatprep.mubr.msk.f32.mxu1 %vm506_vm1, %v15504_v29  ;;  %11595 = vmatprep.mubr.msk.f32.mxu0 %vm506_vm1, %v14025_v5  ;;  %v5716_v18 = vpop.f32.mrf.mxu1  ;;  %v7696_v42 = vld [vmem:[#allocation3 + $0x198] sm:$0xff] }
 0x505   : > { %v6037_v30 = vpop.f32.mrf.mxu0  ;;  %v8086_v34 = vld [vmem:[#allocation3 + $0x199] sm:$0xff] }
 0x506   : > { %v14587_v48 = vadd.f32 %v6037_v30, %v5716_v18  ;;  %v11205_v1 = vpop.f32.mrf.mxu1 }
 0x507   : > { %v11261_v8 = vpop.f32.mrf.mxu0  ;;  %11540 = vmatmul.mubr.msk.f32.gmra.mxu1 %vm506_vm1, %v15505_v56  ;;  %11596 = vmatmul.mubr.msk.f32.gmra.mxu0 %vm506_vm1, %v14038_v51 }
 0x508   : > { %v14593_v36 = vadd.f32 %v11261_v8, %v11205_v1  ;;  %11542 = vmatprep.mubr.msk.f32.mxu1 %vm506_vm1, %v15506_v50  ;;  %11598 = vmatprep.mubr.msk.f32.mxu0 %vm506_vm1, %v14047_v61  ;;  %v5726_v5 = vpop.f32.mrf.mxu1 }
 0x509   : > { %v6047_v55 = vpop.f32.mrf.mxu0 }
 0x50a   : > { %v14599_v44 = vadd.f32 %v6047_v55, %v5726_v5  ;;  %v11208_v16 = vpop.f32.mrf.mxu1 }
 0x50b   : > { %v11264_v20 = vpop.f32.mrf.mxu0  ;;  %11543 = vmatmul.mubr.msk.f32.gmra.mxu1 %vm506_vm1, %v15507_v60  ;;  %11599 = vmatmul.mubr.msk.f32.gmra.mxu0 %vm506_vm1, %v14059_v9  ;;  %v8447_v60 = vld [vmem:[#allocation3 + $0x3a] sm:$0xff] }
 0x50c   : > { %v14605_v51 = vadd.f32 %v11264_v20, %v11208_v16  ;;  %11545 = vmatprep.mubr.msk.f32.mxu1 %vm506_vm1, %v15508_v13  ;;  %11601 = vmatprep.mubr.msk.f32.mxu0 %vm506_vm1, %v14066_v4  ;;  %v5736_v61 = vpop.f32.mrf.mxu1 }
 0x50d   : > { %v6057_v54 = vpop.f32.mrf.mxu0 }
 0x50e   : > { %v14611_v11 = vadd.f32 %v6057_v54, %v5736_v61  ;;  %v11211_v37 = vpop.f32.mrf.mxu1  ;;  %v8448_v54 = vld [vmem:[#allocation3 + $0x4a] sm:$0xff] }
 0x50f   : > { %v11267_v38 = vpop.f32.mrf.mxu0  ;;  %11546 = vmatmul.mubr.msk.f32.gmra.mxu1 %vm506_vm1, %v15509_v40  ;;  %11602 = vmatmul.mubr.msk.f32.gmra.mxu0 %vm506_vm1, %v8081_v43  ;;  %v5948_v43 = vadd.f32 %v14496_v31, %v14494_v2 }
 0x510   : > { %v14616_v9 = vadd.f32 %v11267_v38, %v11211_v37  ;;  %11548 = vmatprep.mubr.msk.f32.mxu1 %vm506_vm1, %v15510_v3  ;;  %11604 = vmatprep.mubr.msk.f32.mxu0 %vm506_vm1, %v15498_v57  ;;  %v5746_v4 = vpop.f32.mrf.mxu1  ;;  %v15511_v37 = vld [vmem:[#allocation59_spill] sm:$0xff] }
 0x511   : > { %v6067_v14 = vpop.f32.mrf.mxu0 }
 0x512   : > { %v14622_v47 = vadd.f32 %v6067_v14, %v5746_v4  ;;  %v11214_v52 = vpop.f32.mrf.mxu1 }
 0x513   : > { %v11270_v19 = vpop.f32.mrf.mxu0  ;;  %11549 = vmatmul.mubr.msk.f32.gmra.mxu1 %vm506_vm1, %v7693_v10  ;;  %11605 = vmatmul.mubr.msk.f32.gmra.mxu0 %vm506_vm1, %v8083_v7  ;;  %v8449_v10 = vld [vmem:[#allocation3 + $0x52] sm:$0xff] }
 0x514   : > { %v14626_v0 = vadd.f32 %v11270_v19, %v11214_v52  ;;  %11551 = vmatprep.mubr.msk.f32.mxu1 %vm506_vm1, %v14309_v35  ;;  %11607 = vmatprep.mubr.msk.f32.mxu0 %vm506_vm1, %v14469_v33  ;;  %v5756_v57 = vpop.f32.mrf.mxu1  ;;  %v7697_v35 = vld [vmem:[#allocation3 + $0x1a0] sm:$0xff] }
 0x515   : > { %v6077_v12 = vpop.f32.mrf.mxu0  ;;  %v8087_v33 = vld [vmem:[#allocation3 + $0x1a1] sm:$0xff] }
 0x516   : > { %v14632_v41 = vadd.f32 %v6077_v12, %v5756_v57  ;;  %v11217_v29 = vpop.f32.mrf.mxu1  ;;  %v8450_v19 = vld [vmem:[#allocation3 + $0x62] sm:$0xff] }
 0x517   : > { %v11273_v18 = vpop.f32.mrf.mxu0  ;;  %11552 = vmatmul.mubr.msk.f32.gmra.mxu1 %vm506_vm1, %v14317_v32  ;;  %11608 = vmatmul.mubr.msk.f32.gmra.mxu0 %vm506_vm1, %v14477_v58  ;;  %v8446_v32 = vld [vmem:[#allocation3 + $0x32] sm:$0xff] }
 0x518   : > { %v14638_v30 = vadd.f32 %v11273_v18, %v11217_v29  ;;  %11554 = vmatprep.mubr.msk.f32.mxu1 %vm506_vm1, %v7696_v42  ;;  %11610 = vmatprep.mubr.msk.f32.mxu0 %vm506_vm1, %v8086_v34  ;;  %v5766_v1 = vpop.f32.mrf.mxu1  ;;  %v8451_v29 = vld [vmem:[#allocation3 + $0x6a] sm:$0xff] }
 0x519   : > { %v6087_v8 = vpop.f32.mrf.mxu0 }
 0x51a   : > { %v14642_v56 = vadd.f32 %v6087_v8, %v5766_v1  ;;  %v11220_v50 = vpop.f32.mrf.mxu1 }
 0x51b   : > { %v11276_v5 = vpop.f32.mrf.mxu0  ;;  %11555 = vmatmul.mubr.msk.f32.gmra.mxu1 %vm506_vm1, %v7697_v35  ;;  %11611 = vmatmul.mubr.msk.f32.gmra.mxu0 %vm506_vm1, %v8087_v33  ;;  %v8452_v33 = vld [vmem:[#allocation3 + $0x7a] sm:$0xff] }
 0x51c   : > { %v14646_v58 = vadd.f32 %v11276_v5, %v11220_v50  ;;  %11621 = vmatprep.mubr.msk.f32.mxu1 %vm506_vm1, %v8446_v32  ;;  %v5776_v55 = vpop.f32.mrf.mxu1 }
 0x51d   : > { %v6097_v16 = vpop.f32.mrf.mxu0 }
 0x51e   : > { %v14649_v20 = vadd.f32 %v6097_v16, %v5776_v55  ;;  %v11287_v13 = vpop.f32.mrf.mxu1  ;;  %v8453_v55 = vld [vmem:[#allocation3 + $0x82] sm:$0xff] }
 0x51f   : > { %v11343_v61 = vpop.f32.mrf.mxu0  ;;  %11622 = vmatmul.mubr.msk.f32.vlgmr.msra.gmra.mxu1 %vm506_vm1, %v8447_v60  ;;  %v6465_v38 = vadd.f32 %v11287_v13, %v15511_v37  ;;  %v8454_v60 = vld [vmem:[#allocation3 + $0x92] sm:$0xff] }
 0x520   : > { %11624 = vmatprep.mubr.msk.f32.mxu1 %vm506_vm1, %v8448_v54  ;;  %v6305_v40 = vpop.f32.mrf.mxu1 }
 0x521   : > { %v6695_v3 = vpop.f32.mrf.mxu0  ;;  %v14656_v4 = vadd.f32 %v11343_v61, %v6465_v38  ;;  %v6464_v14 = vadd.f32 %v6305_v40, %v5948_v43  ;;  %v8455_v38 = vld [vmem:[#allocation3 + $0x9a] sm:$0xff] }
 0x523   : > { %v11290_v7 = vpop.f32.mrf.mxu1  ;;  %v11346_v52 = vpop.f32.mrf.mxu0  ;;  %11625 = vmatmul.mubr.msk.f32.gmra.mxu1 %vm506_vm1, %v8449_v10  ;;  %v14659_v57 = vadd.f32 %v6695_v3, %v6464_v14  ;;  %v8456_v3 = vld [vmem:[#allocation3 + $0xaa] sm:$0xff] }
 0x524   : > { %v6467_v12 = vadd.f32 %v11290_v7, %v14504_v39  ;;  %11627 = vmatprep.mubr.msk.f32.mxu1 %vm506_vm1, %v8450_v19 }
 0x525   : > { %v6315_v2 = vpop.f32.mrf.mxu1  ;;  %v6705_v31 = vpop.f32.mrf.mxu0 }
 0x526   : > { %v14663_v42 = vadd.f32 %v11346_v52, %v6467_v12  ;;  %v6466_v34 = vadd.f32 %v6315_v2, %v14508_v46  ;;  %v8457_v12 = vld [vmem:[#allocation3 + $0xb2] sm:$0xff] }
 0x527   : > { %v11293_v18 = vpop.f32.mrf.mxu1  ;;  %v11349_v35 = vpop.f32.mrf.mxu0  ;;  %11628 = vmatmul.mubr.msk.f32.gmra.mxu1 %vm506_vm1, %v8451_v29 }
 0x528   : > { %v14667_v1 = vadd.f32 %v6705_v31, %v6466_v34  ;;  %v6469_v8 = vadd.f32 %v11293_v18, %v14515_v59  ;;  %11630 = vmatprep.mubr.msk.f32.mxu1 %vm506_vm1, %v8452_v33  ;;  %v8458_v31 = vld [vmem:[#allocation3 + $0xc2] sm:$0xff] }
 0x529   : > { %v6325_v39 = vpop.f32.mrf.mxu1  ;;  %v6715_v50 = vpop.f32.mrf.mxu0 }
 0x52a   : > { %v14671_v5 = vadd.f32 %v11349_v35, %v6469_v8  ;;  %v6468_v32 = vadd.f32 %v6325_v39, %v14519_v17  ;;  %v8459_v8 = vld [vmem:[#allocation3 + $0xca] sm:$0xff] }
 0x52b   : > { %v11296_v46 = vpop.f32.mrf.mxu1  ;;  %v11352_v16 = vpop.f32.mrf.mxu0  ;;  %11631 = vmatmul.mubr.msk.f32.gmra.mxu1 %vm506_vm1, %v8453_v55 }
 0x52c   : > { %v14675_v13 = vadd.f32 %v6715_v50, %v6468_v32  ;;  %v6471_v61 = vadd.f32 %v11296_v46, %v14523_v62  ;;  %11633 = vmatprep.mubr.msk.f32.mxu1 %vm506_vm1, %v8454_v60  ;;  %v8460_v50 = vld [vmem:[#allocation3 + $0xda] sm:$0xff] }
 0x52d   : > { %v6335_v59 = vpop.f32.mrf.mxu1  ;;  %v6725_v54 = vpop.f32.mrf.mxu0 }
 0x52e   : > { %v14679_v43 = vadd.f32 %v11352_v16, %v6471_v61  ;;  %v6470_v37 = vadd.f32 %v6335_v59, %v14527_v49  ;;  %v8461_v61 = vld [vmem:[#allocation3 + $0xe2] sm:$0xff] }
 0x52f   : > { %v11299_v17 = vpop.f32.mrf.mxu1  ;;  %v11355_v40 = vpop.f32.mrf.mxu0  ;;  %11634 = vmatmul.mubr.msk.f32.gmra.mxu1 %vm506_vm1, %v8455_v38 }
 0x530   : > { %v14683_v14 = vadd.f32 %v6725_v54, %v6470_v37  ;;  %v6473_v10 = vadd.f32 %v11299_v17, %v14531_v53  ;;  %11636 = vmatprep.mubr.msk.f32.mxu1 %vm506_vm1, %v8456_v3  ;;  %v8462_v54 = vld [vmem:[#allocation3 + $0xf2] sm:$0xff] }
 0x531   : > { %v6345_v62 = vpop.f32.mrf.mxu1  ;;  %v6735_v7 = vpop.f32.mrf.mxu0 }
 0x532   : > { %v14687_v52 = vadd.f32 %v11355_v40, %v6473_v10  ;;  %v6472_v19 = vadd.f32 %v6345_v62, %v14535_v27  ;;  %v8463_v10 = vld [vmem:[#allocation3 + $0xfa] sm:$0xff] }
 0x533   : > { %v11302_v49 = vpop.f32.mrf.mxu1  ;;  %v11358_v2 = vpop.f32.mrf.mxu0  ;;  %11637 = vmatmul.mubr.msk.f32.gmra.mxu1 %vm506_vm1, %v8457_v12 }
 0x534   : > { %v14691_v34 = vadd.f32 %v6735_v7, %v6472_v19  ;;  %v6475_v29 = vadd.f32 %v11302_v49, %v14539_v15  ;;  %11639 = vmatprep.mubr.msk.f32.mxu1 %vm506_vm1, %v8458_v31  ;;  %v8464_v7 = vld [vmem:[#allocation3 + $0x10a] sm:$0xff] }
 0x535   : > { %v6355_v53 = vpop.f32.mrf.mxu1  ;;  %v6745_v18 = vpop.f32.mrf.mxu0 }
 0x536   : > { %v14695_v35 = vadd.f32 %v11358_v2, %v6475_v29  ;;  %v6474_v33 = vadd.f32 %v6355_v53, %v14543_v25  ;;  %v8465_v29 = vld [vmem:[#allocation3 + $0x112] sm:$0xff] }
 0x537   : > { %v11305_v27 = vpop.f32.mrf.mxu1  ;;  %v11361_v39 = vpop.f32.mrf.mxu0  ;;  %11640 = vmatmul.mubr.msk.f32.gmra.mxu1 %vm506_vm1, %v8459_v8 }
 0x538   : > { %v14699_v32 = vadd.f32 %v6745_v18, %v6474_v33  ;;  %v6477_v55 = vadd.f32 %v11305_v27, %v14547_v22  ;;  %11642 = vmatprep.mubr.msk.f32.mxu1 %vm506_vm1, %v8460_v50  ;;  %v8466_v18 = vld [vmem:[#allocation3 + $0x122] sm:$0xff] }
 0x539   : > { %v6365_v15 = vpop.f32.mrf.mxu1  ;;  %v6755_v46 = vpop.f32.mrf.mxu0 }
 0x53a   : > { %v14703_v16 = vadd.f32 %v11361_v39, %v6477_v55  ;;  %v6476_v60 = vadd.f32 %v6365_v15, %v14552_v21  ;;  %v8467_v55 = vld [vmem:[#allocation3 + $0x12a] sm:$0xff] }
 0x53b   : > { %v11308_v25 = vpop.f32.mrf.mxu1  ;;  %v11364_v59 = vpop.f32.mrf.mxu0  ;;  %11643 = vmatmul.mubr.msk.f32.gmra.mxu1 %vm506_vm1, %v8461_v61 }
 0x53c   : > { %v14707_v37 = vadd.f32 %v6755_v46, %v6476_v60  ;;  %v6479_v38 = vadd.f32 %v11308_v25, %v14557_v6  ;;  %11645 = vmatprep.mubr.msk.f32.mxu1 %vm506_vm1, %v8462_v54  ;;  %v8468_v46 = vld [vmem:[#allocation3 + $0x13a] sm:$0xff] }
 0x53d   : > { %v6375_v22 = vpop.f32.mrf.mxu1  ;;  %v6765_v17 = vpop.f32.mrf.mxu0 }
 0x53e   : > { %v14711_v40 = vadd.f32 %v11364_v59, %v6479_v38  ;;  %v6478_v3 = vadd.f32 %v6375_v22, %v14563_v28  ;;  %v8469_v38 = vld [vmem:[#allocation3 + $0x142] sm:$0xff] }
 0x53f   : > { %v11311_v21 = vpop.f32.mrf.mxu1  ;;  %v11367_v62 = vpop.f32.mrf.mxu0  ;;  %11646 = vmatmul.mubr.msk.f32.gmra.mxu1 %vm506_vm1, %v8463_v10 }
 0x540   : > { %v14715_v19 = vadd.f32 %v6765_v17, %v6478_v3  ;;  %v6481_v12 = vadd.f32 %v11311_v21, %v14569_v63  ;;  %11648 = vmatprep.mubr.msk.f32.mxu1 %vm506_vm1, %v8464_v7  ;;  %v8470_v17 = vld [vmem:[#allocation3 + $0x152] sm:$0xff] }
 0x541   : > { %v6385_v6 = vpop.f32.mrf.mxu1  ;;  %v6775_v49 = vpop.f32.mrf.mxu0 }
 0x542   : > { %v14719_v2 = vadd.f32 %v11367_v62, %v6481_v12  ;;  %v6480_v31 = vadd.f32 %v6385_v6, %v14575_v26  ;;  %v8471_v12 = vld [vmem:[#allocation3 + $0x15a] sm:$0xff] }
 0x543   : > { %v11314_v28 = vpop.f32.mrf.mxu1  ;;  %v11370_v53 = vpop.f32.mrf.mxu0  ;;  %11649 = vmatmul.mubr.msk.f32.gmra.mxu1 %vm506_vm1, %v8465_v29 }
 0x544   : > { %v14723_v33 = vadd.f32 %v6775_v49, %v6480_v31  ;;  %v6483_v8 = vadd.f32 %v11314_v28, %v14581_v45  ;;  %11651 = vmatprep.mubr.msk.f32.mxu1 %vm506_vm1, %v8466_v18  ;;  %v8472_v49 = vld [vmem:[#allocation3 + $0x16a] sm:$0xff] }
 0x545   : > { %v6395_v63 = vpop.f32.mrf.mxu1  ;;  %v6785_v27 = vpop.f32.mrf.mxu0 }
 0x546   : > { %v14727_v39 = vadd.f32 %v11370_v53, %v6483_v8  ;;  %v6482_v50 = vadd.f32 %v6395_v63, %v14587_v48  ;;  %v8473_v8 = vld [vmem:[#allocation3 + $0x172] sm:$0xff] }
 0x547   : > { %v11317_v26 = vpop.f32.mrf.mxu1  ;;  %v11373_v15 = vpop.f32.mrf.mxu0  ;;  %11652 = vmatmul.mubr.msk.f32.gmra.mxu1 %vm506_vm1, %v8467_v55 }
 0x548   : > { %v14731_v60 = vadd.f32 %v6785_v27, %v6482_v50  ;;  %v6485_v61 = vadd.f32 %v11317_v26, %v14593_v36  ;;  %11654 = vmatprep.mubr.msk.f32.mxu1 %vm506_vm1, %v8468_v46  ;;  %v8476_v26 = vld [vmem:[#allocation3 + $0x19a] sm:$0xff] }
 0x549   : > { %v6405_v45 = vpop.f32.mrf.mxu1  ;;  %v6795_v25 = vpop.f32.mrf.mxu0 }
 0x54a   : > { %v14735_v59 = vadd.f32 %v11373_v15, %v6485_v61  ;;  %v6484_v54 = vadd.f32 %v6405_v45, %v14599_v44 }
 0x54b   : > { %v11320_v48 = vpop.f32.mrf.mxu1  ;;  %v11376_v22 = vpop.f32.mrf.mxu0  ;;  %11655 = vmatmul.mubr.msk.f32.gmra.mxu1 %vm506_vm1, %v8469_v38 }
 0x54c   : > { %v14739_v3 = vadd.f32 %v6795_v25, %v6484_v54  ;;  %v6487_v10 = vadd.f32 %v11320_v48, %v14605_v51  ;;  %11657 = vmatprep.mubr.msk.f32.mxu1 %vm506_vm1, %v8470_v17 }
 0x54d   : > { %v6415_v36 = vpop.f32.mrf.mxu1  ;;  %v6805_v21 = vpop.f32.mrf.mxu0 }
 0x54e   : > { %v14743_v62 = vadd.f32 %v11376_v22, %v6487_v10  ;;  %v6486_v7 = vadd.f32 %v6415_v36, %v14611_v11 }
 0x54f   : > { %v11323_v44 = vpop.f32.mrf.mxu1  ;;  %v11379_v6 = vpop.f32.mrf.mxu0  ;;  %11658 = vmatmul.mubr.msk.f32.gmra.mxu1 %vm506_vm1, %v8471_v12 }
 0x550   : > { %v14747_v31 = vadd.f32 %v6805_v21, %v6486_v7  ;;  %v6489_v29 = vadd.f32 %v11323_v44, %v14616_v9  ;;  %11660 = vmatprep.mubr.msk.f32.mxu1 %vm506_vm1, %v8472_v49 }
 0x551   : > { %v6425_v51 = vpop.f32.mrf.mxu1  ;;  %v6815_v28 = vpop.f32.mrf.mxu0 }
 0x552   : > { %v14751_v53 = vadd.f32 %v11379_v6, %v6489_v29  ;;  %v6488_v18 = vadd.f32 %v6425_v51, %v14622_v47 }
 0x553   : > { %v11326_v11 = vpop.f32.mrf.mxu1  ;;  %v11382_v63 = vpop.f32.mrf.mxu0  ;;  %11661 = vmatmul.mubr.msk.f32.gmra.mxu1 %vm506_vm1, %v8473_v8 }
 0x554   : > { %v14755_v27 = vadd.f32 %v6815_v28, %v6488_v18  ;;  %v6491_v50 = vadd.f32 %v11326_v11, %v14626_v0  ;;  %11663 = vmatprep.mubr.msk.f32.mxu1 %vm506_vm1, %v14471_v23  ;;  %v8477_v0 = vld [vmem:[#allocation3 + $0x1a2] sm:$0xff] }
 0x555   : > { %v6435_v9 = vpop.f32.mrf.mxu1  ;;  %v6825_v55 = vpop.f32.mrf.mxu0 }
 0x556   : > { %v14760_v15 = vadd.f32 %v11382_v63, %v6491_v50  ;;  %v6490_v46 = vadd.f32 %v6435_v9, %v14632_v41 }
 0x557   : > { %v11329_v47 = vpop.f32.mrf.mxu1  ;;  %v11385_v61 = vpop.f32.mrf.mxu0  ;;  %11664 = vmatmul.mubr.msk.f32.gmra.mxu1 %vm506_vm1, %v14479_v24 }
 0x558   : > { %v14765_v45 = vadd.f32 %v6825_v55, %v6490_v46  ;;  %v6493_v25 = vadd.f32 %v11329_v47, %v14638_v30  ;;  %11666 = vmatprep.mubr.msk.f32.mxu1 %vm506_vm1, %v8476_v26 }
 0x559   : > { %v6445_v23 = vpop.f32.mrf.mxu1  ;;  %v6835_v54 = vpop.f32.mrf.mxu0 }
 0x55a   : > { %v14769_v38 = vadd.f32 %v11385_v61, %v6493_v25  ;;  %v6492_v48 = vadd.f32 %v6445_v23, %v14642_v56 }
 0x55b   : > { %v11332_v22 = vpop.f32.mrf.mxu1  ;;  %v11388_v41 = vpop.f32.mrf.mxu0  ;;  %11667 = vmatmul.mubr.msk.f32.gmra.mxu1 %vm506_vm1, %v8477_v0 }
 0x55c   : > { %v14773_v17 = vadd.f32 %v6835_v54, %v6492_v48  ;;  %v6495_v24 = vadd.f32 %v11332_v22, %v14646_v58 }
 0x55d   : > { %v6455_v10 = vpop.f32.mrf.mxu1  ;;  %v6845_v36 = vpop.f32.mrf.mxu0 }
 0x55e   : > { %v14776_v30 = vadd.f32 %v11388_v41, %v6495_v24  ;;  %v6494_v21 = vadd.f32 %v6455_v10, %v14649_v20 }
 0x55f   : > { %v11399_v7 = vpop.f32.mrf.mxu1  ;;  %v14779_v12 = vpop.f32.mrf.mxu0 }
 0x560   : > { %v14781_v44 = vadd.f32 %v6845_v36, %v6494_v21  ;;  %v14784_v56 = vadd.f32 %v11399_v7, %v14656_v4 }
 0x561   : > { %v7085_v6 = vpop.f32.mrf.mxu1  ;;  %v14786_v49 = vpop.f32.mrf.mxu0 }
 0x562   : > { %v14789_v29 = vadd.f32 %v7085_v6, %v14659_v57 }
 0x563   : > { %v11402_v58 = vpop.f32.mrf.mxu1  ;;  %v14791_v51 = vpop.f32.mrf.mxu0 }
 0x564   : > { %v14794_v28 = vadd.f32 %v11402_v58, %v14663_v42 }
 0x565   : > { %v7095_v20 = vpop.f32.mrf.mxu1  ;;  %v14796_v18 = vpop.f32.mrf.mxu0 }
 0x566   : > { %v14799_v8 = vadd.f32 %v7095_v20, %v14667_v1 }
 0x567   : > { %v11405_v4 = vpop.f32.mrf.mxu1  ;;  %v14801_v11 = vpop.f32.mrf.mxu0 }
 0x568   : > { %v14804_v63 = vadd.f32 %v11405_v4, %v14671_v5 }
 0x569   : > { %v7105_v57 = vpop.f32.mrf.mxu1  ;;  %v14806_v50 = vpop.f32.mrf.mxu0 }
 0x56a   : > { %v14809_v9 = vadd.f32 %v7105_v57, %v14675_v13 }
 0x56b   : > { %v11408_v42 = vpop.f32.mrf.mxu1  ;;  %v14811_v55 = vpop.f32.mrf.mxu0 }
 0x56c   : > { %v14814_v26 = vadd.f32 %v11408_v42, %v14679_v43 }
 0x56d   : > { %v7115_v1 = vpop.f32.mrf.mxu1  ;;  %v14816_v46 = vpop.f32.mrf.mxu0 }
 0x56e   : > { %v14819_v47 = vadd.f32 %v7115_v1, %v14683_v14 }
 0x56f   : > { %v11411_v5 = vpop.f32.mrf.mxu1  ;;  %v14821_v61 = vpop.f32.mrf.mxu0 }
 0x570   : > { %v14824_v25 = vadd.f32 %v11411_v5, %v14687_v52 }
 0x571   : > { %v7125_v13 = vpop.f32.mrf.mxu1  ;;  %v14826_v0 = vpop.f32.mrf.mxu0 }
 0x572   : > { %v14829_v23 = vadd.f32 %v7125_v13, %v14691_v34 }
 0x573   : > { %v11414_v43 = vpop.f32.mrf.mxu1  ;;  %v14831_v54 = vpop.f32.mrf.mxu0 }
 0x574   : > { %v14834_v48 = vadd.f32 %v11414_v43, %v14695_v35 }
 0x575   : > { %v7135_v14 = vpop.f32.mrf.mxu1  ;;  %v14836_v22 = vpop.f32.mrf.mxu0 }
 0x576   : > { %v14839_v41 = vadd.f32 %v7135_v14, %v14699_v32 }
 0x577   : > { %v11417_v52 = vpop.f32.mrf.mxu1  ;;  %v14841_v24 = vpop.f32.mrf.mxu0 }
 0x578   : > { %v14844_v10 = vadd.f32 %v11417_v52, %v14703_v16 }
 0x579   : > { %v7145_v34 = vpop.f32.mrf.mxu1  ;;  %v14846_v36 = vpop.f32.mrf.mxu0 }
 0x57a   : > { %v14849_v21 = vadd.f32 %v7145_v34, %v14707_v37 }
 0x57b   : > { %v11420_v35 = vpop.f32.mrf.mxu1  ;;  %v14851_v7 = vpop.f32.mrf.mxu0 }
 0x57c   : > { %15512 = vst [vmem:[#allocation63_spill] sm:$0xff] %v14851_v7  ;;  %v14854_v6 = vadd.f32 %v11420_v35, %v14711_v40 }
 0x57d   : > { %v7155_v32 = vpop.f32.mrf.mxu1  ;;  %v14856_v58 = vpop.f32.mrf.mxu0 }
 0x57e   : > { %15513 = vst [vmem:[#allocation12_spill] sm:$0xff] %v14856_v58  ;;  %v14859_v20 = vadd.f32 %v7155_v32, %v14715_v19 }
 0x57f   : > { %v11423_v16 = vpop.f32.mrf.mxu1  ;;  %v14861_v4 = vpop.f32.mrf.mxu0 }
 0x580   : > { %15514 = vst [vmem:[#allocation13_spill] sm:$0xff] %v14859_v20  ;;  %15515 = vst [vmem:[#allocation41_spill] sm:$0xff] %v14861_v4  ;;  %v14864_v57 = vadd.f32 %v11423_v16, %v14719_v2 }
 0x581   : > { %v7165_v37 = vpop.f32.mrf.mxu1  ;;  %v14866_v42 = vpop.f32.mrf.mxu0 }
 0x582   : > { %15516 = vst [vmem:[#allocation42_spill] sm:$0xff] %v14864_v57  ;;  %15517 = vst [vmem:[#allocation24_spill] sm:$0xff] %v14866_v42  ;;  %v14869_v1 = vadd.f32 %v7165_v37, %v14723_v33 }
 0x583   : > { %v11426_v40 = vpop.f32.mrf.mxu1  ;;  %v14871_v5 = vpop.f32.mrf.mxu0 }
 0x584   : > { %15518 = vst [vmem:[#allocation25_spill] sm:$0xff] %v14869_v1  ;;  %15519 = vst [vmem:[#allocation60_spill] sm:$0xff] %v14871_v5  ;;  %v14874_v13 = vadd.f32 %v11426_v40, %v14727_v39 }
 0x585   : > { %v7175_v19 = vpop.f32.mrf.mxu1  ;;  %v14876_v43 = vpop.f32.mrf.mxu0 }
 0x586   : > { %15520 = vst [vmem:[#allocation65_spill] sm:$0xff] %v14874_v13  ;;  %15521 = vst [vmem:[#allocation4_spill] sm:$0xff] %v14876_v43  ;;  %v14879_v14 = vadd.f32 %v7175_v19, %v14731_v60 }
 0x587   : > { %v11429_v2 = vpop.f32.mrf.mxu1  ;;  %v14881_v52 = vpop.f32.mrf.mxu0 }
 0x588   : > { %15522 = vst [vmem:[#allocation5_spill] sm:$0xff] %v14879_v14  ;;  %15523 = vst [vmem:[#allocation43_spill] sm:$0xff] %v14881_v52  ;;  %v14884_v34 = vadd.f32 %v11429_v2, %v14735_v59 }
 0x589   : > { %v7185_v33 = vpop.f32.mrf.mxu1  ;;  %v14886_v35 = vpop.f32.mrf.mxu0 }
 0x58a   : > { %15524 = vst [vmem:[#allocation44_spill] sm:$0xff] %v14884_v34  ;;  %15525 = vst [vmem:[#allocation26_spill] sm:$0xff] %v14886_v35  ;;  %v14889_v32 = vadd.f32 %v7185_v33, %v14739_v3 }
 0x58b   : > { %v11432_v39 = vpop.f32.mrf.mxu1  ;;  %v14891_v16 = vpop.f32.mrf.mxu0 }
 0x58c   : > { %15526 = vst [vmem:[#allocation27_spill] sm:$0xff] %v14889_v32  ;;  %15527 = vst [vmem:[#allocation62_spill] sm:$0xff] %v14891_v16  ;;  %v14894_v37 = vadd.f32 %v11432_v39, %v14743_v62 }
 0x58d   : > { %v7195_v60 = vpop.f32.mrf.mxu1  ;;  %v14896_v40 = vpop.f32.mrf.mxu0 }
 0x58e   : > { %15528 = vst [vmem:[#allocation67_spill] sm:$0xff] %v14894_v37  ;;  %15529 = vst [vmem:[#allocation6_spill] sm:$0xff] %v14896_v40  ;;  %v14899_v19 = vadd.f32 %v7195_v60, %v14747_v31 }
 0x58f   : > { %v11435_v59 = vpop.f32.mrf.mxu1  ;;  %v14901_v2 = vpop.f32.mrf.mxu0 }
 0x590   : > { %15530 = vst [vmem:[#allocation7_spill] sm:$0xff] %v14899_v19  ;;  %15531 = vst [vmem:[#allocation45_spill] sm:$0xff] %v14901_v2  ;;  %v14904_v35 = vadd.f32 %v11435_v59, %v14751_v53 }
 0x591   : > { %v7205_v3 = vpop.f32.mrf.mxu1  ;;  %v14906_v33 = vpop.f32.mrf.mxu0 }
 0x592   : > { %15532 = vst [vmem:[#allocation46_spill] sm:$0xff] %v14904_v35  ;;  %15533 = vst [vmem:[#allocation28_spill] sm:$0xff] %v14906_v33  ;;  %v14909_v16 = vadd.f32 %v7205_v3, %v14755_v27 }
 0x593   : > { %v11438_v62 = vpop.f32.mrf.mxu1  ;;  %v14911_v39 = vpop.f32.mrf.mxu0 }
 0x594   : > { %15534 = vst [vmem:[#allocation29_spill] sm:$0xff] %v14909_v16  ;;  %15535 = vst [vmem:[#allocation64_spill] sm:$0xff] %v14911_v39  ;;  %v14914_v40 = vadd.f32 %v11438_v62, %v14760_v15 }
 0x595   : > { %v7215_v31 = vpop.f32.mrf.mxu1  ;;  %v14916_v60 = vpop.f32.mrf.mxu0 }
 0x596   : > { %15536 = vst [vmem:[#allocation69_spill] sm:$0xff] %v14914_v40  ;;  %15537 = vst [vmem:[#allocation8_spill] sm:$0xff] %v14916_v60  ;;  %v14919_v2 = vadd.f32 %v7215_v31, %v14765_v45 }
 0x597   : > { %v11441_v53 = vpop.f32.mrf.mxu1  ;;  %v14921_v59 = vpop.f32.mrf.mxu0 }
 0x598   : > { %15538 = vst [vmem:[#allocation15_spill] sm:$0xff] %v14919_v2  ;;  %15539 = vst [vmem:[#allocation47_spill] sm:$0xff] %v14921_v59  ;;  %v14924_v33 = vadd.f32 %v11441_v53, %v14769_v38 }
 0x599   : > { %v7225_v27 = vpop.f32.mrf.mxu1  ;;  %v14926_v3 = vpop.f32.mrf.mxu0 }
 0x59a   : > { %15540 = vst [vmem:[#allocation48_spill] sm:$0xff] %v14924_v33  ;;  %15541 = vst [vmem:[#allocation30_spill] sm:$0xff] %v14926_v3  ;;  %v14929_v39 = vadd.f32 %v7225_v27, %v14773_v17 }
 0x59b   : > { %v11444_v15 = vpop.f32.mrf.mxu1  ;;  %v14931_v62 = vpop.f32.mrf.mxu0 }
 0x59c   : > { %15542 = vst [vmem:[#allocation31_spill] sm:$0xff] %v14929_v39  ;;  %15543 = vst [vmem:[#allocation66_spill] sm:$0xff] %v14931_v62  ;;  %v14934_v60 = vadd.f32 %v11444_v15, %v14776_v30 }
 0x59d   : > { %v7235_v45 = vpop.f32.mrf.mxu1  ;;  %v14936_v31 = vpop.f32.mrf.mxu0 }
 0x59e   : > { %15544 = vst [vmem:[#allocation71_spill] sm:$0xff] %v14934_v60  ;;  %15545 = vst [vmem:[#allocation16_spill] sm:$0xff] %v14936_v31  ;;  %v14939_v59 = vadd.f32 %v7235_v45, %v14781_v44 }
 0x59f   : > { %v11511_v38 = vpop.f32.mrf.mxu1  ;;  %v11567_v53 = vpop.f32.mrf.mxu0 }
 0x5a0   : > { %15546 = vst [vmem:[#allocation17_spill] sm:$0xff] %v14939_v59 }
 0x5a1   : > { %v7865_v33 = vpop.f32.mrf.mxu1  ;;  %v8255_v2 = vpop.f32.mrf.mxu0 }
 0x5a3   : > { %v11514_v3 = vpop.f32.mrf.mxu1  ;;  %v11570_v17 = vpop.f32.mrf.mxu0 }
 0x5a5   : > { %v7875_v40 = vpop.f32.mrf.mxu1  ;;  %v14943_v62 = vpop.f32.mrf.mxu0 }
 0x5a7   : > { %v11517_v27 = vpop.f32.mrf.mxu1  ;;  %v14949_v31 = vpop.f32.mrf.mxu0 }
 0x5a9   : > { %v14941_v39 = vpop.f32.mrf.mxu1  ;;  %v14955_v59 = vpop.f32.mrf.mxu0 }
 0x5ab   : > { %v14945_v30 = vpop.f32.mrf.mxu1  ;;  %v14961_v35 = vpop.f32.mrf.mxu0 }
 0x5ad   : > { %v14947_v15 = vpop.f32.mrf.mxu1  ;;  %v14967_v32 = vpop.f32.mrf.mxu0 }
 0x5af   : > { %v14951_v44 = vpop.f32.mrf.mxu1  ;;  %v14973_v43 = vpop.f32.mrf.mxu0 }
 0x5b1   : > { %v14953_v45 = vpop.f32.mrf.mxu1  ;;  %v14979_v13 = vpop.f32.mrf.mxu0 }
 0x5b3   : > { %v14957_v60 = vpop.f32.mrf.mxu1  ;;  %v14985_v4 = vpop.f32.mrf.mxu0 }
 0x5b5   : > { %v14959_v16 = vpop.f32.mrf.mxu1 }
 0x5b7   : > { %v14963_v19 = vpop.f32.mrf.mxu1 }
 0x5b9   : > { %v14965_v37 = vpop.f32.mrf.mxu1 }
 0x5ba   : > { %15547 = vst [vmem:[#allocation49_spill] sm:$0xff] %v14965_v37 }
 0x5bb   : > { %v14969_v52 = vpop.f32.mrf.mxu1 }
 0x5bc   : > { %15548 = vst [vmem:[#allocation50_spill] sm:$0xff] %v14969_v52  ;;  %v14991_v52 = vpop.f32.mrf.mxu0 }
 0x5bd   : > { %v14971_v34 = vpop.f32.mrf.mxu1  ;;  %15556 = vst [vmem:[#allocation34_spill] sm:$0xff] %v14991_v52 }
 0x5be   : > { %15549 = vst [vmem:[#allocation32_spill] sm:$0xff] %v14971_v34 }
 0x5bf   : > { %v14975_v14 = vpop.f32.mrf.mxu1 }
 0x5c0   : > { %15550 = vst [vmem:[#allocation33_spill] sm:$0xff] %v14975_v14  ;;  %v14997_v14 = vpop.f32.mrf.mxu0 }
 0x5c1   : > { %v14977_v5 = vpop.f32.mrf.mxu1  ;;  %15559 = vst [vmem:[#allocation53_spill] sm:$0xff] %v14997_v14 }
 0x5c2   : > { %15551 = vst [vmem:[#allocation68_spill] sm:$0xff] %v14977_v5 }
 0x5c3   : > { %v14981_v42 = vpop.f32.mrf.mxu1 }
 0x5c4   : > { %15552 = vst [vmem:[#allocation18_spill] sm:$0xff] %v14981_v42  ;;  %v15003_v42 = vpop.f32.mrf.mxu0 }
 0x5c5   : > { %v14983_v1 = vpop.f32.mrf.mxu1  ;;  %15562 = vst [vmem:[#allocation72_spill] sm:$0xff] %v15003_v42 }
 0x5c6   : > { %15553 = vst [vmem:[#allocation19_spill] sm:$0xff] %v14983_v1 }
 0x5c7   : > { %v14987_v57 = vpop.f32.mrf.mxu1 }
 0x5c8   : > { %15554 = vst [vmem:[#allocation51_spill] sm:$0xff] %v14987_v57  ;;  %v15009_v57 = vpop.f32.mrf.mxu0 }
 0x5c9   : > { %v14989_v58 = vpop.f32.mrf.mxu1  ;;  %15565 = vst [vmem:[#allocation57_spill] sm:$0xff] %v15009_v57 }
 0x5ca   : > { %15555 = vst [vmem:[#allocation52_spill] sm:$0xff] %v14989_v58 }
 0x5cb   : > { %v14993_v34 = vpop.f32.mrf.mxu1 }
 0x5cc   : > { %15557 = vst [vmem:[#allocation35_spill] sm:$0xff] %v14993_v34  ;;  %v7635_v34 = vadd.f32 %v14779_v12, %v14784_v56 }
 0x5cd   : > { %v14995_v20 = vpop.f32.mrf.mxu1 }
 0x5ce   : > { %15558 = vst [vmem:[#allocation70_spill] sm:$0xff] %v14995_v20  ;;  %v8025_v14 = vadd.f32 %v11511_v38, %v7635_v34 }
 0x5cf   : > { %v14999_v5 = vpop.f32.mrf.mxu1 }
 0x5d0   : > { %15560 = vst [vmem:[#allocation54_spill] sm:$0xff] %v14999_v5  ;;  %v7634_v5 = vadd.f32 %v14786_v49, %v14789_v29  ;;  %v8415_v12 = vadd.f32 %v11567_v53, %v8025_v14  ;;  %v7639_v49 = vadd.f32 %v14801_v11, %v14804_v63 }
 0x5d1   : > { %v15001_v37 = vpop.f32.mrf.mxu1 }
 0x5d2   : > { %15561 = vst [vmem:[#allocation36_spill] sm:$0xff] %v15001_v37  ;;  %v15019_v37 = vpop.f32.mrf.mxu0 }
 0x5d3   : > { %v15005_v1 = vpop.f32.mrf.mxu1 }
 0x5d4   : > { %15563 = vst [vmem:[#allocation55_spill] sm:$0xff] %v15005_v1  ;;  %v8024_v1 = vadd.f32 %v7865_v33, %v7634_v5  ;;  %v8029_v5 = vadd.f32 %v11517_v27, %v7639_v49 }
 0x5d5   : > { %v15007_v7 = vpop.f32.mrf.mxu1 }
 0x5d6   : > { %15564 = vst [vmem:[#allocation56_spill] sm:$0xff] %v15007_v7  ;;  %v7637_v7 = vadd.f32 %v14791_v51, %v14794_v28  ;;  %v8414_v29 = vadd.f32 %v8255_v2, %v8024_v1  ;;  %v7638_v51 = vadd.f32 %v14806_v50, %v14809_v9  ;;  %v7640_v9 = vadd.f32 %v14816_v46, %v14819_v47 }
 0x5d7   : > { %v15011_v58 = vpop.f32.mrf.mxu1  ;;  %v7642_v47 = vadd.f32 %v14826_v0, %v14829_v23  ;;  %v7644_v23 = vadd.f32 %v14836_v22, %v14839_v41  ;;  %v7646_v41 = vadd.f32 %v14846_v36, %v14849_v21  ;;  %v15572_v21 = vld [vmem:[#allocation13_spill] sm:$0xff] }
 0x5d8   : > { %15566 = vst [vmem:[#allocation73_spill] sm:$0xff] %v15011_v58  ;;  %v7636_v58 = vadd.f32 %v14796_v18, %v14799_v8  ;;  %v8027_v56 = vadd.f32 %v11514_v3, %v7637_v7  ;;  %v7641_v7 = vadd.f32 %v14811_v55, %v14814_v26  ;;  %v8028_v63 = vadd.f32 %v14941_v39, %v7638_v51 }
 0x5d9   : > { %v15015_v20 = vpop.f32.mrf.mxu1  ;;  %v7643_v26 = vadd.f32 %v14821_v61, %v14824_v25  ;;  %v8030_v2 = vadd.f32 %v14947_v15, %v7640_v9  ;;  %v7645_v25 = vadd.f32 %v14831_v54, %v14834_v48  ;;  %v7647_v48 = vadd.f32 %v14841_v24, %v14844_v10  ;;  %v15569_v10 = vld [vmem:[#allocation63_spill] sm:$0xff]  ;;  %v15578_v9 = vld [vmem:[#allocation72_spill] sm:$0xff] }
 0x5da   : > { %15567 = vst [vmem:[#allocation39_spill] sm:$0xff] %v15015_v20  ;;  %v15029_v20 = vpop.f32.mrf.mxu0  ;;  %v8026_v34 = vadd.f32 %v7875_v40, %v7636_v58  ;;  %v8417_v28 = vadd.f32 %v11570_v17, %v8027_v56  ;;  %v8031_v1 = vadd.f32 %v14945_v30, %v7641_v7  ;;  %v8418_v40 = vadd.f32 %v14955_v59, %v8028_v63  ;;  %v15576_v63 = vld [vmem:[#allocation42_spill] sm:$0xff] }
 0x5db   : > { %v15021_v42 = vpop.f32.mrf.mxu1  ;;  %v8420_v59 = vadd.f32 %v14967_v32, %v8030_v2  ;;  %v8032_v17 = vadd.f32 %v14953_v45, %v7642_v47  ;;  %v8035_v30 = vadd.f32 %v14957_v60, %v7645_v25  ;;  %v8034_v45 = vadd.f32 %v14959_v16, %v7644_v23  ;;  %v15570_v16 = vld [vmem:[#allocation34_spill] sm:$0xff]  ;;  %v15581_v2 = vld [vmem:[#allocation24_spill] sm:$0xff] }
 0x5dc   : > { %15568 = vst [vmem:[#allocation40_spill] sm:$0xff] %v15021_v42  ;;  %v15036_v18 = vpop.f32.mrf.mxu0  ;;  %v8416_v11 = vadd.f32 %v14943_v62, %v8026_v34  ;;  %v8421_v3 = vadd.f32 %v14961_v35, %v8031_v1  ;;  %v8033_v62 = vadd.f32 %v14951_v44, %v7643_v26  ;;  %v8037_v60 = vadd.f32 %v14963_v19, %v7647_v48  ;;  %v15571_v34 = vld [vmem:[#allocation49_spill] sm:$0xff]  ;;  %v15579_v1 = vld [vmem:[#allocation32_spill] sm:$0xff] }
 0x5dd   : > { %v15025_v57 = vpop.f32.mrf.mxu1  ;;  %v8422_v32 = vadd.f32 %v14979_v13, %v8032_v17  ;;  %v7649_v13 = vadd.f32 %v15569_v10, %v14854_v6  ;;  %v15585_v17 = vld [vmem:[#allocation60_spill] sm:$0xff] }
 0x5de   : > { %v8423_v35 = vadd.f32 %v14973_v43, %v8033_v62  ;;  %v8425_v43 = vadd.f32 %v14985_v4, %v8035_v30  ;;  %v15573_v4 = vld [vmem:[#allocation12_spill] sm:$0xff] }
 0x5df   : > { %v11623_v52 = vpop.f32.mrf.mxu1  ;;  %v7648_v19 = vadd.f32 %v15573_v4, %v15572_v21  ;;  %v15586_v23 = vld [vmem:[#allocation68_spill] sm:$0xff]  ;;  %v15595_v21 = vld [vmem:[#allocation51_spill] sm:$0xff] }
 0x5e0   : > { %v8805_v38 = vadd.f32 %v11623_v52, %v8415_v12  ;;  %v15048_v52 = vpop.f32.mrf.mxu0  ;;  %v15588_v48 = vld [vmem:[#allocation4_spill] sm:$0xff] }
 0x5e1   : > { %v8645_v42 = vpop.f32.mrf.mxu1 }
 0x5e2   : > { %v8804_v33 = vadd.f32 %v8645_v42, %v8414_v29  ;;  %8870 = vrot.lane.b32.xlu1 %v8805_v38, %s11690_s30  ;;  %v8419_v42 = vadd.f32 %v14949_v31, %v8029_v5  ;;  %v15060_v53 = vpop.f32.mrf.mxu0  ;;  %v8424_v29 = vadd.f32 %v15570_v16, %v8034_v45  ;;  %v8036_v38 = vadd.f32 %v15571_v34, %v7646_v41 }
 0x5e3   : > { %v11626_v8 = vpop.f32.mrf.mxu1 }
 0x5e4   : > { %v8807_v58 = vadd.f32 %v11626_v8, %v8417_v28  ;;  %8868 = vrot.lane.b32.xlu0 %v8804_v33, %s11690_s30  ;;  %v15072_v44 = vpop.f32.mrf.mxu0  ;;  %v15574_v28 = vld [vmem:[#allocation53_spill] sm:$0xff]  ;;  %v15575_v33 = vld [vmem:[#allocation50_spill] sm:$0xff] }
 0x5e5   : > { %v8655_v50 = vpop.f32.mrf.mxu1  ;;  %v8427_v5 = vadd.f32 %v15574_v28, %v8037_v60  ;;  %v8039_v8 = vadd.f32 %v15575_v33, %v7649_v13  ;;  %v15592_v13 = vld [vmem:[#allocation19_spill] sm:$0xff] }
 0x5e6   : > { %v8806_v14 = vadd.f32 %v8655_v50, %v8416_v11  ;;  %8874 = vrot.lane.b32.xlu1 %v8807_v58, %s11690_s30  ;;  %v15084_v49 = vpop.f32.mrf.mxu0  ;;  %v15577_v58 = vld [vmem:[#allocation41_spill] sm:$0xff]  ;;  %v15596_v33 = vld [vmem:[#allocation67_spill] sm:$0xff] }
 0x5e7   : > { %v11629_v55 = vpop.f32.mrf.mxu1  ;;  %v7651_v50 = vadd.f32 %v15577_v58, %v15576_v63 }
 0x5e8   : > { %v8809_v39 = vadd.f32 %v11629_v55, %v8419_v42  ;;  %8872 = vrot.lane.b32.xlu0 %v8806_v14, %s11690_s30  ;;  %v11600_v11 = vpop.f32.mrf.mxu0  ;;  %v8426_v42 = vadd.f32 %v15578_v9, %v8036_v38  ;;  %v8038_v14 = vadd.f32 %v15579_v1, %v7648_v19  ;;  %v15593_v38 = vld [vmem:[#allocation27_spill] sm:$0xff] }
 0x5e9   : > { %v8665_v46 = vpop.f32.mrf.mxu1  ;;  %v15599_v9 = vld [vmem:[#allocation7_spill] sm:$0xff] }
 0x5ea   : > { %v8808_v31 = vadd.f32 %v8665_v46, %v8418_v40  ;;  %8878 = vrot.lane.b32.xlu1 %v8809_v39, %s11690_s30  ;;  %v15580_v40 = vld [vmem:[#allocation25_spill] sm:$0xff] }
 0x5eb   : > { %v11632_v61 = vpop.f32.mrf.mxu1  ;;  %v7650_v39 = vadd.f32 %v15581_v2, %v15580_v40  ;;  %v15582_v46 = vld [vmem:[#allocation57_spill] sm:$0xff] }
 0x5ec   : > { %v8811_v27 = vadd.f32 %v11632_v61, %v8421_v3  ;;  %8876 = vrot.lane.b32.xlu0 %v8808_v31, %s11690_s30  ;;  %v8429_v47 = vadd.f32 %v15582_v46, %v8039_v8  ;;  %v15583_v3 = vld [vmem:[#allocation33_spill] sm:$0xff]  ;;  %v8365_v61 = vpop.f32.mrf.mxu0 }
 0x5ed   : > { %v8675_v0 = vpop.f32.mrf.mxu1  ;;  %v8041_v62 = vadd.f32 %v15583_v3, %v7651_v50  ;;  %v15604_v3 = vld [vmem:[#allocation70_spill] sm:$0xff] }
 0x5ee   : > { %v8810_v15 = vadd.f32 %v8675_v0, %v8420_v59  ;;  %8882 = vrot.lane.b32.xlu1 %v8811_v27, %s11690_s30  ;;  %v15584_v59 = vld [vmem:[#allocation65_spill] sm:$0xff]  ;;  %v8428_v0 = vadd.f32 %v15019_v37, %v8038_v14  ;;  %v15591_v37 = vld [vmem:[#allocation43_spill] sm:$0xff] }
 0x5ef   : > { %v11635_v54 = vpop.f32.mrf.mxu1  ;;  %v7653_v27 = vadd.f32 %v15585_v17, %v15584_v59  ;;  %v8431_v45 = vadd.f32 %v15029_v20, %v8041_v62  ;;  %v15594_v20 = vld [vmem:[#allocation26_spill] sm:$0xff]  ;;  %v15601_v14 = vld [vmem:[#allocation35_spill] sm:$0xff]  ;;  %v15605_v59 = vld [vmem:[#allocation29_spill] sm:$0xff] }
 0x5f0   : > { %v8813_v12 = vadd.f32 %v11635_v54, %v8423_v35  ;;  %8880 = vrot.lane.b32.xlu0 %v8810_v15, %s11690_s30  ;;  %v8040_v35 = vadd.f32 %v15586_v23, %v7650_v39  ;;  %v15587_v54 = vld [vmem:[#allocation5_spill] sm:$0xff]  ;;  %v15602_v39 = vld [vmem:[#allocation46_spill] sm:$0xff] }
 0x5f1   : > { %v8685_v22 = vpop.f32.mrf.mxu1 }
 0x5f2   : > { %v8812_v56 = vadd.f32 %v8685_v22, %v8422_v32  ;;  %8886 = vrot.lane.b32.xlu1 %v8813_v12, %s11690_s30  ;;  %v7652_v32 = vadd.f32 %v15588_v48, %v15587_v54  ;;  %v15589_v12 = vld [vmem:[#allocation18_spill] sm:$0xff]  ;;  %v8430_v10 = vadd.f32 %v15036_v18, %v8040_v35  ;;  %v15608_v54 = vld [vmem:[#allocation69_spill] sm:$0xff]  ;;  %v15609_v48 = vld [vmem:[#allocation64_spill] sm:$0xff] }
 0x5f3   : > { %v11638_v24 = vpop.f32.mrf.mxu1  ;;  %v8043_v22 = vadd.f32 %v15589_v12, %v7653_v27  ;;  %v15597_v18 = vld [vmem:[#allocation62_spill] sm:$0xff] }
 0x5f4   : > { %v8815_v51 = vadd.f32 %v11638_v24, %v8425_v43  ;;  %8884 = vrot.lane.b32.xlu0 %v8812_v56, %s11690_s30  ;;  %v11603_v43 = vpop.f32.mrf.mxu0  ;;  %v15590_v56 = vld [vmem:[#allocation44_spill] sm:$0xff]  ;;  %v8042_v16 = vadd.f32 %v15592_v13, %v7652_v32  ;;  %v7657_v8 = vadd.f32 %v15597_v18, %v15596_v33  ;;  %v15619_v18 = vld [vmem:[#allocation73_spill] sm:$0xff] }
 0x5f5   : > { %v8695_v36 = vpop.f32.mrf.mxu1  ;;  %v7655_v24 = vadd.f32 %v15591_v37, %v15590_v56  ;;  %v15612_v56 = vld [vmem:[#allocation8_spill] sm:$0xff] }
 0x5f6   : > { %v8814_v7 = vadd.f32 %v8695_v36, %v8424_v29  ;;  %8890 = vrot.lane.b32.xlu1 %v8815_v51, %s11690_s30  ;;  %v7654_v51 = vadd.f32 %v15594_v20, %v15593_v38  ;;  %v8433_v36 = vadd.f32 %v15048_v52, %v8043_v22  ;;  %v8375_v28 = vpop.f32.mrf.mxu0  ;;  %v15600_v52 = vld [vmem:[#allocation6_spill] sm:$0xff]  ;;  %v15615_v38 = vld [vmem:[#allocation47_spill] sm:$0xff] }
 0x5f7   : > { %v11641_v6 = vpop.f32.mrf.mxu1  ;;  %v8045_v4 = vadd.f32 %v15595_v21, %v7655_v24  ;;  %v15613_v24 = vld [vmem:[#allocation55_spill] sm:$0xff] }
 0x5f8   : > { %v8817_v55 = vadd.f32 %v11641_v6, %v8427_v5  ;;  %8888 = vrot.lane.b32.xlu0 %v8814_v7, %s11690_s30  ;;  %v8432_v7 = vadd.f32 %v15060_v53, %v8042_v16  ;;  %v15598_v6 = vld [vmem:[#allocation52_spill] sm:$0xff]  ;;  %v11606_v40 = vpop.f32.mrf.mxu0  ;;  %v15603_v53 = vld [vmem:[#allocation45_spill] sm:$0xff] }
 0x5f9   : > { %v8705_v26 = vpop.f32.mrf.mxu1  ;;  %v8044_v63 = vadd.f32 %v15598_v6, %v7654_v51  ;;  %v8435_v1 = vadd.f32 %v15072_v44, %v8045_v4  ;;  %v7659_v46 = vadd.f32 %v15603_v53, %v15602_v39  ;;  %v15606_v44 = vld [vmem:[#allocation28_spill] sm:$0xff] }
 0x5fa   : > { %v8816_v31 = vadd.f32 %v8705_v26, %v8426_v42  ;;  %8894 = vrot.lane.b32.xlu1 %v8817_v55, %s11690_s30  ;;  %v7656_v42 = vadd.f32 %v15600_v52, %v15599_v9  ;;  %v8047_v55 = vadd.f32 %v15601_v14, %v7657_v8  ;;  %v7658_v17 = vadd.f32 %v15606_v44, %v15605_v59  ;;  %v15616_v51 = vld [vmem:[#allocation56_spill] sm:$0xff]  ;;  %v15622_v52 = vld [vmem:[#allocation39_spill] sm:$0xff] }
 0x5fb   : > { %v11644_v25 = vpop.f32.mrf.mxu1  ;;  %v15625_v53 = vld [vmem:[#allocation40_spill] sm:$0xff] }
 0x5fc   : > { %v8819_v30 = vadd.f32 %v11644_v25, %v8429_v47  ;;  %8892 = vrot.lane.b32.xlu0 %v8816_v31, %s11690_s30  ;;  %v8434_v47 = vadd.f32 %v15084_v49, %v8044_v63  ;;  %v8046_v62 = vadd.f32 %v15604_v3, %v7656_v42  ;;  %v8437_v27 = vadd.f32 %v11600_v11, %v8047_v55 }
 0x5fd   : > { %v8715_v15 = vpop.f32.mrf.mxu1  ;;  %v7661_v49 = vadd.f32 %v15609_v48, %v15608_v54 }
 0x5fe   : > { %v8818_v41 = vadd.f32 %v8715_v15, %v8428_v0  ;;  %8898 = vrot.lane.b32.xlu1 %v8819_v30, %s11690_s30  ;;  %v15607_v0 = vld [vmem:[#allocation54_spill] sm:$0xff]  ;;  %v8385_v30 = vpop.f32.mrf.mxu0  ;;  %v8436_v32 = vadd.f32 %v8365_v61, %v8046_v62 }
 0x5ff   : > { %v11647_v60 = vpop.f32.mrf.mxu1  ;;  %v8049_v23 = vadd.f32 %v15607_v0, %v7659_v46 }
 0x600   : > { %v8821_v29 = vadd.f32 %v11647_v60, %v8431_v45  ;;  %8896 = vrot.lane.b32.xlu0 %v8818_v41, %s11690_s30  ;;  %v15610_v45 = vld [vmem:[#allocation36_spill] sm:$0xff]  ;;  %v15611_v60 = vld [vmem:[#allocation15_spill] sm:$0xff]  ;;  %v11609_v16 = vpop.f32.mrf.mxu0 }
 0x601   : > { %v8725_v34 = vpop.f32.mrf.mxu1  ;;  %v8048_v12 = vadd.f32 %v15610_v45, %v7658_v17  ;;  %v7660_v11 = vadd.f32 %v15612_v56, %v15611_v60  ;;  %v8439_v37 = vadd.f32 %v11603_v43, %v8049_v23 }
 0x602   : > { %v8820_v19 = vadd.f32 %v8725_v34, %v8430_v10  ;;  %8902 = vrot.lane.b32.xlu1 %v8821_v29, %s11690_s30  ;;  %v8051_v10 = vadd.f32 %v15613_v24, %v7661_v49  ;;  %v15614_v34 = vld [vmem:[#allocation48_spill] sm:$0xff]  ;;  %v8395_v6 = vpop.f32.mrf.mxu0 }
 0x603   : > { %v11650_v5 = vpop.f32.mrf.mxu1  ;;  %v7663_v61 = vadd.f32 %v15615_v38, %v15614_v34  ;;  %v8438_v20 = vadd.f32 %v8375_v28, %v8048_v12 }
 0x604   : > { %v8823_v58 = vadd.f32 %v11650_v5, %v8433_v36  ;;  %8900 = vrot.lane.b32.xlu0 %v8820_v19, %s11690_s30  ;;  %v8050_v36 = vadd.f32 %v15616_v51, %v7660_v11  ;;  %v15617_v19 = vld [vmem:[#allocation31_spill] sm:$0xff]  ;;  %v15618_v5 = vld [vmem:[#allocation30_spill] sm:$0xff]  ;;  %v8441_v33 = vadd.f32 %v11606_v40, %v8051_v10  ;;  %v11612_v14 = vpop.f32.mrf.mxu0  ;;  %v15624_v40 = vld [vmem:[#allocation16_spill] sm:$0xff] }
 0x605   : > { %v8735_v50 = vpop.f32.mrf.mxu1  ;;  %v7662_v43 = vadd.f32 %v15618_v5, %v15617_v19  ;;  %v8053_v8 = vadd.f32 %v15619_v18, %v7663_v61 }
 0x606   : > { %v8822_v26 = vadd.f32 %v8735_v50, %v8432_v7  ;;  %8906 = vrot.lane.b32.xlu1 %v8823_v58, %s11690_s30  ;;  %v15620_v58 = vld [vmem:[#allocation71_spill] sm:$0xff]  ;;  %v15621_v50 = vld [vmem:[#allocation66_spill] sm:$0xff]  ;;  %v8440_v9 = vadd.f32 %v8385_v30, %v8050_v36  ;;  %v8405_v59 = vpop.f32.mrf.mxu0 }
 0x607   : > { %v11653_v2 = vpop.f32.mrf.mxu1  ;;  %v7665_v28 = vadd.f32 %v15621_v50, %v15620_v58  ;;  %v8052_v42 = vadd.f32 %v15622_v52, %v7662_v43  ;;  %v8443_v39 = vadd.f32 %v11609_v16, %v8053_v8 }
 0x608   : > { %v8825_v31 = vadd.f32 %v11653_v2, %v8435_v1  ;;  %8904 = vrot.lane.b32.xlu0 %v8822_v26, %s11690_s30  ;;  %v15623_v26 = vld [vmem:[#allocation17_spill] sm:$0xff] }
 0x609   : > { %v8745_v25 = vpop.f32.mrf.mxu1  ;;  %v7664_v2 = vadd.f32 %v15624_v40, %v15623_v26  ;;  %v8055_v46 = vadd.f32 %v15625_v53, %v7665_v28  ;;  %v8442_v62 = vadd.f32 %v8395_v6, %v8052_v42 }
 0x60a   : > { %v8824_v35 = vadd.f32 %v8745_v25, %v8434_v47  ;;  %8910 = vrot.lane.b32.xlu1 %v8825_v31, %s11690_s30 }
 0x60b   : > { %v11656_v15 = vpop.f32.mrf.mxu1  ;;  %v8054_v31 = vadd.f32 %v15025_v57, %v7664_v2  ;;  %v8445_v17 = vadd.f32 %v11612_v14, %v8055_v46 }
 0x60c   : > { %v8827_v22 = vadd.f32 %v11656_v15, %v8437_v27  ;;  %8908 = vrot.lane.b32.xlu0 %v8824_v35, %s11690_s30 }
 0x60d   : > { %v8755_v41 = vpop.f32.mrf.mxu1  ;;  %v8444_v23 = vadd.f32 %v8405_v59, %v8054_v31 }
 0x60e   : > { %v8826_v13 = vadd.f32 %v8755_v41, %v8436_v32  ;;  %8914 = vrot.lane.b32.xlu1 %v8827_v22, %s11690_s30 }
 0x60f   : > { %v11659_v29 = vpop.f32.mrf.mxu1 }
 0x610   : > { %v8829_v21 = vadd.f32 %v11659_v29, %v8439_v37  ;;  %8912 = vrot.lane.b32.xlu0 %v8826_v13, %s11690_s30 }
 0x611   : > { %v8765_v4 = vpop.f32.mrf.mxu1 }
 0x612   : > { %v8828_v7 = vadd.f32 %v8765_v4, %v8438_v20  ;;  %8918 = vrot.lane.b32.xlu1 %v8829_v21, %s11690_s30 }
 0x613   : > { %v11662_v63 = vpop.f32.mrf.mxu1 }
 0x614   : > { %v8831_v1 = vadd.f32 %v11662_v63, %v8441_v33  ;;  %8916 = vrot.lane.b32.xlu0 %v8828_v7, %s11690_s30 }
 0x615   : > { %v8775_v55 = vpop.f32.mrf.mxu1 }
 0x616   : > { %v8830_v47 = vadd.f32 %v8775_v55, %v8440_v9  ;;  %8922 = vrot.lane.b32.xlu1 %v8831_v1, %s11690_s30 }
 0x617   : > { %v11665_v3 = vpop.f32.mrf.mxu1 }
 0x618   : > { %v8833_v25 = vadd.f32 %v11665_v3, %v8443_v39  ;;  %8920 = vrot.lane.b32.xlu0 %v8830_v47, %s11690_s30 }
 0x619   : > { %v8785_v44 = vpop.f32.mrf.mxu1 }
 0x61a   : > { %v8832_v27 = vadd.f32 %v8785_v44, %v8442_v62  ;;  %8926 = vrot.lane.b32.xlu1 %v8833_v25, %s11690_s30 }
 0x61b   : > { %v11668_v0 = vpop.f32.mrf.mxu1 }
 0x61c   : > { %v8835_v35 = vadd.f32 %v11668_v0, %v8445_v17  ;;  %8924 = vrot.lane.b32.xlu0 %v8832_v27, %s11690_s30 }
 0x61d   : > { %v8795_v30 = vpop.f32.mrf.mxu1 }
 0x61e   : > { %v8834_v15 = vadd.f32 %v8795_v30, %v8444_v23  ;;  %8930 = vrot.lane.b32.xlu1 %v8835_v35, %s11690_s30 }
 0x620   : > { %8928 = vrot.lane.b32.xlu0 %v8834_v15, %s11690_s30 }
 0x654   : > { %v8871_v57 = vpop.permute.xlu1 %8870 }
 0x655   : > { %8966 = vst.msk [vmem:[#allocation2 + $0x8] sm:$0xff] %vm8964_vm6, %v8871_v57 }
 0x656   : > { %v8869_v54 = vpop.permute.xlu0 %8868 }
 0x657   : > { %8965 = vst.msk [vmem:[#allocation2] sm:$0xff] %vm8964_vm6, %v8869_v54 }
 0x658   : > { %v8875_v48 = vpop.permute.xlu1 %8874 }
 0x659   : > { %8968 = vst.msk [vmem:[#allocation2 + $0x18] sm:$0xff] %vm8964_vm6, %v8875_v48 }
 0x65a   : > { %v8873_v49 = vpop.permute.xlu0 %8872 }
 0x65b   : > { %8967 = vst.msk [vmem:[#allocation2 + $0x10] sm:$0xff] %vm8964_vm6, %v8873_v49 }
 0x65c   : > { %v8998_v32 = vld [vmem:[#allocation2 + $0x8] sm:$0xff]  ;;  %v8879_v45 = vpop.permute.xlu1 %8878 }
 0x65d   : > { %9031 = vst.msk [vmem:[%s15183_s16 + $0x8] sm:$0xff] %vm9029_vm7, %v8998_v32 }
 0x65e   : > { %8970 = vst.msk [vmem:[#allocation2 + $0x28] sm:$0xff] %vm8964_vm6, %v8879_v45  ;;  %v8997_v12 = vld [vmem:[#allocation2] sm:$0xff]  ;;  %v8877_v22 = vpop.permute.xlu0 %8876 }
 0x65f   : > { %9030 = vst.msk [vmem:[%s15183_s16] sm:$0xff] %vm9029_vm7, %v8997_v12 }
 0x660   : > { %8969 = vst.msk [vmem:[#allocation2 + $0x20] sm:$0xff] %vm8964_vm6, %v8877_v22  ;;  %v9000_v41 = vld [vmem:[#allocation2 + $0x18] sm:$0xff]  ;;  %v8883_v60 = vpop.permute.xlu1 %8882 }
 0x661   : > { %9033 = vst.msk [vmem:[%s15183_s16 + $0x18] sm:$0xff] %vm9029_vm7, %v9000_v41 }
 0x662   : > { %8972 = vst.msk [vmem:[#allocation2 + $0x38] sm:$0xff] %vm8964_vm6, %v8883_v60  ;;  %v8999_v56 = vld [vmem:[#allocation2 + $0x10] sm:$0xff]  ;;  %v8881_v11 = vpop.permute.xlu0 %8880 }
 0x663   : > { %9032 = vst.msk [vmem:[%s15183_s16 + $0x10] sm:$0xff] %vm9029_vm7, %v8999_v56 }
 0x664   : > { %8971 = vst.msk [vmem:[#allocation2 + $0x30] sm:$0xff] %vm8964_vm6, %v8881_v11  ;;  %v8887_v24 = vpop.permute.xlu1 %8886 }
 0x665   : > { %v9002_v37 = vld [vmem:[#allocation2 + $0x28] sm:$0xff]  ;;  %8974 = vst.msk [vmem:[#allocation2 + $0x48] sm:$0xff] %vm8964_vm6, %v8887_v24 }
 0x666   : > { %9035 = vst.msk [vmem:[%s15183_s16 + $0x28] sm:$0xff] %vm9029_vm7, %v9002_v37  ;;  %v8885_v13 = vpop.permute.xlu0 %8884 }
 0x667   : > { %v9001_v10 = vld [vmem:[#allocation2 + $0x20] sm:$0xff]  ;;  %8973 = vst.msk [vmem:[#allocation2 + $0x40] sm:$0xff] %vm8964_vm6, %v8885_v13 }
 0x668   : > { %9034 = vst.msk [vmem:[%s15183_s16 + $0x20] sm:$0xff] %vm9029_vm7, %v9001_v10  ;;  %v8891_v29 = vpop.permute.xlu1 %8890 }
 0x669   : > { %v9004_v16 = vld [vmem:[#allocation2 + $0x38] sm:$0xff]  ;;  %8976 = vst.msk [vmem:[#allocation2 + $0x58] sm:$0xff] %vm8964_vm6, %v8891_v29 }
 0x66a   : > { %9037 = vst.msk [vmem:[%s15183_s16 + $0x38] sm:$0xff] %vm9029_vm7, %v9004_v16  ;;  %v8889_v38 = vpop.permute.xlu0 %8888 }
 0x66b   : > { %v9003_v34 = vld [vmem:[#allocation2 + $0x30] sm:$0xff]  ;;  %8975 = vst.msk [vmem:[#allocation2 + $0x50] sm:$0xff] %vm8964_vm6, %v8889_v38 }
 0x66c   : > { %9036 = vst.msk [vmem:[%s15183_s16 + $0x30] sm:$0xff] %vm9029_vm7, %v9003_v34  ;;  %v9006_v61 = vld [vmem:[#allocation2 + $0x48] sm:$0xff]  ;;  %v8895_v20 = vpop.permute.xlu1 %8894 }
 0x66d   : > { %9039 = vst.msk [vmem:[%s15183_s16 + $0x48] sm:$0xff] %vm9029_vm7, %v9006_v61 }
 0x66e   : > { %8978 = vst.msk [vmem:[#allocation2 + $0x68] sm:$0xff] %vm8964_vm6, %v8895_v20  ;;  %v9005_v51 = vld [vmem:[#allocation2 + $0x40] sm:$0xff]  ;;  %v8893_v36 = vpop.permute.xlu0 %8892 }
 0x66f   : > { %9038 = vst.msk [vmem:[%s15183_s16 + $0x40] sm:$0xff] %vm9029_vm7, %v9005_v51 }
 0x670   : > { %8977 = vst.msk [vmem:[#allocation2 + $0x60] sm:$0xff] %vm8964_vm6, %v8893_v36  ;;  %v9008_v21 = vld [vmem:[#allocation2 + $0x58] sm:$0xff]  ;;  %v8899_v4 = vpop.permute.xlu1 %8898 }
 0x671   : > { %9041 = vst.msk [vmem:[%s15183_s16 + $0x58] sm:$0xff] %vm9029_vm7, %v9008_v21 }
 0x672   : > { %8980 = vst.msk [vmem:[#allocation2 + $0x78] sm:$0xff] %vm8964_vm6, %v8899_v4  ;;  %v9007_v19 = vld [vmem:[#allocation2 + $0x50] sm:$0xff]  ;;  %v8897_v5 = vpop.permute.xlu0 %8896 }
 0x673   : > { %9040 = vst.msk [vmem:[%s15183_s16 + $0x50] sm:$0xff] %vm9029_vm7, %v9007_v19 }
 0x674   : > { %8979 = vst.msk [vmem:[#allocation2 + $0x70] sm:$0xff] %vm8964_vm6, %v8897_v5  ;;  %v8903_v33 = vpop.permute.xlu1 %8902 }
 0x675   : > { %v9010_v43 = vld [vmem:[#allocation2 + $0x68] sm:$0xff]  ;;  %8982 = vst.msk [vmem:[#allocation2 + $0x88] sm:$0xff] %vm8964_vm6, %v8903_v33 }
 0x676   : > { %9043 = vst.msk [vmem:[%s15183_s16 + $0x68] sm:$0xff] %vm9029_vm7, %v9010_v43  ;;  %v8901_v8 = vpop.permute.xlu0 %8900 }
 0x677   : > { %v9009_v18 = vld [vmem:[#allocation2 + $0x60] sm:$0xff]  ;;  %8981 = vst.msk [vmem:[#allocation2 + $0x80] sm:$0xff] %vm8964_vm6, %v8901_v8 }
 0x678   : > { %9042 = vst.msk [vmem:[%s15183_s16 + $0x60] sm:$0xff] %vm9029_vm7, %v9009_v18  ;;  %v8907_v6 = vpop.permute.xlu1 %8906 }
 0x679   : > { %v9012_v7 = vld [vmem:[#allocation2 + $0x78] sm:$0xff]  ;;  %8984 = vst.msk [vmem:[#allocation2 + $0x98] sm:$0xff] %vm8964_vm6, %v8907_v6 }
 0x67a   : > { %9045 = vst.msk [vmem:[%s15183_s16 + $0x78] sm:$0xff] %vm9029_vm7, %v9012_v7  ;;  %v8905_v58 = vpop.permute.xlu0 %8904 }
 0x67b   : > { %v9011_v63 = vld [vmem:[#allocation2 + $0x70] sm:$0xff]  ;;  %8983 = vst.msk [vmem:[#allocation2 + $0x90] sm:$0xff] %vm8964_vm6, %v8905_v58 }
 0x67c   : > { %9044 = vst.msk [vmem:[%s15183_s16 + $0x70] sm:$0xff] %vm9029_vm7, %v9011_v63  ;;  %v9014_v50 = vld [vmem:[#allocation2 + $0x88] sm:$0xff]  ;;  %v8911_v28 = vpop.permute.xlu1 %8910 }
 0x67d   : > { %9047 = vst.msk [vmem:[%s15183_s16 + $0x88] sm:$0xff] %vm9029_vm7, %v9014_v50 }
 0x67e   : > { %8986 = vst.msk [vmem:[#allocation2 + $0xa8] sm:$0xff] %vm8964_vm6, %v8911_v28  ;;  %v9013_v9 = vld [vmem:[#allocation2 + $0x80] sm:$0xff]  ;;  %v8909_v52 = vpop.permute.xlu0 %8908 }
 0x67f   : > { %9046 = vst.msk [vmem:[%s15183_s16 + $0x80] sm:$0xff] %vm9029_vm7, %v9013_v9 }
 0x680   : > { %8985 = vst.msk [vmem:[#allocation2 + $0xa0] sm:$0xff] %vm8964_vm6, %v8909_v52  ;;  %v9016_v42 = vld [vmem:[#allocation2 + $0x98] sm:$0xff]  ;;  %v8915_v1 = vpop.permute.xlu1 %8914 }
 0x681   : > { %9049 = vst.msk [vmem:[%s15183_s16 + $0x98] sm:$0xff] %vm9029_vm7, %v9016_v42 }
 0x682   : > { %8988 = vst.msk [vmem:[#allocation2 + $0xb8] sm:$0xff] %vm8964_vm6, %v8915_v1  ;;  %v9015_v14 = vld [vmem:[#allocation2 + $0x90] sm:$0xff]  ;;  %v8913_v55 = vpop.permute.xlu0 %8912 }
 0x683   : > { %9048 = vst.msk [vmem:[%s15183_s16 + $0x90] sm:$0xff] %vm9029_vm7, %v9015_v14 }
 0x684   : > { %8987 = vst.msk [vmem:[#allocation2 + $0xb0] sm:$0xff] %vm8964_vm6, %v8913_v55  ;;  %v8919_v40 = vpop.permute.xlu1 %8918 }
 0x685   : > { %v9018_v26 = vld [vmem:[#allocation2 + $0xa8] sm:$0xff]  ;;  %8990 = vst.msk [vmem:[#allocation2 + $0xc8] sm:$0xff] %vm8964_vm6, %v8919_v40 }
 0x686   : > { %9051 = vst.msk [vmem:[%s15183_s16 + $0xa8] sm:$0xff] %vm9029_vm7, %v9018_v26  ;;  %v8917_v39 = vpop.permute.xlu0 %8916 }
 0x687   : > { %v9017_v2 = vld [vmem:[#allocation2 + $0xa0] sm:$0xff]  ;;  %8989 = vst.msk [vmem:[#allocation2 + $0xc0] sm:$0xff] %vm8964_vm6, %v8917_v39 }
 0x688   : > { %9050 = vst.msk [vmem:[%s15183_s16 + $0xa0] sm:$0xff] %vm9029_vm7, %v9017_v2  ;;  %v8923_v46 = vpop.permute.xlu1 %8922 }
 0x689   : > { %v9020_v53 = vld [vmem:[#allocation2 + $0xb8] sm:$0xff]  ;;  %8992 = vst.msk [vmem:[#allocation2 + $0xd8] sm:$0xff] %vm8964_vm6, %v8923_v46 }
 0x68a   : > { %9053 = vst.msk [vmem:[%s15183_s16 + $0xb8] sm:$0xff] %vm9029_vm7, %v9020_v53  ;;  %v8921_v3 = vpop.permute.xlu0 %8920 }
 0x68b   : > { %v9019_v47 = vld [vmem:[#allocation2 + $0xb0] sm:$0xff]  ;;  %8991 = vst.msk [vmem:[#allocation2 + $0xd0] sm:$0xff] %vm8964_vm6, %v8921_v3 }
 0x68c   : > { %9052 = vst.msk [vmem:[%s15183_s16 + $0xb0] sm:$0xff] %vm9029_vm7, %v9019_v47  ;;  %v9022_v62 = vld [vmem:[#allocation2 + $0xc8] sm:$0xff]  ;;  %v8927_v31 = vpop.permute.xlu1 %8926 }
 0x68d   : > { %9055 = vst.msk [vmem:[%s15183_s16 + $0xc8] sm:$0xff] %vm9029_vm7, %v9022_v62 }
 0x68e   : > { %8994 = vst.msk [vmem:[#allocation2 + $0xe8] sm:$0xff] %vm8964_vm6, %v8927_v31  ;;  %v9021_v25 = vld [vmem:[#allocation2 + $0xc0] sm:$0xff]  ;;  %v8925_v59 = vpop.permute.xlu0 %8924 }
 0x68f   : > { %9054 = vst.msk [vmem:[%s15183_s16 + $0xc0] sm:$0xff] %vm9029_vm7, %v9021_v25 }
 0x690   : > { %8993 = vst.msk [vmem:[#allocation2 + $0xe0] sm:$0xff] %vm8964_vm6, %v8925_v59  ;;  %v9024_v44 = vld [vmem:[#allocation2 + $0xd8] sm:$0xff]  ;;  %v8931_v17 = vpop.permute.xlu1 %8930 }
 0x691   : > { %9057 = vst.msk [vmem:[%s15183_s16 + $0xd8] sm:$0xff] %vm9029_vm7, %v9024_v44 }
 0x692   : > { %8996 = vst.msk [vmem:[#allocation2 + $0xf8] sm:$0xff] %vm8964_vm6, %v8931_v17  ;;  %v9023_v27 = vld [vmem:[#allocation2 + $0xd0] sm:$0xff]  ;;  %v8929_v0 = vpop.permute.xlu0 %8928 }
 0x693   : > { %9056 = vst.msk [vmem:[%s15183_s16 + $0xd0] sm:$0xff] %vm9029_vm7, %v9023_v27 }
 0x694   : > { %8995 = vst.msk [vmem:[#allocation2 + $0xf0] sm:$0xff] %vm8964_vm6, %v8929_v0 }
 0x695   : > { %v9026_v23 = vld [vmem:[#allocation2 + $0xe8] sm:$0xff] }
 0x696   : > { %9059 = vst.msk [vmem:[%s15183_s16 + $0xe8] sm:$0xff] %vm9029_vm7, %v9026_v23 }
 0x697   : > { %v9025_v35 = vld [vmem:[#allocation2 + $0xe0] sm:$0xff] }
 0x698   : > { %9058 = vst.msk [vmem:[%s15183_s16 + $0xe0] sm:$0xff] %vm9029_vm7, %v9025_v35 }
 0x699   : > { %v9028_v30 = vld [vmem:[#allocation2 + $0xf8] sm:$0xff] }
 0x69a   : > { %9061 = vst.msk [vmem:[%s15183_s16 + $0xf8] sm:$0xff] %vm9029_vm7, %v9028_v30 }
 0x69b   : > { %v9027_v15 = vld [vmem:[#allocation2 + $0xf0] sm:$0xff] }
 0x69c   : > { %9060 = vst.msk [vmem:[%s15183_s16 + $0xf0] sm:$0xff] %vm9029_vm7, %v9027_v15 }
 0x69d PF: > { %s23_s25 = sadd.s32 1, %s11686_s25  }
 0x69e   : > { %p20_p4 = scmp.ge.s32.totalorder %s23_s25, 4  }
 0x6a0   :  { %22 = sbr.rel (!%p20_p4) target bundleno = 1 (0x1), region = 120 }

</bundles_post_ra>
